<compile_context>
chip_gen: v7x
topology: tpu7x:2x2x1
jax: 0.10.0
libtpu: 0.0.40
codegen_flags: <defaults>
</compile_context>

<pallas_src>
import jax
import jax.numpy as jnp
from jax.experimental import pallas as pl
from jax.experimental.pallas import tpu as pltpu

IN, H1, H2, H3, OUT = 6400, 2048, 512, 64, 2
TN = 512                     # Cout tile for the dominant first Linear


# ---------------------------------------------------------------------------
# Fused MLP kernel.  Grid = (H1 // TN,) over the first layer's output columns.
#   x_ref  : (B, 6400)  bf16   (constant block)
#   w1_ref : (6400, TN) bf16   (streamed tile j)
#   b1_ref : (1, TN)    f32    (tile j)
#   w2_ref : (2048, 512) bf16, b2_ref (1, 512) f32
#   w3_ref : (512, 64)   bf16, b3_ref (1, 64)  f32
#   w4_ref : (64, 2)     f32 , b4_ref (1, 2)   f32
#   out_ref: (B, 2)      f32
#   y1_ref : (B, 2048)   f32 VMEM scratch (hidden activations of layer 1)
# ---------------------------------------------------------------------------
def discriminator_kernel(x_ref, w1_ref, b1_ref, w2_ref, b2_ref,
                         w3_ref, b3_ref, w4_ref, b4_ref,
                         out_ref, y1_ref):
    j = pl.program_id(0)
    tn = w1_ref.shape[1]

    # ---- Layer 1, tile j: ReLU(x @ W1[:, j*tn:(j+1)*tn] + b1_tile) ----------
    z = jnp.dot(x_ref[...], w1_ref[...],
                preferred_element_type=jnp.float32)          # (B, tn) f32
    z = jnp.maximum(z + b1_ref[...], 0.0)
    start = pl.multiple_of(j * tn, tn)
    y1_ref[:, pl.ds(start, tn)] = z

    # ---- Epilogue on the last tile: layers 2..4 (all tiny) -----------------
    @pl.when(j == pl.num_programs(0) - 1)
    def _():
        y1 = y1_ref[...].astype(jnp.bfloat16)                # (B, 2048)
        y2 = jnp.maximum(
            jnp.dot(y1, w2_ref[...], preferred_element_type=jnp.float32)
            + b2_ref[...], 0.0)                              # (B, 512) f32
        y3 = jnp.maximum(
            jnp.dot(y2.astype(jnp.bfloat16), w3_ref[...],
                    preferred_element_type=jnp.float32)
            + b3_ref[...], 0.0)                              # (B, 64) f32
        logits = jnp.dot(y3, w4_ref[...],
                         preferred_element_type=jnp.float32) + b4_ref[...]
        out_ref[...] = logits                                # (B, 2) f32


@jax.jit
def dnet_discriminator_forward(params, x):
    """x: (B, 6400) f32 -> logits (B, 2) f32."""
    (w1, b1), (w2, b2), (w3, b3), (w4, b4) = params
    B = x.shape[0]
    grid = (H1 // TN,)
    return pl.pallas_call(
        discriminator_kernel,
        out_shape=jax.ShapeDtypeStruct((B, OUT), jnp.float32),
        grid_spec=pltpu.PrefetchScalarGridSpec(
            num_scalar_prefetch=0,
            grid=grid,
            in_specs=[
                pl.BlockSpec((B, IN),   lambda j: (0, 0)),    # x (resident)
                pl.BlockSpec((IN, TN),  lambda j: (0, j)),    # W1 tile (streamed)
                pl.BlockSpec((1, TN),   lambda j: (0, j)),    # b1 tile
                pl.BlockSpec((H1, H2),  lambda j: (0, 0)),    # W2 (resident)
                pl.BlockSpec((1, H2),   lambda j: (0, 0)),    # b2
                pl.BlockSpec((H2, H3),  lambda j: (0, 0)),    # W3
                pl.BlockSpec((1, H3),   lambda j: (0, 0)),    # b3
                pl.BlockSpec((H3, OUT), lambda j: (0, 0)),    # W4
                pl.BlockSpec((1, OUT),  lambda j: (0, 0)),    # b4
            ],
            out_specs=pl.BlockSpec((B, OUT), lambda j: (0, 0)),
            scratch_shapes=[pltpu.VMEM((B, H1), jnp.float32)],
        ),
        compiler_params=pltpu.CompilerParams(
            # grid axis carries the y1 scratch + last-step epilogue -> arbitrary
            dimension_semantics=("arbitrary",),
            # ~18 MB actually used; set explicitly so v5e's 16 MiB scoped
            # default doesn't bite and we stay well under v7x's 64 MiB.
            vmem_limit_bytes=48 * 1024 * 1024,
        ),
    )(x.astype(jnp.bfloat16), w1, b1, w2, b2, w3, b3, w4, b4)


# ---------------------------------------------------------------------------
# Deterministic synthetic params mirroring nn.Linear's default init shapes.
# Weights stored transposed (in, out); big weights stored bf16 (MXU operands),
# last (tiny) layer and all biases kept f32.
# ---------------------------------------------------------------------------
def init_params(key):
    dims = [(IN, H1), (H1, H2), (H2, H3), (H3, OUT)]
    params = []
    for i, (fan_in, fan_out) in enumerate(dims):
        key, kw, kb = jax.random.split(key, 3)
        bound = 1.0 / float(jnp.sqrt(jnp.float32(fan_in)))
        w = jax.random.uniform(kw, (fan_in, fan_out), jnp.float32, -bound, bound)
        b = jax.random.uniform(kb, (1, fan_out), jnp.float32, -bound, bound)
        w_dtype = jnp.float32 if i == len(dims) - 1 else jnp.bfloat16
        params.append((w.astype(w_dtype), b))
    return params


def reference_forward(params, x):
    """Pure-JAX reference with the same dtype policy as the kernel."""
    (w1, b1), (w2, b2), (w3, b3), (w4, b4) = params
    h = x.astype(jnp.bfloat16)
    h = jnp.maximum(jnp.dot(h, w1, preferred_element_type=jnp.float32) + b1, 0.0)
    h = jnp.maximum(jnp.dot(h.astype(jnp.bfloat16), w2,
                            preferred_element_type=jnp.float32) + b2, 0.0)
    h = jnp.maximum(jnp.dot(h.astype(jnp.bfloat16), w3,
                            preferred_element_type=jnp.float32) + b3, 0.0)
    return jnp.dot(h, w4, preferred_element_type=jnp.float32) + b4


if __name__ == "__main__":
    key = jax.random.PRNGKey(0)
    kp, kx = jax.random.split(key)
    params = init_params(kp)

    B = 2
    x = jax.random.normal(kx, (B, IN), jnp.float32)   # discriminator input (B, 6400)

    out = dnet_discriminator_forward(params, x)
    jax.block_until_ready(out)

    assert out.shape == (B, OUT), out.shape
    assert bool(jnp.all(jnp.isfinite(out)))
    ref = reference_forward(params, x)
    assert bool(jnp.allclose(out, ref, rtol=5e-2, atol=5e-2)), (out, ref)
    print("KERNEL_OK")
</pallas_src>

<mosaic_0001>
module attributes {stable_mosaic.version = 11 : i64} {
  func.func @discriminator_kernel(%arg0: i32, %arg1: memref<2x6400xbf16, #tpu.memory_space<vmem>>, %arg2: memref<6400x512xbf16, #tpu.memory_space<vmem>>, %arg3: memref<1x512xf32, #tpu.memory_space<vmem>>, %arg4: memref<2048x512xbf16, #tpu.memory_space<vmem>>, %arg5: memref<1x512xf32, #tpu.memory_space<vmem>>, %arg6: memref<512x64xbf16, #tpu.memory_space<vmem>>, %arg7: memref<1x64xf32, #tpu.memory_space<vmem>>, %arg8: memref<64x2xf32, #tpu.memory_space<vmem>>, %arg9: memref<1x2xf32, #tpu.memory_space<vmem>>, %arg10: memref<2x2xf32, #tpu.memory_space<vmem>>, %arg11: memref<2x2048xf32, #tpu.memory_space<vmem>>) attributes {dimension_semantics = [#tpu.dimension_semantics<arbitrary>], iteration_bounds = array<i64: 4>, scalar_prefetch = 0 : i64, scratch_operands = 1 : i64, tpu.core_type = #tpu.core_type<tc>, window_params = [{pipeline_mode = #tpu.pipeline_mode<synchronous>, transform_indices = @transform_0, window_bounds = array<i64: 2, 6400>}, {transform_indices = @transform_1, window_bounds = array<i64: 6400, 512>}, {transform_indices = @transform_2, window_bounds = array<i64: 1, 512>}, {pipeline_mode = #tpu.pipeline_mode<synchronous>, transform_indices = @transform_3, window_bounds = array<i64: 2048, 512>}, {pipeline_mode = #tpu.pipeline_mode<synchronous>, transform_indices = @transform_4, window_bounds = array<i64: 1, 512>}, {pipeline_mode = #tpu.pipeline_mode<synchronous>, transform_indices = @transform_5, window_bounds = array<i64: 512, 64>}, {pipeline_mode = #tpu.pipeline_mode<synchronous>, transform_indices = @transform_6, window_bounds = array<i64: 1, 64>}, {pipeline_mode = #tpu.pipeline_mode<synchronous>, transform_indices = @transform_7, window_bounds = array<i64: 64, 2>}, {pipeline_mode = #tpu.pipeline_mode<synchronous>, transform_indices = @transform_8, window_bounds = array<i64: 1, 2>}, {pipeline_mode = #tpu.pipeline_mode<synchronous>, transform_indices = @transform_9, window_bounds = array<i64: 2, 2>}]} {
    %c0 = arith.constant 0 : index
    %c0_0 = arith.constant 0 : index
    %0 = vector.load %arg1[%c0, %c0_0] : memref<2x6400xbf16, #tpu.memory_space<vmem>>, vector<2x6400xbf16>
    %c0_1 = arith.constant 0 : index
    %c0_2 = arith.constant 0 : index
    %1 = vector.load %arg2[%c0_1, %c0_2] : memref<6400x512xbf16, #tpu.memory_space<vmem>>, vector<6400x512xbf16>
    %cst = arith.constant dense<0.000000e+00> : vector<2x512xf32>
    %2 = tpu.matmul %0, %1, %cst {dimension_numbers = #tpu.dot_dimension_numbers<[1], [0], [0], [1], [0, 0, 1, 1], [], []>} : vector<2x6400xbf16>, vector<6400x512xbf16>, vector<2x512xf32> -> vector<2x512xf32>
    %c0_3 = arith.constant 0 : index
    %c0_4 = arith.constant 0 : index
    %3 = vector.load %arg3[%c0_3, %c0_4] : memref<1x512xf32, #tpu.memory_space<vmem>>, vector<1x512xf32>
    %4 = vector.broadcast %3 : vector<1x512xf32> to vector<2x512xf32>
    %5 = arith.addf %2, %4 : vector<2x512xf32>
    %cst_5 = arith.constant 0.000000e+00 : f32
    %6 = vector.broadcast %cst_5 : f32 to vector<2x512xf32>
    %7 = arith.maximumf %5, %6 : vector<2x512xf32>
    %c512_i32 = arith.constant 512 : i32
    %8 = arith.muli %arg0, %c512_i32 : i32
    %9 = tpu.assume_multiple %8, 512 : i32
    %c0_6 = arith.constant 0 : index
    %10 = arith.index_cast %9 : i32 to index
    %11 = vector.load %arg11[%c0_6, %10] : memref<2x2048xf32, #tpu.memory_space<vmem>>, vector<2x512xf32>
    tpu.vector_store %arg11[%c0_6, %10], %7 {strides = array<i32>} : memref<2x2048xf32, #tpu.memory_space<vmem>>, vector<2x512xf32>,
    %c3_i32 = arith.constant 3 : i32
    %12 = arith.cmpi eq, %arg0, %c3_i32 : i32
    %13 = arith.extui %12 : i1 to i32
    %c0_i32 = arith.constant 0 : i32
    %14 = arith.cmpi ne, %13, %c0_i32 : i32
    scf.if %14 {
      %c0_7 = arith.constant 0 : index
      %c0_8 = arith.constant 0 : index
      %15 = vector.load %arg11[%c0_7, %c0_8] : memref<2x2048xf32, #tpu.memory_space<vmem>>, vector<2x2048xf32>
      %16 = arith.truncf %15 : vector<2x2048xf32> to vector<2x2048xbf16>
      %c0_9 = arith.constant 0 : index
      %c0_10 = arith.constant 0 : index
      %17 = vector.load %arg4[%c0_9, %c0_10] : memref<2048x512xbf16, #tpu.memory_space<vmem>>, vector<2048x512xbf16>
      %cst_11 = arith.constant dense<0.000000e+00> : vector<2x512xf32>
      %18 = tpu.matmul %16, %17, %cst_11 {dimension_numbers = #tpu.dot_dimension_numbers<[1], [0], [0], [1], [0, 0, 1, 1], [], []>} : vector<2x2048xbf16>, vector<2048x512xbf16>, vector<2x512xf32> -> vector<2x512xf32>
      %c0_12 = arith.constant 0 : index
      %c0_13 = arith.constant 0 : index
      %19 = vector.load %arg5[%c0_12, %c0_13] : memref<1x512xf32, #tpu.memory_space<vmem>>, vector<1x512xf32>
      %20 = vector.broadcast %19 : vector<1x512xf32> to vector<2x512xf32>
      %21 = arith.addf %18, %20 : vector<2x512xf32>
      %cst_14 = arith.constant 0.000000e+00 : f32
      %22 = vector.broadcast %cst_14 : f32 to vector<2x512xf32>
      %23 = arith.maximumf %21, %22 : vector<2x512xf32>
      %24 = arith.truncf %23 : vector<2x512xf32> to vector<2x512xbf16>
      %c0_15 = arith.constant 0 : index
      %c0_16 = arith.constant 0 : index
      %25 = vector.load %arg6[%c0_15, %c0_16] : memref<512x64xbf16, #tpu.memory_space<vmem>>, vector<512x64xbf16>
      %cst_17 = arith.constant dense<0.000000e+00> : vector<2x64xf32>
      %26 = tpu.matmul %24, %25, %cst_17 {dimension_numbers = #tpu.dot_dimension_numbers<[1], [0], [0], [1], [0, 0, 1, 1], [], []>} : vector<2x512xbf16>, vector<512x64xbf16>, vector<2x64xf32> -> vector<2x64xf32>
      %c0_18 = arith.constant 0 : index
      %c0_19 = arith.constant 0 : index
      %27 = vector.load %arg7[%c0_18, %c0_19] : memref<1x64xf32, #tpu.memory_space<vmem>>, vector<1x64xf32>
      %28 = vector.broadcast %27 : vector<1x64xf32> to vector<2x64xf32>
      %29 = arith.addf %26, %28 : vector<2x64xf32>
      %cst_20 = arith.constant 0.000000e+00 : f32
      %30 = vector.broadcast %cst_20 : f32 to vector<2x64xf32>
      %31 = arith.maximumf %29, %30 : vector<2x64xf32>
      %c0_21 = arith.constant 0 : index
      %c0_22 = arith.constant 0 : index
      %32 = vector.load %arg8[%c0_21, %c0_22] : memref<64x2xf32, #tpu.memory_space<vmem>>, vector<64x2xf32>
      %cst_23 = arith.constant dense<0.000000e+00> : vector<2x2xf32>
      %33 = tpu.matmul %31, %32, %cst_23 {dimension_numbers = #tpu.dot_dimension_numbers<[1], [0], [0], [1], [0, 0, 1, 1], [], []>} : vector<2x64xf32>, vector<64x2xf32>, vector<2x2xf32> -> vector<2x2xf32>
      %c0_24 = arith.constant 0 : index
      %c0_25 = arith.constant 0 : index
      %34 = vector.load %arg9[%c0_24, %c0_25] : memref<1x2xf32, #tpu.memory_space<vmem>>, vector<1x2xf32>
      %35 = vector.broadcast %34 : vector<1x2xf32> to vector<2x2xf32>
      %36 = arith.addf %33, %35 : vector<2x2xf32>
      %c0_26 = arith.constant 0 : index
      %c0_27 = arith.constant 0 : index
      %37 = vector.load %arg10[%c0_26, %c0_27] : memref<2x2xf32, #tpu.memory_space<vmem>>, vector<2x2xf32>
      tpu.vector_store %arg10[%c0_26, %c0_27], %36 {strides = array<i32>} : memref<2x2xf32, #tpu.memory_space<vmem>>, vector<2x2xf32>,
    } else {
    }
    return
  }
  func.func @transform_0(%arg0: i32) -> (i32, i32) {
    %c0_i32 = arith.constant 0 : i32
    %c0_i32_0 = arith.constant 0 : i32
    %c0_i32_1 = arith.constant 0 : i32
    return %c0_i32, %c0_i32_0 : i32, i32
  }
  func.func @transform_1(%arg0: i32) -> (i32, i32) {
    %c0_i32 = arith.constant 0 : i32
    %c0_i32_0 = arith.constant 0 : i32
    return %c0_i32, %arg0 : i32, i32
  }
  func.func @transform_2(%arg0: i32) -> (i32, i32) {
    %c0_i32 = arith.constant 0 : i32
    %c0_i32_0 = arith.constant 0 : i32
    return %c0_i32, %arg0 : i32, i32
  }
  func.func @transform_3(%arg0: i32) -> (i32, i32) {
    %c0_i32 = arith.constant 0 : i32
    %c0_i32_0 = arith.constant 0 : i32
    %c0_i32_1 = arith.constant 0 : i32
    return %c0_i32, %c0_i32_0 : i32, i32
  }
  func.func @transform_4(%arg0: i32) -> (i32, i32) {
    %c0_i32 = arith.constant 0 : i32
    %c0_i32_0 = arith.constant 0 : i32
    %c0_i32_1 = arith.constant 0 : i32
    return %c0_i32, %c0_i32_0 : i32, i32
  }
  func.func @transform_5(%arg0: i32) -> (i32, i32) {
    %c0_i32 = arith.constant 0 : i32
    %c0_i32_0 = arith.constant 0 : i32
    %c0_i32_1 = arith.constant 0 : i32
    return %c0_i32, %c0_i32_0 : i32, i32
  }
  func.func @transform_6(%arg0: i32) -> (i32, i32) {
    %c0_i32 = arith.constant 0 : i32
    %c0_i32_0 = arith.constant 0 : i32
    %c0_i32_1 = arith.constant 0 : i32
    return %c0_i32, %c0_i32_0 : i32, i32
  }
  func.func @transform_7(%arg0: i32) -> (i32, i32) {
    %c0_i32 = arith.constant 0 : i32
    %c0_i32_0 = arith.constant 0 : i32
    %c0_i32_1 = arith.constant 0 : i32
    return %c0_i32, %c0_i32_0 : i32, i32
  }
  func.func @transform_8(%arg0: i32) -> (i32, i32) {
    %c0_i32 = arith.constant 0 : i32
    %c0_i32_0 = arith.constant 0 : i32
    %c0_i32_1 = arith.constant 0 : i32
    return %c0_i32, %c0_i32_0 : i32, i32
  }
  func.func @transform_9(%arg0: i32) -> (i32, i32) {
    %c0_i32 = arith.constant 0 : i32
    %c0_i32_0 = arith.constant 0 : i32
    %c0_i32_1 = arith.constant 0 : i32
    return %c0_i32, %c0_i32_0 : i32, i32
  }
}

</mosaic_0001>

<bundles_post_ra>
// kernel: dnet_discriminator_forward.1
= control target key start
LH: loop header
LB: loop body
LE: loop exit
PB: predicated region body
PF: predicated region fallthrough
CT: control target
= control target key end

     0   :  { %s25483_s0 = inlined_call_operand.vmem [shape: bf16[2,6400], index: 0, kind: input, shape index: {}]   ;;  %s25484_s1 = inlined_call_operand.hbm [shape: bf16[6400,2048], index: 1, kind: input, shape index: {}]   ;;  %s25485_s2 = inlined_call_operand.hbm [shape: f32[1,2048], index: 2, kind: input, shape index: {}]   ;;  %s25486_s3 = inlined_call_operand.hbm [shape: bf16[2048,512], index: 3, kind: input, shape index: {}]   ;;  %s25487_s4 = inlined_call_operand.hbm [shape: f32[1,512], index: 4, kind: input, shape index: {}]   ;;  %s25488_s5 = inlined_call_operand.vmem [shape: bf16[512,64], index: 5, kind: input, shape index: {}]   ;;  %s25489_s6 = inlined_call_operand.hbm [shape: f32[1,64], index: 6, kind: input, shape index: {}]   ;;  %s25490_s7 = inlined_call_operand.vmem [shape: f32[64,2], index: 7, kind: input, shape index: {}]   ;;  %s25491_s8 = inlined_call_operand.hbm [shape: f32[1,2], index: 8, kind: input, shape index: {}]   ;;  %s25492_s9 = inlined_call_operand.hbm [shape: f32[2,2], index: 9, kind: output, shape index: {}]  }
   0x1   :  { %25499 = sst [smem:[#allocation21_spill]] %s25484_s1 }
   0x2   :  { %25500 = sst [smem:[#allocation22_spill]] %s25486_s3 }
   0x3   :  { %25501 = sst [smem:[#allocation23_spill]] %s25487_s4 }
   0x4   :  { %25502 = sst [smem:[#allocation24_spill]] %s25489_s6 }
   0x5   :  { %25503 = sst [smem:[#allocation25_spill]] %s25492_s9 }
   0x6   :  { %14 = vsyncpa [#allocation4], 0 }
   0x7   :  { %16 = vsyncpa [#allocation4 + $0x1], 0 }
   0x8   :  { %17 = vsyncpa [#allocation7], 0 }
   0x9   :  { %19 = vsyncpa [#allocation7 + $0x1], 0 }
   0xa   :  { %20 = vsyncpa [#allocation10], 0 }
   0xb   :  { %21 = vsyncpa [#allocation13], 0 }
   0xc   :  { %22 = vsyncpa [#allocation5], 0  ;;  %s23091_s30 = smov 0   ;;  %s23093_s10 = smov 0  }
   0xd   :  { %s23095_s11 = smov 0   ;;  %s23097_s12 = smov 0  }
   0xe LB: > { %s23110_s13 = sadd.s32 4294967295, %s23024_s12   ;;  %p69_p0 = scmp.ne.s32.totalorder %s23016_s10, %s23012_s30  ;;  %s23024_s12 = sphi %s23097_s12, %s25528_s12   ;;  %s23020_s11 = sphi %s23095_s11, %s25527_s11   ;;  %s23016_s10 = sphi %s23093_s10, %s25526_s10   ;;  %s23012_s30 = sphi %s23091_s30, %s25525_s30  }
   0xf   : > { %p25493_p1 = scmp.eq.s32.totalorder %s23110_s13, 0  ;;  %p16942_p2 = scmp.ge.s32.totalorder %s23024_s12, 1 }
  0x10   : > { %p253_p3 = scmp.lt.s32.totalorder %s23024_s12, 5  ;;  %s23026_s16 = smov [#allocation8]  }
  0x11   : > { %p23118_p4 = por %p25493_p1, %p69_p0  ;;  %s268_s17 = sshll.u32 %s23026_s16, 4  ;;  %s23126_s17 = int_to_ptr.vmem [resolvable:$true] %s268_s17 }
  0x12   : > { %p23122_p5 = pnand %p16942_p2, %p253_p3  ;;  %s23027_s19 = smov [#allocation9]  }
  0x13   : > { %s25504_s14 = scalar_select %p23118_p4, 1, 0 }
  0x14   : > { %s25505_s15 = scalar_select %p23122_p5, 1, 0 }
  0x15   : > { %p19482_p6 = pneg %p23122_p5  ;;  %s282_s20 = sshll.u32 %s23027_s19, 4  ;;  %s23136_s20 = int_to_ptr.vmem [resolvable:$true] %s282_s20 }
  0x16   : > { %s23028_s21 = smov [#allocation11]   ;;  %s25507_s3 = sld [smem:[#allocation22_spill]] }
  0x17   : > { %p23132_p7 = pnand %p19482_p6, %p25493_p1  ;;  %s23138_s22 = sshll.u32 %s23028_s21, 4  ;;  %s297_s22 = int_to_ptr.vmem [resolvable:$true] %s23138_s22 }
  0x19   : > { %p23148_p9 = pneg %p23132_p7 }
  0x1c   : > { %s22772_s25 = scalar_lea.hbm %s25507_s3, 65536 }
  0x1d   : > { %p22773_p8 = scmp.ne.s32.totalorder %s25507_s3, %s22772_s25  ;;  %p22779_p12 = scmp.lt.u32.totalorder %s22772_s25, %s25507_s3 }
  0x1f   : > { %p22775_p10 = pnand %p23148_p9, %p22773_p8 }
  0x21   : > { %p22776_p11 = pneg %p22775_p10 }
  0x23   : > { %p22781_p13 = pnand %p22779_p12, %p22776_p11 }
  0x25   : > { %22784 = shalt.err (!%p22781_p13)
}
  0x26   : > { %s22785_s16 = scalar_lea.vmem %s23126_s17, 65536  ;;  %p22793_p6 = scmp.lt.s32.totalorder %s23126_s17, %s23126_s17 }
  0x27   : > { %p22786_p0 = scmp.ne.s32.totalorder %s23126_s17, %s22785_s16  ;;  %p22794_p1 = scmp.lt.s32.totalorder %s22785_s16, %s22785_s16 }
  0x29   : > { %p22788_p2 = pnand %p22786_p0, %p23148_p9  ;;  %p22795_p8 = por %p22794_p1, %p22793_p6 }
  0x2b   : > { %p22789_p3 = pneg %p22788_p2 }
  0x2d   : > { %p22796_p10 = pnand %p22795_p8, %p22789_p3 }
  0x2f   : > { %22799 = shalt.err (!%p22796_p10)
}
  0x30   : > { %s25497_s19 = smov 256   ;;  %s25498_s21 = smov 16  }
  0x31   : > { %19485 = dma.hbm_to_vmem [thread:$0]  (!%p23132_p7), %s25507_s3, 65536, %s23126_s17, [#allocation7], %s25497_s19, %s25497_s19, %s25498_s21  }
  0x32   : > { %s25509_s4 = sld [smem:[#allocation23_spill]] }
  0x38   : > { %s22800_s27 = scalar_lea.hbm %s25509_s4, 64 }
  0x39   : > { %p22801_p1 = scmp.ne.s32.totalorder %s25509_s4, %s22800_s27  ;;  %p22807_p13 = scmp.lt.u32.totalorder %s22800_s27, %s25509_s4 }
  0x3b   : > { %p22803_p11 = pnand %p22801_p1, %p23148_p9 }
  0x3d   : > { %p22804_p12 = pneg %p22803_p11 }
  0x3f   : > { %p22809_p0 = pnand %p22807_p13, %p22804_p12 }
  0x41   : > { %22812 = shalt.err (!%p22809_p0)
}
  0x42   : > { %s22813_s17 = scalar_lea.vmem %s23136_s20, 64  ;;  %p22821_p8 = scmp.lt.s32.totalorder %s23136_s20, %s23136_s20 }
  0x43   : > { %p22814_p2 = scmp.ne.s32.totalorder %s23136_s20, %s22813_s17  ;;  %p22822_p10 = scmp.lt.s32.totalorder %s22813_s17, %s22813_s17 }
  0x45   : > { %p22816_p3 = pnand %p22814_p2, %p23148_p9  ;;  %p22823_p1 = por %p22822_p10, %p22821_p8 }
  0x47   : > { %p22817_p6 = pneg %p22816_p3 }
  0x49   : > { %p22824_p11 = pnand %p22823_p1, %p22817_p6 }
  0x4b   : > { %22827 = shalt.err (!%p22824_p11)
}
  0x4c   : > { %19488 = dma.hbm_to_vmem [thread:$0]  (!%p23132_p7), %s25509_s4, 64, %s23136_s20, [#allocation10]  }
  0x4d   : > { %s25510_s6 = sld [smem:[#allocation24_spill]] }
  0x53   : > { %s22828_s26 = scalar_lea.hbm %s25510_s6, 16 }
  0x54   : > { %p22829_p12 = scmp.ne.s32.totalorder %s25510_s6, %s22828_s26  ;;  %p22835_p2 = scmp.lt.u32.totalorder %s22828_s26, %s25510_s6 }
  0x56   : > { %p22831_p13 = pnand %p22829_p12, %p23148_p9 }
  0x58   : > { %p22832_p0 = pneg %p22831_p13 }
  0x5a   : > { %p22837_p3 = pnand %p22835_p2, %p22832_p0 }
  0x5c   : > { %22840 = shalt.err (!%p22837_p3)
}
  0x5d   : > { %s22841_s17 = scalar_lea.vmem %s297_s22, 16  ;;  %s22848_s20 = scalar_lea.vmem %s297_s22, 32 }
  0x5e   : > { %p22842_p6 = scmp.ne.s32.totalorder %s297_s22, %s22841_s17  ;;  %p22849_p1 = scmp.lt.s32.totalorder %s297_s22, %s297_s22 }
  0x5f   : > { %p22850_p11 = scmp.lt.s32.totalorder %s22848_s20, %s22841_s17 }
  0x60   : > { %p22844_p8 = pnand %p22842_p6, %p23148_p9 }
  0x61   : > { %p22851_p4 = por %p22850_p11, %p22849_p1 }
  0x62   : > { %p22845_p10 = pneg %p22844_p8 }
  0x64   : > { %p22852_p5 = pnand %p22851_p4, %p22845_p10 }
  0x66   : > { %22855 = shalt.err (!%p22852_p5)
}
  0x67   : > { %19491 = dma.hbm_to_vmem [thread:$0]  (!%p23132_p7), %s25510_s6, 16, %s297_s22, [#allocation10]  }
  0x68   : > { %s23031_s24 = smov [#allocation12]   ;;  %s22856_s29 = scalar_lea.hbm %s25491_s8, 16 }
  0x69   : > { %s310_s25 = sshll.u32 %s23031_s24, 4  ;;  %p22857_p12 = scmp.ne.s32.totalorder %s25491_s8, %s22856_s29  ;;  %s311_s25 = int_to_ptr.vmem [resolvable:$true] %s310_s25 }
  0x6a   : > { %p22863_p13 = scmp.lt.u32.totalorder %s22856_s29, %s25491_s8 }
  0x6b   : > { %p22859_p4 = pnand %p22857_p12, %p23148_p9 }
  0x6d   : > { %p22860_p5 = pneg %p22859_p4 }
  0x6f   : > { %p22865_p0 = pnand %p22863_p13, %p22860_p5 }
  0x71   : > { %22868 = shalt.err (!%p22865_p0)
}
  0x72   : > { %s22869_s22 = scalar_lea.vmem %s311_s25, 16  ;;  %s22876_s9 = scalar_lea.vmem %s311_s25, 32 }
  0x73   : > { %p22870_p2 = scmp.ne.s32.totalorder %s311_s25, %s22869_s22  ;;  %p22877_p8 = scmp.lt.s32.totalorder %s311_s25, %s311_s25 }
  0x74   : > { %p22878_p10 = scmp.lt.s32.totalorder %s22876_s9, %s22869_s22 }
  0x75   : > { %p22872_p3 = pnand %p22870_p2, %p23148_p9 }
  0x76   : > { %p22879_p1 = por %p22878_p10, %p22877_p8 }
  0x77   : > { %p22873_p6 = pneg %p22872_p3 }
  0x79   : > { %p22880_p11 = pnand %p22879_p1, %p22873_p6 }
  0x7b   : > { %22883 = shalt.err (!%p22880_p11)
}
  0x7c   : > { %19494 = dma.hbm_to_vmem [thread:$0]  (!%p23132_p7), %s25491_s8, 16, %s311_s25, [#allocation13]  }
  0x7d   : > { %s23233_s28 = sadd.s32 1, %s23024_s12   ;;  %s56_s26 = sadd.s32 1, %s23020_s11 }
  0x7e   : > { %s53_s18 = ssub.s32 %s23024_s12, %s23233_s28  ;;  %p63_p9 = scmp.ne.s32.totalorder %s23020_s11, %s23016_s10 }
  0x7f   : > { %p54_p12 = scmp.eq.s32.totalorder %s53_s18, 0  ;;  %p64_p4 = scmp.eq.s32.totalorder %s23024_s12, 0 }
  0x80   : > { %p19506_p5 = scmp.lt.s32.totalorder %s23024_s12, 4  ;;  %s23243_s27 = sand.u32 1, %s23020_s11  }
  0x81   : > { %s23246_s29 = scalar_select %p54_p12, %s23020_s11, %s56_s26  }
  0x82   : > { %p65_p13 = por %p64_p4, %p63_p9  ;;  %s19456_s30 = smul.u32 12800, %s23243_s27 }
  0x83   : > { %s19114_s16 = sshll.u32 %s23024_s12, 8  ;;  %s25511_s1 = sld [smem:[#allocation21_spill]] }
  0x84   : > { %p23255_p7 = pnand %p19506_p5, %p65_p13  ;;  %s325_s9 = scalar_lea.vmem [#allocation3], %s19456_s30 }
  0x85   : > { %s332_s23 = sshll.u32 %s325_s9, 4  ;;  %s322_s26 = scalar_lea.sflag [#allocation4], %s23243_s27  ;;  %s23259_s23 = int_to_ptr.vmem [resolvable:$true] %s332_s23 }
  0x86   : > { %p22886_p2 = pneg %p23255_p7 }
  0x89   : > { %s23253_s20 = scalar_lea.hbm %s25511_s1, %s19114_s16  ;;  %s22889_s17 = scalar_lea.hbm %s25511_s1, 819200 }
  0x8a   : > { %s22884_s18 = scalar_lea.hbm %s23253_s20, 204800  ;;  %p22890_p8 = scmp.lt.u32.totalorder %s23253_s20, %s25511_s1 }
  0x8b   : > { %p22885_p0 = scmp.ne.s32.totalorder %s23253_s20, %s22884_s18  ;;  %p22891_p10 = scmp.lt.u32.totalorder %s22889_s17, %s22884_s18 }
  0x8c   : > { %p22893_p11 = scmp.lt.u32.totalorder %s22884_s18, %s23253_s20 }
  0x8d   : > { %p22887_p3 = pnand %p22886_p2, %p22885_p0  ;;  %p22892_p1 = por %p22891_p10, %p22890_p8 }
  0x8f   : > { %p22888_p6 = pneg %p22887_p3  ;;  %p22894_p9 = por %p22893_p11, %p22892_p1 }
  0x91   : > { %p22895_p12 = pnand %p22894_p9, %p22888_p6 }
  0x93   : > { %22898 = shalt.err (!%p22895_p12)
}
  0x94   : > { %s22899_s30 = scalar_lea.vmem %s23259_s23, 204800  ;;  %s23032_s9 = smov [#allocation3]  }
  0x95   : > { %p22900_p4 = scmp.ne.s32.totalorder %s23259_s23, %s22899_s30  ;;  %s22904_s16 = sshll.u32 %s23032_s9, 4  ;;  %s22905_s16 = int_to_ptr.vmem [resolvable:$false] %s22904_s16 }
  0x96   : > { %s22906_s19 = scalar_lea.vmem %s22905_s16, 409600  ;;  %p22907_p0 = scmp.lt.s32.totalorder %s23259_s23, %s22905_s16 }
  0x97   : > { %p22902_p5 = pnand %p22900_p4, %p22886_p2  ;;  %p22908_p3 = scmp.lt.s32.totalorder %s22906_s19, %s22899_s30 }
  0x99   : > { %p22903_p13 = pneg %p22902_p5  ;;  %p22909_p8 = por %p22908_p3, %p22907_p0 }
  0x9b   : > { %p22910_p10 = pnand %p22909_p8, %p22903_p13 }
  0x9d   : > { %22913 = shalt.err (!%p22910_p10)
}
  0x9e   : > { %s23033_s21 = smov 1024   ;;  %s25513_s18 = smov 16  }
  0x9f   : > { %s25514_s25 = smov 256   ;;  %s16950_s17 = sshll.u32 %s23243_s27, 2 }
  0xa0   : > { %19498 = dma.hbm_to_vmem [thread:$0]  (!%p23255_p7), %s23253_s20, 204800, %s23259_s23, %s322_s26, %s23033_s21, %s25514_s25, %s25513_s18  }
  0xa1   : > { %s19115_s9 = sshll.u32 %s23024_s12, 6  ;;  %s346_s24 = scalar_lea.vmem [#allocation6], %s16950_s17 }
  0xa2   : > { %s23297_s19 = scalar_lea.hbm %s25485_s2, %s19115_s9  ;;  %s354_s1 = sshll.u32 %s346_s24, 4  ;;  %s355_s1 = int_to_ptr.vmem [resolvable:$true] %s354_s1 }
  0xa3   : > { %s25515_s3 = sand.u32 1, %s23024_s12   ;;  %s22914_s6 = scalar_lea.hbm %s23297_s19, 64 }
  0xa4   : > { %s343_s4 = scalar_lea.sflag [#allocation7], %s25515_s3  ;;  %p22915_p6 = scmp.ne.s32.totalorder %s23297_s19, %s22914_s6 }
  0xa5   : > { %s22919_s23 = scalar_lea.hbm %s25485_s2, 256  ;;  %p22920_p9 = scmp.lt.u32.totalorder %s23297_s19, %s25485_s2 }
  0xa6   : > { %p22917_p1 = pnand %p22915_p6, %p22886_p2  ;;  %p22921_p12 = scmp.lt.u32.totalorder %s22919_s23, %s22914_s6 }
  0xa7   : > { %p22923_p5 = scmp.lt.u32.totalorder %s22914_s6, %s23297_s19 }
  0xa8   : > { %p22918_p11 = pneg %p22917_p1  ;;  %p22922_p4 = por %p22921_p12, %p22920_p9 }
  0xaa   : > { %p22924_p13 = por %p22923_p5, %p22922_p4 }
  0xac   : > { %p22925_p0 = pnand %p22924_p13, %p22918_p11 }
  0xae   : > { %22928 = shalt.err (!%p22925_p0)
}
  0xaf   : > { %s22929_s3 = scalar_lea.vmem %s355_s1, 64  ;;  %s23034_s12 = smov [#allocation6]  }
  0xb0   : > { %p22930_p3 = scmp.ne.s32.totalorder %s355_s1, %s22929_s3  ;;  %s22934_s24 = sshll.u32 %s23034_s12, 4  ;;  %s22935_s24 = int_to_ptr.vmem [resolvable:$false] %s22934_s24 }
  0xb1   : > { %s22936_s18 = scalar_lea.vmem %s22935_s24, 128  ;;  %p22937_p6 = scmp.lt.s32.totalorder %s355_s1, %s22935_s24 }
  0xb2   : > { %p22932_p8 = pnand %p22930_p3, %p22886_p2  ;;  %p22938_p1 = scmp.lt.s32.totalorder %s22936_s18, %s22929_s3 }
  0xb4   : > { %p22933_p10 = pneg %p22932_p8  ;;  %p22939_p9 = por %p22938_p1, %p22937_p6 }
  0xb6   : > { %p22940_p12 = pnand %p22939_p9, %p22933_p10 }
  0xb8   : > { %22943 = shalt.err (!%p22940_p12)
}
  0xb9   : > { %19501 = dma.hbm_to_vmem [thread:$0]  (!%p23255_p7), %s23297_s19, 64, %s355_s1, %s343_s4  }
  0xba   : > { %p25516_p11 = scmp.ne.s32.totalorder %s25505_s15, 0 }
  0xbb   : > { %s365_s6 = sand.u32 (!%p25516_p11), 1, %s23016_s10   ;;  %p25517_p2 = scmp.ne.s32.totalorder (!%p25516_p11), %s25504_s14, 0 }
  0xbc   : > { %363 = sbr.rel (%p25516_p11) target bundleno = 3190 (0xc76), region = 56  ;;  %s366_s17 = scalar_lea.sflag (!%p25516_p11), [#allocation4], %s365_s6 }
  0xbd   : > { %s19457_s25 = smul.u32 (!%p25516_p11), 12800, %s365_s6 }
  0xbf   : > { %s23323_s9 = scalar_lea.vmem (!%p25516_p11), [#allocation3], %s19457_s25 }
  0xc3   : > { %22987 = dma.done.wait (%p25517_p2), %s366_s17, 204800  }
  0xc4   : > { %22989 = vsyncadd (%p25517_p2), %s366_s17, 4294762496  ;;  %s374_s22 = sand.u32 1, %s23110_s13   ;;  %s16954_s30 = sshll.u32 %s365_s6, 2 }
  0xc5   : > { %s375_s1 = scalar_lea.sflag [#allocation7], %s374_s22  ;;  %s23330_s4 = scalar_lea.vmem [#allocation6], %s16954_s30 }
  0xc6   : > { %22991 = dma.done.wait (%p25517_p2), %s375_s1, 64  }
  0xc7   : > { %22993 = vsyncadd (%p25517_p2), %s375_s1, 4294967232  ;;  %p25518_p7 = scmp.eq.s32.totalorder %s23110_s13, 0 }
  0xc9   : > { %22995 = dma.done.wait (%p25518_p7), [#allocation7], 65536   ;;  %p25519_p4 = pmov %p25518_p7 }
  0xcb   : > { %22997 = vsyncadd (%p25519_p4), [#allocation7], 4294901760  ;;  %p25520_p5 = pmov %p25519_p4 }
  0xcc   : > { %p25521_p13 = pmov %p25519_p4 }
  0xcd   : > { %22999 = dma.done.wait (%p25520_p5), [#allocation10], 80  }
  0xce   : > { %23001 = vsyncadd (%p25521_p13), [#allocation10], 4294967216  ;;  %p25522_p0 = pmov %p25519_p4 }
  0xd0   : > { %23003 = dma.done.wait (%p25522_p0), [#allocation13], 16   ;;  %p25523_p3 = pmov %p25522_p0 }
  0xd1   : > { %v19558_v0 = vld [vmem:[%s23323_s9 + $0x4] ss:$16 sps:$4 sm:$0xff]   ;;  %v19560_v1 = vld [vmem:[%s23323_s9 + $0xc] ss:$16 sps:$4 sm:$0xff]   ;;  %v19562_v2 = vld [vmem:[%s23323_s9] ss:$16 sps:$4 sm:$0xff]   ;;  %v2041_v36 = vlaneseq }
  0xd2   : > { %23005 = vsyncadd (%p25523_p3), [#allocation13], 4294967280  ;;  %10434 = vmatprep.subr.bf16.mxu0 %v19558_v0  ;;  %v19563_v3 = vld [vmem:[%s23323_s9 + $0x8] ss:$16 sps:$4 sm:$0xff]   ;;  %11459 = vmatprep.subr.bf16.mxu1 %v19560_v1  ;;  %v19564_v4 = vld [vmem:[%s23323_s9 + $0x24] ss:$16 sps:$4 sm:$0xff]  }
  0xd3   : > { %10435 = vmatpush1.bf16.msra.mxu0 %v19562_v2  ;;  %11460 = vmatpush1.bf16.msra.mxu1 %v19563_v3  ;;  %v19566_v5 = vld [vmem:[%s23323_s9 + $0x2c] ss:$16 sps:$4 sm:$0xff]   ;;  %v19568_v6 = vld [vmem:[%s23323_s9 + $0x20] ss:$16 sps:$4 sm:$0xff]   ;;  %v19569_v7 = vld [vmem:[%s23323_s9 + $0x28] ss:$16 sps:$4 sm:$0xff]  }
  0xd4   : > { %10436 = vmatprep.subr.bf16.mxu0 %v19564_v4  ;;  %11461 = vmatprep.subr.bf16.mxu1 %v19566_v5  ;;  %v19570_v8 = vld [vmem:[%s23323_s9 + $0x44] ss:$16 sps:$4 sm:$0xff]   ;;  %v19572_v9 = vld [vmem:[%s23323_s9 + $0x4c] ss:$16 sps:$4 sm:$0xff]   ;;  %v19574_v10 = vld [vmem:[%s23323_s9 + $0x40] ss:$16 sps:$4 sm:$0xff]  }
  0xd5   : > { %v19575_v11 = vld [vmem:[%s23323_s9 + $0x48] ss:$16 sps:$4 sm:$0xff]   ;;  %v19576_v12 = vld [vmem:[%s23323_s9 + $0x64] ss:$16 sps:$4 sm:$0xff]   ;;  %v19578_v13 = vld [vmem:[%s23323_s9 + $0x6c] ss:$16 sps:$4 sm:$0xff]  }
  0xd6   : > { %v19580_v14 = vld [vmem:[%s23323_s9 + $0x60] ss:$16 sps:$4 sm:$0xff]   ;;  %v19581_v15 = vld [vmem:[%s23323_s9 + $0x68] ss:$16 sps:$4 sm:$0xff]   ;;  %v19582_v16 = vld [vmem:[%s23323_s9 + $0x84] ss:$16 sps:$4 sm:$0xff]  }
  0xd7   : > { %10437 = vmatpush1.bf16.msra.mxu0 %v19568_v6  ;;  %11462 = vmatpush1.bf16.msra.mxu1 %v19569_v7  ;;  %v19584_v17 = vld [vmem:[%s23323_s9 + $0x8c] ss:$16 sps:$4 sm:$0xff]   ;;  %v19586_v18 = vld [vmem:[%s23323_s9 + $0x80] ss:$16 sps:$4 sm:$0xff]   ;;  %v19587_v19 = vld [vmem:[%s23323_s9 + $0x88] ss:$16 sps:$4 sm:$0xff]  }
  0xd8   : > { %10438 = vmatprep.subr.bf16.mxu0 %v19570_v8  ;;  %11463 = vmatprep.subr.bf16.mxu1 %v19572_v9  ;;  %v19588_v20 = vld [vmem:[%s23323_s9 + $0xa4] ss:$16 sps:$4 sm:$0xff]   ;;  %v19590_v21 = vld [vmem:[%s23323_s9 + $0xac] ss:$16 sps:$4 sm:$0xff]   ;;  %v19592_v22 = vld [vmem:[%s23323_s9 + $0xa0] ss:$16 sps:$4 sm:$0xff]  }
  0xd9   : > { %v19593_v23 = vld [vmem:[%s23323_s9 + $0xa8] ss:$16 sps:$4 sm:$0xff]   ;;  %v19594_v24 = vld [vmem:[%s23323_s9 + $0xc4] ss:$16 sps:$4 sm:$0xff]   ;;  %v19596_v25 = vld [vmem:[%s23323_s9 + $0xcc] ss:$16 sps:$4 sm:$0xff]  }
  0xda   : > { %v19598_v26 = vld [vmem:[%s23323_s9 + $0xc0] ss:$16 sps:$4 sm:$0xff]   ;;  %v19599_v27 = vld [vmem:[%s23323_s9 + $0xc8] ss:$16 sps:$4 sm:$0xff]   ;;  %v19600_v28 = vld [vmem:[%s23323_s9 + $0xe4] ss:$16 sps:$4 sm:$0xff]  }
  0xdb   : > { %10439 = vmatpush1.bf16.msra.mxu0 %v19574_v10  ;;  %11464 = vmatpush1.bf16.msra.mxu1 %v19575_v11  ;;  %v19602_v29 = vld [vmem:[%s23323_s9 + $0xec] ss:$16 sps:$4 sm:$0xff]   ;;  %v19604_v30 = vld [vmem:[%s23323_s9 + $0xe0] ss:$16 sps:$4 sm:$0xff]   ;;  %v19605_v31 = vld [vmem:[%s23323_s9 + $0xe8] ss:$16 sps:$4 sm:$0xff]  }
  0xdc   : > { %10440 = vmatprep.subr.bf16.mxu0 %v19576_v12  ;;  %11465 = vmatprep.subr.bf16.mxu1 %v19578_v13  ;;  %v19606_v32 = vld [vmem:[%s23323_s9 + $0x104] ss:$16 sps:$4 sm:$0xff]   ;;  %v19608_v33 = vld [vmem:[%s23323_s9 + $0x10c] ss:$16 sps:$4 sm:$0xff]   ;;  %v19610_v34 = vld [vmem:[%s23323_s9 + $0x100] ss:$16 sps:$4 sm:$0xff]  }
  0xdd   : > { %v19611_v35 = vld [vmem:[%s23323_s9 + $0x108] ss:$16 sps:$4 sm:$0xff]   ;;  %v23035_v37 = vmov 1966171168   ;;  %v19612_v39 = vld [vmem:[%s23323_s9 + $0x124] ss:$16 sps:$4 sm:$0xff]  }
  0xde   : > { %v2070_v38 = vunpack.c.l.s4 %v23035_v37  ;;  %v19614_v40 = vld [vmem:[%s23323_s9 + $0x12c] ss:$16 sps:$4 sm:$0xff]   ;;  %v19616_v41 = vld [vmem:[%s23323_s9 + $0x120] ss:$16 sps:$4 sm:$0xff]   ;;  %v23387_v42 = vshrl.u32 %v2041_v36, 7  ;;  %p18562_p8 = scmp.ne.s32.totalorder %s23110_s13, 3 }
  0xdf   : > { %10441 = vmatpush1.bf16.msra.mxu0 %v19580_v14  ;;  %11466 = vmatpush1.bf16.msra.mxu1 %v19581_v15  ;;  %v19617_v44 = vld [vmem:[%s23323_s9 + $0x128] ss:$16 sps:$4 sm:$0xff]   ;;  %v19618_v45 = vld [vmem:[%s23323_s9 + $0x144] ss:$16 sps:$4 sm:$0xff]   ;;  %v19620_v46 = vld [vmem:[%s23323_s9 + $0x14c] ss:$16 sps:$4 sm:$0xff]  }
  0xe0   : > { %10442 = vmatprep.subr.bf16.mxu0 %v19582_v16  ;;  %11467 = vmatprep.subr.bf16.mxu1 %v19584_v17  ;;  %v2071_v43 = vunpack.c.0.s8 %v2070_v38  ;;  %v19622_v47 = vld [vmem:[%s23323_s9 + $0x140] ss:$16 sps:$4 sm:$0xff]   ;;  %v19623_v48 = vld [vmem:[%s23323_s9 + $0x148] ss:$16 sps:$4 sm:$0xff]   ;;  %v19624_v50 = vld [vmem:[%s23323_s9 + $0x164] ss:$16 sps:$4 sm:$0xff]  }
  0xe1   : > { %v19626_v51 = vld [vmem:[%s23323_s9 + $0x16c] ss:$16 sps:$4 sm:$0xff]   ;;  %v23402_v52 = vld [vmem:[%s25483_s0] sm:$0xff]  ;;  %v19629_v55 = vld [vmem:[%s23323_s9 + $0x168] ss:$16 sps:$4 sm:$0xff]   ;;  %vm23038_vm0 = vmmov (!%p18562_p8), 0  }
  0xe2   : > { %v23395_v49 = vsub.s32 %v2071_v43, %v23387_v42  ;;  %v19628_v53 = vld [vmem:[%s23323_s9 + $0x160] ss:$16 sps:$4 sm:$0xff]   ;;  %v19630_v56 = vld [vmem:[%s23323_s9 + $0x184] ss:$16 sps:$4 sm:$0xff]   ;;  %v19632_v57 = vld [vmem:[%s23323_s9 + $0x18c] ss:$16 sps:$4 sm:$0xff]  }
  0xe3   : > { %10443 = vmatpush1.bf16.msra.mxu0 %v19586_v18  ;;  %11468 = vmatpush1.bf16.msra.mxu1 %v19587_v19  ;;  %v19634_v59 = vld [vmem:[%s23323_s9 + $0x180] ss:$16 sps:$4 sm:$0xff]   ;;  %v19635_v61 = vld [vmem:[%s23323_s9 + $0x188] ss:$16 sps:$4 sm:$0xff]   ;;  %v19636_v62 = vld [vmem:[%s23323_s9 + $0x1a4] ss:$16 sps:$4 sm:$0xff]  }
  0xe4   : > { %10444 = vmatprep.subr.bf16.mxu0 %v19588_v20  ;;  %11469 = vmatprep.subr.bf16.mxu1 %v19590_v21  ;;  %v2075_v54 = vrot.slane %v23402_v52, %v23395_v49  ;;  %v19638_v63 = vld [vmem:[%s23323_s9 + $0x1ac] ss:$16 sps:$4 sm:$0xff]   ;;  %v19640_v0 = vld [vmem:[%s23323_s9 + $0x1a0] ss:$16 sps:$4 sm:$0xff]   ;;  %v19641_v1 = vld [vmem:[%s23323_s9 + $0x1a8] ss:$16 sps:$4 sm:$0xff]  }
  0xe5   : > { %v19642_v2 = vld [vmem:[%s23323_s9 + $0x1c4] ss:$16 sps:$4 sm:$0xff]   ;;  %v19644_v3 = vld [vmem:[%s23323_s9 + $0x1cc] ss:$16 sps:$4 sm:$0xff]   ;;  %v19646_v4 = vld [vmem:[%s23323_s9 + $0x1c0] ss:$16 sps:$4 sm:$0xff]  }
  0xe6   : > { %v2083_v58 = vcombine.high %v2075_v54, %v2075_v54  ;;  %v19647_v5 = vld [vmem:[%s23323_s9 + $0x1c8] ss:$16 sps:$4 sm:$0xff]   ;;  %v19648_v6 = vld [vmem:[%s23323_s9 + $0x1e4] ss:$16 sps:$4 sm:$0xff]   ;;  %v19650_v7 = vld [vmem:[%s23323_s9 + $0x1ec] ss:$16 sps:$4 sm:$0xff]   ;;  %v23429_v13 = vrot.slane %v2075_v54, %v23395_v49 }
  0xe7   : > { %10445 = vmatpush1.bf16.msra.mxu0 %v19592_v22  ;;  %11470 = vmatpush1.bf16.msra.mxu1 %v19593_v23  ;;  %v19652_v8 = vld [vmem:[%s23323_s9 + $0x1e0] ss:$16 sps:$4 sm:$0xff]   ;;  %v19653_v9 = vld [vmem:[%s23323_s9 + $0x1e8] ss:$16 sps:$4 sm:$0xff]   ;;  %v19656_v10 = vld [vmem:[%s23323_s9 + $0x204] ss:$16 sps:$4 sm:$0xff]  }
  0xe8   : > { %10446 = vmatprep.subr.bf16.mxu0 %v19594_v24  ;;  %11471 = vmatprep.subr.bf16.mxu1 %v19596_v25  ;;  %v2105_v60 = vrot.slane %v2083_v58, %v23395_v49  ;;  %v19659_v11 = vld [vmem:[%s23323_s9 + $0x20c] ss:$16 sps:$4 sm:$0xff]   ;;  %v19654_v12 = vld [vmem:[%s23323_s9 + $0x200] ss:$16 sps:$4 sm:$0xff]   ;;  %v19657_v14 = vld [vmem:[%s23323_s9 + $0x208] ss:$16 sps:$4 sm:$0xff]  }
  0xe9   : > { %v19662_v15 = vld [vmem:[%s23323_s9 + $0x224] ss:$16 sps:$4 sm:$0xff]   ;;  %v19665_v16 = vld [vmem:[%s23323_s9 + $0x22c] ss:$16 sps:$4 sm:$0xff]   ;;  %v19660_v18 = vld [vmem:[%s23323_s9 + $0x220] ss:$16 sps:$4 sm:$0xff]  }
  0xea   : > { %10466 = vmatprep.mubr.bf16.mxu0 %v2105_v60  ;;  %11491 = vmatprep.mubr.bf16.mxu1 %v2105_v60  ;;  %v2115_v17 = vcombine.high %v2105_v60, %v2105_v60  ;;  %v19663_v19 = vld [vmem:[%s23323_s9 + $0x228] ss:$16 sps:$4 sm:$0xff]   ;;  %v19668_v20 = vld [vmem:[%s23323_s9 + $0x244] ss:$16 sps:$4 sm:$0xff]   ;;  %v19671_v21 = vld [vmem:[%s23323_s9 + $0x24c] ss:$16 sps:$4 sm:$0xff]  }
  0xeb   : > { %10447 = vmatpush1.bf16.msra.mxu0 %v19598_v26  ;;  %11472 = vmatpush1.bf16.msra.mxu1 %v19599_v27  ;;  %v19666_v22 = vld [vmem:[%s23323_s9 + $0x240] ss:$16 sps:$4 sm:$0xff]   ;;  %v19669_v23 = vld [vmem:[%s23323_s9 + $0x248] ss:$16 sps:$4 sm:$0xff]   ;;  %v19674_v24 = vld [vmem:[%s23323_s9 + $0x264] ss:$16 sps:$4 sm:$0xff]  }
  0xec   : > { %10448 = vmatprep.subr.bf16.mxu0 %v19600_v28  ;;  %11473 = vmatprep.subr.bf16.mxu1 %v19602_v29  ;;  %v19677_v25 = vld [vmem:[%s23323_s9 + $0x26c] ss:$16 sps:$4 sm:$0xff]   ;;  %v19672_v26 = vld [vmem:[%s23323_s9 + $0x260] ss:$16 sps:$4 sm:$0xff]   ;;  %v19675_v27 = vld [vmem:[%s23323_s9 + $0x268] ss:$16 sps:$4 sm:$0xff]  }
  0xed   : > { %v19680_v28 = vld [vmem:[%s23323_s9 + $0x284] ss:$16 sps:$4 sm:$0xff]   ;;  %v19683_v29 = vld [vmem:[%s23323_s9 + $0x28c] ss:$16 sps:$4 sm:$0xff]   ;;  %v19690_v38 = vld [vmem:[%s23323_s9 + $0x2c0] ss:$16 sps:$4 sm:$0xff]  }
  0xee   : > { %v19692_v36 = vld [vmem:[%s23323_s9 + $0x2c4] ss:$16 sps:$4 sm:$0xff]   ;;  %v19695_v37 = vld [vmem:[%s23323_s9 + $0x2cc] ss:$16 sps:$4 sm:$0xff]   ;;  %v19696_v43 = vld [vmem:[%s23323_s9 + $0x2e0] ss:$16 sps:$4 sm:$0xff]  }
  0xef   : > { %10449 = vmatpush1.bf16.msra.mxu0 %v19604_v30  ;;  %11474 = vmatpush1.bf16.msra.mxu1 %v19605_v31  ;;  %v19678_v30 = vld [vmem:[%s23323_s9 + $0x280] ss:$16 sps:$4 sm:$0xff]   ;;  %v19681_v31 = vld [vmem:[%s23323_s9 + $0x288] ss:$16 sps:$4 sm:$0xff]   ;;  %v19725_v60 = vld [vmem:[%s23323_s9 + $0x36c] ss:$16 sps:$4 sm:$0xff]  }
  0xf0   : > { %10450 = vmatprep.subr.bf16.mxu0 %v19606_v32  ;;  %11475 = vmatprep.subr.bf16.mxu1 %v19608_v33  ;;  %v19686_v32 = vld [vmem:[%s23323_s9 + $0x2a4] ss:$16 sps:$4 sm:$0xff]   ;;  %v19689_v33 = vld [vmem:[%s23323_s9 + $0x2ac] ss:$16 sps:$4 sm:$0xff]   ;;  %v19711_v54 = vld [vmem:[%s23323_s9 + $0x328] ss:$16 sps:$4 sm:$0xff]  }
  0xf1   : > { %v19717_v58 = vld [vmem:[%s23323_s9 + $0x348] ss:$16 sps:$4 sm:$0xff]   ;;  %vm16745_vm1 = vcmask (!%p18562_p8), 523264   ;;  %vm16819_vm2 = vcmask (!%p18562_p8), 9216  }
  0xf3   : > { %10451 = vmatpush1.bf16.msra.mxu0 %v19610_v34  ;;  %11476 = vmatpush1.bf16.msra.mxu1 %v19611_v35  ;;  %v19684_v34 = vld [vmem:[%s23323_s9 + $0x2a0] ss:$16 sps:$4 sm:$0xff]   ;;  %v19687_v35 = vld [vmem:[%s23323_s9 + $0x2a8] ss:$16 sps:$4 sm:$0xff]  }
  0xf4   : > { %10452 = vmatprep.subr.bf16.mxu0 %v19612_v39  ;;  %11477 = vmatprep.subr.bf16.mxu1 %v19614_v40  ;;  %v19693_v39 = vld [vmem:[%s23323_s9 + $0x2c8] ss:$16 sps:$4 sm:$0xff]   ;;  %v19698_v40 = vld [vmem:[%s23323_s9 + $0x2e4] ss:$16 sps:$4 sm:$0xff]  }
  0xf7   : > { %10453 = vmatpush1.bf16.msra.mxu0 %v19616_v41  ;;  %11478 = vmatpush1.bf16.msra.mxu1 %v19617_v44  ;;  %v19701_v41 = vld [vmem:[%s23323_s9 + $0x2ec] ss:$16 sps:$4 sm:$0xff]   ;;  %v19699_v44 = vld [vmem:[%s23323_s9 + $0x2e8] ss:$16 sps:$4 sm:$0xff]  }
  0xf8   : > { %10454 = vmatprep.subr.bf16.mxu0 %v19618_v45  ;;  %11479 = vmatprep.subr.bf16.mxu1 %v19620_v46  ;;  %v19704_v45 = vld [vmem:[%s23323_s9 + $0x304] ss:$16 sps:$4 sm:$0xff]   ;;  %v19707_v46 = vld [vmem:[%s23323_s9 + $0x30c] ss:$16 sps:$4 sm:$0xff]  }
  0xfb   : > { %10455 = vmatpush1.bf16.msra.mxu0 %v19622_v47  ;;  %11480 = vmatpush1.bf16.msra.mxu1 %v19623_v48  ;;  %v19702_v47 = vld [vmem:[%s23323_s9 + $0x300] ss:$16 sps:$4 sm:$0xff]   ;;  %v19705_v48 = vld [vmem:[%s23323_s9 + $0x308] ss:$16 sps:$4 sm:$0xff]  }
  0xfc   : > { %10456 = vmatprep.subr.bf16.mxu0 %v19624_v50  ;;  %11481 = vmatprep.subr.bf16.mxu1 %v19626_v51  ;;  %v19710_v50 = vld [vmem:[%s23323_s9 + $0x324] ss:$16 sps:$4 sm:$0xff]   ;;  %v19713_v51 = vld [vmem:[%s23323_s9 + $0x32c] ss:$16 sps:$4 sm:$0xff]  }
  0xff   : > { %10457 = vmatpush1.bf16.msra.mxu0 %v19628_v53  ;;  %11482 = vmatpush1.bf16.msra.mxu1 %v19629_v55  ;;  %v19708_v53 = vld [vmem:[%s23323_s9 + $0x320] ss:$16 sps:$4 sm:$0xff]   ;;  %v19716_v55 = vld [vmem:[%s23323_s9 + $0x344] ss:$16 sps:$4 sm:$0xff]  }
 0x100   : > { %10458 = vmatprep.subr.bf16.mxu0 %v19630_v56  ;;  %11483 = vmatprep.subr.bf16.mxu1 %v19632_v57  ;;  %v19719_v56 = vld [vmem:[%s23323_s9 + $0x34c] ss:$16 sps:$4 sm:$0xff]   ;;  %v19714_v57 = vld [vmem:[%s23323_s9 + $0x340] ss:$16 sps:$4 sm:$0xff]  }
 0x103   : > { %10459 = vmatpush1.bf16.msra.mxu0 %v19634_v59  ;;  %11484 = vmatpush1.bf16.msra.mxu1 %v19635_v61  ;;  %v19722_v59 = vld [vmem:[%s23323_s9 + $0x364] ss:$16 sps:$4 sm:$0xff]   ;;  %v19720_v61 = vld [vmem:[%s23323_s9 + $0x360] ss:$16 sps:$4 sm:$0xff]  }
 0x104   : > { %10460 = vmatprep.subr.bf16.mxu0 %v19636_v62  ;;  %11485 = vmatprep.subr.bf16.mxu1 %v19638_v63  ;;  %v19723_v62 = vld [vmem:[%s23323_s9 + $0x368] ss:$16 sps:$4 sm:$0xff]   ;;  %v19728_v63 = vld [vmem:[%s23323_s9 + $0x384] ss:$16 sps:$4 sm:$0xff]  }
 0x107   : > { %10461 = vmatpush1.bf16.msra.mxu0 %v19640_v0  ;;  %11486 = vmatpush1.bf16.msra.mxu1 %v19641_v1  ;;  %v19731_v0 = vld [vmem:[%s23323_s9 + $0x38c] ss:$16 sps:$4 sm:$0xff]   ;;  %v19726_v1 = vld [vmem:[%s23323_s9 + $0x380] ss:$16 sps:$4 sm:$0xff]  }
 0x108   : > { %10462 = vmatprep.subr.bf16.mxu0 %v19642_v2  ;;  %11487 = vmatprep.subr.bf16.mxu1 %v19644_v3  ;;  %v19729_v2 = vld [vmem:[%s23323_s9 + $0x388] ss:$16 sps:$4 sm:$0xff]   ;;  %v19734_v3 = vld [vmem:[%s23323_s9 + $0x3a4] ss:$16 sps:$4 sm:$0xff]  }
 0x10b   : > { %10463 = vmatpush1.bf16.msra.mxu0 %v19646_v4  ;;  %11488 = vmatpush1.bf16.msra.mxu1 %v19647_v5  ;;  %v19737_v4 = vld [vmem:[%s23323_s9 + $0x3ac] ss:$16 sps:$4 sm:$0xff]   ;;  %v19732_v5 = vld [vmem:[%s23323_s9 + $0x3a0] ss:$16 sps:$4 sm:$0xff]  }
 0x10c   : > { %10464 = vmatprep.subr.bf16.mxu0 %v19648_v6  ;;  %11489 = vmatprep.subr.bf16.mxu1 %v19650_v7  ;;  %v19735_v6 = vld [vmem:[%s23323_s9 + $0x3a8] ss:$16 sps:$4 sm:$0xff]   ;;  %v19740_v7 = vld [vmem:[%s23323_s9 + $0x3c4] ss:$16 sps:$4 sm:$0xff]  }
 0x10f   : > { %10465 = vmatpush1.bf16.msra.mxu0 %v19652_v8  ;;  %11490 = vmatpush1.bf16.msra.mxu1 %v19653_v9  ;;  %v19743_v8 = vld [vmem:[%s23323_s9 + $0x3cc] ss:$16 sps:$4 sm:$0xff]   ;;  %v2068_v9 = vcombine.high %v23402_v52, %v23402_v52  ;;  %v19747_v52 = vld [vmem:[%s23323_s9 + $0x3e8] ss:$16 sps:$4 sm:$0xff]  }
 0x110   : > { %10475 = vmatprep.subr.bf16.mxu0 %v19656_v10  ;;  %11500 = vmatprep.subr.bf16.mxu1 %v19659_v11  ;;  %v19738_v10 = vld [vmem:[%s23323_s9 + $0x3c0] ss:$16 sps:$4 sm:$0xff]   ;;  %v19741_v11 = vld [vmem:[%s23323_s9 + $0x3c8] ss:$16 sps:$4 sm:$0xff]  }
 0x112   : > { %10467 = vmatmul.mubr.bf16.vlgmr.msra.gmra.mrb[0].mxu0 %v23429_v13  ;;  %11492 = vmatmul.mubr.bf16.vlgmr.msra.gmra.mrb[0].mxu1 %v23429_v13 }
 0x113   : > { %10476 = vmatpush1.bf16.msra.mxu0 %v19654_v12  ;;  %11501 = vmatpush1.bf16.msra.mxu1 %v19657_v14  ;;  %v19746_v12 = vld [vmem:[%s23323_s9 + $0x3e4] ss:$16 sps:$4 sm:$0xff]   ;;  %v19749_v14 = vld [vmem:[%s23323_s9 + $0x3ec] ss:$16 sps:$4 sm:$0xff]  }
 0x114   : > { %10477 = vmatprep.subr.bf16.mxu0 %v19662_v15  ;;  %11502 = vmatprep.subr.bf16.mxu1 %v19665_v16  ;;  %v23495_v15 = vrot.slane %v2068_v9, %v23395_v49  ;;  %v19744_v16 = vld [vmem:[%s23323_s9 + $0x3e0] ss:$16 sps:$4 sm:$0xff]   ;;  %v19825_v9 = vld [vmem:[%s23323_s9 + $0x588] ss:$16 sps:$4 sm:$0xff]  }
 0x115   : > { %10507 = vmatprep.mubr.bf16.mxu0 %v2115_v17  ;;  %11532 = vmatprep.mubr.bf16.mxu1 %v2115_v17  ;;  %v19752_v17 = vld [vmem:[%s23323_s9 + $0x404] ss:$16 sps:$4 sm:$0xff]  }
 0x117   : > { %10478 = vmatpush1.bf16.msra.mxu0 %v19660_v18  ;;  %11503 = vmatpush1.bf16.msra.mxu1 %v19663_v19  ;;  %v19755_v18 = vld [vmem:[%s23323_s9 + $0x40c] ss:$16 sps:$4 sm:$0xff]   ;;  %v2084_v19 = vcombine.high %v23495_v15, %v23495_v15 }
 0x118   : > { %10479 = vmatprep.subr.bf16.mxu0 %v19668_v20  ;;  %11504 = vmatprep.subr.bf16.mxu1 %v19671_v21  ;;  %v19750_v20 = vld [vmem:[%s23323_s9 + $0x400] ss:$16 sps:$4 sm:$0xff]   ;;  %v2113_v21 = vcombine.high %v23429_v13, %v23429_v13  ;;  %v19759_v13 = vld [vmem:[%s23323_s9 + $0x428] ss:$16 sps:$4 sm:$0xff]  }
 0x11b   : > { %10480 = vmatpush1.bf16.msra.mxu0 %v19666_v22  ;;  %11505 = vmatpush1.bf16.msra.mxu1 %v19669_v23  ;;  %v19753_v22 = vld [vmem:[%s23323_s9 + $0x408] ss:$16 sps:$4 sm:$0xff]   ;;  %v19758_v23 = vld [vmem:[%s23323_s9 + $0x424] ss:$16 sps:$4 sm:$0xff]  }
 0x11c   : > { %10481 = vmatprep.subr.bf16.mxu0 %v19674_v24  ;;  %11506 = vmatprep.subr.bf16.mxu1 %v19677_v25  ;;  %v19761_v24 = vld [vmem:[%s23323_s9 + $0x42c] ss:$16 sps:$4 sm:$0xff]   ;;  %v23510_v25 = vrot.slane %v2084_v19, %v23395_v49  ;;  %v19842_v19 = vld [vmem:[%s23323_s9 + $0x5e4] ss:$16 sps:$4 sm:$0xff]  }
 0x11f   : > { %10482 = vmatpush1.bf16.msra.mxu0 %v19672_v26  ;;  %11507 = vmatpush1.bf16.msra.mxu1 %v19675_v27  ;;  %v19756_v26 = vld [vmem:[%s23323_s9 + $0x420] ss:$16 sps:$4 sm:$0xff]   ;;  %v19764_v27 = vld [vmem:[%s23323_s9 + $0x444] ss:$16 sps:$4 sm:$0xff]  }
 0x120   : > { %10483 = vmatprep.subr.bf16.mxu0 %v19680_v28  ;;  %11508 = vmatprep.subr.bf16.mxu1 %v19683_v29  ;;  %v19767_v28 = vld [vmem:[%s23323_s9 + $0x44c] ss:$16 sps:$4 sm:$0xff]   ;;  %v19762_v29 = vld [vmem:[%s23323_s9 + $0x440] ss:$16 sps:$4 sm:$0xff]  }
 0x123   : > { %10484 = vmatpush1.bf16.msra.mxu0 %v19678_v30  ;;  %11509 = vmatpush1.bf16.msra.mxu1 %v19681_v31  ;;  %v19765_v30 = vld [vmem:[%s23323_s9 + $0x448] ss:$16 sps:$4 sm:$0xff]   ;;  %v19770_v31 = vld [vmem:[%s23323_s9 + $0x464] ss:$16 sps:$4 sm:$0xff]  }
 0x124   : > { %10485 = vmatprep.subr.bf16.mxu0 %v19686_v32  ;;  %11510 = vmatprep.subr.bf16.mxu1 %v19689_v33  ;;  %v19773_v32 = vld [vmem:[%s23323_s9 + $0x46c] ss:$16 sps:$4 sm:$0xff]   ;;  %v19768_v33 = vld [vmem:[%s23323_s9 + $0x460] ss:$16 sps:$4 sm:$0xff]  }
 0x127   : > { %10486 = vmatpush1.bf16.msra.mxu0 %v19684_v34  ;;  %11511 = vmatpush1.bf16.msra.mxu1 %v19687_v35  ;;  %v19771_v34 = vld [vmem:[%s23323_s9 + $0x468] ss:$16 sps:$4 sm:$0xff]   ;;  %v19776_v35 = vld [vmem:[%s23323_s9 + $0x484] ss:$16 sps:$4 sm:$0xff]  }
 0x128   : > { %10487 = vmatprep.subr.bf16.mxu0 %v19692_v36  ;;  %11512 = vmatprep.subr.bf16.mxu1 %v19695_v37  ;;  %v19779_v36 = vld [vmem:[%s23323_s9 + $0x48c] ss:$16 sps:$4 sm:$0xff]   ;;  %v19774_v37 = vld [vmem:[%s23323_s9 + $0x480] ss:$16 sps:$4 sm:$0xff]  }
 0x12b   : > { %10488 = vmatpush1.bf16.msra.mxu0 %v19690_v38  ;;  %11513 = vmatpush1.bf16.msra.mxu1 %v19693_v39  ;;  %v19777_v38 = vld [vmem:[%s23323_s9 + $0x488] ss:$16 sps:$4 sm:$0xff]   ;;  %v19782_v39 = vld [vmem:[%s23323_s9 + $0x4a4] ss:$16 sps:$4 sm:$0xff]  }
 0x12c   : > { %10489 = vmatprep.subr.bf16.mxu0 %v19698_v40  ;;  %11514 = vmatprep.subr.bf16.mxu1 %v19701_v41  ;;  %v19785_v40 = vld [vmem:[%s23323_s9 + $0x4ac] ss:$16 sps:$4 sm:$0xff]   ;;  %v19780_v41 = vld [vmem:[%s23323_s9 + $0x4a0] ss:$16 sps:$4 sm:$0xff]  }
 0x12f   : > { %10490 = vmatpush1.bf16.msra.mxu0 %v19696_v43  ;;  %11515 = vmatpush1.bf16.msra.mxu1 %v19699_v44  ;;  %v19783_v43 = vld [vmem:[%s23323_s9 + $0x4a8] ss:$16 sps:$4 sm:$0xff]   ;;  %v19788_v44 = vld [vmem:[%s23323_s9 + $0x4c4] ss:$16 sps:$4 sm:$0xff]  }
 0x130   : > { %10491 = vmatprep.subr.bf16.mxu0 %v19704_v45  ;;  %11516 = vmatprep.subr.bf16.mxu1 %v19707_v46  ;;  %v19791_v45 = vld [vmem:[%s23323_s9 + $0x4cc] ss:$16 sps:$4 sm:$0xff]   ;;  %v19786_v46 = vld [vmem:[%s23323_s9 + $0x4c0] ss:$16 sps:$4 sm:$0xff]  }
 0x133   : > { %10492 = vmatpush1.bf16.msra.mxu0 %v19702_v47  ;;  %11517 = vmatpush1.bf16.msra.mxu1 %v19705_v48  ;;  %v19789_v47 = vld [vmem:[%s23323_s9 + $0x4c8] ss:$16 sps:$4 sm:$0xff]   ;;  %v19794_v48 = vld [vmem:[%s23323_s9 + $0x4e4] ss:$16 sps:$4 sm:$0xff]  }
 0x134   : > { %10493 = vmatprep.subr.bf16.mxu0 %v19710_v50  ;;  %11518 = vmatprep.subr.bf16.mxu1 %v19713_v51  ;;  %v19797_v50 = vld [vmem:[%s23323_s9 + $0x4ec] ss:$16 sps:$4 sm:$0xff]   ;;  %v19792_v51 = vld [vmem:[%s23323_s9 + $0x4e0] ss:$16 sps:$4 sm:$0xff]  }
 0x137   : > { %10494 = vmatpush1.bf16.msra.mxu0 %v19708_v53  ;;  %11519 = vmatpush1.bf16.msra.mxu1 %v19711_v54  ;;  %v19795_v53 = vld [vmem:[%s23323_s9 + $0x4e8] ss:$16 sps:$4 sm:$0xff]   ;;  %v19800_v54 = vld [vmem:[%s23323_s9 + $0x504] ss:$16 sps:$4 sm:$0xff]  }
 0x138   : > { %10495 = vmatprep.subr.bf16.mxu0 %v19716_v55  ;;  %11520 = vmatprep.subr.bf16.mxu1 %v19719_v56  ;;  %v19803_v55 = vld [vmem:[%s23323_s9 + $0x50c] ss:$16 sps:$4 sm:$0xff]   ;;  %v19798_v56 = vld [vmem:[%s23323_s9 + $0x500] ss:$16 sps:$4 sm:$0xff]  }
 0x13b   : > { %10496 = vmatpush1.bf16.msra.mxu0 %v19714_v57  ;;  %11521 = vmatpush1.bf16.msra.mxu1 %v19717_v58  ;;  %v19801_v57 = vld [vmem:[%s23323_s9 + $0x508] ss:$16 sps:$4 sm:$0xff]   ;;  %v19806_v58 = vld [vmem:[%s23323_s9 + $0x524] ss:$16 sps:$4 sm:$0xff]  }
 0x13c   : > { %10497 = vmatprep.subr.bf16.mxu0 %v19722_v59  ;;  %11522 = vmatprep.subr.bf16.mxu1 %v19725_v60  ;;  %v19809_v59 = vld [vmem:[%s23323_s9 + $0x52c] ss:$16 sps:$4 sm:$0xff]   ;;  %v19804_v60 = vld [vmem:[%s23323_s9 + $0x520] ss:$16 sps:$4 sm:$0xff]  }
 0x13f   : > { %10498 = vmatpush1.bf16.msra.mxu0 %v19720_v61  ;;  %11523 = vmatpush1.bf16.msra.mxu1 %v19723_v62  ;;  %v19807_v61 = vld [vmem:[%s23323_s9 + $0x528] ss:$16 sps:$4 sm:$0xff]   ;;  %v19812_v62 = vld [vmem:[%s23323_s9 + $0x544] ss:$16 sps:$4 sm:$0xff]  }
 0x140   : > { %10499 = vmatprep.subr.bf16.mxu0 %v19728_v63  ;;  %11524 = vmatprep.subr.bf16.mxu1 %v19731_v0  ;;  %v19815_v63 = vld [vmem:[%s23323_s9 + $0x54c] ss:$16 sps:$4 sm:$0xff]   ;;  %v19810_v0 = vld [vmem:[%s23323_s9 + $0x540] ss:$16 sps:$4 sm:$0xff]  }
 0x143   : > { %10500 = vmatpush1.bf16.msra.mxu0 %v19726_v1  ;;  %11525 = vmatpush1.bf16.msra.mxu1 %v19729_v2  ;;  %v19813_v1 = vld [vmem:[%s23323_s9 + $0x548] ss:$16 sps:$4 sm:$0xff]   ;;  %v19818_v2 = vld [vmem:[%s23323_s9 + $0x564] ss:$16 sps:$4 sm:$0xff]  }
 0x144   : > { %10501 = vmatprep.subr.bf16.mxu0 %v19734_v3  ;;  %11526 = vmatprep.subr.bf16.mxu1 %v19737_v4  ;;  %v19821_v3 = vld [vmem:[%s23323_s9 + $0x56c] ss:$16 sps:$4 sm:$0xff]   ;;  %v19816_v4 = vld [vmem:[%s23323_s9 + $0x560] ss:$16 sps:$4 sm:$0xff]  }
 0x147   : > { %10502 = vmatpush1.bf16.msra.mxu0 %v19732_v5  ;;  %11527 = vmatpush1.bf16.msra.mxu1 %v19735_v6  ;;  %v19819_v5 = vld [vmem:[%s23323_s9 + $0x568] ss:$16 sps:$4 sm:$0xff]   ;;  %v19824_v6 = vld [vmem:[%s23323_s9 + $0x584] ss:$16 sps:$4 sm:$0xff]  }
 0x148   : > { %10503 = vmatprep.subr.bf16.mxu0 %v19740_v7  ;;  %11528 = vmatprep.subr.bf16.mxu1 %v19743_v8  ;;  %v19827_v7 = vld [vmem:[%s23323_s9 + $0x58c] ss:$16 sps:$4 sm:$0xff]   ;;  %v19822_v8 = vld [vmem:[%s23323_s9 + $0x580] ss:$16 sps:$4 sm:$0xff]  }
 0x14b   : > { %10504 = vmatpush1.bf16.msra.mxu0 %v19738_v10  ;;  %11529 = vmatpush1.bf16.msra.mxu1 %v19741_v11  ;;  %v19830_v10 = vld [vmem:[%s23323_s9 + $0x5a4] ss:$16 sps:$4 sm:$0xff]   ;;  %v19833_v11 = vld [vmem:[%s23323_s9 + $0x5ac] ss:$16 sps:$4 sm:$0xff]  }
 0x14c   : > { %10505 = vmatprep.subr.bf16.mxu0 %v19746_v12  ;;  %11530 = vmatprep.subr.bf16.mxu1 %v19749_v14  ;;  %v19828_v12 = vld [vmem:[%s23323_s9 + $0x5a0] ss:$16 sps:$4 sm:$0xff]   ;;  %v19831_v14 = vld [vmem:[%s23323_s9 + $0x5a8] ss:$16 sps:$4 sm:$0xff]  }
 0x14f   : > { %10506 = vmatpush1.bf16.msra.mxu0 %v19744_v16  ;;  %11531 = vmatpush1.bf16.msra.mxu1 %v19747_v52  ;;  %v19836_v16 = vld [vmem:[%s23323_s9 + $0x5c4] ss:$16 sps:$4 sm:$0xff]   ;;  %v19839_v52 = vld [vmem:[%s23323_s9 + $0x5cc] ss:$16 sps:$4 sm:$0xff]  }
 0x150   : > { %10516 = vmatprep.subr.bf16.mxu0 %v19752_v17  ;;  %11541 = vmatprep.subr.bf16.mxu1 %v19755_v18  ;;  %v19834_v17 = vld [vmem:[%s23323_s9 + $0x5c0] ss:$16 sps:$4 sm:$0xff]   ;;  %v19837_v18 = vld [vmem:[%s23323_s9 + $0x5c8] ss:$16 sps:$4 sm:$0xff]  }
 0x152   : > { %10508 = vmatmul.mubr.bf16.vlgmr.msra.gmra.mrb[0].mxu0 %v2113_v21  ;;  %11533 = vmatmul.mubr.bf16.vlgmr.msra.gmra.mrb[0].mxu1 %v2113_v21  ;;  %v19840_v21 = vld [vmem:[%s23323_s9 + $0x5e0] ss:$16 sps:$4 sm:$0xff]  }
 0x153   : > { %10517 = vmatpush1.bf16.msra.mxu0 %v19750_v20  ;;  %11542 = vmatpush1.bf16.msra.mxu1 %v19753_v22  ;;  %v19845_v20 = vld [vmem:[%s23323_s9 + $0x5ec] ss:$16 sps:$4 sm:$0xff]   ;;  %v19843_v22 = vld [vmem:[%s23323_s9 + $0x5e8] ss:$16 sps:$4 sm:$0xff]  }
 0x154   : > { %10518 = vmatprep.subr.bf16.mxu0 %v19758_v23  ;;  %11543 = vmatprep.subr.bf16.mxu1 %v19761_v24  ;;  %v19849_v23 = vld [vmem:[%s23323_s9 + $0x604] ss:$16 sps:$4 sm:$0xff]   ;;  %v19852_v24 = vld [vmem:[%s23323_s9 + $0x60c] ss:$16 sps:$4 sm:$0xff]  }
 0x155   : > { %10548 = vmatprep.mubr.bf16.mxu0 %v23510_v25  ;;  %11573 = vmatprep.mubr.bf16.mxu1 %v23510_v25 }
 0x157   : > { %10519 = vmatpush1.bf16.msra.mxu0 %v19756_v26  ;;  %11544 = vmatpush1.bf16.msra.mxu1 %v19759_v13  ;;  %v19847_v26 = vld [vmem:[%s23323_s9 + $0x600] ss:$16 sps:$4 sm:$0xff]   ;;  %v23577_v13 = vrot.slane %v23495_v15, %v23395_v49 }
 0x158   : > { %10520 = vmatprep.subr.bf16.mxu0 %v19764_v27  ;;  %11545 = vmatprep.subr.bf16.mxu1 %v19767_v28  ;;  %v19850_v27 = vld [vmem:[%s23323_s9 + $0x608] ss:$16 sps:$4 sm:$0xff]   ;;  %v19855_v28 = vld [vmem:[%s23323_s9 + $0x624] ss:$16 sps:$4 sm:$0xff]   ;;  %v19853_v15 = vld [vmem:[%s23323_s9 + $0x620] ss:$16 sps:$4 sm:$0xff]  }
 0x15b   : > { %10521 = vmatpush1.bf16.msra.mxu0 %v19762_v29  ;;  %11546 = vmatpush1.bf16.msra.mxu1 %v19765_v30  ;;  %v19858_v29 = vld [vmem:[%s23323_s9 + $0x62c] ss:$16 sps:$4 sm:$0xff]   ;;  %v2116_v30 = vcombine.high %v23510_v25, %v23510_v25  ;;  %v19859_v25 = vld [vmem:[%s23323_s9 + $0x640] ss:$16 sps:$4 sm:$0xff]  }
 0x15c   : > { %10522 = vmatprep.subr.bf16.mxu0 %v19770_v31  ;;  %11547 = vmatprep.subr.bf16.mxu1 %v19773_v32  ;;  %v19856_v31 = vld [vmem:[%s23323_s9 + $0x628] ss:$16 sps:$4 sm:$0xff]   ;;  %v19861_v32 = vld [vmem:[%s23323_s9 + $0x644] ss:$16 sps:$4 sm:$0xff]  }
 0x15f   : > { %10523 = vmatpush1.bf16.msra.mxu0 %v19768_v33  ;;  %11548 = vmatpush1.bf16.msra.mxu1 %v19771_v34  ;;  %v19864_v33 = vld [vmem:[%s23323_s9 + $0x64c] ss:$16 sps:$4 sm:$0xff]   ;;  %v19862_v34 = vld [vmem:[%s23323_s9 + $0x648] ss:$16 sps:$4 sm:$0xff]  }
 0x160   : > { %10524 = vmatprep.subr.bf16.mxu0 %v19776_v35  ;;  %11549 = vmatprep.subr.bf16.mxu1 %v19779_v36  ;;  %v19867_v35 = vld [vmem:[%s23323_s9 + $0x664] ss:$16 sps:$4 sm:$0xff]   ;;  %v19870_v36 = vld [vmem:[%s23323_s9 + $0x66c] ss:$16 sps:$4 sm:$0xff]  }
 0x163   : > { %10525 = vmatpush1.bf16.msra.mxu0 %v19774_v37  ;;  %11550 = vmatpush1.bf16.msra.mxu1 %v19777_v38  ;;  %v19865_v37 = vld [vmem:[%s23323_s9 + $0x660] ss:$16 sps:$4 sm:$0xff]   ;;  %v19868_v38 = vld [vmem:[%s23323_s9 + $0x668] ss:$16 sps:$4 sm:$0xff]  }
 0x164   : > { %10526 = vmatprep.subr.bf16.mxu0 %v19782_v39  ;;  %11551 = vmatprep.subr.bf16.mxu1 %v19785_v40  ;;  %v19873_v39 = vld [vmem:[%s23323_s9 + $0x684] ss:$16 sps:$4 sm:$0xff]   ;;  %v19876_v40 = vld [vmem:[%s23323_s9 + $0x68c] ss:$16 sps:$4 sm:$0xff]  }
 0x167   : > { %10527 = vmatpush1.bf16.msra.mxu0 %v19780_v41  ;;  %11552 = vmatpush1.bf16.msra.mxu1 %v19783_v43  ;;  %v19871_v41 = vld [vmem:[%s23323_s9 + $0x680] ss:$16 sps:$4 sm:$0xff]   ;;  %v19874_v43 = vld [vmem:[%s23323_s9 + $0x688] ss:$16 sps:$4 sm:$0xff]  }
 0x168   : > { %10528 = vmatprep.subr.bf16.mxu0 %v19788_v44  ;;  %11553 = vmatprep.subr.bf16.mxu1 %v19791_v45  ;;  %v19879_v44 = vld [vmem:[%s23323_s9 + $0x6a4] ss:$16 sps:$4 sm:$0xff]   ;;  %v19882_v45 = vld [vmem:[%s23323_s9 + $0x6ac] ss:$16 sps:$4 sm:$0xff]  }
 0x16b   : > { %10529 = vmatpush1.bf16.msra.mxu0 %v19786_v46  ;;  %11554 = vmatpush1.bf16.msra.mxu1 %v19789_v47  ;;  %v19877_v46 = vld [vmem:[%s23323_s9 + $0x6a0] ss:$16 sps:$4 sm:$0xff]   ;;  %v19880_v47 = vld [vmem:[%s23323_s9 + $0x6a8] ss:$16 sps:$4 sm:$0xff]  }
 0x16c   : > { %10530 = vmatprep.subr.bf16.mxu0 %v19794_v48  ;;  %11555 = vmatprep.subr.bf16.mxu1 %v19797_v50  ;;  %v19885_v48 = vld [vmem:[%s23323_s9 + $0x6c4] ss:$16 sps:$4 sm:$0xff]   ;;  %v19888_v50 = vld [vmem:[%s23323_s9 + $0x6cc] ss:$16 sps:$4 sm:$0xff]  }
 0x16f   : > { %10531 = vmatpush1.bf16.msra.mxu0 %v19792_v51  ;;  %11556 = vmatpush1.bf16.msra.mxu1 %v19795_v53  ;;  %v19883_v51 = vld [vmem:[%s23323_s9 + $0x6c0] ss:$16 sps:$4 sm:$0xff]   ;;  %v19886_v53 = vld [vmem:[%s23323_s9 + $0x6c8] ss:$16 sps:$4 sm:$0xff]  }
 0x170   : > { %10532 = vmatprep.subr.bf16.mxu0 %v19800_v54  ;;  %11557 = vmatprep.subr.bf16.mxu1 %v19803_v55  ;;  %v19891_v54 = vld [vmem:[%s23323_s9 + $0x6e4] ss:$16 sps:$4 sm:$0xff]   ;;  %v19894_v55 = vld [vmem:[%s23323_s9 + $0x6ec] ss:$16 sps:$4 sm:$0xff]  }
 0x173   : > { %10533 = vmatpush1.bf16.msra.mxu0 %v19798_v56  ;;  %11558 = vmatpush1.bf16.msra.mxu1 %v19801_v57  ;;  %v19889_v56 = vld [vmem:[%s23323_s9 + $0x6e0] ss:$16 sps:$4 sm:$0xff]   ;;  %v19892_v57 = vld [vmem:[%s23323_s9 + $0x6e8] ss:$16 sps:$4 sm:$0xff]  }
 0x174   : > { %10534 = vmatprep.subr.bf16.mxu0 %v19806_v58  ;;  %11559 = vmatprep.subr.bf16.mxu1 %v19809_v59  ;;  %v19897_v58 = vld [vmem:[%s23323_s9 + $0x704] ss:$16 sps:$4 sm:$0xff]   ;;  %v19900_v59 = vld [vmem:[%s23323_s9 + $0x70c] ss:$16 sps:$4 sm:$0xff]  }
 0x177   : > { %10535 = vmatpush1.bf16.msra.mxu0 %v19804_v60  ;;  %11560 = vmatpush1.bf16.msra.mxu1 %v19807_v61  ;;  %v19895_v60 = vld [vmem:[%s23323_s9 + $0x700] ss:$16 sps:$4 sm:$0xff]   ;;  %v19898_v61 = vld [vmem:[%s23323_s9 + $0x708] ss:$16 sps:$4 sm:$0xff]  }
 0x178   : > { %10536 = vmatprep.subr.bf16.mxu0 %v19812_v62  ;;  %11561 = vmatprep.subr.bf16.mxu1 %v19815_v63  ;;  %v19903_v62 = vld [vmem:[%s23323_s9 + $0x724] ss:$16 sps:$4 sm:$0xff]   ;;  %v19906_v63 = vld [vmem:[%s23323_s9 + $0x72c] ss:$16 sps:$4 sm:$0xff]  }
 0x17b   : > { %10537 = vmatpush1.bf16.msra.mxu0 %v19810_v0  ;;  %11562 = vmatpush1.bf16.msra.mxu1 %v19813_v1  ;;  %v19901_v0 = vld [vmem:[%s23323_s9 + $0x720] ss:$16 sps:$4 sm:$0xff]   ;;  %v19904_v1 = vld [vmem:[%s23323_s9 + $0x728] ss:$16 sps:$4 sm:$0xff]  }
 0x17c   : > { %10538 = vmatprep.subr.bf16.mxu0 %v19818_v2  ;;  %11563 = vmatprep.subr.bf16.mxu1 %v19821_v3  ;;  %v19909_v2 = vld [vmem:[%s23323_s9 + $0x744] ss:$16 sps:$4 sm:$0xff]   ;;  %v19912_v3 = vld [vmem:[%s23323_s9 + $0x74c] ss:$16 sps:$4 sm:$0xff]  }
 0x17f   : > { %10539 = vmatpush1.bf16.msra.mxu0 %v19816_v4  ;;  %11564 = vmatpush1.bf16.msra.mxu1 %v19819_v5  ;;  %v19907_v4 = vld [vmem:[%s23323_s9 + $0x740] ss:$16 sps:$4 sm:$0xff]   ;;  %v19910_v5 = vld [vmem:[%s23323_s9 + $0x748] ss:$16 sps:$4 sm:$0xff]  }
 0x180   : > { %10540 = vmatprep.subr.bf16.mxu0 %v19824_v6  ;;  %11565 = vmatprep.subr.bf16.mxu1 %v19827_v7  ;;  %v19915_v6 = vld [vmem:[%s23323_s9 + $0x764] ss:$16 sps:$4 sm:$0xff]   ;;  %v19918_v7 = vld [vmem:[%s23323_s9 + $0x76c] ss:$16 sps:$4 sm:$0xff]  }
 0x183   : > { %10541 = vmatpush1.bf16.msra.mxu0 %v19822_v8  ;;  %11566 = vmatpush1.bf16.msra.mxu1 %v19825_v9  ;;  %v19913_v8 = vld [vmem:[%s23323_s9 + $0x760] ss:$16 sps:$4 sm:$0xff]   ;;  %v19916_v9 = vld [vmem:[%s23323_s9 + $0x768] ss:$16 sps:$4 sm:$0xff]  }
 0x184   : > { %10542 = vmatprep.subr.bf16.mxu0 %v19830_v10  ;;  %11567 = vmatprep.subr.bf16.mxu1 %v19833_v11  ;;  %v19921_v10 = vld [vmem:[%s23323_s9 + $0x784] ss:$16 sps:$4 sm:$0xff]   ;;  %v19924_v11 = vld [vmem:[%s23323_s9 + $0x78c] ss:$16 sps:$4 sm:$0xff]  }
 0x187   : > { %10543 = vmatpush1.bf16.msra.mxu0 %v19828_v12  ;;  %11568 = vmatpush1.bf16.msra.mxu1 %v19831_v14  ;;  %v19919_v12 = vld [vmem:[%s23323_s9 + $0x780] ss:$16 sps:$4 sm:$0xff]   ;;  %v19922_v14 = vld [vmem:[%s23323_s9 + $0x788] ss:$16 sps:$4 sm:$0xff]  }
 0x188   : > { %10544 = vmatprep.subr.bf16.mxu0 %v19836_v16  ;;  %11569 = vmatprep.subr.bf16.mxu1 %v19839_v52  ;;  %v19927_v16 = vld [vmem:[%s23323_s9 + $0x7a4] ss:$16 sps:$4 sm:$0xff]   ;;  %v19930_v52 = vld [vmem:[%s23323_s9 + $0x7ac] ss:$16 sps:$4 sm:$0xff]  }
 0x18b   : > { %10545 = vmatpush1.bf16.msra.mxu0 %v19834_v17  ;;  %11570 = vmatpush1.bf16.msra.mxu1 %v19837_v18  ;;  %v19925_v17 = vld [vmem:[%s23323_s9 + $0x7a0] ss:$16 sps:$4 sm:$0xff]   ;;  %v19928_v18 = vld [vmem:[%s23323_s9 + $0x7a8] ss:$16 sps:$4 sm:$0xff]  }
 0x18c   : > { %10546 = vmatprep.subr.bf16.mxu0 %v19842_v19  ;;  %11571 = vmatprep.subr.bf16.mxu1 %v19845_v20  ;;  %v19933_v19 = vld [vmem:[%s23323_s9 + $0x7c4] ss:$16 sps:$4 sm:$0xff]   ;;  %v19936_v20 = vld [vmem:[%s23323_s9 + $0x7cc] ss:$16 sps:$4 sm:$0xff]  }
 0x18f   : > { %10547 = vmatpush1.bf16.msra.mxu0 %v19840_v21  ;;  %11572 = vmatpush1.bf16.msra.mxu1 %v19843_v22  ;;  %v23641_v21 = vld.sshfl [vmem:[%s25483_s0 + $0x8] sm:$0xff pattern:$0x75316420]  ;;  %v19931_v22 = vld [vmem:[%s23323_s9 + $0x7c0] ss:$16 sps:$4 sm:$0xff]  }
 0x190   : > { %10557 = vmatprep.subr.bf16.mxu0 %v19849_v23  ;;  %11582 = vmatprep.subr.bf16.mxu1 %v19852_v24  ;;  %v19934_v23 = vld [vmem:[%s23323_s9 + $0x7c8] ss:$16 sps:$4 sm:$0xff]   ;;  %v19939_v24 = vld [vmem:[%s23323_s9 + $0x7e4] ss:$16 sps:$4 sm:$0xff]  }
 0x192   : > { %10549 = vmatmul.mubr.bf16.vlgmr.msra.gmra.mrb[0].mxu0 %v23577_v13  ;;  %11574 = vmatmul.mubr.bf16.vlgmr.msra.gmra.mrb[0].mxu1 %v23577_v13 }
 0x193   : > { %10558 = vmatpush1.bf16.msra.mxu0 %v19847_v26  ;;  %11583 = vmatpush1.bf16.msra.mxu1 %v19850_v27  ;;  %v19942_v26 = vld [vmem:[%s23323_s9 + $0x7ec] ss:$16 sps:$4 sm:$0xff]   ;;  %v19937_v27 = vld [vmem:[%s23323_s9 + $0x7e0] ss:$16 sps:$4 sm:$0xff]  }
 0x194   : > { %10559 = vmatprep.subr.bf16.mxu0 %v19855_v28  ;;  %11584 = vmatprep.subr.bf16.mxu1 %v19858_v29  ;;  %v19940_v28 = vld [vmem:[%s23323_s9 + $0x7e8] ss:$16 sps:$4 sm:$0xff]   ;;  %v19945_v29 = vld [vmem:[%s23323_s9 + $0x804] ss:$16 sps:$4 sm:$0xff]  }
 0x195   : > { %10589 = vmatprep.mubr.bf16.mxu0 %v2116_v30  ;;  %11614 = vmatprep.mubr.bf16.mxu1 %v2116_v30  ;;  %v19948_v30 = vld [vmem:[%s23323_s9 + $0x80c] ss:$16 sps:$4 sm:$0xff]  }
 0x197   : > { %10560 = vmatpush1.bf16.msra.mxu0 %v19853_v15  ;;  %11585 = vmatpush1.bf16.msra.mxu1 %v19856_v31  ;;  %v2132_v15 = vcombine.high %v23641_v21, %v23641_v21  ;;  %v2114_v31 = vcombine.high %v23577_v13, %v23577_v13  ;;  %v19949_v13 = vld [vmem:[%s23323_s9 + $0x820] ss:$16 sps:$4 sm:$0xff]  }
 0x198   : > { %10561 = vmatprep.subr.bf16.mxu0 %v19861_v32  ;;  %11586 = vmatprep.subr.bf16.mxu1 %v19864_v33  ;;  %v19943_v32 = vld [vmem:[%s23323_s9 + $0x800] ss:$16 sps:$4 sm:$0xff]   ;;  %v19946_v33 = vld [vmem:[%s23323_s9 + $0x808] ss:$16 sps:$4 sm:$0xff]  }
 0x19b   : > { %10562 = vmatpush1.bf16.msra.mxu0 %v19859_v25  ;;  %11587 = vmatpush1.bf16.msra.mxu1 %v19862_v34  ;;  %v19951_v25 = vld [vmem:[%s23323_s9 + $0x824] ss:$16 sps:$4 sm:$0xff]   ;;  %v19954_v34 = vld [vmem:[%s23323_s9 + $0x82c] ss:$16 sps:$4 sm:$0xff]  }
 0x19c   : > { %10563 = vmatprep.subr.bf16.mxu0 %v19867_v35  ;;  %11588 = vmatprep.subr.bf16.mxu1 %v19870_v36  ;;  %v23660_v35 = vrot.slane %v2132_v15, %v23395_v49  ;;  %v19952_v36 = vld [vmem:[%s23323_s9 + $0x828] ss:$16 sps:$4 sm:$0xff]   ;;  %v20035_v15 = vld [vmem:[%s23323_s9 + $0x9e4] ss:$16 sps:$4 sm:$0xff]  }
 0x19f   : > { %10564 = vmatpush1.bf16.msra.mxu0 %v19865_v37  ;;  %11589 = vmatpush1.bf16.msra.mxu1 %v19868_v38  ;;  %v19957_v37 = vld [vmem:[%s23323_s9 + $0x844] ss:$16 sps:$4 sm:$0xff]   ;;  %v19960_v38 = vld [vmem:[%s23323_s9 + $0x84c] ss:$16 sps:$4 sm:$0xff]  }
 0x1a0   : > { %10565 = vmatprep.subr.bf16.mxu0 %v19873_v39  ;;  %11590 = vmatprep.subr.bf16.mxu1 %v19876_v40  ;;  %v19955_v39 = vld [vmem:[%s23323_s9 + $0x840] ss:$16 sps:$4 sm:$0xff]   ;;  %v19958_v40 = vld [vmem:[%s23323_s9 + $0x848] ss:$16 sps:$4 sm:$0xff]  }
 0x1a3   : > { %10566 = vmatpush1.bf16.msra.mxu0 %v19871_v41  ;;  %11591 = vmatpush1.bf16.msra.mxu1 %v19874_v43  ;;  %v19963_v41 = vld [vmem:[%s23323_s9 + $0x864] ss:$16 sps:$4 sm:$0xff]   ;;  %v19966_v43 = vld [vmem:[%s23323_s9 + $0x86c] ss:$16 sps:$4 sm:$0xff]  }
 0x1a4   : > { %10567 = vmatprep.subr.bf16.mxu0 %v19879_v44  ;;  %11592 = vmatprep.subr.bf16.mxu1 %v19882_v45  ;;  %v19961_v44 = vld [vmem:[%s23323_s9 + $0x860] ss:$16 sps:$4 sm:$0xff]   ;;  %v19964_v45 = vld [vmem:[%s23323_s9 + $0x868] ss:$16 sps:$4 sm:$0xff]  }
 0x1a7   : > { %10568 = vmatpush1.bf16.msra.mxu0 %v19877_v46  ;;  %11593 = vmatpush1.bf16.msra.mxu1 %v19880_v47  ;;  %v19969_v46 = vld [vmem:[%s23323_s9 + $0x884] ss:$16 sps:$4 sm:$0xff]   ;;  %v19972_v47 = vld [vmem:[%s23323_s9 + $0x88c] ss:$16 sps:$4 sm:$0xff]  }
 0x1a8   : > { %10569 = vmatprep.subr.bf16.mxu0 %v19885_v48  ;;  %11594 = vmatprep.subr.bf16.mxu1 %v19888_v50  ;;  %v19967_v48 = vld [vmem:[%s23323_s9 + $0x880] ss:$16 sps:$4 sm:$0xff]   ;;  %v19970_v50 = vld [vmem:[%s23323_s9 + $0x888] ss:$16 sps:$4 sm:$0xff]  }
 0x1ab   : > { %10570 = vmatpush1.bf16.msra.mxu0 %v19883_v51  ;;  %11595 = vmatpush1.bf16.msra.mxu1 %v19886_v53  ;;  %v19975_v51 = vld [vmem:[%s23323_s9 + $0x8a4] ss:$16 sps:$4 sm:$0xff]   ;;  %v19978_v53 = vld [vmem:[%s23323_s9 + $0x8ac] ss:$16 sps:$4 sm:$0xff]  }
 0x1ac   : > { %10571 = vmatprep.subr.bf16.mxu0 %v19891_v54  ;;  %11596 = vmatprep.subr.bf16.mxu1 %v19894_v55  ;;  %v19973_v54 = vld [vmem:[%s23323_s9 + $0x8a0] ss:$16 sps:$4 sm:$0xff]   ;;  %v19976_v55 = vld [vmem:[%s23323_s9 + $0x8a8] ss:$16 sps:$4 sm:$0xff]  }
 0x1af   : > { %10572 = vmatpush1.bf16.msra.mxu0 %v19889_v56  ;;  %11597 = vmatpush1.bf16.msra.mxu1 %v19892_v57  ;;  %v19981_v56 = vld [vmem:[%s23323_s9 + $0x8c4] ss:$16 sps:$4 sm:$0xff]   ;;  %v19984_v57 = vld [vmem:[%s23323_s9 + $0x8cc] ss:$16 sps:$4 sm:$0xff]  }
 0x1b0   : > { %10573 = vmatprep.subr.bf16.mxu0 %v19897_v58  ;;  %11598 = vmatprep.subr.bf16.mxu1 %v19900_v59  ;;  %v19979_v58 = vld [vmem:[%s23323_s9 + $0x8c0] ss:$16 sps:$4 sm:$0xff]   ;;  %v19982_v59 = vld [vmem:[%s23323_s9 + $0x8c8] ss:$16 sps:$4 sm:$0xff]  }
 0x1b3   : > { %10574 = vmatpush1.bf16.msra.mxu0 %v19895_v60  ;;  %11599 = vmatpush1.bf16.msra.mxu1 %v19898_v61  ;;  %v19987_v60 = vld [vmem:[%s23323_s9 + $0x8e4] ss:$16 sps:$4 sm:$0xff]   ;;  %v19990_v61 = vld [vmem:[%s23323_s9 + $0x8ec] ss:$16 sps:$4 sm:$0xff]  }
 0x1b4   : > { %10575 = vmatprep.subr.bf16.mxu0 %v19903_v62  ;;  %11600 = vmatprep.subr.bf16.mxu1 %v19906_v63  ;;  %v19985_v62 = vld [vmem:[%s23323_s9 + $0x8e0] ss:$16 sps:$4 sm:$0xff]   ;;  %v19988_v63 = vld [vmem:[%s23323_s9 + $0x8e8] ss:$16 sps:$4 sm:$0xff]  }
 0x1b7   : > { %10576 = vmatpush1.bf16.msra.mxu0 %v19901_v0  ;;  %11601 = vmatpush1.bf16.msra.mxu1 %v19904_v1  ;;  %v19993_v0 = vld [vmem:[%s23323_s9 + $0x904] ss:$16 sps:$4 sm:$0xff]   ;;  %v19996_v1 = vld [vmem:[%s23323_s9 + $0x90c] ss:$16 sps:$4 sm:$0xff]  }
 0x1b8   : > { %10577 = vmatprep.subr.bf16.mxu0 %v19909_v2  ;;  %11602 = vmatprep.subr.bf16.mxu1 %v19912_v3  ;;  %v19991_v2 = vld [vmem:[%s23323_s9 + $0x900] ss:$16 sps:$4 sm:$0xff]   ;;  %v19994_v3 = vld [vmem:[%s23323_s9 + $0x908] ss:$16 sps:$4 sm:$0xff]  }
 0x1bb   : > { %10578 = vmatpush1.bf16.msra.mxu0 %v19907_v4  ;;  %11603 = vmatpush1.bf16.msra.mxu1 %v19910_v5  ;;  %v19999_v4 = vld [vmem:[%s23323_s9 + $0x924] ss:$16 sps:$4 sm:$0xff]   ;;  %v20002_v5 = vld [vmem:[%s23323_s9 + $0x92c] ss:$16 sps:$4 sm:$0xff]  }
 0x1bc   : > { %10579 = vmatprep.subr.bf16.mxu0 %v19915_v6  ;;  %11604 = vmatprep.subr.bf16.mxu1 %v19918_v7  ;;  %v19997_v6 = vld [vmem:[%s23323_s9 + $0x920] ss:$16 sps:$4 sm:$0xff]   ;;  %v20000_v7 = vld [vmem:[%s23323_s9 + $0x928] ss:$16 sps:$4 sm:$0xff]  }
 0x1bf   : > { %10580 = vmatpush1.bf16.msra.mxu0 %v19913_v8  ;;  %11605 = vmatpush1.bf16.msra.mxu1 %v19916_v9  ;;  %v20005_v8 = vld [vmem:[%s23323_s9 + $0x944] ss:$16 sps:$4 sm:$0xff]   ;;  %v20008_v9 = vld [vmem:[%s23323_s9 + $0x94c] ss:$16 sps:$4 sm:$0xff]  }
 0x1c0   : > { %10581 = vmatprep.subr.bf16.mxu0 %v19921_v10  ;;  %11606 = vmatprep.subr.bf16.mxu1 %v19924_v11  ;;  %v20003_v10 = vld [vmem:[%s23323_s9 + $0x940] ss:$16 sps:$4 sm:$0xff]   ;;  %v20006_v11 = vld [vmem:[%s23323_s9 + $0x948] ss:$16 sps:$4 sm:$0xff]  }
 0x1c3   : > { %10582 = vmatpush1.bf16.msra.mxu0 %v19919_v12  ;;  %11607 = vmatpush1.bf16.msra.mxu1 %v19922_v14  ;;  %v20011_v12 = vld [vmem:[%s23323_s9 + $0x964] ss:$16 sps:$4 sm:$0xff]   ;;  %v20014_v14 = vld [vmem:[%s23323_s9 + $0x96c] ss:$16 sps:$4 sm:$0xff]  }
 0x1c4   : > { %10583 = vmatprep.subr.bf16.mxu0 %v19927_v16  ;;  %11608 = vmatprep.subr.bf16.mxu1 %v19930_v52  ;;  %v20009_v16 = vld [vmem:[%s23323_s9 + $0x960] ss:$16 sps:$4 sm:$0xff]   ;;  %v20012_v52 = vld [vmem:[%s23323_s9 + $0x968] ss:$16 sps:$4 sm:$0xff]  }
 0x1c7   : > { %10584 = vmatpush1.bf16.msra.mxu0 %v19925_v17  ;;  %11609 = vmatpush1.bf16.msra.mxu1 %v19928_v18  ;;  %v20017_v17 = vld [vmem:[%s23323_s9 + $0x984] ss:$16 sps:$4 sm:$0xff]   ;;  %v20020_v18 = vld [vmem:[%s23323_s9 + $0x98c] ss:$16 sps:$4 sm:$0xff]  }
 0x1c8   : > { %10585 = vmatprep.subr.bf16.mxu0 %v19933_v19  ;;  %11610 = vmatprep.subr.bf16.mxu1 %v19936_v20  ;;  %v20015_v19 = vld [vmem:[%s23323_s9 + $0x980] ss:$16 sps:$4 sm:$0xff]   ;;  %v20018_v20 = vld [vmem:[%s23323_s9 + $0x988] ss:$16 sps:$4 sm:$0xff]  }
 0x1cb   : > { %10586 = vmatpush1.bf16.msra.mxu0 %v19931_v22  ;;  %11611 = vmatpush1.bf16.msra.mxu1 %v19934_v23  ;;  %v20023_v22 = vld [vmem:[%s23323_s9 + $0x9a4] ss:$16 sps:$4 sm:$0xff]   ;;  %v20026_v23 = vld [vmem:[%s23323_s9 + $0x9ac] ss:$16 sps:$4 sm:$0xff]  }
 0x1cc   : > { %10587 = vmatprep.subr.bf16.mxu0 %v19939_v24  ;;  %11612 = vmatprep.subr.bf16.mxu1 %v19942_v26  ;;  %v20021_v24 = vld [vmem:[%s23323_s9 + $0x9a0] ss:$16 sps:$4 sm:$0xff]   ;;  %v20024_v26 = vld [vmem:[%s23323_s9 + $0x9a8] ss:$16 sps:$4 sm:$0xff]  }
 0x1cf   : > { %10588 = vmatpush1.bf16.msra.mxu0 %v19937_v27  ;;  %11613 = vmatpush1.bf16.msra.mxu1 %v19940_v28  ;;  %v20029_v27 = vld [vmem:[%s23323_s9 + $0x9c4] ss:$16 sps:$4 sm:$0xff]   ;;  %v20032_v28 = vld [vmem:[%s23323_s9 + $0x9cc] ss:$16 sps:$4 sm:$0xff]  }
 0x1d0   : > { %10598 = vmatprep.subr.bf16.mxu0 %v19945_v29  ;;  %11623 = vmatprep.subr.bf16.mxu1 %v19948_v30  ;;  %v20027_v29 = vld [vmem:[%s23323_s9 + $0x9c0] ss:$16 sps:$4 sm:$0xff]   ;;  %v20030_v30 = vld [vmem:[%s23323_s9 + $0x9c8] ss:$16 sps:$4 sm:$0xff]  }
 0x1d2   : > { %10590 = vmatmul.mubr.bf16.vlgmr.msra.gmra.mrb[0].mxu0 %v2114_v31  ;;  %11615 = vmatmul.mubr.bf16.vlgmr.msra.gmra.mrb[0].mxu1 %v2114_v31  ;;  %v20038_v31 = vld [vmem:[%s23323_s9 + $0x9ec] ss:$16 sps:$4 sm:$0xff]  }
 0x1d3   : > { %10599 = vmatpush1.bf16.msra.mxu0 %v19943_v32  ;;  %11624 = vmatpush1.bf16.msra.mxu1 %v19946_v33  ;;  %v20033_v32 = vld [vmem:[%s23323_s9 + $0x9e0] ss:$16 sps:$4 sm:$0xff]   ;;  %v20036_v33 = vld [vmem:[%s23323_s9 + $0x9e8] ss:$16 sps:$4 sm:$0xff]  }
 0x1d4   : > { %10600 = vmatprep.subr.bf16.mxu0 %v19951_v25  ;;  %11625 = vmatprep.subr.bf16.mxu1 %v19954_v34  ;;  %v20041_v25 = vld [vmem:[%s23323_s9 + $0xa04] ss:$16 sps:$4 sm:$0xff]   ;;  %v20044_v34 = vld [vmem:[%s23323_s9 + $0xa0c] ss:$16 sps:$4 sm:$0xff]  }
 0x1d5   : > { %10630 = vmatprep.mubr.bf16.mxu0 %v23660_v35  ;;  %11655 = vmatprep.mubr.bf16.mxu1 %v23660_v35 }
 0x1d7   : > { %10601 = vmatpush1.bf16.msra.mxu0 %v19949_v13  ;;  %11626 = vmatpush1.bf16.msra.mxu1 %v19952_v36  ;;  %v23726_v13 = vrot.slane %v23641_v21, %v23395_v49  ;;  %v20039_v36 = vld [vmem:[%s23323_s9 + $0xa00] ss:$16 sps:$4 sm:$0xff]  }
 0x1d8   : > { %10602 = vmatprep.subr.bf16.mxu0 %v19957_v37  ;;  %11627 = vmatprep.subr.bf16.mxu1 %v19960_v38  ;;  %v20042_v37 = vld [vmem:[%s23323_s9 + $0xa08] ss:$16 sps:$4 sm:$0xff]   ;;  %v20047_v38 = vld [vmem:[%s23323_s9 + $0xa24] ss:$16 sps:$4 sm:$0xff]   ;;  %v20045_v21 = vld [vmem:[%s23323_s9 + $0xa20] ss:$16 sps:$4 sm:$0xff]  }
 0x1db   : > { %10603 = vmatpush1.bf16.msra.mxu0 %v19955_v39  ;;  %11628 = vmatpush1.bf16.msra.mxu1 %v19958_v40  ;;  %v20050_v39 = vld [vmem:[%s23323_s9 + $0xa2c] ss:$16 sps:$4 sm:$0xff]   ;;  %v2164_v40 = vcombine.high %v23660_v35, %v23660_v35  ;;  %v20051_v35 = vld [vmem:[%s23323_s9 + $0xa40] ss:$16 sps:$4 sm:$0xff]  }
 0x1dc   : > { %10604 = vmatprep.subr.bf16.mxu0 %v19963_v41  ;;  %11629 = vmatprep.subr.bf16.mxu1 %v19966_v43  ;;  %v20048_v41 = vld [vmem:[%s23323_s9 + $0xa28] ss:$16 sps:$4 sm:$0xff]   ;;  %v20053_v43 = vld [vmem:[%s23323_s9 + $0xa44] ss:$16 sps:$4 sm:$0xff]  }
 0x1df   : > { %10605 = vmatpush1.bf16.msra.mxu0 %v19961_v44  ;;  %11630 = vmatpush1.bf16.msra.mxu1 %v19964_v45  ;;  %v20056_v44 = vld [vmem:[%s23323_s9 + $0xa4c] ss:$16 sps:$4 sm:$0xff]   ;;  %v20054_v45 = vld [vmem:[%s23323_s9 + $0xa48] ss:$16 sps:$4 sm:$0xff]  }
 0x1e0   : > { %10606 = vmatprep.subr.bf16.mxu0 %v19969_v46  ;;  %11631 = vmatprep.subr.bf16.mxu1 %v19972_v47  ;;  %v20059_v46 = vld [vmem:[%s23323_s9 + $0xa64] ss:$16 sps:$4 sm:$0xff]   ;;  %v20062_v47 = vld [vmem:[%s23323_s9 + $0xa6c] ss:$16 sps:$4 sm:$0xff]  }
 0x1e3   : > { %10607 = vmatpush1.bf16.msra.mxu0 %v19967_v48  ;;  %11632 = vmatpush1.bf16.msra.mxu1 %v19970_v50  ;;  %v20057_v48 = vld [vmem:[%s23323_s9 + $0xa60] ss:$16 sps:$4 sm:$0xff]   ;;  %v20060_v50 = vld [vmem:[%s23323_s9 + $0xa68] ss:$16 sps:$4 sm:$0xff]  }
 0x1e4   : > { %10608 = vmatprep.subr.bf16.mxu0 %v19975_v51  ;;  %11633 = vmatprep.subr.bf16.mxu1 %v19978_v53  ;;  %v20065_v51 = vld [vmem:[%s23323_s9 + $0xa84] ss:$16 sps:$4 sm:$0xff]   ;;  %v20068_v53 = vld [vmem:[%s23323_s9 + $0xa8c] ss:$16 sps:$4 sm:$0xff]  }
 0x1e7   : > { %10609 = vmatpush1.bf16.msra.mxu0 %v19973_v54  ;;  %11634 = vmatpush1.bf16.msra.mxu1 %v19976_v55  ;;  %v20063_v54 = vld [vmem:[%s23323_s9 + $0xa80] ss:$16 sps:$4 sm:$0xff]   ;;  %v20066_v55 = vld [vmem:[%s23323_s9 + $0xa88] ss:$16 sps:$4 sm:$0xff]  }
 0x1e8   : > { %10610 = vmatprep.subr.bf16.mxu0 %v19981_v56  ;;  %11635 = vmatprep.subr.bf16.mxu1 %v19984_v57  ;;  %v20071_v56 = vld [vmem:[%s23323_s9 + $0xaa4] ss:$16 sps:$4 sm:$0xff]   ;;  %v20074_v57 = vld [vmem:[%s23323_s9 + $0xaac] ss:$16 sps:$4 sm:$0xff]  }
 0x1eb   : > { %10611 = vmatpush1.bf16.msra.mxu0 %v19979_v58  ;;  %11636 = vmatpush1.bf16.msra.mxu1 %v19982_v59  ;;  %v20069_v58 = vld [vmem:[%s23323_s9 + $0xaa0] ss:$16 sps:$4 sm:$0xff]   ;;  %v20072_v59 = vld [vmem:[%s23323_s9 + $0xaa8] ss:$16 sps:$4 sm:$0xff]  }
 0x1ec   : > { %10612 = vmatprep.subr.bf16.mxu0 %v19987_v60  ;;  %11637 = vmatprep.subr.bf16.mxu1 %v19990_v61  ;;  %v20077_v60 = vld [vmem:[%s23323_s9 + $0xac4] ss:$16 sps:$4 sm:$0xff]   ;;  %v20080_v61 = vld [vmem:[%s23323_s9 + $0xacc] ss:$16 sps:$4 sm:$0xff]  }
 0x1ef   : > { %10613 = vmatpush1.bf16.msra.mxu0 %v19985_v62  ;;  %11638 = vmatpush1.bf16.msra.mxu1 %v19988_v63  ;;  %v20075_v62 = vld [vmem:[%s23323_s9 + $0xac0] ss:$16 sps:$4 sm:$0xff]   ;;  %v20078_v63 = vld [vmem:[%s23323_s9 + $0xac8] ss:$16 sps:$4 sm:$0xff]  }
 0x1f0   : > { %10614 = vmatprep.subr.bf16.mxu0 %v19993_v0  ;;  %11639 = vmatprep.subr.bf16.mxu1 %v19996_v1  ;;  %v20083_v0 = vld [vmem:[%s23323_s9 + $0xae4] ss:$16 sps:$4 sm:$0xff]   ;;  %v20086_v1 = vld [vmem:[%s23323_s9 + $0xaec] ss:$16 sps:$4 sm:$0xff]  }
 0x1f3   : > { %10615 = vmatpush1.bf16.msra.mxu0 %v19991_v2  ;;  %11640 = vmatpush1.bf16.msra.mxu1 %v19994_v3  ;;  %v20081_v2 = vld [vmem:[%s23323_s9 + $0xae0] ss:$16 sps:$4 sm:$0xff]   ;;  %v20084_v3 = vld [vmem:[%s23323_s9 + $0xae8] ss:$16 sps:$4 sm:$0xff]  }
 0x1f4   : > { %10616 = vmatprep.subr.bf16.mxu0 %v19999_v4  ;;  %11641 = vmatprep.subr.bf16.mxu1 %v20002_v5  ;;  %v20089_v4 = vld [vmem:[%s23323_s9 + $0xb04] ss:$16 sps:$4 sm:$0xff]   ;;  %v20092_v5 = vld [vmem:[%s23323_s9 + $0xb0c] ss:$16 sps:$4 sm:$0xff]  }
 0x1f7   : > { %10617 = vmatpush1.bf16.msra.mxu0 %v19997_v6  ;;  %11642 = vmatpush1.bf16.msra.mxu1 %v20000_v7  ;;  %v20087_v6 = vld [vmem:[%s23323_s9 + $0xb00] ss:$16 sps:$4 sm:$0xff]   ;;  %v20090_v7 = vld [vmem:[%s23323_s9 + $0xb08] ss:$16 sps:$4 sm:$0xff]  }
 0x1f8   : > { %10618 = vmatprep.subr.bf16.mxu0 %v20005_v8  ;;  %11643 = vmatprep.subr.bf16.mxu1 %v20008_v9  ;;  %v20095_v8 = vld [vmem:[%s23323_s9 + $0xb24] ss:$16 sps:$4 sm:$0xff]   ;;  %v20098_v9 = vld [vmem:[%s23323_s9 + $0xb2c] ss:$16 sps:$4 sm:$0xff]  }
 0x1fb   : > { %10619 = vmatpush1.bf16.msra.mxu0 %v20003_v10  ;;  %11644 = vmatpush1.bf16.msra.mxu1 %v20006_v11  ;;  %v20093_v10 = vld [vmem:[%s23323_s9 + $0xb20] ss:$16 sps:$4 sm:$0xff]   ;;  %v20096_v11 = vld [vmem:[%s23323_s9 + $0xb28] ss:$16 sps:$4 sm:$0xff]  }
 0x1fc   : > { %10620 = vmatprep.subr.bf16.mxu0 %v20011_v12  ;;  %11645 = vmatprep.subr.bf16.mxu1 %v20014_v14  ;;  %v20101_v12 = vld [vmem:[%s23323_s9 + $0xb44] ss:$16 sps:$4 sm:$0xff]   ;;  %v20104_v14 = vld [vmem:[%s23323_s9 + $0xb4c] ss:$16 sps:$4 sm:$0xff]  }
 0x1ff   : > { %10621 = vmatpush1.bf16.msra.mxu0 %v20009_v16  ;;  %11646 = vmatpush1.bf16.msra.mxu1 %v20012_v52  ;;  %v20099_v16 = vld [vmem:[%s23323_s9 + $0xb40] ss:$16 sps:$4 sm:$0xff]   ;;  %v20102_v52 = vld [vmem:[%s23323_s9 + $0xb48] ss:$16 sps:$4 sm:$0xff]  }
 0x200   : > { %10622 = vmatprep.subr.bf16.mxu0 %v20017_v17  ;;  %11647 = vmatprep.subr.bf16.mxu1 %v20020_v18  ;;  %v20107_v17 = vld [vmem:[%s23323_s9 + $0xb64] ss:$16 sps:$4 sm:$0xff]   ;;  %v20110_v18 = vld [vmem:[%s23323_s9 + $0xb6c] ss:$16 sps:$4 sm:$0xff]  }
 0x203   : > { %10623 = vmatpush1.bf16.msra.mxu0 %v20015_v19  ;;  %11648 = vmatpush1.bf16.msra.mxu1 %v20018_v20  ;;  %v20105_v19 = vld [vmem:[%s23323_s9 + $0xb60] ss:$16 sps:$4 sm:$0xff]   ;;  %v20108_v20 = vld [vmem:[%s23323_s9 + $0xb68] ss:$16 sps:$4 sm:$0xff]  }
 0x204   : > { %10624 = vmatprep.subr.bf16.mxu0 %v20023_v22  ;;  %11649 = vmatprep.subr.bf16.mxu1 %v20026_v23  ;;  %v20113_v22 = vld [vmem:[%s23323_s9 + $0xb84] ss:$16 sps:$4 sm:$0xff]   ;;  %v20116_v23 = vld [vmem:[%s23323_s9 + $0xb8c] ss:$16 sps:$4 sm:$0xff]  }
 0x207   : > { %10625 = vmatpush1.bf16.msra.mxu0 %v20021_v24  ;;  %11650 = vmatpush1.bf16.msra.mxu1 %v20024_v26  ;;  %v20111_v24 = vld [vmem:[%s23323_s9 + $0xb80] ss:$16 sps:$4 sm:$0xff]   ;;  %v20114_v26 = vld [vmem:[%s23323_s9 + $0xb88] ss:$16 sps:$4 sm:$0xff]  }
 0x208   : > { %10626 = vmatprep.subr.bf16.mxu0 %v20029_v27  ;;  %11651 = vmatprep.subr.bf16.mxu1 %v20032_v28  ;;  %v20119_v27 = vld [vmem:[%s23323_s9 + $0xba4] ss:$16 sps:$4 sm:$0xff]   ;;  %v20122_v28 = vld [vmem:[%s23323_s9 + $0xbac] ss:$16 sps:$4 sm:$0xff]  }
 0x20b   : > { %10627 = vmatpush1.bf16.msra.mxu0 %v20027_v29  ;;  %11652 = vmatpush1.bf16.msra.mxu1 %v20030_v30  ;;  %v20117_v29 = vld [vmem:[%s23323_s9 + $0xba0] ss:$16 sps:$4 sm:$0xff]   ;;  %v20120_v30 = vld [vmem:[%s23323_s9 + $0xba8] ss:$16 sps:$4 sm:$0xff]  }
 0x20c   : > { %10628 = vmatprep.subr.bf16.mxu0 %v20035_v15  ;;  %11653 = vmatprep.subr.bf16.mxu1 %v20038_v31  ;;  %v20125_v15 = vld [vmem:[%s23323_s9 + $0xbc4] ss:$16 sps:$4 sm:$0xff]   ;;  %v20128_v31 = vld [vmem:[%s23323_s9 + $0xbcc] ss:$16 sps:$4 sm:$0xff]  }
 0x20f   : > { %10629 = vmatpush1.bf16.msra.mxu0 %v20033_v32  ;;  %11654 = vmatpush1.bf16.msra.mxu1 %v20036_v33  ;;  %v21964_v32 = vld [vmem:[%s25483_s0 + $0x8] sm:$0xff] }
 0x210   : > { %10639 = vmatprep.subr.bf16.mxu0 %v20041_v25  ;;  %11664 = vmatprep.subr.bf16.mxu1 %v20044_v34  ;;  %v2117_v33 = vcombine.high %v21964_v32, %v21964_v32  ;;  %v20123_v25 = vld [vmem:[%s23323_s9 + $0xbc0] ss:$16 sps:$4 sm:$0xff]   ;;  %v20126_v34 = vld [vmem:[%s23323_s9 + $0xbc8] ss:$16 sps:$4 sm:$0xff]  }
 0x211   : > { %v20207_v32 = vld [vmem:[%s23323_s9 + $0xd80] ss:$16 sps:$4 sm:$0xff]  }
 0x212   : > { %10631 = vmatmul.mubr.bf16.vlgmr.msra.gmra.mrb[0].mxu0 %v23726_v13  ;;  %11656 = vmatmul.mubr.bf16.vlgmr.msra.gmra.mrb[0].mxu1 %v23726_v13 }
 0x213   : > { %10640 = vmatpush1.bf16.msra.mxu0 %v20039_v36  ;;  %11665 = vmatpush1.bf16.msra.mxu1 %v20042_v37  ;;  %v20131_v36 = vld [vmem:[%s23323_s9 + $0xbe4] ss:$16 sps:$4 sm:$0xff]   ;;  %v20134_v37 = vld [vmem:[%s23323_s9 + $0xbec] ss:$16 sps:$4 sm:$0xff]  }
 0x214   : > { %10641 = vmatprep.subr.bf16.mxu0 %v20047_v38  ;;  %11666 = vmatprep.subr.bf16.mxu1 %v20050_v39  ;;  %v23796_v38 = vrot.slane %v2117_v33, %v23395_v49  ;;  %v20129_v39 = vld [vmem:[%s23323_s9 + $0xbe0] ss:$16 sps:$4 sm:$0xff]   ;;  %v20210_v33 = vld [vmem:[%s23323_s9 + $0xd88] ss:$16 sps:$4 sm:$0xff]  }
 0x215   : > { %10671 = vmatprep.mubr.bf16.mxu0 %v2164_v40  ;;  %11696 = vmatprep.mubr.bf16.mxu1 %v2164_v40  ;;  %v20132_v40 = vld [vmem:[%s23323_s9 + $0xbe8] ss:$16 sps:$4 sm:$0xff]  }
 0x217   : > { %10642 = vmatpush1.bf16.msra.mxu0 %v20045_v21  ;;  %11667 = vmatpush1.bf16.msra.mxu1 %v20048_v41  ;;  %v20137_v21 = vld [vmem:[%s23323_s9 + $0xc04] ss:$16 sps:$4 sm:$0xff]   ;;  %v20140_v41 = vld [vmem:[%s23323_s9 + $0xc0c] ss:$16 sps:$4 sm:$0xff]  }
 0x218   : > { %10643 = vmatprep.subr.bf16.mxu0 %v20053_v43  ;;  %11668 = vmatprep.subr.bf16.mxu1 %v20056_v44  ;;  %v2133_v43 = vcombine.high %v23796_v38, %v23796_v38  ;;  %v2162_v44 = vcombine.high %v23726_v13, %v23726_v13  ;;  %v20141_v13 = vld [vmem:[%s23323_s9 + $0xc20] ss:$16 sps:$4 sm:$0xff]  }
 0x21b   : > { %10644 = vmatpush1.bf16.msra.mxu0 %v20051_v35  ;;  %11669 = vmatpush1.bf16.msra.mxu1 %v20054_v45  ;;  %v20135_v35 = vld [vmem:[%s23323_s9 + $0xc00] ss:$16 sps:$4 sm:$0xff]   ;;  %v20138_v45 = vld [vmem:[%s23323_s9 + $0xc08] ss:$16 sps:$4 sm:$0xff]  }
 0x21c   : > { %10645 = vmatprep.subr.bf16.mxu0 %v20059_v46  ;;  %11670 = vmatprep.subr.bf16.mxu1 %v20062_v47  ;;  %v20143_v46 = vld [vmem:[%s23323_s9 + $0xc24] ss:$16 sps:$4 sm:$0xff]   ;;  %v20146_v47 = vld [vmem:[%s23323_s9 + $0xc2c] ss:$16 sps:$4 sm:$0xff]  }
 0x21f   : > { %10646 = vmatpush1.bf16.msra.mxu0 %v20057_v48  ;;  %11671 = vmatpush1.bf16.msra.mxu1 %v20060_v50  ;;  %v23811_v48 = vrot.slane %v2133_v43, %v23395_v49  ;;  %v20144_v50 = vld [vmem:[%s23323_s9 + $0xc28] ss:$16 sps:$4 sm:$0xff]   ;;  %v20227_v43 = vld [vmem:[%s23323_s9 + $0xde4] ss:$16 sps:$4 sm:$0xff]  }
 0x220   : > { %10647 = vmatprep.subr.bf16.mxu0 %v20065_v51  ;;  %11672 = vmatprep.subr.bf16.mxu1 %v20068_v53  ;;  %v20149_v51 = vld [vmem:[%s23323_s9 + $0xc44] ss:$16 sps:$4 sm:$0xff]   ;;  %v20152_v53 = vld [vmem:[%s23323_s9 + $0xc4c] ss:$16 sps:$4 sm:$0xff]  }
 0x223   : > { %10648 = vmatpush1.bf16.msra.mxu0 %v20063_v54  ;;  %11673 = vmatpush1.bf16.msra.mxu1 %v20066_v55  ;;  %v20147_v54 = vld [vmem:[%s23323_s9 + $0xc40] ss:$16 sps:$4 sm:$0xff]   ;;  %v20150_v55 = vld [vmem:[%s23323_s9 + $0xc48] ss:$16 sps:$4 sm:$0xff]  }
 0x224   : > { %10649 = vmatprep.subr.bf16.mxu0 %v20071_v56  ;;  %11674 = vmatprep.subr.bf16.mxu1 %v20074_v57  ;;  %v20155_v56 = vld [vmem:[%s23323_s9 + $0xc64] ss:$16 sps:$4 sm:$0xff]   ;;  %v20158_v57 = vld [vmem:[%s23323_s9 + $0xc6c] ss:$16 sps:$4 sm:$0xff]  }
 0x227   : > { %10650 = vmatpush1.bf16.msra.mxu0 %v20069_v58  ;;  %11675 = vmatpush1.bf16.msra.mxu1 %v20072_v59  ;;  %v20153_v58 = vld [vmem:[%s23323_s9 + $0xc60] ss:$16 sps:$4 sm:$0xff]   ;;  %v20156_v59 = vld [vmem:[%s23323_s9 + $0xc68] ss:$16 sps:$4 sm:$0xff]  }
 0x228   : > { %10651 = vmatprep.subr.bf16.mxu0 %v20077_v60  ;;  %11676 = vmatprep.subr.bf16.mxu1 %v20080_v61  ;;  %v20161_v60 = vld [vmem:[%s23323_s9 + $0xc84] ss:$16 sps:$4 sm:$0xff]   ;;  %v20164_v61 = vld [vmem:[%s23323_s9 + $0xc8c] ss:$16 sps:$4 sm:$0xff]  }
 0x22b   : > { %10652 = vmatpush1.bf16.msra.mxu0 %v20075_v62  ;;  %11677 = vmatpush1.bf16.msra.mxu1 %v20078_v63  ;;  %v20159_v62 = vld [vmem:[%s23323_s9 + $0xc80] ss:$16 sps:$4 sm:$0xff]   ;;  %v20162_v63 = vld [vmem:[%s23323_s9 + $0xc88] ss:$16 sps:$4 sm:$0xff]  }
 0x22c   : > { %10653 = vmatprep.subr.bf16.mxu0 %v20083_v0  ;;  %11678 = vmatprep.subr.bf16.mxu1 %v20086_v1  ;;  %v20167_v0 = vld [vmem:[%s23323_s9 + $0xca4] ss:$16 sps:$4 sm:$0xff]   ;;  %v20170_v1 = vld [vmem:[%s23323_s9 + $0xcac] ss:$16 sps:$4 sm:$0xff]  }
 0x22f   : > { %10654 = vmatpush1.bf16.msra.mxu0 %v20081_v2  ;;  %11679 = vmatpush1.bf16.msra.mxu1 %v20084_v3  ;;  %v20165_v2 = vld [vmem:[%s23323_s9 + $0xca0] ss:$16 sps:$4 sm:$0xff]   ;;  %v20168_v3 = vld [vmem:[%s23323_s9 + $0xca8] ss:$16 sps:$4 sm:$0xff]  }
 0x230   : > { %10655 = vmatprep.subr.bf16.mxu0 %v20089_v4  ;;  %11680 = vmatprep.subr.bf16.mxu1 %v20092_v5  ;;  %v20173_v4 = vld [vmem:[%s23323_s9 + $0xcc4] ss:$16 sps:$4 sm:$0xff]   ;;  %v20176_v5 = vld [vmem:[%s23323_s9 + $0xccc] ss:$16 sps:$4 sm:$0xff]  }
 0x233   : > { %10656 = vmatpush1.bf16.msra.mxu0 %v20087_v6  ;;  %11681 = vmatpush1.bf16.msra.mxu1 %v20090_v7  ;;  %v20171_v6 = vld [vmem:[%s23323_s9 + $0xcc0] ss:$16 sps:$4 sm:$0xff]   ;;  %v20174_v7 = vld [vmem:[%s23323_s9 + $0xcc8] ss:$16 sps:$4 sm:$0xff]  }
 0x234   : > { %10657 = vmatprep.subr.bf16.mxu0 %v20095_v8  ;;  %11682 = vmatprep.subr.bf16.mxu1 %v20098_v9  ;;  %v20179_v8 = vld [vmem:[%s23323_s9 + $0xce4] ss:$16 sps:$4 sm:$0xff]   ;;  %v20182_v9 = vld [vmem:[%s23323_s9 + $0xcec] ss:$16 sps:$4 sm:$0xff]  }
 0x237   : > { %10658 = vmatpush1.bf16.msra.mxu0 %v20093_v10  ;;  %11683 = vmatpush1.bf16.msra.mxu1 %v20096_v11  ;;  %v20177_v10 = vld [vmem:[%s23323_s9 + $0xce0] ss:$16 sps:$4 sm:$0xff]   ;;  %v20180_v11 = vld [vmem:[%s23323_s9 + $0xce8] ss:$16 sps:$4 sm:$0xff]  }
 0x238   : > { %10659 = vmatprep.subr.bf16.mxu0 %v20101_v12  ;;  %11684 = vmatprep.subr.bf16.mxu1 %v20104_v14  ;;  %v20185_v12 = vld [vmem:[%s23323_s9 + $0xd04] ss:$16 sps:$4 sm:$0xff]   ;;  %v20188_v14 = vld [vmem:[%s23323_s9 + $0xd0c] ss:$16 sps:$4 sm:$0xff]  }
 0x23b   : > { %10660 = vmatpush1.bf16.msra.mxu0 %v20099_v16  ;;  %11685 = vmatpush1.bf16.msra.mxu1 %v20102_v52  ;;  %v20183_v16 = vld [vmem:[%s23323_s9 + $0xd00] ss:$16 sps:$4 sm:$0xff]   ;;  %v20186_v52 = vld [vmem:[%s23323_s9 + $0xd08] ss:$16 sps:$4 sm:$0xff]  }
 0x23c   : > { %10661 = vmatprep.subr.bf16.mxu0 %v20107_v17  ;;  %11686 = vmatprep.subr.bf16.mxu1 %v20110_v18  ;;  %v20191_v17 = vld [vmem:[%s23323_s9 + $0xd24] ss:$16 sps:$4 sm:$0xff]   ;;  %v20194_v18 = vld [vmem:[%s23323_s9 + $0xd2c] ss:$16 sps:$4 sm:$0xff]  }
 0x23f   : > { %10662 = vmatpush1.bf16.msra.mxu0 %v20105_v19  ;;  %11687 = vmatpush1.bf16.msra.mxu1 %v20108_v20  ;;  %v20189_v19 = vld [vmem:[%s23323_s9 + $0xd20] ss:$16 sps:$4 sm:$0xff]   ;;  %v20192_v20 = vld [vmem:[%s23323_s9 + $0xd28] ss:$16 sps:$4 sm:$0xff]  }
 0x240   : > { %10663 = vmatprep.subr.bf16.mxu0 %v20113_v22  ;;  %11688 = vmatprep.subr.bf16.mxu1 %v20116_v23  ;;  %v20197_v22 = vld [vmem:[%s23323_s9 + $0xd44] ss:$16 sps:$4 sm:$0xff]   ;;  %v20200_v23 = vld [vmem:[%s23323_s9 + $0xd4c] ss:$16 sps:$4 sm:$0xff]  }
 0x243   : > { %10664 = vmatpush1.bf16.msra.mxu0 %v20111_v24  ;;  %11689 = vmatpush1.bf16.msra.mxu1 %v20114_v26  ;;  %v20195_v24 = vld [vmem:[%s23323_s9 + $0xd40] ss:$16 sps:$4 sm:$0xff]   ;;  %v20198_v26 = vld [vmem:[%s23323_s9 + $0xd48] ss:$16 sps:$4 sm:$0xff]  }
 0x244   : > { %10665 = vmatprep.subr.bf16.mxu0 %v20119_v27  ;;  %11690 = vmatprep.subr.bf16.mxu1 %v20122_v28  ;;  %v20203_v27 = vld [vmem:[%s23323_s9 + $0xd64] ss:$16 sps:$4 sm:$0xff]   ;;  %v20206_v28 = vld [vmem:[%s23323_s9 + $0xd6c] ss:$16 sps:$4 sm:$0xff]  }
 0x247   : > { %10666 = vmatpush1.bf16.msra.mxu0 %v20117_v29  ;;  %11691 = vmatpush1.bf16.msra.mxu1 %v20120_v30  ;;  %v20201_v29 = vld [vmem:[%s23323_s9 + $0xd60] ss:$16 sps:$4 sm:$0xff]   ;;  %v20204_v30 = vld [vmem:[%s23323_s9 + $0xd68] ss:$16 sps:$4 sm:$0xff]  }
 0x248   : > { %10667 = vmatprep.subr.bf16.mxu0 %v20125_v15  ;;  %11692 = vmatprep.subr.bf16.mxu1 %v20128_v31  ;;  %v20209_v15 = vld [vmem:[%s23323_s9 + $0xd84] ss:$16 sps:$4 sm:$0xff]   ;;  %v20212_v31 = vld [vmem:[%s23323_s9 + $0xd8c] ss:$16 sps:$4 sm:$0xff]  }
 0x24b   : > { %10668 = vmatpush1.bf16.msra.mxu0 %v20123_v25  ;;  %11693 = vmatpush1.bf16.msra.mxu1 %v20126_v34  ;;  %v20215_v25 = vld [vmem:[%s23323_s9 + $0xda4] ss:$16 sps:$4 sm:$0xff]   ;;  %v20218_v34 = vld [vmem:[%s23323_s9 + $0xdac] ss:$16 sps:$4 sm:$0xff]  }
 0x24c   : > { %10669 = vmatprep.subr.bf16.mxu0 %v20131_v36  ;;  %11694 = vmatprep.subr.bf16.mxu1 %v20134_v37  ;;  %v20213_v36 = vld [vmem:[%s23323_s9 + $0xda0] ss:$16 sps:$4 sm:$0xff]   ;;  %v20216_v37 = vld [vmem:[%s23323_s9 + $0xda8] ss:$16 sps:$4 sm:$0xff]  }
 0x24f   : > { %10670 = vmatpush1.bf16.msra.mxu0 %v20129_v39  ;;  %11695 = vmatpush1.bf16.msra.mxu1 %v20132_v40  ;;  %v20221_v39 = vld [vmem:[%s23323_s9 + $0xdc4] ss:$16 sps:$4 sm:$0xff]   ;;  %v20224_v40 = vld [vmem:[%s23323_s9 + $0xdcc] ss:$16 sps:$4 sm:$0xff]  }
 0x250   : > { %10680 = vmatprep.subr.bf16.mxu0 %v20137_v21  ;;  %11705 = vmatprep.subr.bf16.mxu1 %v20140_v41  ;;  %v20219_v21 = vld [vmem:[%s23323_s9 + $0xdc0] ss:$16 sps:$4 sm:$0xff]   ;;  %v20222_v41 = vld [vmem:[%s23323_s9 + $0xdc8] ss:$16 sps:$4 sm:$0xff]  }
 0x252   : > { %10672 = vmatmul.mubr.bf16.vlgmr.msra.gmra.mrb[0].mxu0 %v2162_v44  ;;  %11697 = vmatmul.mubr.bf16.vlgmr.msra.gmra.mrb[0].mxu1 %v2162_v44  ;;  %v20230_v44 = vld [vmem:[%s23323_s9 + $0xdec] ss:$16 sps:$4 sm:$0xff]  }
 0x253   : > { %10681 = vmatpush1.bf16.msra.mxu0 %v20135_v35  ;;  %11706 = vmatpush1.bf16.msra.mxu1 %v20138_v45  ;;  %v20225_v35 = vld [vmem:[%s23323_s9 + $0xde0] ss:$16 sps:$4 sm:$0xff]   ;;  %v20228_v45 = vld [vmem:[%s23323_s9 + $0xde8] ss:$16 sps:$4 sm:$0xff]  }
 0x254   : > { %10682 = vmatprep.subr.bf16.mxu0 %v20143_v46  ;;  %11707 = vmatprep.subr.bf16.mxu1 %v20146_v47  ;;  %v20234_v46 = vld [vmem:[%s23323_s9 + $0xe04] ss:$16 sps:$4 sm:$0xff]   ;;  %v20237_v47 = vld [vmem:[%s23323_s9 + $0xe0c] ss:$16 sps:$4 sm:$0xff]  }
 0x255   : > { %10712 = vmatprep.mubr.bf16.mxu0 %v23811_v48  ;;  %11737 = vmatprep.mubr.bf16.mxu1 %v23811_v48 }
 0x257   : > { %10683 = vmatpush1.bf16.msra.mxu0 %v20141_v13  ;;  %11708 = vmatpush1.bf16.msra.mxu1 %v20144_v50  ;;  %v23877_v13 = vrot.slane %v23796_v38, %v23395_v49  ;;  %v20232_v50 = vld [vmem:[%s23323_s9 + $0xe00] ss:$16 sps:$4 sm:$0xff]  }
 0x258   : > { %10684 = vmatprep.subr.bf16.mxu0 %v20149_v51  ;;  %11709 = vmatprep.subr.bf16.mxu1 %v20152_v53  ;;  %v20235_v51 = vld [vmem:[%s23323_s9 + $0xe08] ss:$16 sps:$4 sm:$0xff]   ;;  %v20240_v53 = vld [vmem:[%s23323_s9 + $0xe24] ss:$16 sps:$4 sm:$0xff]   ;;  %v20238_v38 = vld [vmem:[%s23323_s9 + $0xe20] ss:$16 sps:$4 sm:$0xff]  }
 0x25b   : > { %10685 = vmatpush1.bf16.msra.mxu0 %v20147_v54  ;;  %11710 = vmatpush1.bf16.msra.mxu1 %v20150_v55  ;;  %v20243_v54 = vld [vmem:[%s23323_s9 + $0xe2c] ss:$16 sps:$4 sm:$0xff]   ;;  %v2165_v55 = vcombine.high %v23811_v48, %v23811_v48  ;;  %v20244_v48 = vld [vmem:[%s23323_s9 + $0xe40] ss:$16 sps:$4 sm:$0xff]  }
 0x25c   : > { %10686 = vmatprep.subr.bf16.mxu0 %v20155_v56  ;;  %11711 = vmatprep.subr.bf16.mxu1 %v20158_v57  ;;  %v20241_v56 = vld [vmem:[%s23323_s9 + $0xe28] ss:$16 sps:$4 sm:$0xff]   ;;  %v20246_v57 = vld [vmem:[%s23323_s9 + $0xe44] ss:$16 sps:$4 sm:$0xff]  }
 0x25f   : > { %10687 = vmatpush1.bf16.msra.mxu0 %v20153_v58  ;;  %11712 = vmatpush1.bf16.msra.mxu1 %v20156_v59  ;;  %v20249_v58 = vld [vmem:[%s23323_s9 + $0xe4c] ss:$16 sps:$4 sm:$0xff]   ;;  %v20247_v59 = vld [vmem:[%s23323_s9 + $0xe48] ss:$16 sps:$4 sm:$0xff]  }
 0x260   : > { %10688 = vmatprep.subr.bf16.mxu0 %v20161_v60  ;;  %11713 = vmatprep.subr.bf16.mxu1 %v20164_v61  ;;  %v20252_v60 = vld [vmem:[%s23323_s9 + $0xe64] ss:$16 sps:$4 sm:$0xff]   ;;  %v20255_v61 = vld [vmem:[%s23323_s9 + $0xe6c] ss:$16 sps:$4 sm:$0xff]  }
 0x263   : > { %10689 = vmatpush1.bf16.msra.mxu0 %v20159_v62  ;;  %11714 = vmatpush1.bf16.msra.mxu1 %v20162_v63  ;;  %v20250_v62 = vld [vmem:[%s23323_s9 + $0xe60] ss:$16 sps:$4 sm:$0xff]   ;;  %v20253_v63 = vld [vmem:[%s23323_s9 + $0xe68] ss:$16 sps:$4 sm:$0xff]  }
 0x264   : > { %10690 = vmatprep.subr.bf16.mxu0 %v20167_v0  ;;  %11715 = vmatprep.subr.bf16.mxu1 %v20170_v1  ;;  %v20258_v0 = vld [vmem:[%s23323_s9 + $0xe84] ss:$16 sps:$4 sm:$0xff]   ;;  %v20261_v1 = vld [vmem:[%s23323_s9 + $0xe8c] ss:$16 sps:$4 sm:$0xff]  }
 0x267   : > { %10691 = vmatpush1.bf16.msra.mxu0 %v20165_v2  ;;  %11716 = vmatpush1.bf16.msra.mxu1 %v20168_v3  ;;  %v20256_v2 = vld [vmem:[%s23323_s9 + $0xe80] ss:$16 sps:$4 sm:$0xff]   ;;  %v20259_v3 = vld [vmem:[%s23323_s9 + $0xe88] ss:$16 sps:$4 sm:$0xff]  }
 0x268   : > { %10692 = vmatprep.subr.bf16.mxu0 %v20173_v4  ;;  %11717 = vmatprep.subr.bf16.mxu1 %v20176_v5  ;;  %v20264_v4 = vld [vmem:[%s23323_s9 + $0xea4] ss:$16 sps:$4 sm:$0xff]   ;;  %v20267_v5 = vld [vmem:[%s23323_s9 + $0xeac] ss:$16 sps:$4 sm:$0xff]  }
 0x26b   : > { %10693 = vmatpush1.bf16.msra.mxu0 %v20171_v6  ;;  %11718 = vmatpush1.bf16.msra.mxu1 %v20174_v7  ;;  %v20262_v6 = vld [vmem:[%s23323_s9 + $0xea0] ss:$16 sps:$4 sm:$0xff]   ;;  %v20265_v7 = vld [vmem:[%s23323_s9 + $0xea8] ss:$16 sps:$4 sm:$0xff]  }
 0x26c   : > { %10694 = vmatprep.subr.bf16.mxu0 %v20179_v8  ;;  %11719 = vmatprep.subr.bf16.mxu1 %v20182_v9  ;;  %v20270_v8 = vld [vmem:[%s23323_s9 + $0xec4] ss:$16 sps:$4 sm:$0xff]   ;;  %v20273_v9 = vld [vmem:[%s23323_s9 + $0xecc] ss:$16 sps:$4 sm:$0xff]  }
 0x26f   : > { %10695 = vmatpush1.bf16.msra.mxu0 %v20177_v10  ;;  %11720 = vmatpush1.bf16.msra.mxu1 %v20180_v11  ;;  %v20268_v10 = vld [vmem:[%s23323_s9 + $0xec0] ss:$16 sps:$4 sm:$0xff]   ;;  %v20271_v11 = vld [vmem:[%s23323_s9 + $0xec8] ss:$16 sps:$4 sm:$0xff]  }
 0x270   : > { %10696 = vmatprep.subr.bf16.mxu0 %v20185_v12  ;;  %11721 = vmatprep.subr.bf16.mxu1 %v20188_v14  ;;  %v20276_v12 = vld [vmem:[%s23323_s9 + $0xee4] ss:$16 sps:$4 sm:$0xff]   ;;  %v20279_v14 = vld [vmem:[%s23323_s9 + $0xeec] ss:$16 sps:$4 sm:$0xff]  }
 0x273   : > { %10697 = vmatpush1.bf16.msra.mxu0 %v20183_v16  ;;  %11722 = vmatpush1.bf16.msra.mxu1 %v20186_v52  ;;  %v20274_v16 = vld [vmem:[%s23323_s9 + $0xee0] ss:$16 sps:$4 sm:$0xff]   ;;  %v20277_v52 = vld [vmem:[%s23323_s9 + $0xee8] ss:$16 sps:$4 sm:$0xff]  }
 0x274   : > { %10698 = vmatprep.subr.bf16.mxu0 %v20191_v17  ;;  %11723 = vmatprep.subr.bf16.mxu1 %v20194_v18  ;;  %v20282_v17 = vld [vmem:[%s23323_s9 + $0xf04] ss:$16 sps:$4 sm:$0xff]   ;;  %v20285_v18 = vld [vmem:[%s23323_s9 + $0xf0c] ss:$16 sps:$4 sm:$0xff]  }
 0x277   : > { %10699 = vmatpush1.bf16.msra.mxu0 %v20189_v19  ;;  %11724 = vmatpush1.bf16.msra.mxu1 %v20192_v20  ;;  %v20280_v19 = vld [vmem:[%s23323_s9 + $0xf00] ss:$16 sps:$4 sm:$0xff]   ;;  %v20283_v20 = vld [vmem:[%s23323_s9 + $0xf08] ss:$16 sps:$4 sm:$0xff]  }
 0x278   : > { %10700 = vmatprep.subr.bf16.mxu0 %v20197_v22  ;;  %11725 = vmatprep.subr.bf16.mxu1 %v20200_v23  ;;  %v20288_v22 = vld [vmem:[%s23323_s9 + $0xf24] ss:$16 sps:$4 sm:$0xff]   ;;  %v20291_v23 = vld [vmem:[%s23323_s9 + $0xf2c] ss:$16 sps:$4 sm:$0xff]  }
 0x27b   : > { %10701 = vmatpush1.bf16.msra.mxu0 %v20195_v24  ;;  %11726 = vmatpush1.bf16.msra.mxu1 %v20198_v26  ;;  %v20286_v24 = vld [vmem:[%s23323_s9 + $0xf20] ss:$16 sps:$4 sm:$0xff]   ;;  %v20289_v26 = vld [vmem:[%s23323_s9 + $0xf28] ss:$16 sps:$4 sm:$0xff]  }
 0x27c   : > { %10702 = vmatprep.subr.bf16.mxu0 %v20203_v27  ;;  %11727 = vmatprep.subr.bf16.mxu1 %v20206_v28  ;;  %v20294_v27 = vld [vmem:[%s23323_s9 + $0xf44] ss:$16 sps:$4 sm:$0xff]   ;;  %v20297_v28 = vld [vmem:[%s23323_s9 + $0xf4c] ss:$16 sps:$4 sm:$0xff]  }
 0x27f   : > { %10703 = vmatpush1.bf16.msra.mxu0 %v20201_v29  ;;  %11728 = vmatpush1.bf16.msra.mxu1 %v20204_v30  ;;  %v20292_v29 = vld [vmem:[%s23323_s9 + $0xf40] ss:$16 sps:$4 sm:$0xff]   ;;  %v20295_v30 = vld [vmem:[%s23323_s9 + $0xf48] ss:$16 sps:$4 sm:$0xff]  }
 0x280   : > { %10704 = vmatprep.subr.bf16.mxu0 %v20209_v15  ;;  %11729 = vmatprep.subr.bf16.mxu1 %v20212_v31  ;;  %v20300_v15 = vld [vmem:[%s23323_s9 + $0xf64] ss:$16 sps:$4 sm:$0xff]   ;;  %v20303_v31 = vld [vmem:[%s23323_s9 + $0xf6c] ss:$16 sps:$4 sm:$0xff]  }
 0x283   : > { %10705 = vmatpush1.bf16.msra.mxu0 %v20207_v32  ;;  %11730 = vmatpush1.bf16.msra.mxu1 %v20210_v33  ;;  %v20298_v32 = vld [vmem:[%s23323_s9 + $0xf60] ss:$16 sps:$4 sm:$0xff]   ;;  %v20301_v33 = vld [vmem:[%s23323_s9 + $0xf68] ss:$16 sps:$4 sm:$0xff]  }
 0x284   : > { %10706 = vmatprep.subr.bf16.mxu0 %v20215_v25  ;;  %11731 = vmatprep.subr.bf16.mxu1 %v20218_v34  ;;  %v20306_v25 = vld [vmem:[%s23323_s9 + $0xf84] ss:$16 sps:$4 sm:$0xff]   ;;  %v20309_v34 = vld [vmem:[%s23323_s9 + $0xf8c] ss:$16 sps:$4 sm:$0xff]  }
 0x287   : > { %10707 = vmatpush1.bf16.msra.mxu0 %v20213_v36  ;;  %11732 = vmatpush1.bf16.msra.mxu1 %v20216_v37  ;;  %v20304_v36 = vld [vmem:[%s23323_s9 + $0xf80] ss:$16 sps:$4 sm:$0xff]   ;;  %v20307_v37 = vld [vmem:[%s23323_s9 + $0xf88] ss:$16 sps:$4 sm:$0xff]  }
 0x288   : > { %10708 = vmatprep.subr.bf16.mxu0 %v20221_v39  ;;  %11733 = vmatprep.subr.bf16.mxu1 %v20224_v40  ;;  %v20312_v39 = vld [vmem:[%s23323_s9 + $0xfa4] ss:$16 sps:$4 sm:$0xff]   ;;  %v20315_v40 = vld [vmem:[%s23323_s9 + $0xfac] ss:$16 sps:$4 sm:$0xff]  }
 0x28b   : > { %10709 = vmatpush1.bf16.msra.mxu0 %v20219_v21  ;;  %11734 = vmatpush1.bf16.msra.mxu1 %v20222_v41  ;;  %v20310_v21 = vld [vmem:[%s23323_s9 + $0xfa0] ss:$16 sps:$4 sm:$0xff]   ;;  %v20313_v41 = vld [vmem:[%s23323_s9 + $0xfa8] ss:$16 sps:$4 sm:$0xff]  }
 0x28c   : > { %10710 = vmatprep.subr.bf16.mxu0 %v20227_v43  ;;  %11735 = vmatprep.subr.bf16.mxu1 %v20230_v44  ;;  %v20318_v43 = vld [vmem:[%s23323_s9 + $0xfc4] ss:$16 sps:$4 sm:$0xff]   ;;  %v20321_v44 = vld [vmem:[%s23323_s9 + $0xfcc] ss:$16 sps:$4 sm:$0xff]  }
 0x28f   : > { %10711 = vmatpush1.bf16.msra.mxu0 %v20225_v35  ;;  %11736 = vmatpush1.bf16.msra.mxu1 %v20228_v45  ;;  %v23942_v35 = vld.sshfl [vmem:[%s25483_s0 + $0x10] sm:$0xff pattern:$0x75316420] }
 0x290   : > { %10721 = vmatprep.subr.bf16.mxu0 %v20234_v46  ;;  %11746 = vmatprep.subr.bf16.mxu1 %v20237_v47  ;;  %v20316_v45 = vld [vmem:[%s23323_s9 + $0xfc0] ss:$16 sps:$4 sm:$0xff]   ;;  %v20319_v46 = vld [vmem:[%s23323_s9 + $0xfc8] ss:$16 sps:$4 sm:$0xff]   ;;  %v20324_v47 = vld [vmem:[%s23323_s9 + $0xfe4] ss:$16 sps:$4 sm:$0xff]  }
 0x292   : > { %10713 = vmatmul.mubr.bf16.vlgmr.msra.gmra.mrb[0].mxu0 %v23877_v13  ;;  %11738 = vmatmul.mubr.bf16.vlgmr.msra.gmra.mrb[0].mxu1 %v23877_v13 }
 0x293   : > { %10722 = vmatpush1.bf16.msra.mxu0 %v20232_v50  ;;  %11747 = vmatpush1.bf16.msra.mxu1 %v20235_v51  ;;  %v20327_v50 = vld [vmem:[%s23323_s9 + $0xfec] ss:$16 sps:$4 sm:$0xff]   ;;  %v20322_v51 = vld [vmem:[%s23323_s9 + $0xfe0] ss:$16 sps:$4 sm:$0xff]  }
 0x294   : > { %10723 = vmatprep.subr.bf16.mxu0 %v20240_v53  ;;  %11748 = vmatprep.subr.bf16.mxu1 %v20243_v54  ;;  %v20325_v53 = vld [vmem:[%s23323_s9 + $0xfe8] ss:$16 sps:$4 sm:$0xff]   ;;  %v20330_v54 = vld [vmem:[%s23323_s9 + $0x1004] ss:$16 sps:$4 sm:$0xff]  }
 0x295   : > { %10753 = vmatprep.mubr.bf16.mxu0 %v2165_v55  ;;  %11778 = vmatprep.mubr.bf16.mxu1 %v2165_v55  ;;  %v20333_v55 = vld [vmem:[%s23323_s9 + $0x100c] ss:$16 sps:$4 sm:$0xff]  }
 0x297   : > { %10724 = vmatpush1.bf16.msra.mxu0 %v20238_v38  ;;  %11749 = vmatpush1.bf16.msra.mxu1 %v20241_v56  ;;  %v2181_v38 = vcombine.high %v23942_v35, %v23942_v35  ;;  %v2163_v56 = vcombine.high %v23877_v13, %v23877_v13  ;;  %v20334_v13 = vld [vmem:[%s23323_s9 + $0x1020] ss:$16 sps:$4 sm:$0xff]  }
 0x298   : > { %10725 = vmatprep.subr.bf16.mxu0 %v20246_v57  ;;  %11750 = vmatprep.subr.bf16.mxu1 %v20249_v58  ;;  %v20328_v57 = vld [vmem:[%s23323_s9 + $0x1000] ss:$16 sps:$4 sm:$0xff]   ;;  %v20331_v58 = vld [vmem:[%s23323_s9 + $0x1008] ss:$16 sps:$4 sm:$0xff]  }
 0x29b   : > { %10726 = vmatpush1.bf16.msra.mxu0 %v20244_v48  ;;  %11751 = vmatpush1.bf16.msra.mxu1 %v20247_v59  ;;  %v20336_v48 = vld [vmem:[%s23323_s9 + $0x1024] ss:$16 sps:$4 sm:$0xff]   ;;  %v20339_v59 = vld [vmem:[%s23323_s9 + $0x102c] ss:$16 sps:$4 sm:$0xff]  }
 0x29c   : > { %10727 = vmatprep.subr.bf16.mxu0 %v20252_v60  ;;  %11752 = vmatprep.subr.bf16.mxu1 %v20255_v61  ;;  %v23961_v60 = vrot.slane %v2181_v38, %v23395_v49  ;;  %v20337_v61 = vld [vmem:[%s23323_s9 + $0x1028] ss:$16 sps:$4 sm:$0xff]   ;;  %v20420_v38 = vld [vmem:[%s23323_s9 + $0x11e4] ss:$16 sps:$4 sm:$0xff]  }
 0x29f   : > { %10728 = vmatpush1.bf16.msra.mxu0 %v20250_v62  ;;  %11753 = vmatpush1.bf16.msra.mxu1 %v20253_v63  ;;  %v20342_v62 = vld [vmem:[%s23323_s9 + $0x1044] ss:$16 sps:$4 sm:$0xff]   ;;  %v20345_v63 = vld [vmem:[%s23323_s9 + $0x104c] ss:$16 sps:$4 sm:$0xff]  }
 0x2a0   : > { %10729 = vmatprep.subr.bf16.mxu0 %v20258_v0  ;;  %11754 = vmatprep.subr.bf16.mxu1 %v20261_v1  ;;  %v20340_v0 = vld [vmem:[%s23323_s9 + $0x1040] ss:$16 sps:$4 sm:$0xff]   ;;  %v20343_v1 = vld [vmem:[%s23323_s9 + $0x1048] ss:$16 sps:$4 sm:$0xff]  }
 0x2a3   : > { %10730 = vmatpush1.bf16.msra.mxu0 %v20256_v2  ;;  %11755 = vmatpush1.bf16.msra.mxu1 %v20259_v3  ;;  %v20348_v2 = vld [vmem:[%s23323_s9 + $0x1064] ss:$16 sps:$4 sm:$0xff]   ;;  %v20351_v3 = vld [vmem:[%s23323_s9 + $0x106c] ss:$16 sps:$4 sm:$0xff]  }
 0x2a4   : > { %10731 = vmatprep.subr.bf16.mxu0 %v20264_v4  ;;  %11756 = vmatprep.subr.bf16.mxu1 %v20267_v5  ;;  %v20346_v4 = vld [vmem:[%s23323_s9 + $0x1060] ss:$16 sps:$4 sm:$0xff]   ;;  %v20349_v5 = vld [vmem:[%s23323_s9 + $0x1068] ss:$16 sps:$4 sm:$0xff]  }
 0x2a7   : > { %10732 = vmatpush1.bf16.msra.mxu0 %v20262_v6  ;;  %11757 = vmatpush1.bf16.msra.mxu1 %v20265_v7  ;;  %v20354_v6 = vld [vmem:[%s23323_s9 + $0x1084] ss:$16 sps:$4 sm:$0xff]   ;;  %v20357_v7 = vld [vmem:[%s23323_s9 + $0x108c] ss:$16 sps:$4 sm:$0xff]  }
 0x2a8   : > { %10733 = vmatprep.subr.bf16.mxu0 %v20270_v8  ;;  %11758 = vmatprep.subr.bf16.mxu1 %v20273_v9  ;;  %v20352_v8 = vld [vmem:[%s23323_s9 + $0x1080] ss:$16 sps:$4 sm:$0xff]   ;;  %v20355_v9 = vld [vmem:[%s23323_s9 + $0x1088] ss:$16 sps:$4 sm:$0xff]  }
 0x2ab   : > { %10734 = vmatpush1.bf16.msra.mxu0 %v20268_v10  ;;  %11759 = vmatpush1.bf16.msra.mxu1 %v20271_v11  ;;  %v20360_v10 = vld [vmem:[%s23323_s9 + $0x10a4] ss:$16 sps:$4 sm:$0xff]   ;;  %v20363_v11 = vld [vmem:[%s23323_s9 + $0x10ac] ss:$16 sps:$4 sm:$0xff]  }
 0x2ac   : > { %10735 = vmatprep.subr.bf16.mxu0 %v20276_v12  ;;  %11760 = vmatprep.subr.bf16.mxu1 %v20279_v14  ;;  %v20358_v12 = vld [vmem:[%s23323_s9 + $0x10a0] ss:$16 sps:$4 sm:$0xff]   ;;  %v20361_v14 = vld [vmem:[%s23323_s9 + $0x10a8] ss:$16 sps:$4 sm:$0xff]  }
 0x2af   : > { %10736 = vmatpush1.bf16.msra.mxu0 %v20274_v16  ;;  %11761 = vmatpush1.bf16.msra.mxu1 %v20277_v52  ;;  %v20366_v16 = vld [vmem:[%s23323_s9 + $0x10c4] ss:$16 sps:$4 sm:$0xff]   ;;  %v20369_v52 = vld [vmem:[%s23323_s9 + $0x10cc] ss:$16 sps:$4 sm:$0xff]  }
 0x2b0   : > { %10737 = vmatprep.subr.bf16.mxu0 %v20282_v17  ;;  %11762 = vmatprep.subr.bf16.mxu1 %v20285_v18  ;;  %v20364_v17 = vld [vmem:[%s23323_s9 + $0x10c0] ss:$16 sps:$4 sm:$0xff]   ;;  %v20367_v18 = vld [vmem:[%s23323_s9 + $0x10c8] ss:$16 sps:$4 sm:$0xff]  }
 0x2b3   : > { %10738 = vmatpush1.bf16.msra.mxu0 %v20280_v19  ;;  %11763 = vmatpush1.bf16.msra.mxu1 %v20283_v20  ;;  %v20372_v19 = vld [vmem:[%s23323_s9 + $0x10e4] ss:$16 sps:$4 sm:$0xff]   ;;  %v20375_v20 = vld [vmem:[%s23323_s9 + $0x10ec] ss:$16 sps:$4 sm:$0xff]  }
 0x2b4   : > { %10739 = vmatprep.subr.bf16.mxu0 %v20288_v22  ;;  %11764 = vmatprep.subr.bf16.mxu1 %v20291_v23  ;;  %v20370_v22 = vld [vmem:[%s23323_s9 + $0x10e0] ss:$16 sps:$4 sm:$0xff]   ;;  %v20373_v23 = vld [vmem:[%s23323_s9 + $0x10e8] ss:$16 sps:$4 sm:$0xff]  }
 0x2b7   : > { %10740 = vmatpush1.bf16.msra.mxu0 %v20286_v24  ;;  %11765 = vmatpush1.bf16.msra.mxu1 %v20289_v26  ;;  %v20378_v24 = vld [vmem:[%s23323_s9 + $0x1104] ss:$16 sps:$4 sm:$0xff]   ;;  %v20381_v26 = vld [vmem:[%s23323_s9 + $0x110c] ss:$16 sps:$4 sm:$0xff]  }
 0x2b8   : > { %10741 = vmatprep.subr.bf16.mxu0 %v20294_v27  ;;  %11766 = vmatprep.subr.bf16.mxu1 %v20297_v28  ;;  %v20376_v27 = vld [vmem:[%s23323_s9 + $0x1100] ss:$16 sps:$4 sm:$0xff]   ;;  %v20379_v28 = vld [vmem:[%s23323_s9 + $0x1108] ss:$16 sps:$4 sm:$0xff]  }
 0x2bb   : > { %10742 = vmatpush1.bf16.msra.mxu0 %v20292_v29  ;;  %11767 = vmatpush1.bf16.msra.mxu1 %v20295_v30  ;;  %v20384_v29 = vld [vmem:[%s23323_s9 + $0x1124] ss:$16 sps:$4 sm:$0xff]   ;;  %v20387_v30 = vld [vmem:[%s23323_s9 + $0x112c] ss:$16 sps:$4 sm:$0xff]  }
 0x2bc   : > { %10743 = vmatprep.subr.bf16.mxu0 %v20300_v15  ;;  %11768 = vmatprep.subr.bf16.mxu1 %v20303_v31  ;;  %v20382_v15 = vld [vmem:[%s23323_s9 + $0x1120] ss:$16 sps:$4 sm:$0xff]   ;;  %v20385_v31 = vld [vmem:[%s23323_s9 + $0x1128] ss:$16 sps:$4 sm:$0xff]  }
 0x2bf   : > { %10744 = vmatpush1.bf16.msra.mxu0 %v20298_v32  ;;  %11769 = vmatpush1.bf16.msra.mxu1 %v20301_v33  ;;  %v20390_v32 = vld [vmem:[%s23323_s9 + $0x1144] ss:$16 sps:$4 sm:$0xff]   ;;  %v20393_v33 = vld [vmem:[%s23323_s9 + $0x114c] ss:$16 sps:$4 sm:$0xff]  }
 0x2c0   : > { %10745 = vmatprep.subr.bf16.mxu0 %v20306_v25  ;;  %11770 = vmatprep.subr.bf16.mxu1 %v20309_v34  ;;  %v20388_v25 = vld [vmem:[%s23323_s9 + $0x1140] ss:$16 sps:$4 sm:$0xff]   ;;  %v20391_v34 = vld [vmem:[%s23323_s9 + $0x1148] ss:$16 sps:$4 sm:$0xff]  }
 0x2c3   : > { %10746 = vmatpush1.bf16.msra.mxu0 %v20304_v36  ;;  %11771 = vmatpush1.bf16.msra.mxu1 %v20307_v37  ;;  %v20396_v36 = vld [vmem:[%s23323_s9 + $0x1164] ss:$16 sps:$4 sm:$0xff]   ;;  %v20399_v37 = vld [vmem:[%s23323_s9 + $0x116c] ss:$16 sps:$4 sm:$0xff]  }
 0x2c4   : > { %10747 = vmatprep.subr.bf16.mxu0 %v20312_v39  ;;  %11772 = vmatprep.subr.bf16.mxu1 %v20315_v40  ;;  %v20394_v39 = vld [vmem:[%s23323_s9 + $0x1160] ss:$16 sps:$4 sm:$0xff]   ;;  %v20397_v40 = vld [vmem:[%s23323_s9 + $0x1168] ss:$16 sps:$4 sm:$0xff]  }
 0x2c7   : > { %10748 = vmatpush1.bf16.msra.mxu0 %v20310_v21  ;;  %11773 = vmatpush1.bf16.msra.mxu1 %v20313_v41  ;;  %v20402_v21 = vld [vmem:[%s23323_s9 + $0x1184] ss:$16 sps:$4 sm:$0xff]   ;;  %v20405_v41 = vld [vmem:[%s23323_s9 + $0x118c] ss:$16 sps:$4 sm:$0xff]  }
 0x2c8   : > { %10749 = vmatprep.subr.bf16.mxu0 %v20318_v43  ;;  %11774 = vmatprep.subr.bf16.mxu1 %v20321_v44  ;;  %v20400_v43 = vld [vmem:[%s23323_s9 + $0x1180] ss:$16 sps:$4 sm:$0xff]   ;;  %v20403_v44 = vld [vmem:[%s23323_s9 + $0x1188] ss:$16 sps:$4 sm:$0xff]  }
 0x2cb   : > { %10750 = vmatpush1.bf16.msra.mxu0 %v20316_v45  ;;  %11775 = vmatpush1.bf16.msra.mxu1 %v20319_v46  ;;  %v20408_v45 = vld [vmem:[%s23323_s9 + $0x11a4] ss:$16 sps:$4 sm:$0xff]   ;;  %v20411_v46 = vld [vmem:[%s23323_s9 + $0x11ac] ss:$16 sps:$4 sm:$0xff]  }
 0x2cc   : > { %10751 = vmatprep.subr.bf16.mxu0 %v20324_v47  ;;  %11776 = vmatprep.subr.bf16.mxu1 %v20327_v50  ;;  %v20406_v47 = vld [vmem:[%s23323_s9 + $0x11a0] ss:$16 sps:$4 sm:$0xff]   ;;  %v20409_v50 = vld [vmem:[%s23323_s9 + $0x11a8] ss:$16 sps:$4 sm:$0xff]  }
 0x2cf   : > { %10752 = vmatpush1.bf16.msra.mxu0 %v20322_v51  ;;  %11777 = vmatpush1.bf16.msra.mxu1 %v20325_v53  ;;  %v20414_v51 = vld [vmem:[%s23323_s9 + $0x11c4] ss:$16 sps:$4 sm:$0xff]   ;;  %v20417_v53 = vld [vmem:[%s23323_s9 + $0x11cc] ss:$16 sps:$4 sm:$0xff]  }
 0x2d0   : > { %10762 = vmatprep.subr.bf16.mxu0 %v20330_v54  ;;  %11787 = vmatprep.subr.bf16.mxu1 %v20333_v55  ;;  %v20412_v54 = vld [vmem:[%s23323_s9 + $0x11c0] ss:$16 sps:$4 sm:$0xff]   ;;  %v20415_v55 = vld [vmem:[%s23323_s9 + $0x11c8] ss:$16 sps:$4 sm:$0xff]  }
 0x2d2   : > { %10754 = vmatmul.mubr.bf16.vlgmr.msra.gmra.mrb[0].mxu0 %v2163_v56  ;;  %11779 = vmatmul.mubr.bf16.vlgmr.msra.gmra.mrb[0].mxu1 %v2163_v56  ;;  %v20423_v56 = vld [vmem:[%s23323_s9 + $0x11ec] ss:$16 sps:$4 sm:$0xff]  }
 0x2d3   : > { %10763 = vmatpush1.bf16.msra.mxu0 %v20328_v57  ;;  %11788 = vmatpush1.bf16.msra.mxu1 %v20331_v58  ;;  %v20418_v57 = vld [vmem:[%s23323_s9 + $0x11e0] ss:$16 sps:$4 sm:$0xff]   ;;  %v20421_v58 = vld [vmem:[%s23323_s9 + $0x11e8] ss:$16 sps:$4 sm:$0xff]  }
 0x2d4   : > { %10764 = vmatprep.subr.bf16.mxu0 %v20336_v48  ;;  %11789 = vmatprep.subr.bf16.mxu1 %v20339_v59  ;;  %v20426_v48 = vld [vmem:[%s23323_s9 + $0x1204] ss:$16 sps:$4 sm:$0xff]   ;;  %v20429_v59 = vld [vmem:[%s23323_s9 + $0x120c] ss:$16 sps:$4 sm:$0xff]  }
 0x2d5   : > { %10794 = vmatprep.mubr.bf16.mxu0 %v23961_v60  ;;  %11819 = vmatprep.mubr.bf16.mxu1 %v23961_v60 }
 0x2d7   : > { %10765 = vmatpush1.bf16.msra.mxu0 %v20334_v13  ;;  %11790 = vmatpush1.bf16.msra.mxu1 %v20337_v61  ;;  %v24027_v13 = vrot.slane %v23942_v35, %v23395_v49  ;;  %v20424_v61 = vld [vmem:[%s23323_s9 + $0x1200] ss:$16 sps:$4 sm:$0xff]  }
 0x2d8   : > { %10766 = vmatprep.subr.bf16.mxu0 %v20342_v62  ;;  %11791 = vmatprep.subr.bf16.mxu1 %v20345_v63  ;;  %v20427_v62 = vld [vmem:[%s23323_s9 + $0x1208] ss:$16 sps:$4 sm:$0xff]   ;;  %v20432_v63 = vld [vmem:[%s23323_s9 + $0x1224] ss:$16 sps:$4 sm:$0xff]   ;;  %v20430_v35 = vld [vmem:[%s23323_s9 + $0x1220] ss:$16 sps:$4 sm:$0xff]  }
 0x2db   : > { %10767 = vmatpush1.bf16.msra.mxu0 %v20340_v0  ;;  %11792 = vmatpush1.bf16.msra.mxu1 %v20343_v1  ;;  %v20435_v0 = vld [vmem:[%s23323_s9 + $0x122c] ss:$16 sps:$4 sm:$0xff]   ;;  %v2213_v1 = vcombine.high %v23961_v60, %v23961_v60  ;;  %v20436_v60 = vld [vmem:[%s23323_s9 + $0x1240] ss:$16 sps:$4 sm:$0xff]  }
 0x2dc   : > { %10768 = vmatprep.subr.bf16.mxu0 %v20348_v2  ;;  %11793 = vmatprep.subr.bf16.mxu1 %v20351_v3  ;;  %v20433_v2 = vld [vmem:[%s23323_s9 + $0x1228] ss:$16 sps:$4 sm:$0xff]   ;;  %v20438_v3 = vld [vmem:[%s23323_s9 + $0x1244] ss:$16 sps:$4 sm:$0xff]  }
 0x2df   : > { %10769 = vmatpush1.bf16.msra.mxu0 %v20346_v4  ;;  %11794 = vmatpush1.bf16.msra.mxu1 %v20349_v5  ;;  %v20441_v4 = vld [vmem:[%s23323_s9 + $0x124c] ss:$16 sps:$4 sm:$0xff]   ;;  %v20439_v5 = vld [vmem:[%s23323_s9 + $0x1248] ss:$16 sps:$4 sm:$0xff]  }
 0x2e0   : > { %10770 = vmatprep.subr.bf16.mxu0 %v20354_v6  ;;  %11795 = vmatprep.subr.bf16.mxu1 %v20357_v7  ;;  %v20444_v6 = vld [vmem:[%s23323_s9 + $0x1264] ss:$16 sps:$4 sm:$0xff]   ;;  %v20447_v7 = vld [vmem:[%s23323_s9 + $0x126c] ss:$16 sps:$4 sm:$0xff]  }
 0x2e3   : > { %10771 = vmatpush1.bf16.msra.mxu0 %v20352_v8  ;;  %11796 = vmatpush1.bf16.msra.mxu1 %v20355_v9  ;;  %v20442_v8 = vld [vmem:[%s23323_s9 + $0x1260] ss:$16 sps:$4 sm:$0xff]   ;;  %v20445_v9 = vld [vmem:[%s23323_s9 + $0x1268] ss:$16 sps:$4 sm:$0xff]  }
 0x2e4   : > { %10772 = vmatprep.subr.bf16.mxu0 %v20360_v10  ;;  %11797 = vmatprep.subr.bf16.mxu1 %v20363_v11  ;;  %v20450_v10 = vld [vmem:[%s23323_s9 + $0x1284] ss:$16 sps:$4 sm:$0xff]   ;;  %v20453_v11 = vld [vmem:[%s23323_s9 + $0x128c] ss:$16 sps:$4 sm:$0xff]  }
 0x2e7   : > { %10773 = vmatpush1.bf16.msra.mxu0 %v20358_v12  ;;  %11798 = vmatpush1.bf16.msra.mxu1 %v20361_v14  ;;  %v20448_v12 = vld [vmem:[%s23323_s9 + $0x1280] ss:$16 sps:$4 sm:$0xff]   ;;  %v20451_v14 = vld [vmem:[%s23323_s9 + $0x1288] ss:$16 sps:$4 sm:$0xff]  }
 0x2e8   : > { %10774 = vmatprep.subr.bf16.mxu0 %v20366_v16  ;;  %11799 = vmatprep.subr.bf16.mxu1 %v20369_v52  ;;  %v20456_v16 = vld [vmem:[%s23323_s9 + $0x12a4] ss:$16 sps:$4 sm:$0xff]   ;;  %v20459_v52 = vld [vmem:[%s23323_s9 + $0x12ac] ss:$16 sps:$4 sm:$0xff]  }
 0x2eb   : > { %10775 = vmatpush1.bf16.msra.mxu0 %v20364_v17  ;;  %11800 = vmatpush1.bf16.msra.mxu1 %v20367_v18  ;;  %v20454_v17 = vld [vmem:[%s23323_s9 + $0x12a0] ss:$16 sps:$4 sm:$0xff]   ;;  %v20457_v18 = vld [vmem:[%s23323_s9 + $0x12a8] ss:$16 sps:$4 sm:$0xff]  }
 0x2ec   : > { %10776 = vmatprep.subr.bf16.mxu0 %v20372_v19  ;;  %11801 = vmatprep.subr.bf16.mxu1 %v20375_v20  ;;  %v20462_v19 = vld [vmem:[%s23323_s9 + $0x12c4] ss:$16 sps:$4 sm:$0xff]   ;;  %v20465_v20 = vld [vmem:[%s23323_s9 + $0x12cc] ss:$16 sps:$4 sm:$0xff]  }
 0x2ef   : > { %10777 = vmatpush1.bf16.msra.mxu0 %v20370_v22  ;;  %11802 = vmatpush1.bf16.msra.mxu1 %v20373_v23  ;;  %v20460_v22 = vld [vmem:[%s23323_s9 + $0x12c0] ss:$16 sps:$4 sm:$0xff]   ;;  %v20463_v23 = vld [vmem:[%s23323_s9 + $0x12c8] ss:$16 sps:$4 sm:$0xff]  }
 0x2f0   : > { %10778 = vmatprep.subr.bf16.mxu0 %v20378_v24  ;;  %11803 = vmatprep.subr.bf16.mxu1 %v20381_v26  ;;  %v20468_v24 = vld [vmem:[%s23323_s9 + $0x12e4] ss:$16 sps:$4 sm:$0xff]   ;;  %v20471_v26 = vld [vmem:[%s23323_s9 + $0x12ec] ss:$16 sps:$4 sm:$0xff]  }
 0x2f3   : > { %10779 = vmatpush1.bf16.msra.mxu0 %v20376_v27  ;;  %11804 = vmatpush1.bf16.msra.mxu1 %v20379_v28  ;;  %v20466_v27 = vld [vmem:[%s23323_s9 + $0x12e0] ss:$16 sps:$4 sm:$0xff]   ;;  %v20469_v28 = vld [vmem:[%s23323_s9 + $0x12e8] ss:$16 sps:$4 sm:$0xff]  }
 0x2f4   : > { %10780 = vmatprep.subr.bf16.mxu0 %v20384_v29  ;;  %11805 = vmatprep.subr.bf16.mxu1 %v20387_v30  ;;  %v20474_v29 = vld [vmem:[%s23323_s9 + $0x1304] ss:$16 sps:$4 sm:$0xff]   ;;  %v20477_v30 = vld [vmem:[%s23323_s9 + $0x130c] ss:$16 sps:$4 sm:$0xff]  }
 0x2f7   : > { %10781 = vmatpush1.bf16.msra.mxu0 %v20382_v15  ;;  %11806 = vmatpush1.bf16.msra.mxu1 %v20385_v31  ;;  %v20472_v15 = vld [vmem:[%s23323_s9 + $0x1300] ss:$16 sps:$4 sm:$0xff]   ;;  %v20475_v31 = vld [vmem:[%s23323_s9 + $0x1308] ss:$16 sps:$4 sm:$0xff]  }
 0x2f8   : > { %10782 = vmatprep.subr.bf16.mxu0 %v20390_v32  ;;  %11807 = vmatprep.subr.bf16.mxu1 %v20393_v33  ;;  %v20480_v32 = vld [vmem:[%s23323_s9 + $0x1324] ss:$16 sps:$4 sm:$0xff]   ;;  %v20483_v33 = vld [vmem:[%s23323_s9 + $0x132c] ss:$16 sps:$4 sm:$0xff]  }
 0x2fb   : > { %10783 = vmatpush1.bf16.msra.mxu0 %v20388_v25  ;;  %11808 = vmatpush1.bf16.msra.mxu1 %v20391_v34  ;;  %v20478_v25 = vld [vmem:[%s23323_s9 + $0x1320] ss:$16 sps:$4 sm:$0xff]   ;;  %v20481_v34 = vld [vmem:[%s23323_s9 + $0x1328] ss:$16 sps:$4 sm:$0xff]  }
 0x2fc   : > { %10784 = vmatprep.subr.bf16.mxu0 %v20396_v36  ;;  %11809 = vmatprep.subr.bf16.mxu1 %v20399_v37  ;;  %v20486_v36 = vld [vmem:[%s23323_s9 + $0x1344] ss:$16 sps:$4 sm:$0xff]   ;;  %v20489_v37 = vld [vmem:[%s23323_s9 + $0x134c] ss:$16 sps:$4 sm:$0xff]  }
 0x2ff   : > { %10785 = vmatpush1.bf16.msra.mxu0 %v20394_v39  ;;  %11810 = vmatpush1.bf16.msra.mxu1 %v20397_v40  ;;  %v20484_v39 = vld [vmem:[%s23323_s9 + $0x1340] ss:$16 sps:$4 sm:$0xff]   ;;  %v20487_v40 = vld [vmem:[%s23323_s9 + $0x1348] ss:$16 sps:$4 sm:$0xff]  }
 0x300   : > { %10786 = vmatprep.subr.bf16.mxu0 %v20402_v21  ;;  %11811 = vmatprep.subr.bf16.mxu1 %v20405_v41  ;;  %v20492_v21 = vld [vmem:[%s23323_s9 + $0x1364] ss:$16 sps:$4 sm:$0xff]   ;;  %v20495_v41 = vld [vmem:[%s23323_s9 + $0x136c] ss:$16 sps:$4 sm:$0xff]  }
 0x303   : > { %10787 = vmatpush1.bf16.msra.mxu0 %v20400_v43  ;;  %11812 = vmatpush1.bf16.msra.mxu1 %v20403_v44  ;;  %v20490_v43 = vld [vmem:[%s23323_s9 + $0x1360] ss:$16 sps:$4 sm:$0xff]   ;;  %v20493_v44 = vld [vmem:[%s23323_s9 + $0x1368] ss:$16 sps:$4 sm:$0xff]  }
 0x304   : > { %10788 = vmatprep.subr.bf16.mxu0 %v20408_v45  ;;  %11813 = vmatprep.subr.bf16.mxu1 %v20411_v46  ;;  %v20498_v45 = vld [vmem:[%s23323_s9 + $0x1384] ss:$16 sps:$4 sm:$0xff]   ;;  %v20501_v46 = vld [vmem:[%s23323_s9 + $0x138c] ss:$16 sps:$4 sm:$0xff]  }
 0x307   : > { %10789 = vmatpush1.bf16.msra.mxu0 %v20406_v47  ;;  %11814 = vmatpush1.bf16.msra.mxu1 %v20409_v50  ;;  %v20496_v47 = vld [vmem:[%s23323_s9 + $0x1380] ss:$16 sps:$4 sm:$0xff]   ;;  %v20499_v50 = vld [vmem:[%s23323_s9 + $0x1388] ss:$16 sps:$4 sm:$0xff]  }
 0x308   : > { %10790 = vmatprep.subr.bf16.mxu0 %v20414_v51  ;;  %11815 = vmatprep.subr.bf16.mxu1 %v20417_v53  ;;  %v20504_v51 = vld [vmem:[%s23323_s9 + $0x13a4] ss:$16 sps:$4 sm:$0xff]   ;;  %v20507_v53 = vld [vmem:[%s23323_s9 + $0x13ac] ss:$16 sps:$4 sm:$0xff]  }
 0x30b   : > { %10791 = vmatpush1.bf16.msra.mxu0 %v20412_v54  ;;  %11816 = vmatpush1.bf16.msra.mxu1 %v20415_v55  ;;  %v20502_v54 = vld [vmem:[%s23323_s9 + $0x13a0] ss:$16 sps:$4 sm:$0xff]   ;;  %v20505_v55 = vld [vmem:[%s23323_s9 + $0x13a8] ss:$16 sps:$4 sm:$0xff]  }
 0x30c   : > { %10792 = vmatprep.subr.bf16.mxu0 %v20420_v38  ;;  %11817 = vmatprep.subr.bf16.mxu1 %v20423_v56  ;;  %v20510_v38 = vld [vmem:[%s23323_s9 + $0x13c4] ss:$16 sps:$4 sm:$0xff]   ;;  %v20513_v56 = vld [vmem:[%s23323_s9 + $0x13cc] ss:$16 sps:$4 sm:$0xff]  }
 0x30f   : > { %10793 = vmatpush1.bf16.msra.mxu0 %v20418_v57  ;;  %11818 = vmatpush1.bf16.msra.mxu1 %v20421_v58  ;;  %v21965_v57 = vld [vmem:[%s25483_s0 + $0x10] sm:$0xff] }
 0x310   : > { %10803 = vmatprep.subr.bf16.mxu0 %v20426_v48  ;;  %11828 = vmatprep.subr.bf16.mxu1 %v20429_v59  ;;  %v2166_v58 = vcombine.high %v21965_v57, %v21965_v57  ;;  %v20508_v48 = vld [vmem:[%s23323_s9 + $0x13c0] ss:$16 sps:$4 sm:$0xff]   ;;  %v20511_v59 = vld [vmem:[%s23323_s9 + $0x13c8] ss:$16 sps:$4 sm:$0xff]  }
 0x311   : > { %v20592_v57 = vld [vmem:[%s23323_s9 + $0x1580] ss:$16 sps:$4 sm:$0xff]  }
 0x312   : > { %10795 = vmatmul.mubr.bf16.vlgmr.msra.gmra.mrb[0].mxu0 %v24027_v13  ;;  %11820 = vmatmul.mubr.bf16.vlgmr.msra.gmra.mrb[0].mxu1 %v24027_v13 }
 0x313   : > { %10804 = vmatpush1.bf16.msra.mxu0 %v20424_v61  ;;  %11829 = vmatpush1.bf16.msra.mxu1 %v20427_v62  ;;  %v20516_v61 = vld [vmem:[%s23323_s9 + $0x13e4] ss:$16 sps:$4 sm:$0xff]   ;;  %v20519_v62 = vld [vmem:[%s23323_s9 + $0x13ec] ss:$16 sps:$4 sm:$0xff]  }
 0x314   : > { %10805 = vmatprep.subr.bf16.mxu0 %v20432_v63  ;;  %11830 = vmatprep.subr.bf16.mxu1 %v20435_v0  ;;  %v24097_v63 = vrot.slane %v2166_v58, %v23395_v49  ;;  %v20514_v0 = vld [vmem:[%s23323_s9 + $0x13e0] ss:$16 sps:$4 sm:$0xff]   ;;  %v20595_v58 = vld [vmem:[%s23323_s9 + $0x1588] ss:$16 sps:$4 sm:$0xff]  }
 0x315   : > { %10835 = vmatprep.mubr.bf16.mxu0 %v2213_v1  ;;  %11860 = vmatprep.mubr.bf16.mxu1 %v2213_v1  ;;  %v20517_v1 = vld [vmem:[%s23323_s9 + $0x13e8] ss:$16 sps:$4 sm:$0xff]  }
 0x317   : > { %10806 = vmatpush1.bf16.msra.mxu0 %v20430_v35  ;;  %11831 = vmatpush1.bf16.msra.mxu1 %v20433_v2  ;;  %v20522_v35 = vld [vmem:[%s23323_s9 + $0x1404] ss:$16 sps:$4 sm:$0xff]   ;;  %v20525_v2 = vld [vmem:[%s23323_s9 + $0x140c] ss:$16 sps:$4 sm:$0xff]  }
 0x318   : > { %10807 = vmatprep.subr.bf16.mxu0 %v20438_v3  ;;  %11832 = vmatprep.subr.bf16.mxu1 %v20441_v4  ;;  %v2182_v3 = vcombine.high %v24097_v63, %v24097_v63  ;;  %v2211_v4 = vcombine.high %v24027_v13, %v24027_v13  ;;  %v20526_v13 = vld [vmem:[%s23323_s9 + $0x1420] ss:$16 sps:$4 sm:$0xff]  }
 0x31b   : > { %10808 = vmatpush1.bf16.msra.mxu0 %v20436_v60  ;;  %11833 = vmatpush1.bf16.msra.mxu1 %v20439_v5  ;;  %v20520_v60 = vld [vmem:[%s23323_s9 + $0x1400] ss:$16 sps:$4 sm:$0xff]   ;;  %v20523_v5 = vld [vmem:[%s23323_s9 + $0x1408] ss:$16 sps:$4 sm:$0xff]  }
 0x31c   : > { %10809 = vmatprep.subr.bf16.mxu0 %v20444_v6  ;;  %11834 = vmatprep.subr.bf16.mxu1 %v20447_v7  ;;  %v20528_v6 = vld [vmem:[%s23323_s9 + $0x1424] ss:$16 sps:$4 sm:$0xff]   ;;  %v20531_v7 = vld [vmem:[%s23323_s9 + $0x142c] ss:$16 sps:$4 sm:$0xff]  }
 0x31f   : > { %10810 = vmatpush1.bf16.msra.mxu0 %v20442_v8  ;;  %11835 = vmatpush1.bf16.msra.mxu1 %v20445_v9  ;;  %v24112_v8 = vrot.slane %v2182_v3, %v23395_v49  ;;  %v20529_v9 = vld [vmem:[%s23323_s9 + $0x1428] ss:$16 sps:$4 sm:$0xff]   ;;  %v20612_v3 = vld [vmem:[%s23323_s9 + $0x15e4] ss:$16 sps:$4 sm:$0xff]  }
 0x320   : > { %10811 = vmatprep.subr.bf16.mxu0 %v20450_v10  ;;  %11836 = vmatprep.subr.bf16.mxu1 %v20453_v11  ;;  %v20534_v10 = vld [vmem:[%s23323_s9 + $0x1444] ss:$16 sps:$4 sm:$0xff]   ;;  %v20537_v11 = vld [vmem:[%s23323_s9 + $0x144c] ss:$16 sps:$4 sm:$0xff]  }
 0x323   : > { %10812 = vmatpush1.bf16.msra.mxu0 %v20448_v12  ;;  %11837 = vmatpush1.bf16.msra.mxu1 %v20451_v14  ;;  %v20532_v12 = vld [vmem:[%s23323_s9 + $0x1440] ss:$16 sps:$4 sm:$0xff]   ;;  %v20535_v14 = vld [vmem:[%s23323_s9 + $0x1448] ss:$16 sps:$4 sm:$0xff]  }
 0x324   : > { %10813 = vmatprep.subr.bf16.mxu0 %v20456_v16  ;;  %11838 = vmatprep.subr.bf16.mxu1 %v20459_v52  ;;  %v20540_v16 = vld [vmem:[%s23323_s9 + $0x1464] ss:$16 sps:$4 sm:$0xff]   ;;  %v20543_v52 = vld [vmem:[%s23323_s9 + $0x146c] ss:$16 sps:$4 sm:$0xff]  }
 0x327   : > { %10814 = vmatpush1.bf16.msra.mxu0 %v20454_v17  ;;  %11839 = vmatpush1.bf16.msra.mxu1 %v20457_v18  ;;  %v20538_v17 = vld [vmem:[%s23323_s9 + $0x1460] ss:$16 sps:$4 sm:$0xff]   ;;  %v20541_v18 = vld [vmem:[%s23323_s9 + $0x1468] ss:$16 sps:$4 sm:$0xff]  }
 0x328   : > { %10815 = vmatprep.subr.bf16.mxu0 %v20462_v19  ;;  %11840 = vmatprep.subr.bf16.mxu1 %v20465_v20  ;;  %v20546_v19 = vld [vmem:[%s23323_s9 + $0x1484] ss:$16 sps:$4 sm:$0xff]   ;;  %v20549_v20 = vld [vmem:[%s23323_s9 + $0x148c] ss:$16 sps:$4 sm:$0xff]  }
 0x32b   : > { %10816 = vmatpush1.bf16.msra.mxu0 %v20460_v22  ;;  %11841 = vmatpush1.bf16.msra.mxu1 %v20463_v23  ;;  %v20544_v22 = vld [vmem:[%s23323_s9 + $0x1480] ss:$16 sps:$4 sm:$0xff]   ;;  %v20547_v23 = vld [vmem:[%s23323_s9 + $0x1488] ss:$16 sps:$4 sm:$0xff]  }
 0x32c   : > { %10817 = vmatprep.subr.bf16.mxu0 %v20468_v24  ;;  %11842 = vmatprep.subr.bf16.mxu1 %v20471_v26  ;;  %v20552_v24 = vld [vmem:[%s23323_s9 + $0x14a4] ss:$16 sps:$4 sm:$0xff]   ;;  %v20555_v26 = vld [vmem:[%s23323_s9 + $0x14ac] ss:$16 sps:$4 sm:$0xff]  }
 0x32f   : > { %10818 = vmatpush1.bf16.msra.mxu0 %v20466_v27  ;;  %11843 = vmatpush1.bf16.msra.mxu1 %v20469_v28  ;;  %v20550_v27 = vld [vmem:[%s23323_s9 + $0x14a0] ss:$16 sps:$4 sm:$0xff]   ;;  %v20553_v28 = vld [vmem:[%s23323_s9 + $0x14a8] ss:$16 sps:$4 sm:$0xff]  }
 0x330   : > { %10819 = vmatprep.subr.bf16.mxu0 %v20474_v29  ;;  %11844 = vmatprep.subr.bf16.mxu1 %v20477_v30  ;;  %v20558_v29 = vld [vmem:[%s23323_s9 + $0x14c4] ss:$16 sps:$4 sm:$0xff]   ;;  %v20561_v30 = vld [vmem:[%s23323_s9 + $0x14cc] ss:$16 sps:$4 sm:$0xff]  }
 0x333   : > { %10820 = vmatpush1.bf16.msra.mxu0 %v20472_v15  ;;  %11845 = vmatpush1.bf16.msra.mxu1 %v20475_v31  ;;  %v20556_v15 = vld [vmem:[%s23323_s9 + $0x14c0] ss:$16 sps:$4 sm:$0xff]   ;;  %v20559_v31 = vld [vmem:[%s23323_s9 + $0x14c8] ss:$16 sps:$4 sm:$0xff]  }
 0x334   : > { %10821 = vmatprep.subr.bf16.mxu0 %v20480_v32  ;;  %11846 = vmatprep.subr.bf16.mxu1 %v20483_v33  ;;  %v20564_v32 = vld [vmem:[%s23323_s9 + $0x14e4] ss:$16 sps:$4 sm:$0xff]   ;;  %v20567_v33 = vld [vmem:[%s23323_s9 + $0x14ec] ss:$16 sps:$4 sm:$0xff]  }
 0x337   : > { %10822 = vmatpush1.bf16.msra.mxu0 %v20478_v25  ;;  %11847 = vmatpush1.bf16.msra.mxu1 %v20481_v34  ;;  %v20562_v25 = vld [vmem:[%s23323_s9 + $0x14e0] ss:$16 sps:$4 sm:$0xff]   ;;  %v20565_v34 = vld [vmem:[%s23323_s9 + $0x14e8] ss:$16 sps:$4 sm:$0xff]  }
 0x338   : > { %10823 = vmatprep.subr.bf16.mxu0 %v20486_v36  ;;  %11848 = vmatprep.subr.bf16.mxu1 %v20489_v37  ;;  %v20570_v36 = vld [vmem:[%s23323_s9 + $0x1504] ss:$16 sps:$4 sm:$0xff]   ;;  %v20573_v37 = vld [vmem:[%s23323_s9 + $0x150c] ss:$16 sps:$4 sm:$0xff]  }
 0x33b   : > { %10824 = vmatpush1.bf16.msra.mxu0 %v20484_v39  ;;  %11849 = vmatpush1.bf16.msra.mxu1 %v20487_v40  ;;  %v20568_v39 = vld [vmem:[%s23323_s9 + $0x1500] ss:$16 sps:$4 sm:$0xff]   ;;  %v20571_v40 = vld [vmem:[%s23323_s9 + $0x1508] ss:$16 sps:$4 sm:$0xff]  }
 0x33c   : > { %10825 = vmatprep.subr.bf16.mxu0 %v20492_v21  ;;  %11850 = vmatprep.subr.bf16.mxu1 %v20495_v41  ;;  %v20576_v21 = vld [vmem:[%s23323_s9 + $0x1524] ss:$16 sps:$4 sm:$0xff]   ;;  %v20579_v41 = vld [vmem:[%s23323_s9 + $0x152c] ss:$16 sps:$4 sm:$0xff]  }
 0x33f   : > { %10826 = vmatpush1.bf16.msra.mxu0 %v20490_v43  ;;  %11851 = vmatpush1.bf16.msra.mxu1 %v20493_v44  ;;  %v20574_v43 = vld [vmem:[%s23323_s9 + $0x1520] ss:$16 sps:$4 sm:$0xff]   ;;  %v20577_v44 = vld [vmem:[%s23323_s9 + $0x1528] ss:$16 sps:$4 sm:$0xff]  }
 0x340   : > { %10827 = vmatprep.subr.bf16.mxu0 %v20498_v45  ;;  %11852 = vmatprep.subr.bf16.mxu1 %v20501_v46  ;;  %v20582_v45 = vld [vmem:[%s23323_s9 + $0x1544] ss:$16 sps:$4 sm:$0xff]   ;;  %v20585_v46 = vld [vmem:[%s23323_s9 + $0x154c] ss:$16 sps:$4 sm:$0xff]  }
 0x343   : > { %10828 = vmatpush1.bf16.msra.mxu0 %v20496_v47  ;;  %11853 = vmatpush1.bf16.msra.mxu1 %v20499_v50  ;;  %v20580_v47 = vld [vmem:[%s23323_s9 + $0x1540] ss:$16 sps:$4 sm:$0xff]   ;;  %v20583_v50 = vld [vmem:[%s23323_s9 + $0x1548] ss:$16 sps:$4 sm:$0xff]  }
 0x344   : > { %10829 = vmatprep.subr.bf16.mxu0 %v20504_v51  ;;  %11854 = vmatprep.subr.bf16.mxu1 %v20507_v53  ;;  %v20588_v51 = vld [vmem:[%s23323_s9 + $0x1564] ss:$16 sps:$4 sm:$0xff]   ;;  %v20591_v53 = vld [vmem:[%s23323_s9 + $0x156c] ss:$16 sps:$4 sm:$0xff]  }
 0x347   : > { %10830 = vmatpush1.bf16.msra.mxu0 %v20502_v54  ;;  %11855 = vmatpush1.bf16.msra.mxu1 %v20505_v55  ;;  %v20586_v54 = vld [vmem:[%s23323_s9 + $0x1560] ss:$16 sps:$4 sm:$0xff]   ;;  %v20589_v55 = vld [vmem:[%s23323_s9 + $0x1568] ss:$16 sps:$4 sm:$0xff]  }
 0x348   : > { %10831 = vmatprep.subr.bf16.mxu0 %v20510_v38  ;;  %11856 = vmatprep.subr.bf16.mxu1 %v20513_v56  ;;  %v20594_v38 = vld [vmem:[%s23323_s9 + $0x1584] ss:$16 sps:$4 sm:$0xff]   ;;  %v20597_v56 = vld [vmem:[%s23323_s9 + $0x158c] ss:$16 sps:$4 sm:$0xff]  }
 0x34b   : > { %10832 = vmatpush1.bf16.msra.mxu0 %v20508_v48  ;;  %11857 = vmatpush1.bf16.msra.mxu1 %v20511_v59  ;;  %v20600_v48 = vld [vmem:[%s23323_s9 + $0x15a4] ss:$16 sps:$4 sm:$0xff]   ;;  %v20603_v59 = vld [vmem:[%s23323_s9 + $0x15ac] ss:$16 sps:$4 sm:$0xff]  }
 0x34c   : > { %10833 = vmatprep.subr.bf16.mxu0 %v20516_v61  ;;  %11858 = vmatprep.subr.bf16.mxu1 %v20519_v62  ;;  %v20598_v61 = vld [vmem:[%s23323_s9 + $0x15a0] ss:$16 sps:$4 sm:$0xff]   ;;  %v20601_v62 = vld [vmem:[%s23323_s9 + $0x15a8] ss:$16 sps:$4 sm:$0xff]  }
 0x34f   : > { %10834 = vmatpush1.bf16.msra.mxu0 %v20514_v0  ;;  %11859 = vmatpush1.bf16.msra.mxu1 %v20517_v1  ;;  %v20606_v0 = vld [vmem:[%s23323_s9 + $0x15c4] ss:$16 sps:$4 sm:$0xff]   ;;  %v20609_v1 = vld [vmem:[%s23323_s9 + $0x15cc] ss:$16 sps:$4 sm:$0xff]  }
 0x350   : > { %10844 = vmatprep.subr.bf16.mxu0 %v20522_v35  ;;  %11869 = vmatprep.subr.bf16.mxu1 %v20525_v2  ;;  %v20604_v35 = vld [vmem:[%s23323_s9 + $0x15c0] ss:$16 sps:$4 sm:$0xff]   ;;  %v20607_v2 = vld [vmem:[%s23323_s9 + $0x15c8] ss:$16 sps:$4 sm:$0xff]  }
 0x352   : > { %10836 = vmatmul.mubr.bf16.vlgmr.msra.gmra.mrb[0].mxu0 %v2211_v4  ;;  %11861 = vmatmul.mubr.bf16.vlgmr.msra.gmra.mrb[0].mxu1 %v2211_v4  ;;  %v20615_v4 = vld [vmem:[%s23323_s9 + $0x15ec] ss:$16 sps:$4 sm:$0xff]  }
 0x353   : > { %10845 = vmatpush1.bf16.msra.mxu0 %v20520_v60  ;;  %11870 = vmatpush1.bf16.msra.mxu1 %v20523_v5  ;;  %v20610_v60 = vld [vmem:[%s23323_s9 + $0x15e0] ss:$16 sps:$4 sm:$0xff]   ;;  %v20613_v5 = vld [vmem:[%s23323_s9 + $0x15e8] ss:$16 sps:$4 sm:$0xff]  }
 0x354   : > { %10846 = vmatprep.subr.bf16.mxu0 %v20528_v6  ;;  %11871 = vmatprep.subr.bf16.mxu1 %v20531_v7  ;;  %v20619_v6 = vld [vmem:[%s23323_s9 + $0x1604] ss:$16 sps:$4 sm:$0xff]   ;;  %v20622_v7 = vld [vmem:[%s23323_s9 + $0x160c] ss:$16 sps:$4 sm:$0xff]  }
 0x355   : > { %10876 = vmatprep.mubr.bf16.mxu0 %v24112_v8  ;;  %11901 = vmatprep.mubr.bf16.mxu1 %v24112_v8 }
 0x357   : > { %10847 = vmatpush1.bf16.msra.mxu0 %v20526_v13  ;;  %11872 = vmatpush1.bf16.msra.mxu1 %v20529_v9  ;;  %v24178_v13 = vrot.slane %v24097_v63, %v23395_v49  ;;  %v20617_v9 = vld [vmem:[%s23323_s9 + $0x1600] ss:$16 sps:$4 sm:$0xff]  }
 0x358   : > { %10848 = vmatprep.subr.bf16.mxu0 %v20534_v10  ;;  %11873 = vmatprep.subr.bf16.mxu1 %v20537_v11  ;;  %v20620_v10 = vld [vmem:[%s23323_s9 + $0x1608] ss:$16 sps:$4 sm:$0xff]   ;;  %v20625_v11 = vld [vmem:[%s23323_s9 + $0x1624] ss:$16 sps:$4 sm:$0xff]   ;;  %v20623_v63 = vld [vmem:[%s23323_s9 + $0x1620] ss:$16 sps:$4 sm:$0xff]  }
 0x35b   : > { %10849 = vmatpush1.bf16.msra.mxu0 %v20532_v12  ;;  %11874 = vmatpush1.bf16.msra.mxu1 %v20535_v14  ;;  %v20628_v12 = vld [vmem:[%s23323_s9 + $0x162c] ss:$16 sps:$4 sm:$0xff]   ;;  %v2214_v14 = vcombine.high %v24112_v8, %v24112_v8  ;;  %v20629_v8 = vld [vmem:[%s23323_s9 + $0x1640] ss:$16 sps:$4 sm:$0xff]  }
 0x35c   : > { %10850 = vmatprep.subr.bf16.mxu0 %v20540_v16  ;;  %11875 = vmatprep.subr.bf16.mxu1 %v20543_v52  ;;  %v20626_v16 = vld [vmem:[%s23323_s9 + $0x1628] ss:$16 sps:$4 sm:$0xff]   ;;  %v20631_v52 = vld [vmem:[%s23323_s9 + $0x1644] ss:$16 sps:$4 sm:$0xff]  }
 0x35f   : > { %10851 = vmatpush1.bf16.msra.mxu0 %v20538_v17  ;;  %11876 = vmatpush1.bf16.msra.mxu1 %v20541_v18  ;;  %v20634_v17 = vld [vmem:[%s23323_s9 + $0x164c] ss:$16 sps:$4 sm:$0xff]   ;;  %v20632_v18 = vld [vmem:[%s23323_s9 + $0x1648] ss:$16 sps:$4 sm:$0xff]  }
 0x360   : > { %10852 = vmatprep.subr.bf16.mxu0 %v20546_v19  ;;  %11877 = vmatprep.subr.bf16.mxu1 %v20549_v20  ;;  %v20637_v19 = vld [vmem:[%s23323_s9 + $0x1664] ss:$16 sps:$4 sm:$0xff]   ;;  %v20640_v20 = vld [vmem:[%s23323_s9 + $0x166c] ss:$16 sps:$4 sm:$0xff]  }
 0x363   : > { %10853 = vmatpush1.bf16.msra.mxu0 %v20544_v22  ;;  %11878 = vmatpush1.bf16.msra.mxu1 %v20547_v23  ;;  %v20635_v22 = vld [vmem:[%s23323_s9 + $0x1660] ss:$16 sps:$4 sm:$0xff]   ;;  %v20638_v23 = vld [vmem:[%s23323_s9 + $0x1668] ss:$16 sps:$4 sm:$0xff]  }
 0x364   : > { %10854 = vmatprep.subr.bf16.mxu0 %v20552_v24  ;;  %11879 = vmatprep.subr.bf16.mxu1 %v20555_v26  ;;  %v20643_v24 = vld [vmem:[%s23323_s9 + $0x1684] ss:$16 sps:$4 sm:$0xff]   ;;  %v20646_v26 = vld [vmem:[%s23323_s9 + $0x168c] ss:$16 sps:$4 sm:$0xff]  }
 0x367   : > { %10855 = vmatpush1.bf16.msra.mxu0 %v20550_v27  ;;  %11880 = vmatpush1.bf16.msra.mxu1 %v20553_v28  ;;  %v20641_v27 = vld [vmem:[%s23323_s9 + $0x1680] ss:$16 sps:$4 sm:$0xff]   ;;  %v20644_v28 = vld [vmem:[%s23323_s9 + $0x1688] ss:$16 sps:$4 sm:$0xff]  }
 0x368   : > { %10856 = vmatprep.subr.bf16.mxu0 %v20558_v29  ;;  %11881 = vmatprep.subr.bf16.mxu1 %v20561_v30  ;;  %v20649_v29 = vld [vmem:[%s23323_s9 + $0x16a4] ss:$16 sps:$4 sm:$0xff]   ;;  %v20652_v30 = vld [vmem:[%s23323_s9 + $0x16ac] ss:$16 sps:$4 sm:$0xff]  }
 0x36b   : > { %10857 = vmatpush1.bf16.msra.mxu0 %v20556_v15  ;;  %11882 = vmatpush1.bf16.msra.mxu1 %v20559_v31  ;;  %v20647_v15 = vld [vmem:[%s23323_s9 + $0x16a0] ss:$16 sps:$4 sm:$0xff]   ;;  %v20650_v31 = vld [vmem:[%s23323_s9 + $0x16a8] ss:$16 sps:$4 sm:$0xff]  }
 0x36c   : > { %10858 = vmatprep.subr.bf16.mxu0 %v20564_v32  ;;  %11883 = vmatprep.subr.bf16.mxu1 %v20567_v33  ;;  %v20655_v32 = vld [vmem:[%s23323_s9 + $0x16c4] ss:$16 sps:$4 sm:$0xff]   ;;  %v20658_v33 = vld [vmem:[%s23323_s9 + $0x16cc] ss:$16 sps:$4 sm:$0xff]  }
 0x36f   : > { %10859 = vmatpush1.bf16.msra.mxu0 %v20562_v25  ;;  %11884 = vmatpush1.bf16.msra.mxu1 %v20565_v34  ;;  %v20653_v25 = vld [vmem:[%s23323_s9 + $0x16c0] ss:$16 sps:$4 sm:$0xff]   ;;  %v20656_v34 = vld [vmem:[%s23323_s9 + $0x16c8] ss:$16 sps:$4 sm:$0xff]  }
 0x370   : > { %10860 = vmatprep.subr.bf16.mxu0 %v20570_v36  ;;  %11885 = vmatprep.subr.bf16.mxu1 %v20573_v37  ;;  %v20661_v36 = vld [vmem:[%s23323_s9 + $0x16e4] ss:$16 sps:$4 sm:$0xff]   ;;  %v20664_v37 = vld [vmem:[%s23323_s9 + $0x16ec] ss:$16 sps:$4 sm:$0xff]  }
 0x373   : > { %10861 = vmatpush1.bf16.msra.mxu0 %v20568_v39  ;;  %11886 = vmatpush1.bf16.msra.mxu1 %v20571_v40  ;;  %v20659_v39 = vld [vmem:[%s23323_s9 + $0x16e0] ss:$16 sps:$4 sm:$0xff]   ;;  %v20662_v40 = vld [vmem:[%s23323_s9 + $0x16e8] ss:$16 sps:$4 sm:$0xff]  }
 0x374   : > { %10862 = vmatprep.subr.bf16.mxu0 %v20576_v21  ;;  %11887 = vmatprep.subr.bf16.mxu1 %v20579_v41  ;;  %v20667_v21 = vld [vmem:[%s23323_s9 + $0x1704] ss:$16 sps:$4 sm:$0xff]   ;;  %v20670_v41 = vld [vmem:[%s23323_s9 + $0x170c] ss:$16 sps:$4 sm:$0xff]  }
 0x377   : > { %10863 = vmatpush1.bf16.msra.mxu0 %v20574_v43  ;;  %11888 = vmatpush1.bf16.msra.mxu1 %v20577_v44  ;;  %v20665_v43 = vld [vmem:[%s23323_s9 + $0x1700] ss:$16 sps:$4 sm:$0xff]   ;;  %v20668_v44 = vld [vmem:[%s23323_s9 + $0x1708] ss:$16 sps:$4 sm:$0xff]  }
 0x378   : > { %10864 = vmatprep.subr.bf16.mxu0 %v20582_v45  ;;  %11889 = vmatprep.subr.bf16.mxu1 %v20585_v46  ;;  %v20673_v45 = vld [vmem:[%s23323_s9 + $0x1724] ss:$16 sps:$4 sm:$0xff]   ;;  %v20676_v46 = vld [vmem:[%s23323_s9 + $0x172c] ss:$16 sps:$4 sm:$0xff]  }
 0x37b   : > { %10865 = vmatpush1.bf16.msra.mxu0 %v20580_v47  ;;  %11890 = vmatpush1.bf16.msra.mxu1 %v20583_v50  ;;  %v20671_v47 = vld [vmem:[%s23323_s9 + $0x1720] ss:$16 sps:$4 sm:$0xff]   ;;  %v20674_v50 = vld [vmem:[%s23323_s9 + $0x1728] ss:$16 sps:$4 sm:$0xff]  }
 0x37c   : > { %10866 = vmatprep.subr.bf16.mxu0 %v20588_v51  ;;  %11891 = vmatprep.subr.bf16.mxu1 %v20591_v53  ;;  %v20679_v51 = vld [vmem:[%s23323_s9 + $0x1744] ss:$16 sps:$4 sm:$0xff]   ;;  %v20682_v53 = vld [vmem:[%s23323_s9 + $0x174c] ss:$16 sps:$4 sm:$0xff]  }
 0x37f   : > { %10867 = vmatpush1.bf16.msra.mxu0 %v20586_v54  ;;  %11892 = vmatpush1.bf16.msra.mxu1 %v20589_v55  ;;  %v20677_v54 = vld [vmem:[%s23323_s9 + $0x1740] ss:$16 sps:$4 sm:$0xff]   ;;  %v20680_v55 = vld [vmem:[%s23323_s9 + $0x1748] ss:$16 sps:$4 sm:$0xff]  }
 0x380   : > { %10868 = vmatprep.subr.bf16.mxu0 %v20594_v38  ;;  %11893 = vmatprep.subr.bf16.mxu1 %v20597_v56  ;;  %v20685_v38 = vld [vmem:[%s23323_s9 + $0x1764] ss:$16 sps:$4 sm:$0xff]   ;;  %v20688_v56 = vld [vmem:[%s23323_s9 + $0x176c] ss:$16 sps:$4 sm:$0xff]  }
 0x383   : > { %10869 = vmatpush1.bf16.msra.mxu0 %v20592_v57  ;;  %11894 = vmatpush1.bf16.msra.mxu1 %v20595_v58  ;;  %v20683_v57 = vld [vmem:[%s23323_s9 + $0x1760] ss:$16 sps:$4 sm:$0xff]   ;;  %v20686_v58 = vld [vmem:[%s23323_s9 + $0x1768] ss:$16 sps:$4 sm:$0xff]  }
 0x384   : > { %10870 = vmatprep.subr.bf16.mxu0 %v20600_v48  ;;  %11895 = vmatprep.subr.bf16.mxu1 %v20603_v59  ;;  %v20691_v48 = vld [vmem:[%s23323_s9 + $0x1784] ss:$16 sps:$4 sm:$0xff]   ;;  %v20694_v59 = vld [vmem:[%s23323_s9 + $0x178c] ss:$16 sps:$4 sm:$0xff]  }
 0x387   : > { %10871 = vmatpush1.bf16.msra.mxu0 %v20598_v61  ;;  %11896 = vmatpush1.bf16.msra.mxu1 %v20601_v62  ;;  %v20689_v61 = vld [vmem:[%s23323_s9 + $0x1780] ss:$16 sps:$4 sm:$0xff]   ;;  %v20692_v62 = vld [vmem:[%s23323_s9 + $0x1788] ss:$16 sps:$4 sm:$0xff]  }
 0x388   : > { %10872 = vmatprep.subr.bf16.mxu0 %v20606_v0  ;;  %11897 = vmatprep.subr.bf16.mxu1 %v20609_v1  ;;  %v20697_v0 = vld [vmem:[%s23323_s9 + $0x17a4] ss:$16 sps:$4 sm:$0xff]   ;;  %v20700_v1 = vld [vmem:[%s23323_s9 + $0x17ac] ss:$16 sps:$4 sm:$0xff]  }
 0x38b   : > { %10873 = vmatpush1.bf16.msra.mxu0 %v20604_v35  ;;  %11898 = vmatpush1.bf16.msra.mxu1 %v20607_v2  ;;  %v20695_v35 = vld [vmem:[%s23323_s9 + $0x17a0] ss:$16 sps:$4 sm:$0xff]   ;;  %v20698_v2 = vld [vmem:[%s23323_s9 + $0x17a8] ss:$16 sps:$4 sm:$0xff]  }
 0x38c   : > { %10874 = vmatprep.subr.bf16.mxu0 %v20612_v3  ;;  %11899 = vmatprep.subr.bf16.mxu1 %v20615_v4  ;;  %v20703_v3 = vld [vmem:[%s23323_s9 + $0x17c4] ss:$16 sps:$4 sm:$0xff]   ;;  %v20706_v4 = vld [vmem:[%s23323_s9 + $0x17cc] ss:$16 sps:$4 sm:$0xff]  }
 0x38f   : > { %10875 = vmatpush1.bf16.msra.mxu0 %v20610_v60  ;;  %11900 = vmatpush1.bf16.msra.mxu1 %v20613_v5  ;;  %v24243_v60 = vld [vmem:[%s25483_s0 + $0x18] sm:$0xff]  ;;  %v20701_v5 = vld [vmem:[%s23323_s9 + $0x17c0] ss:$16 sps:$4 sm:$0xff]  }
 0x390   : > { %10885 = vmatprep.subr.bf16.mxu0 %v20619_v6  ;;  %11910 = vmatprep.subr.bf16.mxu1 %v20622_v7  ;;  %v20704_v6 = vld [vmem:[%s23323_s9 + $0x17c8] ss:$16 sps:$4 sm:$0xff]   ;;  %v20709_v7 = vld [vmem:[%s23323_s9 + $0x17e4] ss:$16 sps:$4 sm:$0xff]  }
 0x392   : > { %10877 = vmatmul.mubr.bf16.vlgmr.msra.gmra.mrb[0].mxu0 %v24178_v13  ;;  %11902 = vmatmul.mubr.bf16.vlgmr.msra.gmra.mrb[0].mxu1 %v24178_v13 }
 0x393   : > { %10886 = vmatpush1.bf16.msra.mxu0 %v20617_v9  ;;  %11911 = vmatpush1.bf16.msra.mxu1 %v20620_v10  ;;  %v20712_v9 = vld [vmem:[%s23323_s9 + $0x17ec] ss:$16 sps:$4 sm:$0xff]   ;;  %v24251_v10 = vrot.slane %v24243_v60, %v23395_v49 }
 0x394   : > { %10887 = vmatprep.subr.bf16.mxu0 %v20625_v11  ;;  %11912 = vmatprep.subr.bf16.mxu1 %v20628_v12  ;;  %v20707_v11 = vld [vmem:[%s23323_s9 + $0x17e0] ss:$16 sps:$4 sm:$0xff]   ;;  %v20710_v12 = vld [vmem:[%s23323_s9 + $0x17e8] ss:$16 sps:$4 sm:$0xff]  }
 0x395   : > { %10917 = vmatprep.mubr.bf16.mxu0 %v2214_v14  ;;  %11942 = vmatprep.mubr.bf16.mxu1 %v2214_v14  ;;  %v20715_v14 = vld [vmem:[%s23323_s9 + $0x1804] ss:$16 sps:$4 sm:$0xff]  }
 0x397   : > { %10888 = vmatpush1.bf16.msra.mxu0 %v20623_v63  ;;  %11913 = vmatpush1.bf16.msra.mxu1 %v20626_v16  ;;  %v20718_v63 = vld [vmem:[%s23323_s9 + $0x180c] ss:$16 sps:$4 sm:$0xff]   ;;  %v2230_v16 = vcombine.high %v24251_v10, %v24251_v10 }
 0x398   : > { %10889 = vmatprep.subr.bf16.mxu0 %v20631_v52  ;;  %11914 = vmatprep.subr.bf16.mxu1 %v20634_v17  ;;  %v2212_v52 = vcombine.high %v24178_v13, %v24178_v13  ;;  %v20713_v17 = vld [vmem:[%s23323_s9 + $0x1800] ss:$16 sps:$4 sm:$0xff]  }
 0x399   : > { %v20719_v13 = vld [vmem:[%s23323_s9 + $0x1820] ss:$16 sps:$4 sm:$0xff]  }
 0x39b   : > { %10890 = vmatpush1.bf16.msra.mxu0 %v20629_v8  ;;  %11915 = vmatpush1.bf16.msra.mxu1 %v20632_v18  ;;  %v20716_v8 = vld [vmem:[%s23323_s9 + $0x1808] ss:$16 sps:$4 sm:$0xff]   ;;  %v20721_v18 = vld [vmem:[%s23323_s9 + $0x1824] ss:$16 sps:$4 sm:$0xff]  }
 0x39c   : > { %10891 = vmatprep.subr.bf16.mxu0 %v20637_v19  ;;  %11916 = vmatprep.subr.bf16.mxu1 %v20640_v20  ;;  %v20724_v19 = vld [vmem:[%s23323_s9 + $0x182c] ss:$16 sps:$4 sm:$0xff]   ;;  %v24266_v20 = vrot.slane %v2230_v16, %v23395_v49  ;;  %v20800_v16 = vld [vmem:[%s23323_s9 + $0x19c8] ss:$16 sps:$4 sm:$0xff]  }
 0x39f   : > { %10892 = vmatpush1.bf16.msra.mxu0 %v20635_v22  ;;  %11917 = vmatpush1.bf16.msra.mxu1 %v20638_v23  ;;  %v20722_v22 = vld [vmem:[%s23323_s9 + $0x1828] ss:$16 sps:$4 sm:$0xff]   ;;  %v20727_v23 = vld [vmem:[%s23323_s9 + $0x1844] ss:$16 sps:$4 sm:$0xff]  }
 0x3a0   : > { %10893 = vmatprep.subr.bf16.mxu0 %v20643_v24  ;;  %11918 = vmatprep.subr.bf16.mxu1 %v20646_v26  ;;  %v20730_v24 = vld [vmem:[%s23323_s9 + $0x184c] ss:$16 sps:$4 sm:$0xff]   ;;  %v20725_v26 = vld [vmem:[%s23323_s9 + $0x1840] ss:$16 sps:$4 sm:$0xff]  }
 0x3a3   : > { %10894 = vmatpush1.bf16.msra.mxu0 %v20641_v27  ;;  %11919 = vmatpush1.bf16.msra.mxu1 %v20644_v28  ;;  %v20728_v27 = vld [vmem:[%s23323_s9 + $0x1848] ss:$16 sps:$4 sm:$0xff]   ;;  %v20733_v28 = vld [vmem:[%s23323_s9 + $0x1864] ss:$16 sps:$4 sm:$0xff]  }
 0x3a4   : > { %10895 = vmatprep.subr.bf16.mxu0 %v20649_v29  ;;  %11920 = vmatprep.subr.bf16.mxu1 %v20652_v30  ;;  %v20736_v29 = vld [vmem:[%s23323_s9 + $0x186c] ss:$16 sps:$4 sm:$0xff]   ;;  %v20731_v30 = vld [vmem:[%s23323_s9 + $0x1860] ss:$16 sps:$4 sm:$0xff]  }
 0x3a7   : > { %10896 = vmatpush1.bf16.msra.mxu0 %v20647_v15  ;;  %11921 = vmatpush1.bf16.msra.mxu1 %v20650_v31  ;;  %v20734_v15 = vld [vmem:[%s23323_s9 + $0x1868] ss:$16 sps:$4 sm:$0xff]   ;;  %v20739_v31 = vld [vmem:[%s23323_s9 + $0x1884] ss:$16 sps:$4 sm:$0xff]  }
 0x3a8   : > { %10897 = vmatprep.subr.bf16.mxu0 %v20655_v32  ;;  %11922 = vmatprep.subr.bf16.mxu1 %v20658_v33  ;;  %v20742_v32 = vld [vmem:[%s23323_s9 + $0x188c] ss:$16 sps:$4 sm:$0xff]   ;;  %v20737_v33 = vld [vmem:[%s23323_s9 + $0x1880] ss:$16 sps:$4 sm:$0xff]  }
 0x3ab   : > { %10898 = vmatpush1.bf16.msra.mxu0 %v20653_v25  ;;  %11923 = vmatpush1.bf16.msra.mxu1 %v20656_v34  ;;  %v20740_v25 = vld [vmem:[%s23323_s9 + $0x1888] ss:$16 sps:$4 sm:$0xff]   ;;  %v20745_v34 = vld [vmem:[%s23323_s9 + $0x18a4] ss:$16 sps:$4 sm:$0xff]  }
 0x3ac   : > { %10899 = vmatprep.subr.bf16.mxu0 %v20661_v36  ;;  %11924 = vmatprep.subr.bf16.mxu1 %v20664_v37  ;;  %v20748_v36 = vld [vmem:[%s23323_s9 + $0x18ac] ss:$16 sps:$4 sm:$0xff]   ;;  %v20743_v37 = vld [vmem:[%s23323_s9 + $0x18a0] ss:$16 sps:$4 sm:$0xff]  }
 0x3af   : > { %10900 = vmatpush1.bf16.msra.mxu0 %v20659_v39  ;;  %11925 = vmatpush1.bf16.msra.mxu1 %v20662_v40  ;;  %v20746_v39 = vld [vmem:[%s23323_s9 + $0x18a8] ss:$16 sps:$4 sm:$0xff]   ;;  %v20751_v40 = vld [vmem:[%s23323_s9 + $0x18c4] ss:$16 sps:$4 sm:$0xff]  }
 0x3b0   : > { %10901 = vmatprep.subr.bf16.mxu0 %v20667_v21  ;;  %11926 = vmatprep.subr.bf16.mxu1 %v20670_v41  ;;  %v20754_v21 = vld [vmem:[%s23323_s9 + $0x18cc] ss:$16 sps:$4 sm:$0xff]   ;;  %v20749_v41 = vld [vmem:[%s23323_s9 + $0x18c0] ss:$16 sps:$4 sm:$0xff]  }
 0x3b3   : > { %10902 = vmatpush1.bf16.msra.mxu0 %v20665_v43  ;;  %11927 = vmatpush1.bf16.msra.mxu1 %v20668_v44  ;;  %v20752_v43 = vld [vmem:[%s23323_s9 + $0x18c8] ss:$16 sps:$4 sm:$0xff]   ;;  %v20757_v44 = vld [vmem:[%s23323_s9 + $0x18e4] ss:$16 sps:$4 sm:$0xff]  }
 0x3b4   : > { %10903 = vmatprep.subr.bf16.mxu0 %v20673_v45  ;;  %11928 = vmatprep.subr.bf16.mxu1 %v20676_v46  ;;  %v20760_v45 = vld [vmem:[%s23323_s9 + $0x18ec] ss:$16 sps:$4 sm:$0xff]   ;;  %v20755_v46 = vld [vmem:[%s23323_s9 + $0x18e0] ss:$16 sps:$4 sm:$0xff]  }
 0x3b7   : > { %10904 = vmatpush1.bf16.msra.mxu0 %v20671_v47  ;;  %11929 = vmatpush1.bf16.msra.mxu1 %v20674_v50  ;;  %v20758_v47 = vld [vmem:[%s23323_s9 + $0x18e8] ss:$16 sps:$4 sm:$0xff]   ;;  %v20763_v50 = vld [vmem:[%s23323_s9 + $0x1904] ss:$16 sps:$4 sm:$0xff]  }
 0x3b8   : > { %10905 = vmatprep.subr.bf16.mxu0 %v20679_v51  ;;  %11930 = vmatprep.subr.bf16.mxu1 %v20682_v53  ;;  %v20766_v51 = vld [vmem:[%s23323_s9 + $0x190c] ss:$16 sps:$4 sm:$0xff]   ;;  %v20761_v53 = vld [vmem:[%s23323_s9 + $0x1900] ss:$16 sps:$4 sm:$0xff]  }
 0x3bb   : > { %10906 = vmatpush1.bf16.msra.mxu0 %v20677_v54  ;;  %11931 = vmatpush1.bf16.msra.mxu1 %v20680_v55  ;;  %v20764_v54 = vld [vmem:[%s23323_s9 + $0x1908] ss:$16 sps:$4 sm:$0xff]   ;;  %v20769_v55 = vld [vmem:[%s23323_s9 + $0x1924] ss:$16 sps:$4 sm:$0xff]  }
 0x3bc   : > { %10907 = vmatprep.subr.bf16.mxu0 %v20685_v38  ;;  %11932 = vmatprep.subr.bf16.mxu1 %v20688_v56  ;;  %v20772_v38 = vld [vmem:[%s23323_s9 + $0x192c] ss:$16 sps:$4 sm:$0xff]   ;;  %v20767_v56 = vld [vmem:[%s23323_s9 + $0x1920] ss:$16 sps:$4 sm:$0xff]  }
 0x3bf   : > { %10908 = vmatpush1.bf16.msra.mxu0 %v20683_v57  ;;  %11933 = vmatpush1.bf16.msra.mxu1 %v20686_v58  ;;  %v20770_v57 = vld [vmem:[%s23323_s9 + $0x1928] ss:$16 sps:$4 sm:$0xff]   ;;  %v20775_v58 = vld [vmem:[%s23323_s9 + $0x1944] ss:$16 sps:$4 sm:$0xff]  }
 0x3c0   : > { %10909 = vmatprep.subr.bf16.mxu0 %v20691_v48  ;;  %11934 = vmatprep.subr.bf16.mxu1 %v20694_v59  ;;  %v20778_v48 = vld [vmem:[%s23323_s9 + $0x194c] ss:$16 sps:$4 sm:$0xff]   ;;  %v20773_v59 = vld [vmem:[%s23323_s9 + $0x1940] ss:$16 sps:$4 sm:$0xff]  }
 0x3c3   : > { %10910 = vmatpush1.bf16.msra.mxu0 %v20689_v61  ;;  %11935 = vmatpush1.bf16.msra.mxu1 %v20692_v62  ;;  %v20776_v61 = vld [vmem:[%s23323_s9 + $0x1948] ss:$16 sps:$4 sm:$0xff]   ;;  %v20781_v62 = vld [vmem:[%s23323_s9 + $0x1964] ss:$16 sps:$4 sm:$0xff]  }
 0x3c4   : > { %10911 = vmatprep.subr.bf16.mxu0 %v20697_v0  ;;  %11936 = vmatprep.subr.bf16.mxu1 %v20700_v1  ;;  %v20784_v0 = vld [vmem:[%s23323_s9 + $0x196c] ss:$16 sps:$4 sm:$0xff]   ;;  %v20779_v1 = vld [vmem:[%s23323_s9 + $0x1960] ss:$16 sps:$4 sm:$0xff]  }
 0x3c7   : > { %10912 = vmatpush1.bf16.msra.mxu0 %v20695_v35  ;;  %11937 = vmatpush1.bf16.msra.mxu1 %v20698_v2  ;;  %v20782_v35 = vld [vmem:[%s23323_s9 + $0x1968] ss:$16 sps:$4 sm:$0xff]   ;;  %v20787_v2 = vld [vmem:[%s23323_s9 + $0x1984] ss:$16 sps:$4 sm:$0xff]  }
 0x3c8   : > { %10913 = vmatprep.subr.bf16.mxu0 %v20703_v3  ;;  %11938 = vmatprep.subr.bf16.mxu1 %v20706_v4  ;;  %v20790_v3 = vld [vmem:[%s23323_s9 + $0x198c] ss:$16 sps:$4 sm:$0xff]   ;;  %v20785_v4 = vld [vmem:[%s23323_s9 + $0x1980] ss:$16 sps:$4 sm:$0xff]  }
 0x3cb   : > { %10914 = vmatpush1.bf16.msra.mxu0 %v20701_v5  ;;  %11939 = vmatpush1.bf16.msra.mxu1 %v20704_v6  ;;  %v20788_v5 = vld [vmem:[%s23323_s9 + $0x1988] ss:$16 sps:$4 sm:$0xff]   ;;  %v20793_v6 = vld [vmem:[%s23323_s9 + $0x19a4] ss:$16 sps:$4 sm:$0xff]  }
 0x3cc   : > { %10915 = vmatprep.subr.bf16.mxu0 %v20709_v7  ;;  %11940 = vmatprep.subr.bf16.mxu1 %v20712_v9  ;;  %v20796_v7 = vld [vmem:[%s23323_s9 + $0x19ac] ss:$16 sps:$4 sm:$0xff]   ;;  %v20791_v9 = vld [vmem:[%s23323_s9 + $0x19a0] ss:$16 sps:$4 sm:$0xff]  }
 0x3cf   : > { %10916 = vmatpush1.bf16.msra.mxu0 %v20707_v11  ;;  %11941 = vmatpush1.bf16.msra.mxu1 %v20710_v12  ;;  %v20794_v11 = vld [vmem:[%s23323_s9 + $0x19a8] ss:$16 sps:$4 sm:$0xff]   ;;  %v20799_v12 = vld [vmem:[%s23323_s9 + $0x19c4] ss:$16 sps:$4 sm:$0xff]  }
 0x3d0   : > { %10926 = vmatprep.subr.bf16.mxu0 %v20715_v14  ;;  %11951 = vmatprep.subr.bf16.mxu1 %v20718_v63  ;;  %v20802_v14 = vld [vmem:[%s23323_s9 + $0x19cc] ss:$16 sps:$4 sm:$0xff]   ;;  %v20797_v63 = vld [vmem:[%s23323_s9 + $0x19c0] ss:$16 sps:$4 sm:$0xff]  }
 0x3d2   : > { %10918 = vmatmul.mubr.bf16.vlgmr.msra.gmra.mrb[0].mxu0 %v2212_v52  ;;  %11943 = vmatmul.mubr.bf16.vlgmr.msra.gmra.mrb[0].mxu1 %v2212_v52  ;;  %v20805_v52 = vld [vmem:[%s23323_s9 + $0x19e4] ss:$16 sps:$4 sm:$0xff]  }
 0x3d3   : > { %10927 = vmatpush1.bf16.msra.mxu0 %v20713_v17  ;;  %11952 = vmatpush1.bf16.msra.mxu1 %v20716_v8  ;;  %v20808_v17 = vld [vmem:[%s23323_s9 + $0x19ec] ss:$16 sps:$4 sm:$0xff]   ;;  %v20803_v8 = vld [vmem:[%s23323_s9 + $0x19e0] ss:$16 sps:$4 sm:$0xff]  }
 0x3d4   : > { %10928 = vmatprep.subr.bf16.mxu0 %v20721_v18  ;;  %11953 = vmatprep.subr.bf16.mxu1 %v20724_v19  ;;  %v20806_v18 = vld [vmem:[%s23323_s9 + $0x19e8] ss:$16 sps:$4 sm:$0xff]   ;;  %v20811_v19 = vld [vmem:[%s23323_s9 + $0x1a04] ss:$16 sps:$4 sm:$0xff]  }
 0x3d5   : > { %10958 = vmatprep.mubr.bf16.mxu0 %v24266_v20  ;;  %11983 = vmatprep.mubr.bf16.mxu1 %v24266_v20 }
 0x3d7   : > { %10929 = vmatpush1.bf16.msra.mxu0 %v20719_v13  ;;  %11954 = vmatpush1.bf16.msra.mxu1 %v20722_v22  ;;  %v20814_v13 = vld [vmem:[%s23323_s9 + $0x1a0c] ss:$16 sps:$4 sm:$0xff]   ;;  %v24332_v22 = vrot.slane %v24251_v10, %v23395_v49  ;;  %v20815_v10 = vld [vmem:[%s23323_s9 + $0x1a20] ss:$16 sps:$4 sm:$0xff]  }
 0x3d8   : > { %10930 = vmatprep.subr.bf16.mxu0 %v20727_v23  ;;  %11955 = vmatprep.subr.bf16.mxu1 %v20730_v24  ;;  %v20809_v23 = vld [vmem:[%s23323_s9 + $0x1a00] ss:$16 sps:$4 sm:$0xff]   ;;  %v20812_v24 = vld [vmem:[%s23323_s9 + $0x1a08] ss:$16 sps:$4 sm:$0xff]  }
 0x3db   : > { %10931 = vmatpush1.bf16.msra.mxu0 %v20725_v26  ;;  %11956 = vmatpush1.bf16.msra.mxu1 %v20728_v27  ;;  %v20817_v26 = vld [vmem:[%s23323_s9 + $0x1a24] ss:$16 sps:$4 sm:$0xff]   ;;  %v20820_v27 = vld [vmem:[%s23323_s9 + $0x1a2c] ss:$16 sps:$4 sm:$0xff]  }
 0x3dc   : > { %10932 = vmatprep.subr.bf16.mxu0 %v20733_v28  ;;  %11957 = vmatprep.subr.bf16.mxu1 %v20736_v29  ;;  %v2262_v28 = vcombine.high %v24266_v20, %v24266_v20  ;;  %v20818_v29 = vld [vmem:[%s23323_s9 + $0x1a28] ss:$16 sps:$4 sm:$0xff]   ;;  %v20821_v20 = vld [vmem:[%s23323_s9 + $0x1a40] ss:$16 sps:$4 sm:$0xff]  }
 0x3df   : > { %10933 = vmatpush1.bf16.msra.mxu0 %v20731_v30  ;;  %11958 = vmatpush1.bf16.msra.mxu1 %v20734_v15  ;;  %v20823_v30 = vld [vmem:[%s23323_s9 + $0x1a44] ss:$16 sps:$4 sm:$0xff]   ;;  %v20826_v15 = vld [vmem:[%s23323_s9 + $0x1a4c] ss:$16 sps:$4 sm:$0xff]  }
 0x3e0   : > { %10934 = vmatprep.subr.bf16.mxu0 %v20739_v31  ;;  %11959 = vmatprep.subr.bf16.mxu1 %v20742_v32  ;;  %v20824_v31 = vld [vmem:[%s23323_s9 + $0x1a48] ss:$16 sps:$4 sm:$0xff]   ;;  %v20829_v32 = vld [vmem:[%s23323_s9 + $0x1a64] ss:$16 sps:$4 sm:$0xff]  }
 0x3e3   : > { %10935 = vmatpush1.bf16.msra.mxu0 %v20737_v33  ;;  %11960 = vmatpush1.bf16.msra.mxu1 %v20740_v25  ;;  %v20832_v33 = vld [vmem:[%s23323_s9 + $0x1a6c] ss:$16 sps:$4 sm:$0xff]   ;;  %v20827_v25 = vld [vmem:[%s23323_s9 + $0x1a60] ss:$16 sps:$4 sm:$0xff]  }
 0x3e4   : > { %10936 = vmatprep.subr.bf16.mxu0 %v20745_v34  ;;  %11961 = vmatprep.subr.bf16.mxu1 %v20748_v36  ;;  %v20830_v34 = vld [vmem:[%s23323_s9 + $0x1a68] ss:$16 sps:$4 sm:$0xff]   ;;  %v20835_v36 = vld [vmem:[%s23323_s9 + $0x1a84] ss:$16 sps:$4 sm:$0xff]  }
 0x3e7   : > { %10937 = vmatpush1.bf16.msra.mxu0 %v20743_v37  ;;  %11962 = vmatpush1.bf16.msra.mxu1 %v20746_v39  ;;  %v20838_v37 = vld [vmem:[%s23323_s9 + $0x1a8c] ss:$16 sps:$4 sm:$0xff]   ;;  %v20833_v39 = vld [vmem:[%s23323_s9 + $0x1a80] ss:$16 sps:$4 sm:$0xff]  }
 0x3e8   : > { %10938 = vmatprep.subr.bf16.mxu0 %v20751_v40  ;;  %11963 = vmatprep.subr.bf16.mxu1 %v20754_v21  ;;  %v20836_v40 = vld [vmem:[%s23323_s9 + $0x1a88] ss:$16 sps:$4 sm:$0xff]   ;;  %v20841_v21 = vld [vmem:[%s23323_s9 + $0x1aa4] ss:$16 sps:$4 sm:$0xff]  }
 0x3eb   : > { %10939 = vmatpush1.bf16.msra.mxu0 %v20749_v41  ;;  %11964 = vmatpush1.bf16.msra.mxu1 %v20752_v43  ;;  %v20844_v41 = vld [vmem:[%s23323_s9 + $0x1aac] ss:$16 sps:$4 sm:$0xff]   ;;  %v20839_v43 = vld [vmem:[%s23323_s9 + $0x1aa0] ss:$16 sps:$4 sm:$0xff]  }
 0x3ec   : > { %10940 = vmatprep.subr.bf16.mxu0 %v20757_v44  ;;  %11965 = vmatprep.subr.bf16.mxu1 %v20760_v45  ;;  %v20842_v44 = vld [vmem:[%s23323_s9 + $0x1aa8] ss:$16 sps:$4 sm:$0xff]   ;;  %v20847_v45 = vld [vmem:[%s23323_s9 + $0x1ac4] ss:$16 sps:$4 sm:$0xff]  }
 0x3ef   : > { %10941 = vmatpush1.bf16.msra.mxu0 %v20755_v46  ;;  %11966 = vmatpush1.bf16.msra.mxu1 %v20758_v47  ;;  %v20850_v46 = vld [vmem:[%s23323_s9 + $0x1acc] ss:$16 sps:$4 sm:$0xff]   ;;  %v20845_v47 = vld [vmem:[%s23323_s9 + $0x1ac0] ss:$16 sps:$4 sm:$0xff]  }
 0x3f0   : > { %10942 = vmatprep.subr.bf16.mxu0 %v20763_v50  ;;  %11967 = vmatprep.subr.bf16.mxu1 %v20766_v51  ;;  %v20848_v50 = vld [vmem:[%s23323_s9 + $0x1ac8] ss:$16 sps:$4 sm:$0xff]   ;;  %v20853_v51 = vld [vmem:[%s23323_s9 + $0x1ae4] ss:$16 sps:$4 sm:$0xff]  }
 0x3f3   : > { %10943 = vmatpush1.bf16.msra.mxu0 %v20761_v53  ;;  %11968 = vmatpush1.bf16.msra.mxu1 %v20764_v54  ;;  %v20856_v53 = vld [vmem:[%s23323_s9 + $0x1aec] ss:$16 sps:$4 sm:$0xff]   ;;  %v20851_v54 = vld [vmem:[%s23323_s9 + $0x1ae0] ss:$16 sps:$4 sm:$0xff]  }
 0x3f4   : > { %10944 = vmatprep.subr.bf16.mxu0 %v20769_v55  ;;  %11969 = vmatprep.subr.bf16.mxu1 %v20772_v38  ;;  %v20854_v55 = vld [vmem:[%s23323_s9 + $0x1ae8] ss:$16 sps:$4 sm:$0xff]   ;;  %v20859_v38 = vld [vmem:[%s23323_s9 + $0x1b04] ss:$16 sps:$4 sm:$0xff]  }
 0x3f7   : > { %10945 = vmatpush1.bf16.msra.mxu0 %v20767_v56  ;;  %11970 = vmatpush1.bf16.msra.mxu1 %v20770_v57  ;;  %v20862_v56 = vld [vmem:[%s23323_s9 + $0x1b0c] ss:$16 sps:$4 sm:$0xff]   ;;  %v20857_v57 = vld [vmem:[%s23323_s9 + $0x1b00] ss:$16 sps:$4 sm:$0xff]  }
 0x3f8   : > { %10946 = vmatprep.subr.bf16.mxu0 %v20775_v58  ;;  %11971 = vmatprep.subr.bf16.mxu1 %v20778_v48  ;;  %v20860_v58 = vld [vmem:[%s23323_s9 + $0x1b08] ss:$16 sps:$4 sm:$0xff]   ;;  %v20865_v48 = vld [vmem:[%s23323_s9 + $0x1b24] ss:$16 sps:$4 sm:$0xff]  }
 0x3fb   : > { %10947 = vmatpush1.bf16.msra.mxu0 %v20773_v59  ;;  %11972 = vmatpush1.bf16.msra.mxu1 %v20776_v61  ;;  %v20868_v59 = vld [vmem:[%s23323_s9 + $0x1b2c] ss:$16 sps:$4 sm:$0xff]   ;;  %v20863_v61 = vld [vmem:[%s23323_s9 + $0x1b20] ss:$16 sps:$4 sm:$0xff]  }
 0x3fc   : > { %10948 = vmatprep.subr.bf16.mxu0 %v20781_v62  ;;  %11973 = vmatprep.subr.bf16.mxu1 %v20784_v0  ;;  %v20866_v62 = vld [vmem:[%s23323_s9 + $0x1b28] ss:$16 sps:$4 sm:$0xff]   ;;  %v20871_v0 = vld [vmem:[%s23323_s9 + $0x1b44] ss:$16 sps:$4 sm:$0xff]  }
 0x3ff   : > { %10949 = vmatpush1.bf16.msra.mxu0 %v20779_v1  ;;  %11974 = vmatpush1.bf16.msra.mxu1 %v20782_v35  ;;  %v20874_v1 = vld [vmem:[%s23323_s9 + $0x1b4c] ss:$16 sps:$4 sm:$0xff]   ;;  %v20869_v35 = vld [vmem:[%s23323_s9 + $0x1b40] ss:$16 sps:$4 sm:$0xff]  }
 0x400   : > { %10950 = vmatprep.subr.bf16.mxu0 %v20787_v2  ;;  %11975 = vmatprep.subr.bf16.mxu1 %v20790_v3  ;;  %v20872_v2 = vld [vmem:[%s23323_s9 + $0x1b48] ss:$16 sps:$4 sm:$0xff]   ;;  %v20877_v3 = vld [vmem:[%s23323_s9 + $0x1b64] ss:$16 sps:$4 sm:$0xff]  }
 0x403   : > { %10951 = vmatpush1.bf16.msra.mxu0 %v20785_v4  ;;  %11976 = vmatpush1.bf16.msra.mxu1 %v20788_v5  ;;  %v20880_v4 = vld [vmem:[%s23323_s9 + $0x1b6c] ss:$16 sps:$4 sm:$0xff]   ;;  %v20875_v5 = vld [vmem:[%s23323_s9 + $0x1b60] ss:$16 sps:$4 sm:$0xff]  }
 0x404   : > { %10952 = vmatprep.subr.bf16.mxu0 %v20793_v6  ;;  %11977 = vmatprep.subr.bf16.mxu1 %v20796_v7  ;;  %v20878_v6 = vld [vmem:[%s23323_s9 + $0x1b68] ss:$16 sps:$4 sm:$0xff]   ;;  %v20883_v7 = vld [vmem:[%s23323_s9 + $0x1b84] ss:$16 sps:$4 sm:$0xff]  }
 0x407   : > { %10953 = vmatpush1.bf16.msra.mxu0 %v20791_v9  ;;  %11978 = vmatpush1.bf16.msra.mxu1 %v20794_v11  ;;  %v20886_v9 = vld [vmem:[%s23323_s9 + $0x1b8c] ss:$16 sps:$4 sm:$0xff]   ;;  %v20881_v11 = vld [vmem:[%s23323_s9 + $0x1b80] ss:$16 sps:$4 sm:$0xff]  }
 0x408   : > { %10954 = vmatprep.subr.bf16.mxu0 %v20799_v12  ;;  %11979 = vmatprep.subr.bf16.mxu1 %v20802_v14  ;;  %v20884_v12 = vld [vmem:[%s23323_s9 + $0x1b88] ss:$16 sps:$4 sm:$0xff]   ;;  %v20889_v14 = vld [vmem:[%s23323_s9 + $0x1ba4] ss:$16 sps:$4 sm:$0xff]  }
 0x40b   : > { %10955 = vmatpush1.bf16.msra.mxu0 %v20797_v63  ;;  %11980 = vmatpush1.bf16.msra.mxu1 %v20800_v16  ;;  %v20892_v63 = vld [vmem:[%s23323_s9 + $0x1bac] ss:$16 sps:$4 sm:$0xff]   ;;  %v20887_v16 = vld [vmem:[%s23323_s9 + $0x1ba0] ss:$16 sps:$4 sm:$0xff]  }
 0x40c   : > { %10956 = vmatprep.subr.bf16.mxu0 %v20805_v52  ;;  %11981 = vmatprep.subr.bf16.mxu1 %v20808_v17  ;;  %v20890_v52 = vld [vmem:[%s23323_s9 + $0x1ba8] ss:$16 sps:$4 sm:$0xff]   ;;  %v20895_v17 = vld [vmem:[%s23323_s9 + $0x1bc4] ss:$16 sps:$4 sm:$0xff]  }
 0x40f   : > { %10957 = vmatpush1.bf16.msra.mxu0 %v20803_v8  ;;  %11982 = vmatpush1.bf16.msra.mxu1 %v20806_v18  ;;  %v20898_v8 = vld [vmem:[%s23323_s9 + $0x1bcc] ss:$16 sps:$4 sm:$0xff]   ;;  %v2215_v18 = vcombine.high %v24243_v60, %v24243_v60  ;;  %v20899_v60 = vld [vmem:[%s23323_s9 + $0x1be0] ss:$16 sps:$4 sm:$0xff]  }
 0x410   : > { %10967 = vmatprep.subr.bf16.mxu0 %v20811_v19  ;;  %11992 = vmatprep.subr.bf16.mxu1 %v20814_v13  ;;  %v20893_v19 = vld [vmem:[%s23323_s9 + $0x1bc0] ss:$16 sps:$4 sm:$0xff]   ;;  %v20896_v13 = vld [vmem:[%s23323_s9 + $0x1bc8] ss:$16 sps:$4 sm:$0xff]  }
 0x412   : > { %10959 = vmatmul.mubr.bf16.vlgmr.msra.gmra.mrb[0].mxu0 %v24332_v22  ;;  %11984 = vmatmul.mubr.bf16.vlgmr.msra.gmra.mrb[0].mxu1 %v24332_v22 }
 0x413   : > { %10968 = vmatpush1.bf16.msra.mxu0 %v20809_v23  ;;  %11993 = vmatpush1.bf16.msra.mxu1 %v20812_v24  ;;  %v20901_v23 = vld [vmem:[%s23323_s9 + $0x1be4] ss:$16 sps:$4 sm:$0xff]   ;;  %v20904_v24 = vld [vmem:[%s23323_s9 + $0x1bec] ss:$16 sps:$4 sm:$0xff]  }
 0x414   : > { %10969 = vmatprep.subr.bf16.mxu0 %v20817_v26  ;;  %11994 = vmatprep.subr.bf16.mxu1 %v20820_v27  ;;  %v24401_v26 = vrot.slane %v2215_v18, %v23395_v49  ;;  %v20902_v27 = vld [vmem:[%s23323_s9 + $0x1be8] ss:$16 sps:$4 sm:$0xff]  }
 0x415   : > { %10999 = vmatprep.mubr.bf16.mxu0 %v2262_v28  ;;  %12024 = vmatprep.mubr.bf16.mxu1 %v2262_v28  ;;  %v20907_v28 = vld [vmem:[%s23323_s9 + $0x1c04] ss:$16 sps:$4 sm:$0xff]   ;;  %v20980_v18 = vld [vmem:[%s23323_s9 + $0x1d88] ss:$16 sps:$4 sm:$0xff]  }
 0x417   : > { %10970 = vmatpush1.bf16.msra.mxu0 %v20815_v10  ;;  %11995 = vmatpush1.bf16.msra.mxu1 %v20818_v29  ;;  %v20910_v10 = vld [vmem:[%s23323_s9 + $0x1c0c] ss:$16 sps:$4 sm:$0xff]   ;;  %v2231_v29 = vcombine.high %v24401_v26, %v24401_v26 }
 0x418   : > { %10971 = vmatprep.subr.bf16.mxu0 %v20823_v30  ;;  %11996 = vmatprep.subr.bf16.mxu1 %v20826_v15  ;;  %v2260_v30 = vcombine.high %v24332_v22, %v24332_v22  ;;  %v20905_v15 = vld [vmem:[%s23323_s9 + $0x1c00] ss:$16 sps:$4 sm:$0xff]  }
 0x419   : > { %v20911_v22 = vld [vmem:[%s23323_s9 + $0x1c20] ss:$16 sps:$4 sm:$0xff]  }
 0x41b   : > { %10972 = vmatpush1.bf16.msra.mxu0 %v20821_v20  ;;  %11997 = vmatpush1.bf16.msra.mxu1 %v20824_v31  ;;  %v20908_v20 = vld [vmem:[%s23323_s9 + $0x1c08] ss:$16 sps:$4 sm:$0xff]   ;;  %v20913_v31 = vld [vmem:[%s23323_s9 + $0x1c24] ss:$16 sps:$4 sm:$0xff]  }
 0x41c   : > { %10973 = vmatprep.subr.bf16.mxu0 %v20829_v32  ;;  %11998 = vmatprep.subr.bf16.mxu1 %v20832_v33  ;;  %v20916_v32 = vld [vmem:[%s23323_s9 + $0x1c2c] ss:$16 sps:$4 sm:$0xff]   ;;  %v24416_v33 = vrot.slane %v2231_v29, %v23395_v49  ;;  %v20997_v29 = vld [vmem:[%s23323_s9 + $0x1de4] ss:$16 sps:$4 sm:$0xff]  }
 0x41f   : > { %10974 = vmatpush1.bf16.msra.mxu0 %v20827_v25  ;;  %11999 = vmatpush1.bf16.msra.mxu1 %v20830_v34  ;;  %v20914_v25 = vld [vmem:[%s23323_s9 + $0x1c28] ss:$16 sps:$4 sm:$0xff]   ;;  %v20919_v34 = vld [vmem:[%s23323_s9 + $0x1c44] ss:$16 sps:$4 sm:$0xff]  }
 0x420   : > { %10975 = vmatprep.subr.bf16.mxu0 %v20835_v36  ;;  %12000 = vmatprep.subr.bf16.mxu1 %v20838_v37  ;;  %v20922_v36 = vld [vmem:[%s23323_s9 + $0x1c4c] ss:$16 sps:$4 sm:$0xff]   ;;  %v20917_v37 = vld [vmem:[%s23323_s9 + $0x1c40] ss:$16 sps:$4 sm:$0xff]  }
 0x423   : > { %10976 = vmatpush1.bf16.msra.mxu0 %v20833_v39  ;;  %12001 = vmatpush1.bf16.msra.mxu1 %v20836_v40  ;;  %v20920_v39 = vld [vmem:[%s23323_s9 + $0x1c48] ss:$16 sps:$4 sm:$0xff]   ;;  %v20925_v40 = vld [vmem:[%s23323_s9 + $0x1c64] ss:$16 sps:$4 sm:$0xff]  }
 0x424   : > { %10977 = vmatprep.subr.bf16.mxu0 %v20841_v21  ;;  %12002 = vmatprep.subr.bf16.mxu1 %v20844_v41  ;;  %v20928_v21 = vld [vmem:[%s23323_s9 + $0x1c6c] ss:$16 sps:$4 sm:$0xff]   ;;  %v20923_v41 = vld [vmem:[%s23323_s9 + $0x1c60] ss:$16 sps:$4 sm:$0xff]  }
 0x427   : > { %10978 = vmatpush1.bf16.msra.mxu0 %v20839_v43  ;;  %12003 = vmatpush1.bf16.msra.mxu1 %v20842_v44  ;;  %v20926_v43 = vld [vmem:[%s23323_s9 + $0x1c68] ss:$16 sps:$4 sm:$0xff]   ;;  %v20931_v44 = vld [vmem:[%s23323_s9 + $0x1c84] ss:$16 sps:$4 sm:$0xff]  }
 0x428   : > { %10979 = vmatprep.subr.bf16.mxu0 %v20847_v45  ;;  %12004 = vmatprep.subr.bf16.mxu1 %v20850_v46  ;;  %v20934_v45 = vld [vmem:[%s23323_s9 + $0x1c8c] ss:$16 sps:$4 sm:$0xff]   ;;  %v20929_v46 = vld [vmem:[%s23323_s9 + $0x1c80] ss:$16 sps:$4 sm:$0xff]  }
 0x42b   : > { %10980 = vmatpush1.bf16.msra.mxu0 %v20845_v47  ;;  %12005 = vmatpush1.bf16.msra.mxu1 %v20848_v50  ;;  %v20932_v47 = vld [vmem:[%s23323_s9 + $0x1c88] ss:$16 sps:$4 sm:$0xff]   ;;  %v20937_v50 = vld [vmem:[%s23323_s9 + $0x1ca4] ss:$16 sps:$4 sm:$0xff]  }
 0x42c   : > { %10981 = vmatprep.subr.bf16.mxu0 %v20853_v51  ;;  %12006 = vmatprep.subr.bf16.mxu1 %v20856_v53  ;;  %v20940_v51 = vld [vmem:[%s23323_s9 + $0x1cac] ss:$16 sps:$4 sm:$0xff]   ;;  %v20935_v53 = vld [vmem:[%s23323_s9 + $0x1ca0] ss:$16 sps:$4 sm:$0xff]  }
 0x42f   : > { %10982 = vmatpush1.bf16.msra.mxu0 %v20851_v54  ;;  %12007 = vmatpush1.bf16.msra.mxu1 %v20854_v55  ;;  %v20938_v54 = vld [vmem:[%s23323_s9 + $0x1ca8] ss:$16 sps:$4 sm:$0xff]   ;;  %v20943_v55 = vld [vmem:[%s23323_s9 + $0x1cc4] ss:$16 sps:$4 sm:$0xff]  }
 0x430   : > { %10983 = vmatprep.subr.bf16.mxu0 %v20859_v38  ;;  %12008 = vmatprep.subr.bf16.mxu1 %v20862_v56  ;;  %v20946_v38 = vld [vmem:[%s23323_s9 + $0x1ccc] ss:$16 sps:$4 sm:$0xff]   ;;  %v20941_v56 = vld [vmem:[%s23323_s9 + $0x1cc0] ss:$16 sps:$4 sm:$0xff]  }
 0x433   : > { %10984 = vmatpush1.bf16.msra.mxu0 %v20857_v57  ;;  %12009 = vmatpush1.bf16.msra.mxu1 %v20860_v58  ;;  %v20944_v57 = vld [vmem:[%s23323_s9 + $0x1cc8] ss:$16 sps:$4 sm:$0xff]   ;;  %v20949_v58 = vld [vmem:[%s23323_s9 + $0x1ce4] ss:$16 sps:$4 sm:$0xff]  }
 0x434   : > { %10985 = vmatprep.subr.bf16.mxu0 %v20865_v48  ;;  %12010 = vmatprep.subr.bf16.mxu1 %v20868_v59  ;;  %v20952_v48 = vld [vmem:[%s23323_s9 + $0x1cec] ss:$16 sps:$4 sm:$0xff]   ;;  %v20947_v59 = vld [vmem:[%s23323_s9 + $0x1ce0] ss:$16 sps:$4 sm:$0xff]  }
 0x437   : > { %10986 = vmatpush1.bf16.msra.mxu0 %v20863_v61  ;;  %12011 = vmatpush1.bf16.msra.mxu1 %v20866_v62  ;;  %v20950_v61 = vld [vmem:[%s23323_s9 + $0x1ce8] ss:$16 sps:$4 sm:$0xff]   ;;  %v20955_v62 = vld [vmem:[%s23323_s9 + $0x1d04] ss:$16 sps:$4 sm:$0xff]  }
 0x438   : > { %10987 = vmatprep.subr.bf16.mxu0 %v20871_v0  ;;  %12012 = vmatprep.subr.bf16.mxu1 %v20874_v1  ;;  %v20958_v0 = vld [vmem:[%s23323_s9 + $0x1d0c] ss:$16 sps:$4 sm:$0xff]   ;;  %v20953_v1 = vld [vmem:[%s23323_s9 + $0x1d00] ss:$16 sps:$4 sm:$0xff]  }
 0x43b   : > { %10988 = vmatpush1.bf16.msra.mxu0 %v20869_v35  ;;  %12013 = vmatpush1.bf16.msra.mxu1 %v20872_v2  ;;  %v20956_v35 = vld [vmem:[%s23323_s9 + $0x1d08] ss:$16 sps:$4 sm:$0xff]   ;;  %v20961_v2 = vld [vmem:[%s23323_s9 + $0x1d24] ss:$16 sps:$4 sm:$0xff]  }
 0x43c   : > { %10989 = vmatprep.subr.bf16.mxu0 %v20877_v3  ;;  %12014 = vmatprep.subr.bf16.mxu1 %v20880_v4  ;;  %v20964_v3 = vld [vmem:[%s23323_s9 + $0x1d2c] ss:$16 sps:$4 sm:$0xff]   ;;  %v20959_v4 = vld [vmem:[%s23323_s9 + $0x1d20] ss:$16 sps:$4 sm:$0xff]  }
 0x43f   : > { %10990 = vmatpush1.bf16.msra.mxu0 %v20875_v5  ;;  %12015 = vmatpush1.bf16.msra.mxu1 %v20878_v6  ;;  %v20962_v5 = vld [vmem:[%s23323_s9 + $0x1d28] ss:$16 sps:$4 sm:$0xff]   ;;  %v20967_v6 = vld [vmem:[%s23323_s9 + $0x1d44] ss:$16 sps:$4 sm:$0xff]  }
 0x440   : > { %10991 = vmatprep.subr.bf16.mxu0 %v20883_v7  ;;  %12016 = vmatprep.subr.bf16.mxu1 %v20886_v9  ;;  %v20970_v7 = vld [vmem:[%s23323_s9 + $0x1d4c] ss:$16 sps:$4 sm:$0xff]   ;;  %v20965_v9 = vld [vmem:[%s23323_s9 + $0x1d40] ss:$16 sps:$4 sm:$0xff]  }
 0x443   : > { %10992 = vmatpush1.bf16.msra.mxu0 %v20881_v11  ;;  %12017 = vmatpush1.bf16.msra.mxu1 %v20884_v12  ;;  %v20968_v11 = vld [vmem:[%s23323_s9 + $0x1d48] ss:$16 sps:$4 sm:$0xff]   ;;  %v20973_v12 = vld [vmem:[%s23323_s9 + $0x1d64] ss:$16 sps:$4 sm:$0xff]  }
 0x444   : > { %10993 = vmatprep.subr.bf16.mxu0 %v20889_v14  ;;  %12018 = vmatprep.subr.bf16.mxu1 %v20892_v63  ;;  %v20976_v14 = vld [vmem:[%s23323_s9 + $0x1d6c] ss:$16 sps:$4 sm:$0xff]   ;;  %v20971_v63 = vld [vmem:[%s23323_s9 + $0x1d60] ss:$16 sps:$4 sm:$0xff]  }
 0x447   : > { %10994 = vmatpush1.bf16.msra.mxu0 %v20887_v16  ;;  %12019 = vmatpush1.bf16.msra.mxu1 %v20890_v52  ;;  %v20974_v16 = vld [vmem:[%s23323_s9 + $0x1d68] ss:$16 sps:$4 sm:$0xff]   ;;  %v20979_v52 = vld [vmem:[%s23323_s9 + $0x1d84] ss:$16 sps:$4 sm:$0xff]  }
 0x448   : > { %10995 = vmatprep.subr.bf16.mxu0 %v20895_v17  ;;  %12020 = vmatprep.subr.bf16.mxu1 %v20898_v8  ;;  %v20982_v17 = vld [vmem:[%s23323_s9 + $0x1d8c] ss:$16 sps:$4 sm:$0xff]   ;;  %v20977_v8 = vld [vmem:[%s23323_s9 + $0x1d80] ss:$16 sps:$4 sm:$0xff]  }
 0x44b   : > { %10996 = vmatpush1.bf16.msra.mxu0 %v20893_v19  ;;  %12021 = vmatpush1.bf16.msra.mxu1 %v20896_v13  ;;  %v20985_v19 = vld [vmem:[%s23323_s9 + $0x1da4] ss:$16 sps:$4 sm:$0xff]   ;;  %v20988_v13 = vld [vmem:[%s23323_s9 + $0x1dac] ss:$16 sps:$4 sm:$0xff]  }
 0x44c   : > { %10997 = vmatprep.subr.bf16.mxu0 %v20901_v23  ;;  %12022 = vmatprep.subr.bf16.mxu1 %v20904_v24  ;;  %v20983_v23 = vld [vmem:[%s23323_s9 + $0x1da0] ss:$16 sps:$4 sm:$0xff]   ;;  %v20986_v24 = vld [vmem:[%s23323_s9 + $0x1da8] ss:$16 sps:$4 sm:$0xff]  }
 0x44f   : > { %10998 = vmatpush1.bf16.msra.mxu0 %v20899_v60  ;;  %12023 = vmatpush1.bf16.msra.mxu1 %v20902_v27  ;;  %v20991_v60 = vld [vmem:[%s23323_s9 + $0x1dc4] ss:$16 sps:$4 sm:$0xff]   ;;  %v20994_v27 = vld [vmem:[%s23323_s9 + $0x1dcc] ss:$16 sps:$4 sm:$0xff]  }
 0x450   : > { %11008 = vmatprep.subr.bf16.mxu0 %v20907_v28  ;;  %12033 = vmatprep.subr.bf16.mxu1 %v20910_v10  ;;  %v20989_v28 = vld [vmem:[%s23323_s9 + $0x1dc0] ss:$16 sps:$4 sm:$0xff]   ;;  %v20992_v10 = vld [vmem:[%s23323_s9 + $0x1dc8] ss:$16 sps:$4 sm:$0xff]  }
 0x452   : > { %11000 = vmatmul.mubr.bf16.vlgmr.msra.gmra.mrb[0].mxu0 %v2260_v30  ;;  %12025 = vmatmul.mubr.bf16.vlgmr.msra.gmra.mrb[0].mxu1 %v2260_v30  ;;  %v21000_v30 = vld [vmem:[%s23323_s9 + $0x1dec] ss:$16 sps:$4 sm:$0xff]  }
 0x453   : > { %11009 = vmatpush1.bf16.msra.mxu0 %v20905_v15  ;;  %12034 = vmatpush1.bf16.msra.mxu1 %v20908_v20  ;;  %v20995_v15 = vld [vmem:[%s23323_s9 + $0x1de0] ss:$16 sps:$4 sm:$0xff]   ;;  %v20998_v20 = vld [vmem:[%s23323_s9 + $0x1de8] ss:$16 sps:$4 sm:$0xff]  }
 0x454   : > { %11010 = vmatprep.subr.bf16.mxu0 %v20913_v31  ;;  %12035 = vmatprep.subr.bf16.mxu1 %v20916_v32  ;;  %v21004_v31 = vld [vmem:[%s23323_s9 + $0x1e04] ss:$16 sps:$4 sm:$0xff]   ;;  %v21007_v32 = vld [vmem:[%s23323_s9 + $0x1e0c] ss:$16 sps:$4 sm:$0xff]  }
 0x455   : > { %11040 = vmatprep.mubr.bf16.mxu0 %v24416_v33  ;;  %12065 = vmatprep.mubr.bf16.mxu1 %v24416_v33 }
 0x457   : > { %11011 = vmatpush1.bf16.msra.mxu0 %v20911_v22  ;;  %12036 = vmatpush1.bf16.msra.mxu1 %v20914_v25  ;;  %v24482_v22 = vrot.slane %v24401_v26, %v23395_v49  ;;  %v21002_v25 = vld [vmem:[%s23323_s9 + $0x1e00] ss:$16 sps:$4 sm:$0xff]  }
 0x458   : > { %11012 = vmatprep.subr.bf16.mxu0 %v20919_v34  ;;  %12037 = vmatprep.subr.bf16.mxu1 %v20922_v36  ;;  %v21005_v34 = vld [vmem:[%s23323_s9 + $0x1e08] ss:$16 sps:$4 sm:$0xff]   ;;  %v21010_v36 = vld [vmem:[%s23323_s9 + $0x1e24] ss:$16 sps:$4 sm:$0xff]   ;;  %v21008_v26 = vld [vmem:[%s23323_s9 + $0x1e20] ss:$16 sps:$4 sm:$0xff]  }
 0x45b   : > { %11013 = vmatpush1.bf16.msra.mxu0 %v20917_v37  ;;  %12038 = vmatpush1.bf16.msra.mxu1 %v20920_v39  ;;  %v21013_v37 = vld [vmem:[%s23323_s9 + $0x1e2c] ss:$16 sps:$4 sm:$0xff]   ;;  %v2263_v39 = vcombine.high %v24416_v33, %v24416_v33  ;;  %v21014_v33 = vld [vmem:[%s23323_s9 + $0x1e40] ss:$16 sps:$4 sm:$0xff]  }
 0x45c   : > { %11014 = vmatprep.subr.bf16.mxu0 %v20925_v40  ;;  %12039 = vmatprep.subr.bf16.mxu1 %v20928_v21  ;;  %v21011_v40 = vld [vmem:[%s23323_s9 + $0x1e28] ss:$16 sps:$4 sm:$0xff]   ;;  %v21016_v21 = vld [vmem:[%s23323_s9 + $0x1e44] ss:$16 sps:$4 sm:$0xff]  }
 0x45f   : > { %11015 = vmatpush1.bf16.msra.mxu0 %v20923_v41  ;;  %12040 = vmatpush1.bf16.msra.mxu1 %v20926_v43  ;;  %v21019_v41 = vld [vmem:[%s23323_s9 + $0x1e4c] ss:$16 sps:$4 sm:$0xff]   ;;  %v21017_v43 = vld [vmem:[%s23323_s9 + $0x1e48] ss:$16 sps:$4 sm:$0xff]  }
 0x460   : > { %11016 = vmatprep.subr.bf16.mxu0 %v20931_v44  ;;  %12041 = vmatprep.subr.bf16.mxu1 %v20934_v45  ;;  %v21022_v44 = vld [vmem:[%s23323_s9 + $0x1e64] ss:$16 sps:$4 sm:$0xff]   ;;  %v21025_v45 = vld [vmem:[%s23323_s9 + $0x1e6c] ss:$16 sps:$4 sm:$0xff]  }
 0x463   : > { %11017 = vmatpush1.bf16.msra.mxu0 %v20929_v46  ;;  %12042 = vmatpush1.bf16.msra.mxu1 %v20932_v47  ;;  %v21020_v46 = vld [vmem:[%s23323_s9 + $0x1e60] ss:$16 sps:$4 sm:$0xff]   ;;  %v21023_v47 = vld [vmem:[%s23323_s9 + $0x1e68] ss:$16 sps:$4 sm:$0xff]  }
 0x464   : > { %11018 = vmatprep.subr.bf16.mxu0 %v20937_v50  ;;  %12043 = vmatprep.subr.bf16.mxu1 %v20940_v51  ;;  %v21028_v50 = vld [vmem:[%s23323_s9 + $0x1e84] ss:$16 sps:$4 sm:$0xff]   ;;  %v21031_v51 = vld [vmem:[%s23323_s9 + $0x1e8c] ss:$16 sps:$4 sm:$0xff]  }
 0x467   : > { %11019 = vmatpush1.bf16.msra.mxu0 %v20935_v53  ;;  %12044 = vmatpush1.bf16.msra.mxu1 %v20938_v54  ;;  %v21026_v53 = vld [vmem:[%s23323_s9 + $0x1e80] ss:$16 sps:$4 sm:$0xff]   ;;  %v21029_v54 = vld [vmem:[%s23323_s9 + $0x1e88] ss:$16 sps:$4 sm:$0xff]  }
 0x468   : > { %11020 = vmatprep.subr.bf16.mxu0 %v20943_v55  ;;  %12045 = vmatprep.subr.bf16.mxu1 %v20946_v38  ;;  %v21034_v55 = vld [vmem:[%s23323_s9 + $0x1ea4] ss:$16 sps:$4 sm:$0xff]   ;;  %v21037_v38 = vld [vmem:[%s23323_s9 + $0x1eac] ss:$16 sps:$4 sm:$0xff]  }
 0x46b   : > { %11021 = vmatpush1.bf16.msra.mxu0 %v20941_v56  ;;  %12046 = vmatpush1.bf16.msra.mxu1 %v20944_v57  ;;  %v21032_v56 = vld [vmem:[%s23323_s9 + $0x1ea0] ss:$16 sps:$4 sm:$0xff]   ;;  %v21035_v57 = vld [vmem:[%s23323_s9 + $0x1ea8] ss:$16 sps:$4 sm:$0xff]  }
 0x46c   : > { %11022 = vmatprep.subr.bf16.mxu0 %v20949_v58  ;;  %12047 = vmatprep.subr.bf16.mxu1 %v20952_v48  ;;  %v21040_v58 = vld [vmem:[%s23323_s9 + $0x1ec4] ss:$16 sps:$4 sm:$0xff]   ;;  %v21043_v48 = vld [vmem:[%s23323_s9 + $0x1ecc] ss:$16 sps:$4 sm:$0xff]  }
 0x46f   : > { %11023 = vmatpush1.bf16.msra.mxu0 %v20947_v59  ;;  %12048 = vmatpush1.bf16.msra.mxu1 %v20950_v61  ;;  %v21038_v59 = vld [vmem:[%s23323_s9 + $0x1ec0] ss:$16 sps:$4 sm:$0xff]   ;;  %v21041_v61 = vld [vmem:[%s23323_s9 + $0x1ec8] ss:$16 sps:$4 sm:$0xff]  }
 0x470   : > { %11024 = vmatprep.subr.bf16.mxu0 %v20955_v62  ;;  %12049 = vmatprep.subr.bf16.mxu1 %v20958_v0  ;;  %v21046_v62 = vld [vmem:[%s23323_s9 + $0x1ee4] ss:$16 sps:$4 sm:$0xff]   ;;  %v21049_v0 = vld [vmem:[%s23323_s9 + $0x1eec] ss:$16 sps:$4 sm:$0xff]  }
 0x473   : > { %11025 = vmatpush1.bf16.msra.mxu0 %v20953_v1  ;;  %12050 = vmatpush1.bf16.msra.mxu1 %v20956_v35  ;;  %v21044_v1 = vld [vmem:[%s23323_s9 + $0x1ee0] ss:$16 sps:$4 sm:$0xff]   ;;  %v21047_v35 = vld [vmem:[%s23323_s9 + $0x1ee8] ss:$16 sps:$4 sm:$0xff]  }
 0x474   : > { %11026 = vmatprep.subr.bf16.mxu0 %v20961_v2  ;;  %12051 = vmatprep.subr.bf16.mxu1 %v20964_v3  ;;  %v21052_v2 = vld [vmem:[%s23323_s9 + $0x1f04] ss:$16 sps:$4 sm:$0xff]   ;;  %v21055_v3 = vld [vmem:[%s23323_s9 + $0x1f0c] ss:$16 sps:$4 sm:$0xff]  }
 0x477   : > { %11027 = vmatpush1.bf16.msra.mxu0 %v20959_v4  ;;  %12052 = vmatpush1.bf16.msra.mxu1 %v20962_v5  ;;  %v21050_v4 = vld [vmem:[%s23323_s9 + $0x1f00] ss:$16 sps:$4 sm:$0xff]   ;;  %v21053_v5 = vld [vmem:[%s23323_s9 + $0x1f08] ss:$16 sps:$4 sm:$0xff]  }
 0x478   : > { %11028 = vmatprep.subr.bf16.mxu0 %v20967_v6  ;;  %12053 = vmatprep.subr.bf16.mxu1 %v20970_v7  ;;  %v21058_v6 = vld [vmem:[%s23323_s9 + $0x1f24] ss:$16 sps:$4 sm:$0xff]   ;;  %v21061_v7 = vld [vmem:[%s23323_s9 + $0x1f2c] ss:$16 sps:$4 sm:$0xff]  }
 0x47b   : > { %11029 = vmatpush1.bf16.msra.mxu0 %v20965_v9  ;;  %12054 = vmatpush1.bf16.msra.mxu1 %v20968_v11  ;;  %v21056_v9 = vld [vmem:[%s23323_s9 + $0x1f20] ss:$16 sps:$4 sm:$0xff]   ;;  %v21059_v11 = vld [vmem:[%s23323_s9 + $0x1f28] ss:$16 sps:$4 sm:$0xff]  }
 0x47c   : > { %11030 = vmatprep.subr.bf16.mxu0 %v20973_v12  ;;  %12055 = vmatprep.subr.bf16.mxu1 %v20976_v14  ;;  %v21064_v12 = vld [vmem:[%s23323_s9 + $0x1f44] ss:$16 sps:$4 sm:$0xff]   ;;  %v21067_v14 = vld [vmem:[%s23323_s9 + $0x1f4c] ss:$16 sps:$4 sm:$0xff]  }
 0x47f   : > { %11031 = vmatpush1.bf16.msra.mxu0 %v20971_v63  ;;  %12056 = vmatpush1.bf16.msra.mxu1 %v20974_v16  ;;  %v21062_v63 = vld [vmem:[%s23323_s9 + $0x1f40] ss:$16 sps:$4 sm:$0xff]   ;;  %v21065_v16 = vld [vmem:[%s23323_s9 + $0x1f48] ss:$16 sps:$4 sm:$0xff]  }
 0x480   : > { %11032 = vmatprep.subr.bf16.mxu0 %v20979_v52  ;;  %12057 = vmatprep.subr.bf16.mxu1 %v20982_v17  ;;  %v21070_v52 = vld [vmem:[%s23323_s9 + $0x1f64] ss:$16 sps:$4 sm:$0xff]   ;;  %v21073_v17 = vld [vmem:[%s23323_s9 + $0x1f6c] ss:$16 sps:$4 sm:$0xff]  }
 0x483   : > { %11033 = vmatpush1.bf16.msra.mxu0 %v20977_v8  ;;  %12058 = vmatpush1.bf16.msra.mxu1 %v20980_v18  ;;  %v21068_v8 = vld [vmem:[%s23323_s9 + $0x1f60] ss:$16 sps:$4 sm:$0xff]   ;;  %v21071_v18 = vld [vmem:[%s23323_s9 + $0x1f68] ss:$16 sps:$4 sm:$0xff]  }
 0x484   : > { %11034 = vmatprep.subr.bf16.mxu0 %v20985_v19  ;;  %12059 = vmatprep.subr.bf16.mxu1 %v20988_v13  ;;  %v21076_v19 = vld [vmem:[%s23323_s9 + $0x1f84] ss:$16 sps:$4 sm:$0xff]   ;;  %v21079_v13 = vld [vmem:[%s23323_s9 + $0x1f8c] ss:$16 sps:$4 sm:$0xff]  }
 0x487   : > { %11035 = vmatpush1.bf16.msra.mxu0 %v20983_v23  ;;  %12060 = vmatpush1.bf16.msra.mxu1 %v20986_v24  ;;  %v21074_v23 = vld [vmem:[%s23323_s9 + $0x1f80] ss:$16 sps:$4 sm:$0xff]   ;;  %v21077_v24 = vld [vmem:[%s23323_s9 + $0x1f88] ss:$16 sps:$4 sm:$0xff]  }
 0x488   : > { %11036 = vmatprep.subr.bf16.mxu0 %v20991_v60  ;;  %12061 = vmatprep.subr.bf16.mxu1 %v20994_v27  ;;  %v21082_v60 = vld [vmem:[%s23323_s9 + $0x1fa4] ss:$16 sps:$4 sm:$0xff]   ;;  %v21085_v27 = vld [vmem:[%s23323_s9 + $0x1fac] ss:$16 sps:$4 sm:$0xff]  }
 0x48b   : > { %11037 = vmatpush1.bf16.msra.mxu0 %v20989_v28  ;;  %12062 = vmatpush1.bf16.msra.mxu1 %v20992_v10  ;;  %v21080_v28 = vld [vmem:[%s23323_s9 + $0x1fa0] ss:$16 sps:$4 sm:$0xff]   ;;  %v21083_v10 = vld [vmem:[%s23323_s9 + $0x1fa8] ss:$16 sps:$4 sm:$0xff]  }
 0x48c   : > { %11038 = vmatprep.subr.bf16.mxu0 %v20997_v29  ;;  %12063 = vmatprep.subr.bf16.mxu1 %v21000_v30  ;;  %v21088_v29 = vld [vmem:[%s23323_s9 + $0x1fc4] ss:$16 sps:$4 sm:$0xff]   ;;  %v21091_v30 = vld [vmem:[%s23323_s9 + $0x1fcc] ss:$16 sps:$4 sm:$0xff]  }
 0x48f   : > { %11039 = vmatpush1.bf16.msra.mxu0 %v20995_v15  ;;  %12064 = vmatpush1.bf16.msra.mxu1 %v20998_v20  ;;  %v24547_v15 = vld [vmem:[%s25483_s0 + $0x20] sm:$0xff] }
 0x490   : > { %11049 = vmatprep.subr.bf16.mxu0 %v21004_v31  ;;  %12074 = vmatprep.subr.bf16.mxu1 %v21007_v32  ;;  %v21086_v20 = vld [vmem:[%s23323_s9 + $0x1fc0] ss:$16 sps:$4 sm:$0xff]   ;;  %v21089_v31 = vld [vmem:[%s23323_s9 + $0x1fc8] ss:$16 sps:$4 sm:$0xff]   ;;  %v21094_v32 = vld [vmem:[%s23323_s9 + $0x1fe4] ss:$16 sps:$4 sm:$0xff]  }
 0x492   : > { %11041 = vmatmul.mubr.bf16.vlgmr.msra.gmra.mrb[0].mxu0 %v24482_v22  ;;  %12066 = vmatmul.mubr.bf16.vlgmr.msra.gmra.mrb[0].mxu1 %v24482_v22 }
 0x493   : > { %11050 = vmatpush1.bf16.msra.mxu0 %v21002_v25  ;;  %12075 = vmatpush1.bf16.msra.mxu1 %v21005_v34  ;;  %v21097_v25 = vld [vmem:[%s23323_s9 + $0x1fec] ss:$16 sps:$4 sm:$0xff]   ;;  %v24555_v34 = vrot.slane %v24547_v15, %v23395_v49 }
 0x494   : > { %11051 = vmatprep.subr.bf16.mxu0 %v21010_v36  ;;  %12076 = vmatprep.subr.bf16.mxu1 %v21013_v37  ;;  %v21092_v36 = vld [vmem:[%s23323_s9 + $0x1fe0] ss:$16 sps:$4 sm:$0xff]   ;;  %v21095_v37 = vld [vmem:[%s23323_s9 + $0x1fe8] ss:$16 sps:$4 sm:$0xff]  }
 0x495   : > { %11081 = vmatprep.mubr.bf16.mxu0 %v2263_v39  ;;  %12106 = vmatprep.mubr.bf16.mxu1 %v2263_v39  ;;  %v21100_v39 = vld [vmem:[%s23323_s9 + $0x2004] ss:$16 sps:$4 sm:$0xff]  }
 0x497   : > { %11052 = vmatpush1.bf16.msra.mxu0 %v21008_v26  ;;  %12077 = vmatpush1.bf16.msra.mxu1 %v21011_v40  ;;  %v21103_v26 = vld [vmem:[%s23323_s9 + $0x200c] ss:$16 sps:$4 sm:$0xff]   ;;  %v2279_v40 = vcombine.high %v24555_v34, %v24555_v34 }
 0x498   : > { %11053 = vmatprep.subr.bf16.mxu0 %v21016_v21  ;;  %12078 = vmatprep.subr.bf16.mxu1 %v21019_v41  ;;  %v2261_v21 = vcombine.high %v24482_v22, %v24482_v22  ;;  %v21098_v41 = vld [vmem:[%s23323_s9 + $0x2000] ss:$16 sps:$4 sm:$0xff]  }
 0x499   : > { %v21104_v22 = vld [vmem:[%s23323_s9 + $0x2020] ss:$16 sps:$4 sm:$0xff]  }
 0x49b   : > { %11054 = vmatpush1.bf16.msra.mxu0 %v21014_v33  ;;  %12079 = vmatpush1.bf16.msra.mxu1 %v21017_v43  ;;  %v21101_v33 = vld [vmem:[%s23323_s9 + $0x2008] ss:$16 sps:$4 sm:$0xff]   ;;  %v21106_v43 = vld [vmem:[%s23323_s9 + $0x2024] ss:$16 sps:$4 sm:$0xff]  }
 0x49c   : > { %11055 = vmatprep.subr.bf16.mxu0 %v21022_v44  ;;  %12080 = vmatprep.subr.bf16.mxu1 %v21025_v45  ;;  %v21109_v44 = vld [vmem:[%s23323_s9 + $0x202c] ss:$16 sps:$4 sm:$0xff]   ;;  %v24570_v45 = vrot.slane %v2279_v40, %v23395_v49  ;;  %v21185_v40 = vld [vmem:[%s23323_s9 + $0x21c8] ss:$16 sps:$4 sm:$0xff]  }
 0x49f   : > { %11056 = vmatpush1.bf16.msra.mxu0 %v21020_v46  ;;  %12081 = vmatpush1.bf16.msra.mxu1 %v21023_v47  ;;  %v21107_v46 = vld [vmem:[%s23323_s9 + $0x2028] ss:$16 sps:$4 sm:$0xff]   ;;  %v21112_v47 = vld [vmem:[%s23323_s9 + $0x2044] ss:$16 sps:$4 sm:$0xff]  }
 0x4a0   : > { %11057 = vmatprep.subr.bf16.mxu0 %v21028_v50  ;;  %12082 = vmatprep.subr.bf16.mxu1 %v21031_v51  ;;  %v21115_v50 = vld [vmem:[%s23323_s9 + $0x204c] ss:$16 sps:$4 sm:$0xff]   ;;  %v21110_v51 = vld [vmem:[%s23323_s9 + $0x2040] ss:$16 sps:$4 sm:$0xff]  }
 0x4a3   : > { %11058 = vmatpush1.bf16.msra.mxu0 %v21026_v53  ;;  %12083 = vmatpush1.bf16.msra.mxu1 %v21029_v54  ;;  %v21113_v53 = vld [vmem:[%s23323_s9 + $0x2048] ss:$16 sps:$4 sm:$0xff]   ;;  %v21118_v54 = vld [vmem:[%s23323_s9 + $0x2064] ss:$16 sps:$4 sm:$0xff]  }
 0x4a4   : > { %11059 = vmatprep.subr.bf16.mxu0 %v21034_v55  ;;  %12084 = vmatprep.subr.bf16.mxu1 %v21037_v38  ;;  %v21121_v55 = vld [vmem:[%s23323_s9 + $0x206c] ss:$16 sps:$4 sm:$0xff]   ;;  %v21116_v38 = vld [vmem:[%s23323_s9 + $0x2060] ss:$16 sps:$4 sm:$0xff]  }
 0x4a7   : > { %11060 = vmatpush1.bf16.msra.mxu0 %v21032_v56  ;;  %12085 = vmatpush1.bf16.msra.mxu1 %v21035_v57  ;;  %v21119_v56 = vld [vmem:[%s23323_s9 + $0x2068] ss:$16 sps:$4 sm:$0xff]   ;;  %v21124_v57 = vld [vmem:[%s23323_s9 + $0x2084] ss:$16 sps:$4 sm:$0xff]  }
 0x4a8   : > { %11061 = vmatprep.subr.bf16.mxu0 %v21040_v58  ;;  %12086 = vmatprep.subr.bf16.mxu1 %v21043_v48  ;;  %v21127_v58 = vld [vmem:[%s23323_s9 + $0x208c] ss:$16 sps:$4 sm:$0xff]   ;;  %v21122_v48 = vld [vmem:[%s23323_s9 + $0x2080] ss:$16 sps:$4 sm:$0xff]  }
 0x4ab   : > { %11062 = vmatpush1.bf16.msra.mxu0 %v21038_v59  ;;  %12087 = vmatpush1.bf16.msra.mxu1 %v21041_v61  ;;  %v21125_v59 = vld [vmem:[%s23323_s9 + $0x2088] ss:$16 sps:$4 sm:$0xff]   ;;  %v21130_v61 = vld [vmem:[%s23323_s9 + $0x20a4] ss:$16 sps:$4 sm:$0xff]  }
 0x4ac   : > { %11063 = vmatprep.subr.bf16.mxu0 %v21046_v62  ;;  %12088 = vmatprep.subr.bf16.mxu1 %v21049_v0  ;;  %v21133_v62 = vld [vmem:[%s23323_s9 + $0x20ac] ss:$16 sps:$4 sm:$0xff]   ;;  %v21128_v0 = vld [vmem:[%s23323_s9 + $0x20a0] ss:$16 sps:$4 sm:$0xff]  }
 0x4af   : > { %11064 = vmatpush1.bf16.msra.mxu0 %v21044_v1  ;;  %12089 = vmatpush1.bf16.msra.mxu1 %v21047_v35  ;;  %v21131_v1 = vld [vmem:[%s23323_s9 + $0x20a8] ss:$16 sps:$4 sm:$0xff]   ;;  %v21136_v35 = vld [vmem:[%s23323_s9 + $0x20c4] ss:$16 sps:$4 sm:$0xff]  }
 0x4b0   : > { %11065 = vmatprep.subr.bf16.mxu0 %v21052_v2  ;;  %12090 = vmatprep.subr.bf16.mxu1 %v21055_v3  ;;  %v21139_v2 = vld [vmem:[%s23323_s9 + $0x20cc] ss:$16 sps:$4 sm:$0xff]   ;;  %v21134_v3 = vld [vmem:[%s23323_s9 + $0x20c0] ss:$16 sps:$4 sm:$0xff]  }
 0x4b3   : > { %11066 = vmatpush1.bf16.msra.mxu0 %v21050_v4  ;;  %12091 = vmatpush1.bf16.msra.mxu1 %v21053_v5  ;;  %v21137_v4 = vld [vmem:[%s23323_s9 + $0x20c8] ss:$16 sps:$4 sm:$0xff]   ;;  %v21142_v5 = vld [vmem:[%s23323_s9 + $0x20e4] ss:$16 sps:$4 sm:$0xff]  }
 0x4b4   : > { %11067 = vmatprep.subr.bf16.mxu0 %v21058_v6  ;;  %12092 = vmatprep.subr.bf16.mxu1 %v21061_v7  ;;  %v21145_v6 = vld [vmem:[%s23323_s9 + $0x20ec] ss:$16 sps:$4 sm:$0xff]   ;;  %v21140_v7 = vld [vmem:[%s23323_s9 + $0x20e0] ss:$16 sps:$4 sm:$0xff]  }
 0x4b7   : > { %11068 = vmatpush1.bf16.msra.mxu0 %v21056_v9  ;;  %12093 = vmatpush1.bf16.msra.mxu1 %v21059_v11  ;;  %v21143_v9 = vld [vmem:[%s23323_s9 + $0x20e8] ss:$16 sps:$4 sm:$0xff]   ;;  %v21148_v11 = vld [vmem:[%s23323_s9 + $0x2104] ss:$16 sps:$4 sm:$0xff]  }
 0x4b8   : > { %11069 = vmatprep.subr.bf16.mxu0 %v21064_v12  ;;  %12094 = vmatprep.subr.bf16.mxu1 %v21067_v14  ;;  %v21151_v12 = vld [vmem:[%s23323_s9 + $0x210c] ss:$16 sps:$4 sm:$0xff]   ;;  %v21146_v14 = vld [vmem:[%s23323_s9 + $0x2100] ss:$16 sps:$4 sm:$0xff]  }
 0x4bb   : > { %11070 = vmatpush1.bf16.msra.mxu0 %v21062_v63  ;;  %12095 = vmatpush1.bf16.msra.mxu1 %v21065_v16  ;;  %v21149_v63 = vld [vmem:[%s23323_s9 + $0x2108] ss:$16 sps:$4 sm:$0xff]   ;;  %v21154_v16 = vld [vmem:[%s23323_s9 + $0x2124] ss:$16 sps:$4 sm:$0xff]  }
 0x4bc   : > { %11071 = vmatprep.subr.bf16.mxu0 %v21070_v52  ;;  %12096 = vmatprep.subr.bf16.mxu1 %v21073_v17  ;;  %v21157_v52 = vld [vmem:[%s23323_s9 + $0x212c] ss:$16 sps:$4 sm:$0xff]   ;;  %v21152_v17 = vld [vmem:[%s23323_s9 + $0x2120] ss:$16 sps:$4 sm:$0xff]  }
 0x4bf   : > { %11072 = vmatpush1.bf16.msra.mxu0 %v21068_v8  ;;  %12097 = vmatpush1.bf16.msra.mxu1 %v21071_v18  ;;  %v21155_v8 = vld [vmem:[%s23323_s9 + $0x2128] ss:$16 sps:$4 sm:$0xff]   ;;  %v21160_v18 = vld [vmem:[%s23323_s9 + $0x2144] ss:$16 sps:$4 sm:$0xff]  }
 0x4c0   : > { %11073 = vmatprep.subr.bf16.mxu0 %v21076_v19  ;;  %12098 = vmatprep.subr.bf16.mxu1 %v21079_v13  ;;  %v21163_v19 = vld [vmem:[%s23323_s9 + $0x214c] ss:$16 sps:$4 sm:$0xff]   ;;  %v21158_v13 = vld [vmem:[%s23323_s9 + $0x2140] ss:$16 sps:$4 sm:$0xff]  }
 0x4c3   : > { %11074 = vmatpush1.bf16.msra.mxu0 %v21074_v23  ;;  %12099 = vmatpush1.bf16.msra.mxu1 %v21077_v24  ;;  %v21161_v23 = vld [vmem:[%s23323_s9 + $0x2148] ss:$16 sps:$4 sm:$0xff]   ;;  %v21166_v24 = vld [vmem:[%s23323_s9 + $0x2164] ss:$16 sps:$4 sm:$0xff]  }
 0x4c4   : > { %11075 = vmatprep.subr.bf16.mxu0 %v21082_v60  ;;  %12100 = vmatprep.subr.bf16.mxu1 %v21085_v27  ;;  %v21169_v60 = vld [vmem:[%s23323_s9 + $0x216c] ss:$16 sps:$4 sm:$0xff]   ;;  %v21164_v27 = vld [vmem:[%s23323_s9 + $0x2160] ss:$16 sps:$4 sm:$0xff]  }
 0x4c7   : > { %11076 = vmatpush1.bf16.msra.mxu0 %v21080_v28  ;;  %12101 = vmatpush1.bf16.msra.mxu1 %v21083_v10  ;;  %v21167_v28 = vld [vmem:[%s23323_s9 + $0x2168] ss:$16 sps:$4 sm:$0xff]   ;;  %v21172_v10 = vld [vmem:[%s23323_s9 + $0x2184] ss:$16 sps:$4 sm:$0xff]  }
 0x4c8   : > { %11077 = vmatprep.subr.bf16.mxu0 %v21088_v29  ;;  %12102 = vmatprep.subr.bf16.mxu1 %v21091_v30  ;;  %v21175_v29 = vld [vmem:[%s23323_s9 + $0x218c] ss:$16 sps:$4 sm:$0xff]   ;;  %v21170_v30 = vld [vmem:[%s23323_s9 + $0x2180] ss:$16 sps:$4 sm:$0xff]  }
 0x4cb   : > { %11078 = vmatpush1.bf16.msra.mxu0 %v21086_v20  ;;  %12103 = vmatpush1.bf16.msra.mxu1 %v21089_v31  ;;  %v21173_v20 = vld [vmem:[%s23323_s9 + $0x2188] ss:$16 sps:$4 sm:$0xff]   ;;  %v21178_v31 = vld [vmem:[%s23323_s9 + $0x21a4] ss:$16 sps:$4 sm:$0xff]  }
 0x4cc   : > { %11079 = vmatprep.subr.bf16.mxu0 %v21094_v32  ;;  %12104 = vmatprep.subr.bf16.mxu1 %v21097_v25  ;;  %v21181_v32 = vld [vmem:[%s23323_s9 + $0x21ac] ss:$16 sps:$4 sm:$0xff]   ;;  %v21176_v25 = vld [vmem:[%s23323_s9 + $0x21a0] ss:$16 sps:$4 sm:$0xff]  }
 0x4cf   : > { %11080 = vmatpush1.bf16.msra.mxu0 %v21092_v36  ;;  %12105 = vmatpush1.bf16.msra.mxu1 %v21095_v37  ;;  %v21179_v36 = vld [vmem:[%s23323_s9 + $0x21a8] ss:$16 sps:$4 sm:$0xff]   ;;  %v21184_v37 = vld [vmem:[%s23323_s9 + $0x21c4] ss:$16 sps:$4 sm:$0xff]  }
 0x4d0   : > { %11090 = vmatprep.subr.bf16.mxu0 %v21100_v39  ;;  %12115 = vmatprep.subr.bf16.mxu1 %v21103_v26  ;;  %v21187_v39 = vld [vmem:[%s23323_s9 + $0x21cc] ss:$16 sps:$4 sm:$0xff]   ;;  %v21182_v26 = vld [vmem:[%s23323_s9 + $0x21c0] ss:$16 sps:$4 sm:$0xff]  }
 0x4d2   : > { %11082 = vmatmul.mubr.bf16.vlgmr.msra.gmra.mrb[0].mxu0 %v2261_v21  ;;  %12107 = vmatmul.mubr.bf16.vlgmr.msra.gmra.mrb[0].mxu1 %v2261_v21  ;;  %v21190_v21 = vld [vmem:[%s23323_s9 + $0x21e4] ss:$16 sps:$4 sm:$0xff]  }
 0x4d3   : > { %11091 = vmatpush1.bf16.msra.mxu0 %v21098_v41  ;;  %12116 = vmatpush1.bf16.msra.mxu1 %v21101_v33  ;;  %v21193_v41 = vld [vmem:[%s23323_s9 + $0x21ec] ss:$16 sps:$4 sm:$0xff]   ;;  %v21188_v33 = vld [vmem:[%s23323_s9 + $0x21e0] ss:$16 sps:$4 sm:$0xff]  }
 0x4d4   : > { %11092 = vmatprep.subr.bf16.mxu0 %v21106_v43  ;;  %12117 = vmatprep.subr.bf16.mxu1 %v21109_v44  ;;  %v21191_v43 = vld [vmem:[%s23323_s9 + $0x21e8] ss:$16 sps:$4 sm:$0xff]   ;;  %v21196_v44 = vld [vmem:[%s23323_s9 + $0x2204] ss:$16 sps:$4 sm:$0xff]  }
 0x4d5   : > { %11122 = vmatprep.mubr.bf16.mxu0 %v24570_v45  ;;  %12147 = vmatprep.mubr.bf16.mxu1 %v24570_v45 }
 0x4d7   : > { %11093 = vmatpush1.bf16.msra.mxu0 %v21104_v22  ;;  %12118 = vmatpush1.bf16.msra.mxu1 %v21107_v46  ;;  %v21199_v22 = vld [vmem:[%s23323_s9 + $0x220c] ss:$16 sps:$4 sm:$0xff]   ;;  %v24636_v46 = vrot.slane %v24555_v34, %v23395_v49  ;;  %v21200_v34 = vld [vmem:[%s23323_s9 + $0x2220] ss:$16 sps:$4 sm:$0xff]  }
 0x4d8   : > { %11094 = vmatprep.subr.bf16.mxu0 %v21112_v47  ;;  %12119 = vmatprep.subr.bf16.mxu1 %v21115_v50  ;;  %v21194_v47 = vld [vmem:[%s23323_s9 + $0x2200] ss:$16 sps:$4 sm:$0xff]   ;;  %v21197_v50 = vld [vmem:[%s23323_s9 + $0x2208] ss:$16 sps:$4 sm:$0xff]  }
 0x4db   : > { %11095 = vmatpush1.bf16.msra.mxu0 %v21110_v51  ;;  %12120 = vmatpush1.bf16.msra.mxu1 %v21113_v53  ;;  %v21202_v51 = vld [vmem:[%s23323_s9 + $0x2224] ss:$16 sps:$4 sm:$0xff]   ;;  %v21205_v53 = vld [vmem:[%s23323_s9 + $0x222c] ss:$16 sps:$4 sm:$0xff]  }
 0x4dc   : > { %11096 = vmatprep.subr.bf16.mxu0 %v21118_v54  ;;  %12121 = vmatprep.subr.bf16.mxu1 %v21121_v55  ;;  %v2311_v54 = vcombine.high %v24570_v45, %v24570_v45  ;;  %v21203_v55 = vld [vmem:[%s23323_s9 + $0x2228] ss:$16 sps:$4 sm:$0xff]   ;;  %v21206_v45 = vld [vmem:[%s23323_s9 + $0x2240] ss:$16 sps:$4 sm:$0xff]  }
 0x4df   : > { %11097 = vmatpush1.bf16.msra.mxu0 %v21116_v38  ;;  %12122 = vmatpush1.bf16.msra.mxu1 %v21119_v56  ;;  %v21208_v38 = vld [vmem:[%s23323_s9 + $0x2244] ss:$16 sps:$4 sm:$0xff]   ;;  %v21211_v56 = vld [vmem:[%s23323_s9 + $0x224c] ss:$16 sps:$4 sm:$0xff]  }
 0x4e0   : > { %11098 = vmatprep.subr.bf16.mxu0 %v21124_v57  ;;  %12123 = vmatprep.subr.bf16.mxu1 %v21127_v58  ;;  %v21209_v57 = vld [vmem:[%s23323_s9 + $0x2248] ss:$16 sps:$4 sm:$0xff]   ;;  %v21214_v58 = vld [vmem:[%s23323_s9 + $0x2264] ss:$16 sps:$4 sm:$0xff]  }
 0x4e3   : > { %11099 = vmatpush1.bf16.msra.mxu0 %v21122_v48  ;;  %12124 = vmatpush1.bf16.msra.mxu1 %v21125_v59  ;;  %v21217_v48 = vld [vmem:[%s23323_s9 + $0x226c] ss:$16 sps:$4 sm:$0xff]   ;;  %v21212_v59 = vld [vmem:[%s23323_s9 + $0x2260] ss:$16 sps:$4 sm:$0xff]  }
 0x4e4   : > { %11100 = vmatprep.subr.bf16.mxu0 %v21130_v61  ;;  %12125 = vmatprep.subr.bf16.mxu1 %v21133_v62  ;;  %v21215_v61 = vld [vmem:[%s23323_s9 + $0x2268] ss:$16 sps:$4 sm:$0xff]   ;;  %v21220_v62 = vld [vmem:[%s23323_s9 + $0x2284] ss:$16 sps:$4 sm:$0xff]  }
 0x4e7   : > { %11101 = vmatpush1.bf16.msra.mxu0 %v21128_v0  ;;  %12126 = vmatpush1.bf16.msra.mxu1 %v21131_v1  ;;  %v21223_v0 = vld [vmem:[%s23323_s9 + $0x228c] ss:$16 sps:$4 sm:$0xff]   ;;  %v21218_v1 = vld [vmem:[%s23323_s9 + $0x2280] ss:$16 sps:$4 sm:$0xff]  }
 0x4e8   : > { %11102 = vmatprep.subr.bf16.mxu0 %v21136_v35  ;;  %12127 = vmatprep.subr.bf16.mxu1 %v21139_v2  ;;  %v21221_v35 = vld [vmem:[%s23323_s9 + $0x2288] ss:$16 sps:$4 sm:$0xff]   ;;  %v21226_v2 = vld [vmem:[%s23323_s9 + $0x22a4] ss:$16 sps:$4 sm:$0xff]  }
 0x4eb   : > { %11103 = vmatpush1.bf16.msra.mxu0 %v21134_v3  ;;  %12128 = vmatpush1.bf16.msra.mxu1 %v21137_v4  ;;  %v21229_v3 = vld [vmem:[%s23323_s9 + $0x22ac] ss:$16 sps:$4 sm:$0xff]   ;;  %v21224_v4 = vld [vmem:[%s23323_s9 + $0x22a0] ss:$16 sps:$4 sm:$0xff]  }
 0x4ec   : > { %11104 = vmatprep.subr.bf16.mxu0 %v21142_v5  ;;  %12129 = vmatprep.subr.bf16.mxu1 %v21145_v6  ;;  %v21227_v5 = vld [vmem:[%s23323_s9 + $0x22a8] ss:$16 sps:$4 sm:$0xff]   ;;  %v21232_v6 = vld [vmem:[%s23323_s9 + $0x22c4] ss:$16 sps:$4 sm:$0xff]  }
 0x4ef   : > { %11105 = vmatpush1.bf16.msra.mxu0 %v21140_v7  ;;  %12130 = vmatpush1.bf16.msra.mxu1 %v21143_v9  ;;  %v21235_v7 = vld [vmem:[%s23323_s9 + $0x22cc] ss:$16 sps:$4 sm:$0xff]   ;;  %v21230_v9 = vld [vmem:[%s23323_s9 + $0x22c0] ss:$16 sps:$4 sm:$0xff]  }
 0x4f0   : > { %11106 = vmatprep.subr.bf16.mxu0 %v21148_v11  ;;  %12131 = vmatprep.subr.bf16.mxu1 %v21151_v12  ;;  %v21233_v11 = vld [vmem:[%s23323_s9 + $0x22c8] ss:$16 sps:$4 sm:$0xff]   ;;  %v21238_v12 = vld [vmem:[%s23323_s9 + $0x22e4] ss:$16 sps:$4 sm:$0xff]  }
 0x4f3   : > { %11107 = vmatpush1.bf16.msra.mxu0 %v21146_v14  ;;  %12132 = vmatpush1.bf16.msra.mxu1 %v21149_v63  ;;  %v21241_v14 = vld [vmem:[%s23323_s9 + $0x22ec] ss:$16 sps:$4 sm:$0xff]   ;;  %v21236_v63 = vld [vmem:[%s23323_s9 + $0x22e0] ss:$16 sps:$4 sm:$0xff]  }
 0x4f4   : > { %11108 = vmatprep.subr.bf16.mxu0 %v21154_v16  ;;  %12133 = vmatprep.subr.bf16.mxu1 %v21157_v52  ;;  %v21239_v16 = vld [vmem:[%s23323_s9 + $0x22e8] ss:$16 sps:$4 sm:$0xff]   ;;  %v21244_v52 = vld [vmem:[%s23323_s9 + $0x2304] ss:$16 sps:$4 sm:$0xff]  }
 0x4f7   : > { %11109 = vmatpush1.bf16.msra.mxu0 %v21152_v17  ;;  %12134 = vmatpush1.bf16.msra.mxu1 %v21155_v8  ;;  %v21247_v17 = vld [vmem:[%s23323_s9 + $0x230c] ss:$16 sps:$4 sm:$0xff]   ;;  %v21242_v8 = vld [vmem:[%s23323_s9 + $0x2300] ss:$16 sps:$4 sm:$0xff]  }
 0x4f8   : > { %11110 = vmatprep.subr.bf16.mxu0 %v21160_v18  ;;  %12135 = vmatprep.subr.bf16.mxu1 %v21163_v19  ;;  %v21245_v18 = vld [vmem:[%s23323_s9 + $0x2308] ss:$16 sps:$4 sm:$0xff]   ;;  %v21250_v19 = vld [vmem:[%s23323_s9 + $0x2324] ss:$16 sps:$4 sm:$0xff]  }
 0x4fb   : > { %11111 = vmatpush1.bf16.msra.mxu0 %v21158_v13  ;;  %12136 = vmatpush1.bf16.msra.mxu1 %v21161_v23  ;;  %v21253_v13 = vld [vmem:[%s23323_s9 + $0x232c] ss:$16 sps:$4 sm:$0xff]   ;;  %v21248_v23 = vld [vmem:[%s23323_s9 + $0x2320] ss:$16 sps:$4 sm:$0xff]  }
 0x4fc   : > { %11112 = vmatprep.subr.bf16.mxu0 %v21166_v24  ;;  %12137 = vmatprep.subr.bf16.mxu1 %v21169_v60  ;;  %v21251_v24 = vld [vmem:[%s23323_s9 + $0x2328] ss:$16 sps:$4 sm:$0xff]   ;;  %v21256_v60 = vld [vmem:[%s23323_s9 + $0x2344] ss:$16 sps:$4 sm:$0xff]  }
 0x4ff   : > { %11113 = vmatpush1.bf16.msra.mxu0 %v21164_v27  ;;  %12138 = vmatpush1.bf16.msra.mxu1 %v21167_v28  ;;  %v21259_v27 = vld [vmem:[%s23323_s9 + $0x234c] ss:$16 sps:$4 sm:$0xff]   ;;  %v21254_v28 = vld [vmem:[%s23323_s9 + $0x2340] ss:$16 sps:$4 sm:$0xff]  }
 0x500   : > { %11114 = vmatprep.subr.bf16.mxu0 %v21172_v10  ;;  %12139 = vmatprep.subr.bf16.mxu1 %v21175_v29  ;;  %v21257_v10 = vld [vmem:[%s23323_s9 + $0x2348] ss:$16 sps:$4 sm:$0xff]   ;;  %v21262_v29 = vld [vmem:[%s23323_s9 + $0x2364] ss:$16 sps:$4 sm:$0xff]  }
 0x503   : > { %11115 = vmatpush1.bf16.msra.mxu0 %v21170_v30  ;;  %12140 = vmatpush1.bf16.msra.mxu1 %v21173_v20  ;;  %v21265_v30 = vld [vmem:[%s23323_s9 + $0x236c] ss:$16 sps:$4 sm:$0xff]   ;;  %v21260_v20 = vld [vmem:[%s23323_s9 + $0x2360] ss:$16 sps:$4 sm:$0xff]  }
 0x504   : > { %11116 = vmatprep.subr.bf16.mxu0 %v21178_v31  ;;  %12141 = vmatprep.subr.bf16.mxu1 %v21181_v32  ;;  %v21263_v31 = vld [vmem:[%s23323_s9 + $0x2368] ss:$16 sps:$4 sm:$0xff]   ;;  %v21268_v32 = vld [vmem:[%s23323_s9 + $0x2384] ss:$16 sps:$4 sm:$0xff]  }
 0x507   : > { %11117 = vmatpush1.bf16.msra.mxu0 %v21176_v25  ;;  %12142 = vmatpush1.bf16.msra.mxu1 %v21179_v36  ;;  %v21271_v25 = vld [vmem:[%s23323_s9 + $0x238c] ss:$16 sps:$4 sm:$0xff]   ;;  %v21266_v36 = vld [vmem:[%s23323_s9 + $0x2380] ss:$16 sps:$4 sm:$0xff]  }
 0x508   : > { %11118 = vmatprep.subr.bf16.mxu0 %v21184_v37  ;;  %12143 = vmatprep.subr.bf16.mxu1 %v21187_v39  ;;  %v21269_v37 = vld [vmem:[%s23323_s9 + $0x2388] ss:$16 sps:$4 sm:$0xff]   ;;  %v21274_v39 = vld [vmem:[%s23323_s9 + $0x23a4] ss:$16 sps:$4 sm:$0xff]  }
 0x50b   : > { %11119 = vmatpush1.bf16.msra.mxu0 %v21182_v26  ;;  %12144 = vmatpush1.bf16.msra.mxu1 %v21185_v40  ;;  %v21277_v26 = vld [vmem:[%s23323_s9 + $0x23ac] ss:$16 sps:$4 sm:$0xff]   ;;  %v21272_v40 = vld [vmem:[%s23323_s9 + $0x23a0] ss:$16 sps:$4 sm:$0xff]  }
 0x50c   : > { %11120 = vmatprep.subr.bf16.mxu0 %v21190_v21  ;;  %12145 = vmatprep.subr.bf16.mxu1 %v21193_v41  ;;  %v21275_v21 = vld [vmem:[%s23323_s9 + $0x23a8] ss:$16 sps:$4 sm:$0xff]   ;;  %v21280_v41 = vld [vmem:[%s23323_s9 + $0x23c4] ss:$16 sps:$4 sm:$0xff]  }
 0x50f   : > { %11121 = vmatpush1.bf16.msra.mxu0 %v21188_v33  ;;  %12146 = vmatpush1.bf16.msra.mxu1 %v21191_v43  ;;  %v21283_v33 = vld [vmem:[%s23323_s9 + $0x23cc] ss:$16 sps:$4 sm:$0xff]   ;;  %v2264_v43 = vcombine.high %v24547_v15, %v24547_v15  ;;  %v21284_v15 = vld [vmem:[%s23323_s9 + $0x23e0] ss:$16 sps:$4 sm:$0xff]  }
 0x510   : > { %11131 = vmatprep.subr.bf16.mxu0 %v21196_v44  ;;  %12156 = vmatprep.subr.bf16.mxu1 %v21199_v22  ;;  %v21278_v44 = vld [vmem:[%s23323_s9 + $0x23c0] ss:$16 sps:$4 sm:$0xff]   ;;  %v21281_v22 = vld [vmem:[%s23323_s9 + $0x23c8] ss:$16 sps:$4 sm:$0xff]  }
 0x512   : > { %11123 = vmatmul.mubr.bf16.vlgmr.msra.gmra.mrb[0].mxu0 %v24636_v46  ;;  %12148 = vmatmul.mubr.bf16.vlgmr.msra.gmra.mrb[0].mxu1 %v24636_v46 }
 0x513   : > { %11132 = vmatpush1.bf16.msra.mxu0 %v21194_v47  ;;  %12157 = vmatpush1.bf16.msra.mxu1 %v21197_v50  ;;  %v21286_v47 = vld [vmem:[%s23323_s9 + $0x23e4] ss:$16 sps:$4 sm:$0xff]   ;;  %v21289_v50 = vld [vmem:[%s23323_s9 + $0x23ec] ss:$16 sps:$4 sm:$0xff]  }
 0x514   : > { %11133 = vmatprep.subr.bf16.mxu0 %v21202_v51  ;;  %12158 = vmatprep.subr.bf16.mxu1 %v21205_v53  ;;  %v24705_v51 = vrot.slane %v2264_v43, %v23395_v49  ;;  %v21287_v53 = vld [vmem:[%s23323_s9 + $0x23e8] ss:$16 sps:$4 sm:$0xff]  }
 0x515   : > { %11163 = vmatprep.mubr.bf16.mxu0 %v2311_v54  ;;  %12188 = vmatprep.mubr.bf16.mxu1 %v2311_v54  ;;  %v21292_v54 = vld [vmem:[%s23323_s9 + $0x2404] ss:$16 sps:$4 sm:$0xff]   ;;  %v21365_v43 = vld [vmem:[%s23323_s9 + $0x2588] ss:$16 sps:$4 sm:$0xff]  }
 0x517   : > { %11134 = vmatpush1.bf16.msra.mxu0 %v21200_v34  ;;  %12159 = vmatpush1.bf16.msra.mxu1 %v21203_v55  ;;  %v21295_v34 = vld [vmem:[%s23323_s9 + $0x240c] ss:$16 sps:$4 sm:$0xff]   ;;  %v2280_v55 = vcombine.high %v24705_v51, %v24705_v51 }
 0x518   : > { %11135 = vmatprep.subr.bf16.mxu0 %v21208_v38  ;;  %12160 = vmatprep.subr.bf16.mxu1 %v21211_v56  ;;  %v2309_v38 = vcombine.high %v24636_v46, %v24636_v46  ;;  %v21290_v56 = vld [vmem:[%s23323_s9 + $0x2400] ss:$16 sps:$4 sm:$0xff]  }
 0x519   : > { %v21296_v46 = vld [vmem:[%s23323_s9 + $0x2420] ss:$16 sps:$4 sm:$0xff]  }
 0x51b   : > { %11136 = vmatpush1.bf16.msra.mxu0 %v21206_v45  ;;  %12161 = vmatpush1.bf16.msra.mxu1 %v21209_v57  ;;  %v21293_v45 = vld [vmem:[%s23323_s9 + $0x2408] ss:$16 sps:$4 sm:$0xff]   ;;  %v21298_v57 = vld [vmem:[%s23323_s9 + $0x2424] ss:$16 sps:$4 sm:$0xff]  }
 0x51c   : > { %11137 = vmatprep.subr.bf16.mxu0 %v21214_v58  ;;  %12162 = vmatprep.subr.bf16.mxu1 %v21217_v48  ;;  %v21301_v58 = vld [vmem:[%s23323_s9 + $0x242c] ss:$16 sps:$4 sm:$0xff]   ;;  %v24720_v48 = vrot.slane %v2280_v55, %v23395_v49  ;;  %v21382_v55 = vld [vmem:[%s23323_s9 + $0x25e4] ss:$16 sps:$4 sm:$0xff]  }
 0x51f   : > { %11138 = vmatpush1.bf16.msra.mxu0 %v21212_v59  ;;  %12163 = vmatpush1.bf16.msra.mxu1 %v21215_v61  ;;  %v21299_v59 = vld [vmem:[%s23323_s9 + $0x2428] ss:$16 sps:$4 sm:$0xff]   ;;  %v21304_v61 = vld [vmem:[%s23323_s9 + $0x2444] ss:$16 sps:$4 sm:$0xff]  }
 0x520   : > { %11139 = vmatprep.subr.bf16.mxu0 %v21220_v62  ;;  %12164 = vmatprep.subr.bf16.mxu1 %v21223_v0  ;;  %v21307_v62 = vld [vmem:[%s23323_s9 + $0x244c] ss:$16 sps:$4 sm:$0xff]   ;;  %v21302_v0 = vld [vmem:[%s23323_s9 + $0x2440] ss:$16 sps:$4 sm:$0xff]  }
 0x523   : > { %11140 = vmatpush1.bf16.msra.mxu0 %v21218_v1  ;;  %12165 = vmatpush1.bf16.msra.mxu1 %v21221_v35  ;;  %v21305_v1 = vld [vmem:[%s23323_s9 + $0x2448] ss:$16 sps:$4 sm:$0xff]   ;;  %v21310_v35 = vld [vmem:[%s23323_s9 + $0x2464] ss:$16 sps:$4 sm:$0xff]  }
 0x524   : > { %11141 = vmatprep.subr.bf16.mxu0 %v21226_v2  ;;  %12166 = vmatprep.subr.bf16.mxu1 %v21229_v3  ;;  %v21313_v2 = vld [vmem:[%s23323_s9 + $0x246c] ss:$16 sps:$4 sm:$0xff]   ;;  %v21308_v3 = vld [vmem:[%s23323_s9 + $0x2460] ss:$16 sps:$4 sm:$0xff]  }
 0x527   : > { %11142 = vmatpush1.bf16.msra.mxu0 %v21224_v4  ;;  %12167 = vmatpush1.bf16.msra.mxu1 %v21227_v5  ;;  %v21311_v4 = vld [vmem:[%s23323_s9 + $0x2468] ss:$16 sps:$4 sm:$0xff]   ;;  %v21316_v5 = vld [vmem:[%s23323_s9 + $0x2484] ss:$16 sps:$4 sm:$0xff]  }
 0x528   : > { %11143 = vmatprep.subr.bf16.mxu0 %v21232_v6  ;;  %12168 = vmatprep.subr.bf16.mxu1 %v21235_v7  ;;  %v21319_v6 = vld [vmem:[%s23323_s9 + $0x248c] ss:$16 sps:$4 sm:$0xff]   ;;  %v21314_v7 = vld [vmem:[%s23323_s9 + $0x2480] ss:$16 sps:$4 sm:$0xff]  }
 0x52b   : > { %11144 = vmatpush1.bf16.msra.mxu0 %v21230_v9  ;;  %12169 = vmatpush1.bf16.msra.mxu1 %v21233_v11  ;;  %v21317_v9 = vld [vmem:[%s23323_s9 + $0x2488] ss:$16 sps:$4 sm:$0xff]   ;;  %v21322_v11 = vld [vmem:[%s23323_s9 + $0x24a4] ss:$16 sps:$4 sm:$0xff]  }
 0x52c   : > { %11145 = vmatprep.subr.bf16.mxu0 %v21238_v12  ;;  %12170 = vmatprep.subr.bf16.mxu1 %v21241_v14  ;;  %v21325_v12 = vld [vmem:[%s23323_s9 + $0x24ac] ss:$16 sps:$4 sm:$0xff]   ;;  %v21320_v14 = vld [vmem:[%s23323_s9 + $0x24a0] ss:$16 sps:$4 sm:$0xff]  }
 0x52f   : > { %11146 = vmatpush1.bf16.msra.mxu0 %v21236_v63  ;;  %12171 = vmatpush1.bf16.msra.mxu1 %v21239_v16  ;;  %v21323_v63 = vld [vmem:[%s23323_s9 + $0x24a8] ss:$16 sps:$4 sm:$0xff]   ;;  %v21328_v16 = vld [vmem:[%s23323_s9 + $0x24c4] ss:$16 sps:$4 sm:$0xff]  }
 0x530   : > { %11147 = vmatprep.subr.bf16.mxu0 %v21244_v52  ;;  %12172 = vmatprep.subr.bf16.mxu1 %v21247_v17  ;;  %v21331_v52 = vld [vmem:[%s23323_s9 + $0x24cc] ss:$16 sps:$4 sm:$0xff]   ;;  %v21326_v17 = vld [vmem:[%s23323_s9 + $0x24c0] ss:$16 sps:$4 sm:$0xff]  }
 0x533   : > { %11148 = vmatpush1.bf16.msra.mxu0 %v21242_v8  ;;  %12173 = vmatpush1.bf16.msra.mxu1 %v21245_v18  ;;  %v21329_v8 = vld [vmem:[%s23323_s9 + $0x24c8] ss:$16 sps:$4 sm:$0xff]   ;;  %v21334_v18 = vld [vmem:[%s23323_s9 + $0x24e4] ss:$16 sps:$4 sm:$0xff]  }
 0x534   : > { %11149 = vmatprep.subr.bf16.mxu0 %v21250_v19  ;;  %12174 = vmatprep.subr.bf16.mxu1 %v21253_v13  ;;  %v21337_v19 = vld [vmem:[%s23323_s9 + $0x24ec] ss:$16 sps:$4 sm:$0xff]   ;;  %v21332_v13 = vld [vmem:[%s23323_s9 + $0x24e0] ss:$16 sps:$4 sm:$0xff]  }
 0x537   : > { %11150 = vmatpush1.bf16.msra.mxu0 %v21248_v23  ;;  %12175 = vmatpush1.bf16.msra.mxu1 %v21251_v24  ;;  %v21335_v23 = vld [vmem:[%s23323_s9 + $0x24e8] ss:$16 sps:$4 sm:$0xff]   ;;  %v21340_v24 = vld [vmem:[%s23323_s9 + $0x2504] ss:$16 sps:$4 sm:$0xff]  }
 0x538   : > { %11151 = vmatprep.subr.bf16.mxu0 %v21256_v60  ;;  %12176 = vmatprep.subr.bf16.mxu1 %v21259_v27  ;;  %v21343_v60 = vld [vmem:[%s23323_s9 + $0x250c] ss:$16 sps:$4 sm:$0xff]   ;;  %v21338_v27 = vld [vmem:[%s23323_s9 + $0x2500] ss:$16 sps:$4 sm:$0xff]  }
 0x53b   : > { %11152 = vmatpush1.bf16.msra.mxu0 %v21254_v28  ;;  %12177 = vmatpush1.bf16.msra.mxu1 %v21257_v10  ;;  %v21341_v28 = vld [vmem:[%s23323_s9 + $0x2508] ss:$16 sps:$4 sm:$0xff]   ;;  %v21346_v10 = vld [vmem:[%s23323_s9 + $0x2524] ss:$16 sps:$4 sm:$0xff]  }
 0x53c   : > { %11153 = vmatprep.subr.bf16.mxu0 %v21262_v29  ;;  %12178 = vmatprep.subr.bf16.mxu1 %v21265_v30  ;;  %v21349_v29 = vld [vmem:[%s23323_s9 + $0x252c] ss:$16 sps:$4 sm:$0xff]   ;;  %v21344_v30 = vld [vmem:[%s23323_s9 + $0x2520] ss:$16 sps:$4 sm:$0xff]  }
 0x53f   : > { %11154 = vmatpush1.bf16.msra.mxu0 %v21260_v20  ;;  %12179 = vmatpush1.bf16.msra.mxu1 %v21263_v31  ;;  %v21347_v20 = vld [vmem:[%s23323_s9 + $0x2528] ss:$16 sps:$4 sm:$0xff]   ;;  %v21352_v31 = vld [vmem:[%s23323_s9 + $0x2544] ss:$16 sps:$4 sm:$0xff]  }
 0x540   : > { %11155 = vmatprep.subr.bf16.mxu0 %v21268_v32  ;;  %12180 = vmatprep.subr.bf16.mxu1 %v21271_v25  ;;  %v21355_v32 = vld [vmem:[%s23323_s9 + $0x254c] ss:$16 sps:$4 sm:$0xff]   ;;  %v21350_v25 = vld [vmem:[%s23323_s9 + $0x2540] ss:$16 sps:$4 sm:$0xff]  }
 0x543   : > { %11156 = vmatpush1.bf16.msra.mxu0 %v21266_v36  ;;  %12181 = vmatpush1.bf16.msra.mxu1 %v21269_v37  ;;  %v21353_v36 = vld [vmem:[%s23323_s9 + $0x2548] ss:$16 sps:$4 sm:$0xff]   ;;  %v21358_v37 = vld [vmem:[%s23323_s9 + $0x2564] ss:$16 sps:$4 sm:$0xff]  }
 0x544   : > { %11157 = vmatprep.subr.bf16.mxu0 %v21274_v39  ;;  %12182 = vmatprep.subr.bf16.mxu1 %v21277_v26  ;;  %v21361_v39 = vld [vmem:[%s23323_s9 + $0x256c] ss:$16 sps:$4 sm:$0xff]   ;;  %v21356_v26 = vld [vmem:[%s23323_s9 + $0x2560] ss:$16 sps:$4 sm:$0xff]  }
 0x547   : > { %11158 = vmatpush1.bf16.msra.mxu0 %v21272_v40  ;;  %12183 = vmatpush1.bf16.msra.mxu1 %v21275_v21  ;;  %v21359_v40 = vld [vmem:[%s23323_s9 + $0x2568] ss:$16 sps:$4 sm:$0xff]   ;;  %v21364_v21 = vld [vmem:[%s23323_s9 + $0x2584] ss:$16 sps:$4 sm:$0xff]  }
 0x548   : > { %11159 = vmatprep.subr.bf16.mxu0 %v21280_v41  ;;  %12184 = vmatprep.subr.bf16.mxu1 %v21283_v33  ;;  %v21367_v41 = vld [vmem:[%s23323_s9 + $0x258c] ss:$16 sps:$4 sm:$0xff]   ;;  %v21362_v33 = vld [vmem:[%s23323_s9 + $0x2580] ss:$16 sps:$4 sm:$0xff]  }
 0x54b   : > { %11160 = vmatpush1.bf16.msra.mxu0 %v21278_v44  ;;  %12185 = vmatpush1.bf16.msra.mxu1 %v21281_v22  ;;  %v21370_v44 = vld [vmem:[%s23323_s9 + $0x25a4] ss:$16 sps:$4 sm:$0xff]   ;;  %v21373_v22 = vld [vmem:[%s23323_s9 + $0x25ac] ss:$16 sps:$4 sm:$0xff]  }
 0x54c   : > { %11161 = vmatprep.subr.bf16.mxu0 %v21286_v47  ;;  %12186 = vmatprep.subr.bf16.mxu1 %v21289_v50  ;;  %v21368_v47 = vld [vmem:[%s23323_s9 + $0x25a0] ss:$16 sps:$4 sm:$0xff]   ;;  %v21371_v50 = vld [vmem:[%s23323_s9 + $0x25a8] ss:$16 sps:$4 sm:$0xff]  }
 0x54f   : > { %11162 = vmatpush1.bf16.msra.mxu0 %v21284_v15  ;;  %12187 = vmatpush1.bf16.msra.mxu1 %v21287_v53  ;;  %v21376_v15 = vld [vmem:[%s23323_s9 + $0x25c4] ss:$16 sps:$4 sm:$0xff]   ;;  %v21379_v53 = vld [vmem:[%s23323_s9 + $0x25cc] ss:$16 sps:$4 sm:$0xff]  }
 0x550   : > { %11172 = vmatprep.subr.bf16.mxu0 %v21292_v54  ;;  %12197 = vmatprep.subr.bf16.mxu1 %v21295_v34  ;;  %v21374_v54 = vld [vmem:[%s23323_s9 + $0x25c0] ss:$16 sps:$4 sm:$0xff]   ;;  %v21377_v34 = vld [vmem:[%s23323_s9 + $0x25c8] ss:$16 sps:$4 sm:$0xff]  }
 0x552   : > { %11164 = vmatmul.mubr.bf16.vlgmr.msra.gmra.mrb[0].mxu0 %v2309_v38  ;;  %12189 = vmatmul.mubr.bf16.vlgmr.msra.gmra.mrb[0].mxu1 %v2309_v38  ;;  %v21385_v38 = vld [vmem:[%s23323_s9 + $0x25ec] ss:$16 sps:$4 sm:$0xff]  }
 0x553   : > { %11173 = vmatpush1.bf16.msra.mxu0 %v21290_v56  ;;  %12198 = vmatpush1.bf16.msra.mxu1 %v21293_v45  ;;  %v21380_v56 = vld [vmem:[%s23323_s9 + $0x25e0] ss:$16 sps:$4 sm:$0xff]   ;;  %v21383_v45 = vld [vmem:[%s23323_s9 + $0x25e8] ss:$16 sps:$4 sm:$0xff]  }
 0x554   : > { %11174 = vmatprep.subr.bf16.mxu0 %v21298_v57  ;;  %12199 = vmatprep.subr.bf16.mxu1 %v21301_v58  ;;  %v21389_v57 = vld [vmem:[%s23323_s9 + $0x2604] ss:$16 sps:$4 sm:$0xff]   ;;  %v21392_v58 = vld [vmem:[%s23323_s9 + $0x260c] ss:$16 sps:$4 sm:$0xff]  }
 0x555   : > { %11204 = vmatprep.mubr.bf16.mxu0 %v24720_v48  ;;  %12229 = vmatprep.mubr.bf16.mxu1 %v24720_v48 }
 0x557   : > { %11175 = vmatpush1.bf16.msra.mxu0 %v21296_v46  ;;  %12200 = vmatpush1.bf16.msra.mxu1 %v21299_v59  ;;  %v24786_v46 = vrot.slane %v24705_v51, %v23395_v49  ;;  %v21387_v59 = vld [vmem:[%s23323_s9 + $0x2600] ss:$16 sps:$4 sm:$0xff]  }
 0x558   : > { %11176 = vmatprep.subr.bf16.mxu0 %v21304_v61  ;;  %12201 = vmatprep.subr.bf16.mxu1 %v21307_v62  ;;  %v21390_v61 = vld [vmem:[%s23323_s9 + $0x2608] ss:$16 sps:$4 sm:$0xff]   ;;  %v21395_v62 = vld [vmem:[%s23323_s9 + $0x2624] ss:$16 sps:$4 sm:$0xff]   ;;  %v21393_v51 = vld [vmem:[%s23323_s9 + $0x2620] ss:$16 sps:$4 sm:$0xff]  }
 0x55b   : > { %11177 = vmatpush1.bf16.msra.mxu0 %v21302_v0  ;;  %12202 = vmatpush1.bf16.msra.mxu1 %v21305_v1  ;;  %v21398_v0 = vld [vmem:[%s23323_s9 + $0x262c] ss:$16 sps:$4 sm:$0xff]   ;;  %v2312_v1 = vcombine.high %v24720_v48, %v24720_v48  ;;  %v21399_v48 = vld [vmem:[%s23323_s9 + $0x2640] ss:$16 sps:$4 sm:$0xff]  }
 0x55c   : > { %11178 = vmatprep.subr.bf16.mxu0 %v21310_v35  ;;  %12203 = vmatprep.subr.bf16.mxu1 %v21313_v2  ;;  %v21396_v35 = vld [vmem:[%s23323_s9 + $0x2628] ss:$16 sps:$4 sm:$0xff]   ;;  %v21401_v2 = vld [vmem:[%s23323_s9 + $0x2644] ss:$16 sps:$4 sm:$0xff]  }
 0x55f   : > { %11179 = vmatpush1.bf16.msra.mxu0 %v21308_v3  ;;  %12204 = vmatpush1.bf16.msra.mxu1 %v21311_v4  ;;  %v21404_v3 = vld [vmem:[%s23323_s9 + $0x264c] ss:$16 sps:$4 sm:$0xff]   ;;  %v21402_v4 = vld [vmem:[%s23323_s9 + $0x2648] ss:$16 sps:$4 sm:$0xff]  }
 0x560   : > { %11180 = vmatprep.subr.bf16.mxu0 %v21316_v5  ;;  %12205 = vmatprep.subr.bf16.mxu1 %v21319_v6  ;;  %v21407_v5 = vld [vmem:[%s23323_s9 + $0x2664] ss:$16 sps:$4 sm:$0xff]   ;;  %v21410_v6 = vld [vmem:[%s23323_s9 + $0x266c] ss:$16 sps:$4 sm:$0xff]  }
 0x563   : > { %11181 = vmatpush1.bf16.msra.mxu0 %v21314_v7  ;;  %12206 = vmatpush1.bf16.msra.mxu1 %v21317_v9  ;;  %v21405_v7 = vld [vmem:[%s23323_s9 + $0x2660] ss:$16 sps:$4 sm:$0xff]   ;;  %v21408_v9 = vld [vmem:[%s23323_s9 + $0x2668] ss:$16 sps:$4 sm:$0xff]  }
 0x564   : > { %11182 = vmatprep.subr.bf16.mxu0 %v21322_v11  ;;  %12207 = vmatprep.subr.bf16.mxu1 %v21325_v12  ;;  %v21413_v11 = vld [vmem:[%s23323_s9 + $0x2684] ss:$16 sps:$4 sm:$0xff]   ;;  %v21416_v12 = vld [vmem:[%s23323_s9 + $0x268c] ss:$16 sps:$4 sm:$0xff]  }
 0x567   : > { %11183 = vmatpush1.bf16.msra.mxu0 %v21320_v14  ;;  %12208 = vmatpush1.bf16.msra.mxu1 %v21323_v63  ;;  %v21411_v14 = vld [vmem:[%s23323_s9 + $0x2680] ss:$16 sps:$4 sm:$0xff]   ;;  %v21414_v63 = vld [vmem:[%s23323_s9 + $0x2688] ss:$16 sps:$4 sm:$0xff]  }
 0x568   : > { %11184 = vmatprep.subr.bf16.mxu0 %v21328_v16  ;;  %12209 = vmatprep.subr.bf16.mxu1 %v21331_v52  ;;  %v21419_v16 = vld [vmem:[%s23323_s9 + $0x26a4] ss:$16 sps:$4 sm:$0xff]   ;;  %v21422_v52 = vld [vmem:[%s23323_s9 + $0x26ac] ss:$16 sps:$4 sm:$0xff]  }
 0x56b   : > { %11185 = vmatpush1.bf16.msra.mxu0 %v21326_v17  ;;  %12210 = vmatpush1.bf16.msra.mxu1 %v21329_v8  ;;  %v21417_v17 = vld [vmem:[%s23323_s9 + $0x26a0] ss:$16 sps:$4 sm:$0xff]   ;;  %v21420_v8 = vld [vmem:[%s23323_s9 + $0x26a8] ss:$16 sps:$4 sm:$0xff]  }
 0x56c   : > { %11186 = vmatprep.subr.bf16.mxu0 %v21334_v18  ;;  %12211 = vmatprep.subr.bf16.mxu1 %v21337_v19  ;;  %v21425_v18 = vld [vmem:[%s23323_s9 + $0x26c4] ss:$16 sps:$4 sm:$0xff]   ;;  %v21428_v19 = vld [vmem:[%s23323_s9 + $0x26cc] ss:$16 sps:$4 sm:$0xff]  }
 0x56f   : > { %11187 = vmatpush1.bf16.msra.mxu0 %v21332_v13  ;;  %12212 = vmatpush1.bf16.msra.mxu1 %v21335_v23  ;;  %v21423_v13 = vld [vmem:[%s23323_s9 + $0x26c0] ss:$16 sps:$4 sm:$0xff]   ;;  %v21426_v23 = vld [vmem:[%s23323_s9 + $0x26c8] ss:$16 sps:$4 sm:$0xff]  }
 0x570   : > { %11188 = vmatprep.subr.bf16.mxu0 %v21340_v24  ;;  %12213 = vmatprep.subr.bf16.mxu1 %v21343_v60  ;;  %v21431_v24 = vld [vmem:[%s23323_s9 + $0x26e4] ss:$16 sps:$4 sm:$0xff]   ;;  %v21434_v60 = vld [vmem:[%s23323_s9 + $0x26ec] ss:$16 sps:$4 sm:$0xff]  }
 0x573   : > { %11189 = vmatpush1.bf16.msra.mxu0 %v21338_v27  ;;  %12214 = vmatpush1.bf16.msra.mxu1 %v21341_v28  ;;  %v21429_v27 = vld [vmem:[%s23323_s9 + $0x26e0] ss:$16 sps:$4 sm:$0xff]   ;;  %v21432_v28 = vld [vmem:[%s23323_s9 + $0x26e8] ss:$16 sps:$4 sm:$0xff]  }
 0x574   : > { %11190 = vmatprep.subr.bf16.mxu0 %v21346_v10  ;;  %12215 = vmatprep.subr.bf16.mxu1 %v21349_v29  ;;  %v21437_v10 = vld [vmem:[%s23323_s9 + $0x2704] ss:$16 sps:$4 sm:$0xff]   ;;  %v21440_v29 = vld [vmem:[%s23323_s9 + $0x270c] ss:$16 sps:$4 sm:$0xff]  }
 0x577   : > { %11191 = vmatpush1.bf16.msra.mxu0 %v21344_v30  ;;  %12216 = vmatpush1.bf16.msra.mxu1 %v21347_v20  ;;  %v21435_v30 = vld [vmem:[%s23323_s9 + $0x2700] ss:$16 sps:$4 sm:$0xff]   ;;  %v21438_v20 = vld [vmem:[%s23323_s9 + $0x2708] ss:$16 sps:$4 sm:$0xff]  }
 0x578   : > { %11192 = vmatprep.subr.bf16.mxu0 %v21352_v31  ;;  %12217 = vmatprep.subr.bf16.mxu1 %v21355_v32  ;;  %v21443_v31 = vld [vmem:[%s23323_s9 + $0x2724] ss:$16 sps:$4 sm:$0xff]   ;;  %v21446_v32 = vld [vmem:[%s23323_s9 + $0x272c] ss:$16 sps:$4 sm:$0xff]  }
 0x57b   : > { %11193 = vmatpush1.bf16.msra.mxu0 %v21350_v25  ;;  %12218 = vmatpush1.bf16.msra.mxu1 %v21353_v36  ;;  %v21441_v25 = vld [vmem:[%s23323_s9 + $0x2720] ss:$16 sps:$4 sm:$0xff]   ;;  %v21444_v36 = vld [vmem:[%s23323_s9 + $0x2728] ss:$16 sps:$4 sm:$0xff]  }
 0x57c   : > { %11194 = vmatprep.subr.bf16.mxu0 %v21358_v37  ;;  %12219 = vmatprep.subr.bf16.mxu1 %v21361_v39  ;;  %v21449_v37 = vld [vmem:[%s23323_s9 + $0x2744] ss:$16 sps:$4 sm:$0xff]   ;;  %v21452_v39 = vld [vmem:[%s23323_s9 + $0x274c] ss:$16 sps:$4 sm:$0xff]  }
 0x57f   : > { %11195 = vmatpush1.bf16.msra.mxu0 %v21356_v26  ;;  %12220 = vmatpush1.bf16.msra.mxu1 %v21359_v40  ;;  %v21447_v26 = vld [vmem:[%s23323_s9 + $0x2740] ss:$16 sps:$4 sm:$0xff]   ;;  %v21450_v40 = vld [vmem:[%s23323_s9 + $0x2748] ss:$16 sps:$4 sm:$0xff]  }
 0x580   : > { %11196 = vmatprep.subr.bf16.mxu0 %v21364_v21  ;;  %12221 = vmatprep.subr.bf16.mxu1 %v21367_v41  ;;  %v21455_v21 = vld [vmem:[%s23323_s9 + $0x2764] ss:$16 sps:$4 sm:$0xff]   ;;  %v21458_v41 = vld [vmem:[%s23323_s9 + $0x276c] ss:$16 sps:$4 sm:$0xff]  }
 0x583   : > { %11197 = vmatpush1.bf16.msra.mxu0 %v21362_v33  ;;  %12222 = vmatpush1.bf16.msra.mxu1 %v21365_v43  ;;  %v21453_v33 = vld [vmem:[%s23323_s9 + $0x2760] ss:$16 sps:$4 sm:$0xff]   ;;  %v21456_v43 = vld [vmem:[%s23323_s9 + $0x2768] ss:$16 sps:$4 sm:$0xff]  }
 0x584   : > { %11198 = vmatprep.subr.bf16.mxu0 %v21370_v44  ;;  %12223 = vmatprep.subr.bf16.mxu1 %v21373_v22  ;;  %v21461_v44 = vld [vmem:[%s23323_s9 + $0x2784] ss:$16 sps:$4 sm:$0xff]   ;;  %v21464_v22 = vld [vmem:[%s23323_s9 + $0x278c] ss:$16 sps:$4 sm:$0xff]  }
 0x587   : > { %11199 = vmatpush1.bf16.msra.mxu0 %v21368_v47  ;;  %12224 = vmatpush1.bf16.msra.mxu1 %v21371_v50  ;;  %v21459_v47 = vld [vmem:[%s23323_s9 + $0x2780] ss:$16 sps:$4 sm:$0xff]   ;;  %v21462_v50 = vld [vmem:[%s23323_s9 + $0x2788] ss:$16 sps:$4 sm:$0xff]  }
 0x588   : > { %11200 = vmatprep.subr.bf16.mxu0 %v21376_v15  ;;  %12225 = vmatprep.subr.bf16.mxu1 %v21379_v53  ;;  %v21467_v15 = vld [vmem:[%s23323_s9 + $0x27a4] ss:$16 sps:$4 sm:$0xff]   ;;  %v21470_v53 = vld [vmem:[%s23323_s9 + $0x27ac] ss:$16 sps:$4 sm:$0xff]  }
 0x58b   : > { %11201 = vmatpush1.bf16.msra.mxu0 %v21374_v54  ;;  %12226 = vmatpush1.bf16.msra.mxu1 %v21377_v34  ;;  %v21465_v54 = vld [vmem:[%s23323_s9 + $0x27a0] ss:$16 sps:$4 sm:$0xff]   ;;  %v21468_v34 = vld [vmem:[%s23323_s9 + $0x27a8] ss:$16 sps:$4 sm:$0xff]  }
 0x58c   : > { %11202 = vmatprep.subr.bf16.mxu0 %v21382_v55  ;;  %12227 = vmatprep.subr.bf16.mxu1 %v21385_v38  ;;  %v21473_v55 = vld [vmem:[%s23323_s9 + $0x27c4] ss:$16 sps:$4 sm:$0xff]   ;;  %v21476_v38 = vld [vmem:[%s23323_s9 + $0x27cc] ss:$16 sps:$4 sm:$0xff]  }
 0x58f   : > { %11203 = vmatpush1.bf16.msra.mxu0 %v21380_v56  ;;  %12228 = vmatpush1.bf16.msra.mxu1 %v21383_v45  ;;  %v24851_v56 = vld [vmem:[%s25483_s0 + $0x28] sm:$0xff]  ;;  %v21471_v45 = vld [vmem:[%s23323_s9 + $0x27c0] ss:$16 sps:$4 sm:$0xff]  }
 0x590   : > { %11213 = vmatprep.subr.bf16.mxu0 %v21389_v57  ;;  %12238 = vmatprep.subr.bf16.mxu1 %v21392_v58  ;;  %v21474_v57 = vld [vmem:[%s23323_s9 + $0x27c8] ss:$16 sps:$4 sm:$0xff]   ;;  %v21479_v58 = vld [vmem:[%s23323_s9 + $0x27e4] ss:$16 sps:$4 sm:$0xff]  }
 0x592   : > { %11205 = vmatmul.mubr.bf16.vlgmr.msra.gmra.mrb[0].mxu0 %v24786_v46  ;;  %12230 = vmatmul.mubr.bf16.vlgmr.msra.gmra.mrb[0].mxu1 %v24786_v46 }
 0x593   : > { %11214 = vmatpush1.bf16.msra.mxu0 %v21387_v59  ;;  %12239 = vmatpush1.bf16.msra.mxu1 %v21390_v61  ;;  %v21482_v59 = vld [vmem:[%s23323_s9 + $0x27ec] ss:$16 sps:$4 sm:$0xff]   ;;  %v24859_v61 = vrot.slane %v24851_v56, %v23395_v49 }
 0x594   : > { %11215 = vmatprep.subr.bf16.mxu0 %v21395_v62  ;;  %12240 = vmatprep.subr.bf16.mxu1 %v21398_v0  ;;  %v21477_v62 = vld [vmem:[%s23323_s9 + $0x27e0] ss:$16 sps:$4 sm:$0xff]   ;;  %v21480_v0 = vld [vmem:[%s23323_s9 + $0x27e8] ss:$16 sps:$4 sm:$0xff]  }
 0x595   : > { %11245 = vmatprep.mubr.bf16.mxu0 %v2312_v1  ;;  %12270 = vmatprep.mubr.bf16.mxu1 %v2312_v1  ;;  %v21485_v1 = vld [vmem:[%s23323_s9 + $0x2804] ss:$16 sps:$4 sm:$0xff]  }
 0x597   : > { %11216 = vmatpush1.bf16.msra.mxu0 %v21393_v51  ;;  %12241 = vmatpush1.bf16.msra.mxu1 %v21396_v35  ;;  %v21488_v51 = vld [vmem:[%s23323_s9 + $0x280c] ss:$16 sps:$4 sm:$0xff]   ;;  %v2328_v35 = vcombine.high %v24859_v61, %v24859_v61 }
 0x598   : > { %11217 = vmatprep.subr.bf16.mxu0 %v21401_v2  ;;  %12242 = vmatprep.subr.bf16.mxu1 %v21404_v3  ;;  %v2310_v2 = vcombine.high %v24786_v46, %v24786_v46  ;;  %v21483_v3 = vld [vmem:[%s23323_s9 + $0x2800] ss:$16 sps:$4 sm:$0xff]  }
 0x599   : > { %v21489_v46 = vld [vmem:[%s23323_s9 + $0x2820] ss:$16 sps:$4 sm:$0xff]  }
 0x59b   : > { %11218 = vmatpush1.bf16.msra.mxu0 %v21399_v48  ;;  %12243 = vmatpush1.bf16.msra.mxu1 %v21402_v4  ;;  %v21486_v48 = vld [vmem:[%s23323_s9 + $0x2808] ss:$16 sps:$4 sm:$0xff]   ;;  %v21491_v4 = vld [vmem:[%s23323_s9 + $0x2824] ss:$16 sps:$4 sm:$0xff]  }
 0x59c   : > { %11219 = vmatprep.subr.bf16.mxu0 %v21407_v5  ;;  %12244 = vmatprep.subr.bf16.mxu1 %v21410_v6  ;;  %v21494_v5 = vld [vmem:[%s23323_s9 + $0x282c] ss:$16 sps:$4 sm:$0xff]   ;;  %v24874_v6 = vrot.slane %v2328_v35, %v23395_v49  ;;  %v21570_v35 = vld [vmem:[%s23323_s9 + $0x29c8] ss:$16 sps:$4 sm:$0xff]  }
 0x59f   : > { %11220 = vmatpush1.bf16.msra.mxu0 %v21405_v7  ;;  %12245 = vmatpush1.bf16.msra.mxu1 %v21408_v9  ;;  %v21492_v7 = vld [vmem:[%s23323_s9 + $0x2828] ss:$16 sps:$4 sm:$0xff]   ;;  %v21497_v9 = vld [vmem:[%s23323_s9 + $0x2844] ss:$16 sps:$4 sm:$0xff]  }
 0x5a0   : > { %11221 = vmatprep.subr.bf16.mxu0 %v21413_v11  ;;  %12246 = vmatprep.subr.bf16.mxu1 %v21416_v12  ;;  %v21500_v11 = vld [vmem:[%s23323_s9 + $0x284c] ss:$16 sps:$4 sm:$0xff]   ;;  %v21495_v12 = vld [vmem:[%s23323_s9 + $0x2840] ss:$16 sps:$4 sm:$0xff]  }
 0x5a3   : > { %11222 = vmatpush1.bf16.msra.mxu0 %v21411_v14  ;;  %12247 = vmatpush1.bf16.msra.mxu1 %v21414_v63  ;;  %v21498_v14 = vld [vmem:[%s23323_s9 + $0x2848] ss:$16 sps:$4 sm:$0xff]   ;;  %v21503_v63 = vld [vmem:[%s23323_s9 + $0x2864] ss:$16 sps:$4 sm:$0xff]  }
 0x5a4   : > { %11223 = vmatprep.subr.bf16.mxu0 %v21419_v16  ;;  %12248 = vmatprep.subr.bf16.mxu1 %v21422_v52  ;;  %v21506_v16 = vld [vmem:[%s23323_s9 + $0x286c] ss:$16 sps:$4 sm:$0xff]   ;;  %v21501_v52 = vld [vmem:[%s23323_s9 + $0x2860] ss:$16 sps:$4 sm:$0xff]  }
 0x5a7   : > { %11224 = vmatpush1.bf16.msra.mxu0 %v21417_v17  ;;  %12249 = vmatpush1.bf16.msra.mxu1 %v21420_v8  ;;  %v21504_v17 = vld [vmem:[%s23323_s9 + $0x2868] ss:$16 sps:$4 sm:$0xff]   ;;  %v21509_v8 = vld [vmem:[%s23323_s9 + $0x2884] ss:$16 sps:$4 sm:$0xff]  }
 0x5a8   : > { %11225 = vmatprep.subr.bf16.mxu0 %v21425_v18  ;;  %12250 = vmatprep.subr.bf16.mxu1 %v21428_v19  ;;  %v21512_v18 = vld [vmem:[%s23323_s9 + $0x288c] ss:$16 sps:$4 sm:$0xff]   ;;  %v21507_v19 = vld [vmem:[%s23323_s9 + $0x2880] ss:$16 sps:$4 sm:$0xff]  }
 0x5ab   : > { %11226 = vmatpush1.bf16.msra.mxu0 %v21423_v13  ;;  %12251 = vmatpush1.bf16.msra.mxu1 %v21426_v23  ;;  %v21510_v13 = vld [vmem:[%s23323_s9 + $0x2888] ss:$16 sps:$4 sm:$0xff]   ;;  %v21515_v23 = vld [vmem:[%s23323_s9 + $0x28a4] ss:$16 sps:$4 sm:$0xff]  }
 0x5ac   : > { %11227 = vmatprep.subr.bf16.mxu0 %v21431_v24  ;;  %12252 = vmatprep.subr.bf16.mxu1 %v21434_v60  ;;  %v21518_v24 = vld [vmem:[%s23323_s9 + $0x28ac] ss:$16 sps:$4 sm:$0xff]   ;;  %v21513_v60 = vld [vmem:[%s23323_s9 + $0x28a0] ss:$16 sps:$4 sm:$0xff]  }
 0x5af   : > { %11228 = vmatpush1.bf16.msra.mxu0 %v21429_v27  ;;  %12253 = vmatpush1.bf16.msra.mxu1 %v21432_v28  ;;  %v21516_v27 = vld [vmem:[%s23323_s9 + $0x28a8] ss:$16 sps:$4 sm:$0xff]   ;;  %v21521_v28 = vld [vmem:[%s23323_s9 + $0x28c4] ss:$16 sps:$4 sm:$0xff]  }
 0x5b0   : > { %11229 = vmatprep.subr.bf16.mxu0 %v21437_v10  ;;  %12254 = vmatprep.subr.bf16.mxu1 %v21440_v29  ;;  %v21524_v10 = vld [vmem:[%s23323_s9 + $0x28cc] ss:$16 sps:$4 sm:$0xff]   ;;  %v21519_v29 = vld [vmem:[%s23323_s9 + $0x28c0] ss:$16 sps:$4 sm:$0xff]  }
 0x5b3   : > { %11230 = vmatpush1.bf16.msra.mxu0 %v21435_v30  ;;  %12255 = vmatpush1.bf16.msra.mxu1 %v21438_v20  ;;  %v21522_v30 = vld [vmem:[%s23323_s9 + $0x28c8] ss:$16 sps:$4 sm:$0xff]   ;;  %v21527_v20 = vld [vmem:[%s23323_s9 + $0x28e4] ss:$16 sps:$4 sm:$0xff]  }
 0x5b4   : > { %11231 = vmatprep.subr.bf16.mxu0 %v21443_v31  ;;  %12256 = vmatprep.subr.bf16.mxu1 %v21446_v32  ;;  %v21530_v31 = vld [vmem:[%s23323_s9 + $0x28ec] ss:$16 sps:$4 sm:$0xff]   ;;  %v21525_v32 = vld [vmem:[%s23323_s9 + $0x28e0] ss:$16 sps:$4 sm:$0xff]  }
 0x5b7   : > { %11232 = vmatpush1.bf16.msra.mxu0 %v21441_v25  ;;  %12257 = vmatpush1.bf16.msra.mxu1 %v21444_v36  ;;  %v21528_v25 = vld [vmem:[%s23323_s9 + $0x28e8] ss:$16 sps:$4 sm:$0xff]   ;;  %v21533_v36 = vld [vmem:[%s23323_s9 + $0x2904] ss:$16 sps:$4 sm:$0xff]  }
 0x5b8   : > { %11233 = vmatprep.subr.bf16.mxu0 %v21449_v37  ;;  %12258 = vmatprep.subr.bf16.mxu1 %v21452_v39  ;;  %v21536_v37 = vld [vmem:[%s23323_s9 + $0x290c] ss:$16 sps:$4 sm:$0xff]   ;;  %v21531_v39 = vld [vmem:[%s23323_s9 + $0x2900] ss:$16 sps:$4 sm:$0xff]  }
 0x5bb   : > { %11234 = vmatpush1.bf16.msra.mxu0 %v21447_v26  ;;  %12259 = vmatpush1.bf16.msra.mxu1 %v21450_v40  ;;  %v21534_v26 = vld [vmem:[%s23323_s9 + $0x2908] ss:$16 sps:$4 sm:$0xff]   ;;  %v21539_v40 = vld [vmem:[%s23323_s9 + $0x2924] ss:$16 sps:$4 sm:$0xff]  }
 0x5bc   : > { %11235 = vmatprep.subr.bf16.mxu0 %v21455_v21  ;;  %12260 = vmatprep.subr.bf16.mxu1 %v21458_v41  ;;  %v21542_v21 = vld [vmem:[%s23323_s9 + $0x292c] ss:$16 sps:$4 sm:$0xff]   ;;  %v21537_v41 = vld [vmem:[%s23323_s9 + $0x2920] ss:$16 sps:$4 sm:$0xff]  }
 0x5bf   : > { %11236 = vmatpush1.bf16.msra.mxu0 %v21453_v33  ;;  %12261 = vmatpush1.bf16.msra.mxu1 %v21456_v43  ;;  %v21540_v33 = vld [vmem:[%s23323_s9 + $0x2928] ss:$16 sps:$4 sm:$0xff]   ;;  %v21545_v43 = vld [vmem:[%s23323_s9 + $0x2944] ss:$16 sps:$4 sm:$0xff]  }
 0x5c0   : > { %11237 = vmatprep.subr.bf16.mxu0 %v21461_v44  ;;  %12262 = vmatprep.subr.bf16.mxu1 %v21464_v22  ;;  %v21548_v44 = vld [vmem:[%s23323_s9 + $0x294c] ss:$16 sps:$4 sm:$0xff]   ;;  %v21543_v22 = vld [vmem:[%s23323_s9 + $0x2940] ss:$16 sps:$4 sm:$0xff]  }
 0x5c3   : > { %11238 = vmatpush1.bf16.msra.mxu0 %v21459_v47  ;;  %12263 = vmatpush1.bf16.msra.mxu1 %v21462_v50  ;;  %v21546_v47 = vld [vmem:[%s23323_s9 + $0x2948] ss:$16 sps:$4 sm:$0xff]   ;;  %v21551_v50 = vld [vmem:[%s23323_s9 + $0x2964] ss:$16 sps:$4 sm:$0xff]  }
 0x5c4   : > { %11239 = vmatprep.subr.bf16.mxu0 %v21467_v15  ;;  %12264 = vmatprep.subr.bf16.mxu1 %v21470_v53  ;;  %v21554_v15 = vld [vmem:[%s23323_s9 + $0x296c] ss:$16 sps:$4 sm:$0xff]   ;;  %v21549_v53 = vld [vmem:[%s23323_s9 + $0x2960] ss:$16 sps:$4 sm:$0xff]  }
 0x5c7   : > { %11240 = vmatpush1.bf16.msra.mxu0 %v21465_v54  ;;  %12265 = vmatpush1.bf16.msra.mxu1 %v21468_v34  ;;  %v21552_v54 = vld [vmem:[%s23323_s9 + $0x2968] ss:$16 sps:$4 sm:$0xff]   ;;  %v21557_v34 = vld [vmem:[%s23323_s9 + $0x2984] ss:$16 sps:$4 sm:$0xff]  }
 0x5c8   : > { %11241 = vmatprep.subr.bf16.mxu0 %v21473_v55  ;;  %12266 = vmatprep.subr.bf16.mxu1 %v21476_v38  ;;  %v21560_v55 = vld [vmem:[%s23323_s9 + $0x298c] ss:$16 sps:$4 sm:$0xff]   ;;  %v21555_v38 = vld [vmem:[%s23323_s9 + $0x2980] ss:$16 sps:$4 sm:$0xff]  }
 0x5cb   : > { %11242 = vmatpush1.bf16.msra.mxu0 %v21471_v45  ;;  %12267 = vmatpush1.bf16.msra.mxu1 %v21474_v57  ;;  %v21558_v45 = vld [vmem:[%s23323_s9 + $0x2988] ss:$16 sps:$4 sm:$0xff]   ;;  %v21563_v57 = vld [vmem:[%s23323_s9 + $0x29a4] ss:$16 sps:$4 sm:$0xff]  }
 0x5cc   : > { %11243 = vmatprep.subr.bf16.mxu0 %v21479_v58  ;;  %12268 = vmatprep.subr.bf16.mxu1 %v21482_v59  ;;  %v21566_v58 = vld [vmem:[%s23323_s9 + $0x29ac] ss:$16 sps:$4 sm:$0xff]   ;;  %v21561_v59 = vld [vmem:[%s23323_s9 + $0x29a0] ss:$16 sps:$4 sm:$0xff]  }
 0x5cf   : > { %11244 = vmatpush1.bf16.msra.mxu0 %v21477_v62  ;;  %12269 = vmatpush1.bf16.msra.mxu1 %v21480_v0  ;;  %v21564_v62 = vld [vmem:[%s23323_s9 + $0x29a8] ss:$16 sps:$4 sm:$0xff]   ;;  %v21569_v0 = vld [vmem:[%s23323_s9 + $0x29c4] ss:$16 sps:$4 sm:$0xff]  }
 0x5d0   : > { %11254 = vmatprep.subr.bf16.mxu0 %v21485_v1  ;;  %12279 = vmatprep.subr.bf16.mxu1 %v21488_v51  ;;  %v21572_v1 = vld [vmem:[%s23323_s9 + $0x29cc] ss:$16 sps:$4 sm:$0xff]   ;;  %v21567_v51 = vld [vmem:[%s23323_s9 + $0x29c0] ss:$16 sps:$4 sm:$0xff]  }
 0x5d2   : > { %11246 = vmatmul.mubr.bf16.vlgmr.msra.gmra.mrb[0].mxu0 %v2310_v2  ;;  %12271 = vmatmul.mubr.bf16.vlgmr.msra.gmra.mrb[0].mxu1 %v2310_v2  ;;  %v21575_v2 = vld [vmem:[%s23323_s9 + $0x29e4] ss:$16 sps:$4 sm:$0xff]  }
 0x5d3   : > { %11255 = vmatpush1.bf16.msra.mxu0 %v21483_v3  ;;  %12280 = vmatpush1.bf16.msra.mxu1 %v21486_v48  ;;  %v21578_v3 = vld [vmem:[%s23323_s9 + $0x29ec] ss:$16 sps:$4 sm:$0xff]   ;;  %v21573_v48 = vld [vmem:[%s23323_s9 + $0x29e0] ss:$16 sps:$4 sm:$0xff]  }
 0x5d4   : > { %11256 = vmatprep.subr.bf16.mxu0 %v21491_v4  ;;  %12281 = vmatprep.subr.bf16.mxu1 %v21494_v5  ;;  %v21576_v4 = vld [vmem:[%s23323_s9 + $0x29e8] ss:$16 sps:$4 sm:$0xff]   ;;  %v21581_v5 = vld [vmem:[%s23323_s9 + $0x2a04] ss:$16 sps:$4 sm:$0xff]  }
 0x5d5   : > { %11286 = vmatprep.mubr.bf16.mxu0 %v24874_v6  ;;  %12311 = vmatprep.mubr.bf16.mxu1 %v24874_v6 }
 0x5d7   : > { %11257 = vmatpush1.bf16.msra.mxu0 %v21489_v46  ;;  %12282 = vmatpush1.bf16.msra.mxu1 %v21492_v7  ;;  %v21584_v46 = vld [vmem:[%s23323_s9 + $0x2a0c] ss:$16 sps:$4 sm:$0xff]   ;;  %v24940_v7 = vrot.slane %v24859_v61, %v23395_v49  ;;  %v21585_v61 = vld [vmem:[%s23323_s9 + $0x2a20] ss:$16 sps:$4 sm:$0xff]  }
 0x5d8   : > { %11258 = vmatprep.subr.bf16.mxu0 %v21497_v9  ;;  %12283 = vmatprep.subr.bf16.mxu1 %v21500_v11  ;;  %v21579_v9 = vld [vmem:[%s23323_s9 + $0x2a00] ss:$16 sps:$4 sm:$0xff]   ;;  %v21582_v11 = vld [vmem:[%s23323_s9 + $0x2a08] ss:$16 sps:$4 sm:$0xff]  }
 0x5db   : > { %11259 = vmatpush1.bf16.msra.mxu0 %v21495_v12  ;;  %12284 = vmatpush1.bf16.msra.mxu1 %v21498_v14  ;;  %v21587_v12 = vld [vmem:[%s23323_s9 + $0x2a24] ss:$16 sps:$4 sm:$0xff]   ;;  %v21590_v14 = vld [vmem:[%s23323_s9 + $0x2a2c] ss:$16 sps:$4 sm:$0xff]  }
 0x5dc   : > { %11260 = vmatprep.subr.bf16.mxu0 %v21503_v63  ;;  %12285 = vmatprep.subr.bf16.mxu1 %v21506_v16  ;;  %v2360_v63 = vcombine.high %v24874_v6, %v24874_v6  ;;  %v21588_v16 = vld [vmem:[%s23323_s9 + $0x2a28] ss:$16 sps:$4 sm:$0xff]   ;;  %v21591_v6 = vld [vmem:[%s23323_s9 + $0x2a40] ss:$16 sps:$4 sm:$0xff]  }
 0x5df   : > { %11261 = vmatpush1.bf16.msra.mxu0 %v21501_v52  ;;  %12286 = vmatpush1.bf16.msra.mxu1 %v21504_v17  ;;  %v21593_v52 = vld [vmem:[%s23323_s9 + $0x2a44] ss:$16 sps:$4 sm:$0xff]   ;;  %v21596_v17 = vld [vmem:[%s23323_s9 + $0x2a4c] ss:$16 sps:$4 sm:$0xff]  }
 0x5e0   : > { %11262 = vmatprep.subr.bf16.mxu0 %v21509_v8  ;;  %12287 = vmatprep.subr.bf16.mxu1 %v21512_v18  ;;  %v21594_v8 = vld [vmem:[%s23323_s9 + $0x2a48] ss:$16 sps:$4 sm:$0xff]   ;;  %v21599_v18 = vld [vmem:[%s23323_s9 + $0x2a64] ss:$16 sps:$4 sm:$0xff]  }
 0x5e3   : > { %11263 = vmatpush1.bf16.msra.mxu0 %v21507_v19  ;;  %12288 = vmatpush1.bf16.msra.mxu1 %v21510_v13  ;;  %v21602_v19 = vld [vmem:[%s23323_s9 + $0x2a6c] ss:$16 sps:$4 sm:$0xff]   ;;  %v21597_v13 = vld [vmem:[%s23323_s9 + $0x2a60] ss:$16 sps:$4 sm:$0xff]  }
 0x5e4   : > { %11264 = vmatprep.subr.bf16.mxu0 %v21515_v23  ;;  %12289 = vmatprep.subr.bf16.mxu1 %v21518_v24  ;;  %v21600_v23 = vld [vmem:[%s23323_s9 + $0x2a68] ss:$16 sps:$4 sm:$0xff]   ;;  %v21605_v24 = vld [vmem:[%s23323_s9 + $0x2a84] ss:$16 sps:$4 sm:$0xff]  }
 0x5e7   : > { %11265 = vmatpush1.bf16.msra.mxu0 %v21513_v60  ;;  %12290 = vmatpush1.bf16.msra.mxu1 %v21516_v27  ;;  %v21608_v60 = vld [vmem:[%s23323_s9 + $0x2a8c] ss:$16 sps:$4 sm:$0xff]   ;;  %v21603_v27 = vld [vmem:[%s23323_s9 + $0x2a80] ss:$16 sps:$4 sm:$0xff]  }
 0x5e8   : > { %11266 = vmatprep.subr.bf16.mxu0 %v21521_v28  ;;  %12291 = vmatprep.subr.bf16.mxu1 %v21524_v10  ;;  %v21606_v28 = vld [vmem:[%s23323_s9 + $0x2a88] ss:$16 sps:$4 sm:$0xff]   ;;  %v21611_v10 = vld [vmem:[%s23323_s9 + $0x2aa4] ss:$16 sps:$4 sm:$0xff]  }
 0x5eb   : > { %11267 = vmatpush1.bf16.msra.mxu0 %v21519_v29  ;;  %12292 = vmatpush1.bf16.msra.mxu1 %v21522_v30  ;;  %v21614_v29 = vld [vmem:[%s23323_s9 + $0x2aac] ss:$16 sps:$4 sm:$0xff]   ;;  %v21609_v30 = vld [vmem:[%s23323_s9 + $0x2aa0] ss:$16 sps:$4 sm:$0xff]  }
 0x5ec   : > { %11268 = vmatprep.subr.bf16.mxu0 %v21527_v20  ;;  %12293 = vmatprep.subr.bf16.mxu1 %v21530_v31  ;;  %v21612_v20 = vld [vmem:[%s23323_s9 + $0x2aa8] ss:$16 sps:$4 sm:$0xff]   ;;  %v21617_v31 = vld [vmem:[%s23323_s9 + $0x2ac4] ss:$16 sps:$4 sm:$0xff]  }
 0x5ef   : > { %11269 = vmatpush1.bf16.msra.mxu0 %v21525_v32  ;;  %12294 = vmatpush1.bf16.msra.mxu1 %v21528_v25  ;;  %v21620_v32 = vld [vmem:[%s23323_s9 + $0x2acc] ss:$16 sps:$4 sm:$0xff]   ;;  %v21615_v25 = vld [vmem:[%s23323_s9 + $0x2ac0] ss:$16 sps:$4 sm:$0xff]  }
 0x5f0   : > { %11270 = vmatprep.subr.bf16.mxu0 %v21533_v36  ;;  %12295 = vmatprep.subr.bf16.mxu1 %v21536_v37  ;;  %v21618_v36 = vld [vmem:[%s23323_s9 + $0x2ac8] ss:$16 sps:$4 sm:$0xff]   ;;  %v21623_v37 = vld [vmem:[%s23323_s9 + $0x2ae4] ss:$16 sps:$4 sm:$0xff]  }
 0x5f3   : > { %11271 = vmatpush1.bf16.msra.mxu0 %v21531_v39  ;;  %12296 = vmatpush1.bf16.msra.mxu1 %v21534_v26  ;;  %v21626_v39 = vld [vmem:[%s23323_s9 + $0x2aec] ss:$16 sps:$4 sm:$0xff]   ;;  %v21621_v26 = vld [vmem:[%s23323_s9 + $0x2ae0] ss:$16 sps:$4 sm:$0xff]  }
 0x5f4   : > { %11272 = vmatprep.subr.bf16.mxu0 %v21539_v40  ;;  %12297 = vmatprep.subr.bf16.mxu1 %v21542_v21  ;;  %v21624_v40 = vld [vmem:[%s23323_s9 + $0x2ae8] ss:$16 sps:$4 sm:$0xff]   ;;  %v21629_v21 = vld [vmem:[%s23323_s9 + $0x2b04] ss:$16 sps:$4 sm:$0xff]  }
 0x5f7   : > { %11273 = vmatpush1.bf16.msra.mxu0 %v21537_v41  ;;  %12298 = vmatpush1.bf16.msra.mxu1 %v21540_v33  ;;  %v21632_v41 = vld [vmem:[%s23323_s9 + $0x2b0c] ss:$16 sps:$4 sm:$0xff]   ;;  %v21627_v33 = vld [vmem:[%s23323_s9 + $0x2b00] ss:$16 sps:$4 sm:$0xff]  }
 0x5f8   : > { %11274 = vmatprep.subr.bf16.mxu0 %v21545_v43  ;;  %12299 = vmatprep.subr.bf16.mxu1 %v21548_v44  ;;  %v21630_v43 = vld [vmem:[%s23323_s9 + $0x2b08] ss:$16 sps:$4 sm:$0xff]   ;;  %v21635_v44 = vld [vmem:[%s23323_s9 + $0x2b24] ss:$16 sps:$4 sm:$0xff]  }
 0x5fb   : > { %11275 = vmatpush1.bf16.msra.mxu0 %v21543_v22  ;;  %12300 = vmatpush1.bf16.msra.mxu1 %v21546_v47  ;;  %v21638_v22 = vld [vmem:[%s23323_s9 + $0x2b2c] ss:$16 sps:$4 sm:$0xff]   ;;  %v21633_v47 = vld [vmem:[%s23323_s9 + $0x2b20] ss:$16 sps:$4 sm:$0xff]  }
 0x5fc   : > { %11276 = vmatprep.subr.bf16.mxu0 %v21551_v50  ;;  %12301 = vmatprep.subr.bf16.mxu1 %v21554_v15  ;;  %v21636_v50 = vld [vmem:[%s23323_s9 + $0x2b28] ss:$16 sps:$4 sm:$0xff]   ;;  %v21641_v15 = vld [vmem:[%s23323_s9 + $0x2b44] ss:$16 sps:$4 sm:$0xff]  }
 0x5ff   : > { %11277 = vmatpush1.bf16.msra.mxu0 %v21549_v53  ;;  %12302 = vmatpush1.bf16.msra.mxu1 %v21552_v54  ;;  %v21644_v53 = vld [vmem:[%s23323_s9 + $0x2b4c] ss:$16 sps:$4 sm:$0xff]   ;;  %v21639_v54 = vld [vmem:[%s23323_s9 + $0x2b40] ss:$16 sps:$4 sm:$0xff]  }
 0x600   : > { %11278 = vmatprep.subr.bf16.mxu0 %v21557_v34  ;;  %12303 = vmatprep.subr.bf16.mxu1 %v21560_v55  ;;  %v21642_v34 = vld [vmem:[%s23323_s9 + $0x2b48] ss:$16 sps:$4 sm:$0xff]   ;;  %v21647_v55 = vld [vmem:[%s23323_s9 + $0x2b64] ss:$16 sps:$4 sm:$0xff]  }
 0x603   : > { %11279 = vmatpush1.bf16.msra.mxu0 %v21555_v38  ;;  %12304 = vmatpush1.bf16.msra.mxu1 %v21558_v45  ;;  %v21650_v38 = vld [vmem:[%s23323_s9 + $0x2b6c] ss:$16 sps:$4 sm:$0xff]   ;;  %v21645_v45 = vld [vmem:[%s23323_s9 + $0x2b60] ss:$16 sps:$4 sm:$0xff]  }
 0x604   : > { %11280 = vmatprep.subr.bf16.mxu0 %v21563_v57  ;;  %12305 = vmatprep.subr.bf16.mxu1 %v21566_v58  ;;  %v21648_v57 = vld [vmem:[%s23323_s9 + $0x2b68] ss:$16 sps:$4 sm:$0xff]   ;;  %v21653_v58 = vld [vmem:[%s23323_s9 + $0x2b84] ss:$16 sps:$4 sm:$0xff]  }
 0x607   : > { %11281 = vmatpush1.bf16.msra.mxu0 %v21561_v59  ;;  %12306 = vmatpush1.bf16.msra.mxu1 %v21564_v62  ;;  %v21656_v59 = vld [vmem:[%s23323_s9 + $0x2b8c] ss:$16 sps:$4 sm:$0xff]   ;;  %v21651_v62 = vld [vmem:[%s23323_s9 + $0x2b80] ss:$16 sps:$4 sm:$0xff]  }
 0x608   : > { %11282 = vmatprep.subr.bf16.mxu0 %v21569_v0  ;;  %12307 = vmatprep.subr.bf16.mxu1 %v21572_v1  ;;  %v21654_v0 = vld [vmem:[%s23323_s9 + $0x2b88] ss:$16 sps:$4 sm:$0xff]   ;;  %v21659_v1 = vld [vmem:[%s23323_s9 + $0x2ba4] ss:$16 sps:$4 sm:$0xff]  }
 0x60b   : > { %11283 = vmatpush1.bf16.msra.mxu0 %v21567_v51  ;;  %12308 = vmatpush1.bf16.msra.mxu1 %v21570_v35  ;;  %v21662_v51 = vld [vmem:[%s23323_s9 + $0x2bac] ss:$16 sps:$4 sm:$0xff]   ;;  %v21657_v35 = vld [vmem:[%s23323_s9 + $0x2ba0] ss:$16 sps:$4 sm:$0xff]  }
 0x60c   : > { %11284 = vmatprep.subr.bf16.mxu0 %v21575_v2  ;;  %12309 = vmatprep.subr.bf16.mxu1 %v21578_v3  ;;  %v21660_v2 = vld [vmem:[%s23323_s9 + $0x2ba8] ss:$16 sps:$4 sm:$0xff]   ;;  %v21665_v3 = vld [vmem:[%s23323_s9 + $0x2bc4] ss:$16 sps:$4 sm:$0xff]  }
 0x60f   : > { %11285 = vmatpush1.bf16.msra.mxu0 %v21573_v48  ;;  %12310 = vmatpush1.bf16.msra.mxu1 %v21576_v4  ;;  %v21668_v48 = vld [vmem:[%s23323_s9 + $0x2bcc] ss:$16 sps:$4 sm:$0xff]   ;;  %v2313_v4 = vcombine.high %v24851_v56, %v24851_v56  ;;  %v21669_v56 = vld [vmem:[%s23323_s9 + $0x2be0] ss:$16 sps:$4 sm:$0xff]  }
 0x610   : > { %11295 = vmatprep.subr.bf16.mxu0 %v21581_v5  ;;  %12320 = vmatprep.subr.bf16.mxu1 %v21584_v46  ;;  %v21663_v5 = vld [vmem:[%s23323_s9 + $0x2bc0] ss:$16 sps:$4 sm:$0xff]   ;;  %v21666_v46 = vld [vmem:[%s23323_s9 + $0x2bc8] ss:$16 sps:$4 sm:$0xff]  }
 0x612   : > { %11287 = vmatmul.mubr.bf16.vlgmr.msra.gmra.mrb[0].mxu0 %v24940_v7  ;;  %12312 = vmatmul.mubr.bf16.vlgmr.msra.gmra.mrb[0].mxu1 %v24940_v7 }
 0x613   : > { %11296 = vmatpush1.bf16.msra.mxu0 %v21579_v9  ;;  %12321 = vmatpush1.bf16.msra.mxu1 %v21582_v11  ;;  %v21671_v9 = vld [vmem:[%s23323_s9 + $0x2be4] ss:$16 sps:$4 sm:$0xff]   ;;  %v21674_v11 = vld [vmem:[%s23323_s9 + $0x2bec] ss:$16 sps:$4 sm:$0xff]  }
 0x614   : > { %11297 = vmatprep.subr.bf16.mxu0 %v21587_v12  ;;  %12322 = vmatprep.subr.bf16.mxu1 %v21590_v14  ;;  %v25009_v12 = vrot.slane %v2313_v4, %v23395_v49  ;;  %v21672_v14 = vld [vmem:[%s23323_s9 + $0x2be8] ss:$16 sps:$4 sm:$0xff]  }
 0x615   : > { %11327 = vmatprep.mubr.bf16.mxu0 %v2360_v63  ;;  %12352 = vmatprep.mubr.bf16.mxu1 %v2360_v63  ;;  %v21677_v63 = vld [vmem:[%s23323_s9 + $0x2c04] ss:$16 sps:$4 sm:$0xff]   ;;  %v21750_v4 = vld [vmem:[%s23323_s9 + $0x2d88] ss:$16 sps:$4 sm:$0xff]  }
 0x617   : > { %11298 = vmatpush1.bf16.msra.mxu0 %v21585_v61  ;;  %12323 = vmatpush1.bf16.msra.mxu1 %v21588_v16  ;;  %v21680_v61 = vld [vmem:[%s23323_s9 + $0x2c0c] ss:$16 sps:$4 sm:$0xff]   ;;  %v2329_v16 = vcombine.high %v25009_v12, %v25009_v12 }
 0x618   : > { %11299 = vmatprep.subr.bf16.mxu0 %v21593_v52  ;;  %12324 = vmatprep.subr.bf16.mxu1 %v21596_v17  ;;  %v2358_v52 = vcombine.high %v24940_v7, %v24940_v7  ;;  %v21675_v17 = vld [vmem:[%s23323_s9 + $0x2c00] ss:$16 sps:$4 sm:$0xff]  }
 0x619   : > { %v21681_v7 = vld [vmem:[%s23323_s9 + $0x2c20] ss:$16 sps:$4 sm:$0xff]  }
 0x61b   : > { %11300 = vmatpush1.bf16.msra.mxu0 %v21591_v6  ;;  %12325 = vmatpush1.bf16.msra.mxu1 %v21594_v8  ;;  %v21678_v6 = vld [vmem:[%s23323_s9 + $0x2c08] ss:$16 sps:$4 sm:$0xff]   ;;  %v21683_v8 = vld [vmem:[%s23323_s9 + $0x2c24] ss:$16 sps:$4 sm:$0xff]  }
 0x61c   : > { %11301 = vmatprep.subr.bf16.mxu0 %v21599_v18  ;;  %12326 = vmatprep.subr.bf16.mxu1 %v21602_v19  ;;  %v21686_v18 = vld [vmem:[%s23323_s9 + $0x2c2c] ss:$16 sps:$4 sm:$0xff]   ;;  %v25024_v19 = vrot.slane %v2329_v16, %v23395_v49  ;;  %v21767_v16 = vld [vmem:[%s23323_s9 + $0x2de4] ss:$16 sps:$4 sm:$0xff]  }
 0x61f   : > { %11302 = vmatpush1.bf16.msra.mxu0 %v21597_v13  ;;  %12327 = vmatpush1.bf16.msra.mxu1 %v21600_v23  ;;  %v21684_v13 = vld [vmem:[%s23323_s9 + $0x2c28] ss:$16 sps:$4 sm:$0xff]   ;;  %v21689_v23 = vld [vmem:[%s23323_s9 + $0x2c44] ss:$16 sps:$4 sm:$0xff]  }
 0x620   : > { %11303 = vmatprep.subr.bf16.mxu0 %v21605_v24  ;;  %12328 = vmatprep.subr.bf16.mxu1 %v21608_v60  ;;  %v21692_v24 = vld [vmem:[%s23323_s9 + $0x2c4c] ss:$16 sps:$4 sm:$0xff]   ;;  %v21687_v60 = vld [vmem:[%s23323_s9 + $0x2c40] ss:$16 sps:$4 sm:$0xff]  }
 0x623   : > { %11304 = vmatpush1.bf16.msra.mxu0 %v21603_v27  ;;  %12329 = vmatpush1.bf16.msra.mxu1 %v21606_v28  ;;  %v21690_v27 = vld [vmem:[%s23323_s9 + $0x2c48] ss:$16 sps:$4 sm:$0xff]   ;;  %v21695_v28 = vld [vmem:[%s23323_s9 + $0x2c64] ss:$16 sps:$4 sm:$0xff]  }
 0x624   : > { %11305 = vmatprep.subr.bf16.mxu0 %v21611_v10  ;;  %12330 = vmatprep.subr.bf16.mxu1 %v21614_v29  ;;  %v21698_v10 = vld [vmem:[%s23323_s9 + $0x2c6c] ss:$16 sps:$4 sm:$0xff]   ;;  %v21693_v29 = vld [vmem:[%s23323_s9 + $0x2c60] ss:$16 sps:$4 sm:$0xff]  }
 0x627   : > { %11306 = vmatpush1.bf16.msra.mxu0 %v21609_v30  ;;  %12331 = vmatpush1.bf16.msra.mxu1 %v21612_v20  ;;  %v21696_v30 = vld [vmem:[%s23323_s9 + $0x2c68] ss:$16 sps:$4 sm:$0xff]   ;;  %v21701_v20 = vld [vmem:[%s23323_s9 + $0x2c84] ss:$16 sps:$4 sm:$0xff]  }
 0x628   : > { %11307 = vmatprep.subr.bf16.mxu0 %v21617_v31  ;;  %12332 = vmatprep.subr.bf16.mxu1 %v21620_v32  ;;  %v21704_v31 = vld [vmem:[%s23323_s9 + $0x2c8c] ss:$16 sps:$4 sm:$0xff]   ;;  %v21699_v32 = vld [vmem:[%s23323_s9 + $0x2c80] ss:$16 sps:$4 sm:$0xff]  }
 0x62b   : > { %11308 = vmatpush1.bf16.msra.mxu0 %v21615_v25  ;;  %12333 = vmatpush1.bf16.msra.mxu1 %v21618_v36  ;;  %v21702_v25 = vld [vmem:[%s23323_s9 + $0x2c88] ss:$16 sps:$4 sm:$0xff]   ;;  %v21707_v36 = vld [vmem:[%s23323_s9 + $0x2ca4] ss:$16 sps:$4 sm:$0xff]  }
 0x62c   : > { %11309 = vmatprep.subr.bf16.mxu0 %v21623_v37  ;;  %12334 = vmatprep.subr.bf16.mxu1 %v21626_v39  ;;  %v21710_v37 = vld [vmem:[%s23323_s9 + $0x2cac] ss:$16 sps:$4 sm:$0xff]   ;;  %v21705_v39 = vld [vmem:[%s23323_s9 + $0x2ca0] ss:$16 sps:$4 sm:$0xff]  }
 0x62f   : > { %11310 = vmatpush1.bf16.msra.mxu0 %v21621_v26  ;;  %12335 = vmatpush1.bf16.msra.mxu1 %v21624_v40  ;;  %v21708_v26 = vld [vmem:[%s23323_s9 + $0x2ca8] ss:$16 sps:$4 sm:$0xff]   ;;  %v21713_v40 = vld [vmem:[%s23323_s9 + $0x2cc4] ss:$16 sps:$4 sm:$0xff]  }
 0x630   : > { %11311 = vmatprep.subr.bf16.mxu0 %v21629_v21  ;;  %12336 = vmatprep.subr.bf16.mxu1 %v21632_v41  ;;  %v21716_v21 = vld [vmem:[%s23323_s9 + $0x2ccc] ss:$16 sps:$4 sm:$0xff]   ;;  %v21711_v41 = vld [vmem:[%s23323_s9 + $0x2cc0] ss:$16 sps:$4 sm:$0xff]  }
 0x633   : > { %11312 = vmatpush1.bf16.msra.mxu0 %v21627_v33  ;;  %12337 = vmatpush1.bf16.msra.mxu1 %v21630_v43  ;;  %v21714_v33 = vld [vmem:[%s23323_s9 + $0x2cc8] ss:$16 sps:$4 sm:$0xff]   ;;  %v21719_v43 = vld [vmem:[%s23323_s9 + $0x2ce4] ss:$16 sps:$4 sm:$0xff]  }
 0x634   : > { %11313 = vmatprep.subr.bf16.mxu0 %v21635_v44  ;;  %12338 = vmatprep.subr.bf16.mxu1 %v21638_v22  ;;  %v21722_v44 = vld [vmem:[%s23323_s9 + $0x2cec] ss:$16 sps:$4 sm:$0xff]   ;;  %v21717_v22 = vld [vmem:[%s23323_s9 + $0x2ce0] ss:$16 sps:$4 sm:$0xff]  }
 0x637   : > { %11314 = vmatpush1.bf16.msra.mxu0 %v21633_v47  ;;  %12339 = vmatpush1.bf16.msra.mxu1 %v21636_v50  ;;  %v21720_v47 = vld [vmem:[%s23323_s9 + $0x2ce8] ss:$16 sps:$4 sm:$0xff]   ;;  %v21725_v50 = vld [vmem:[%s23323_s9 + $0x2d04] ss:$16 sps:$4 sm:$0xff]  }
 0x638   : > { %11315 = vmatprep.subr.bf16.mxu0 %v21641_v15  ;;  %12340 = vmatprep.subr.bf16.mxu1 %v21644_v53  ;;  %v21728_v15 = vld [vmem:[%s23323_s9 + $0x2d0c] ss:$16 sps:$4 sm:$0xff]   ;;  %v21723_v53 = vld [vmem:[%s23323_s9 + $0x2d00] ss:$16 sps:$4 sm:$0xff]  }
 0x63b   : > { %11316 = vmatpush1.bf16.msra.mxu0 %v21639_v54  ;;  %12341 = vmatpush1.bf16.msra.mxu1 %v21642_v34  ;;  %v21726_v54 = vld [vmem:[%s23323_s9 + $0x2d08] ss:$16 sps:$4 sm:$0xff]   ;;  %v21731_v34 = vld [vmem:[%s23323_s9 + $0x2d24] ss:$16 sps:$4 sm:$0xff]  }
 0x63c   : > { %11317 = vmatprep.subr.bf16.mxu0 %v21647_v55  ;;  %12342 = vmatprep.subr.bf16.mxu1 %v21650_v38  ;;  %v21734_v55 = vld [vmem:[%s23323_s9 + $0x2d2c] ss:$16 sps:$4 sm:$0xff]   ;;  %v21729_v38 = vld [vmem:[%s23323_s9 + $0x2d20] ss:$16 sps:$4 sm:$0xff]  }
 0x63f   : > { %11318 = vmatpush1.bf16.msra.mxu0 %v21645_v45  ;;  %12343 = vmatpush1.bf16.msra.mxu1 %v21648_v57  ;;  %v21732_v45 = vld [vmem:[%s23323_s9 + $0x2d28] ss:$16 sps:$4 sm:$0xff]   ;;  %v21737_v57 = vld [vmem:[%s23323_s9 + $0x2d44] ss:$16 sps:$4 sm:$0xff]  }
 0x640   : > { %11319 = vmatprep.subr.bf16.mxu0 %v21653_v58  ;;  %12344 = vmatprep.subr.bf16.mxu1 %v21656_v59  ;;  %v21740_v58 = vld [vmem:[%s23323_s9 + $0x2d4c] ss:$16 sps:$4 sm:$0xff]   ;;  %v21735_v59 = vld [vmem:[%s23323_s9 + $0x2d40] ss:$16 sps:$4 sm:$0xff]  }
 0x643   : > { %11320 = vmatpush1.bf16.msra.mxu0 %v21651_v62  ;;  %12345 = vmatpush1.bf16.msra.mxu1 %v21654_v0  ;;  %v21738_v62 = vld [vmem:[%s23323_s9 + $0x2d48] ss:$16 sps:$4 sm:$0xff]   ;;  %v21743_v0 = vld [vmem:[%s23323_s9 + $0x2d64] ss:$16 sps:$4 sm:$0xff]  }
 0x644   : > { %11321 = vmatprep.subr.bf16.mxu0 %v21659_v1  ;;  %12346 = vmatprep.subr.bf16.mxu1 %v21662_v51  ;;  %v21746_v1 = vld [vmem:[%s23323_s9 + $0x2d6c] ss:$16 sps:$4 sm:$0xff]   ;;  %v21741_v51 = vld [vmem:[%s23323_s9 + $0x2d60] ss:$16 sps:$4 sm:$0xff]  }
 0x647   : > { %11322 = vmatpush1.bf16.msra.mxu0 %v21657_v35  ;;  %12347 = vmatpush1.bf16.msra.mxu1 %v21660_v2  ;;  %v21744_v35 = vld [vmem:[%s23323_s9 + $0x2d68] ss:$16 sps:$4 sm:$0xff]   ;;  %v21749_v2 = vld [vmem:[%s23323_s9 + $0x2d84] ss:$16 sps:$4 sm:$0xff]  }
 0x648   : > { %11323 = vmatprep.subr.bf16.mxu0 %v21665_v3  ;;  %12348 = vmatprep.subr.bf16.mxu1 %v21668_v48  ;;  %v21752_v3 = vld [vmem:[%s23323_s9 + $0x2d8c] ss:$16 sps:$4 sm:$0xff]   ;;  %v21747_v48 = vld [vmem:[%s23323_s9 + $0x2d80] ss:$16 sps:$4 sm:$0xff]  }
 0x64b   : > { %11324 = vmatpush1.bf16.msra.mxu0 %v21663_v5  ;;  %12349 = vmatpush1.bf16.msra.mxu1 %v21666_v46  ;;  %v21755_v5 = vld [vmem:[%s23323_s9 + $0x2da4] ss:$16 sps:$4 sm:$0xff]   ;;  %v21758_v46 = vld [vmem:[%s23323_s9 + $0x2dac] ss:$16 sps:$4 sm:$0xff]  }
 0x64c   : > { %11325 = vmatprep.subr.bf16.mxu0 %v21671_v9  ;;  %12350 = vmatprep.subr.bf16.mxu1 %v21674_v11  ;;  %v21753_v9 = vld [vmem:[%s23323_s9 + $0x2da0] ss:$16 sps:$4 sm:$0xff]   ;;  %v21756_v11 = vld [vmem:[%s23323_s9 + $0x2da8] ss:$16 sps:$4 sm:$0xff]  }
 0x64f   : > { %11326 = vmatpush1.bf16.msra.mxu0 %v21669_v56  ;;  %12351 = vmatpush1.bf16.msra.mxu1 %v21672_v14  ;;  %v21761_v56 = vld [vmem:[%s23323_s9 + $0x2dc4] ss:$16 sps:$4 sm:$0xff]   ;;  %v21764_v14 = vld [vmem:[%s23323_s9 + $0x2dcc] ss:$16 sps:$4 sm:$0xff]  }
 0x650   : > { %11336 = vmatprep.subr.bf16.mxu0 %v21677_v63  ;;  %12361 = vmatprep.subr.bf16.mxu1 %v21680_v61  ;;  %v21759_v63 = vld [vmem:[%s23323_s9 + $0x2dc0] ss:$16 sps:$4 sm:$0xff]   ;;  %v21762_v61 = vld [vmem:[%s23323_s9 + $0x2dc8] ss:$16 sps:$4 sm:$0xff]  }
 0x652   : > { %11328 = vmatmul.mubr.bf16.vlgmr.msra.gmra.mrb[0].mxu0 %v2358_v52  ;;  %12353 = vmatmul.mubr.bf16.vlgmr.msra.gmra.mrb[0].mxu1 %v2358_v52  ;;  %v21770_v52 = vld [vmem:[%s23323_s9 + $0x2dec] ss:$16 sps:$4 sm:$0xff]  }
 0x653   : > { %11337 = vmatpush1.bf16.msra.mxu0 %v21675_v17  ;;  %12362 = vmatpush1.bf16.msra.mxu1 %v21678_v6  ;;  %v21765_v17 = vld [vmem:[%s23323_s9 + $0x2de0] ss:$16 sps:$4 sm:$0xff]   ;;  %v21768_v6 = vld [vmem:[%s23323_s9 + $0x2de8] ss:$16 sps:$4 sm:$0xff]  }
 0x654   : > { %11338 = vmatprep.subr.bf16.mxu0 %v21683_v8  ;;  %12363 = vmatprep.subr.bf16.mxu1 %v21686_v18  ;;  %v21774_v8 = vld [vmem:[%s23323_s9 + $0x2e04] ss:$16 sps:$4 sm:$0xff]   ;;  %v21777_v18 = vld [vmem:[%s23323_s9 + $0x2e0c] ss:$16 sps:$4 sm:$0xff]  }
 0x655   : > { %11368 = vmatprep.mubr.bf16.mxu0 %v25024_v19  ;;  %12393 = vmatprep.mubr.bf16.mxu1 %v25024_v19 }
 0x657   : > { %11339 = vmatpush1.bf16.msra.mxu0 %v21681_v7  ;;  %12364 = vmatpush1.bf16.msra.mxu1 %v21684_v13  ;;  %v25090_v7 = vrot.slane %v25009_v12, %v23395_v49  ;;  %v21772_v13 = vld [vmem:[%s23323_s9 + $0x2e00] ss:$16 sps:$4 sm:$0xff]  }
 0x658   : > { %11340 = vmatprep.subr.bf16.mxu0 %v21689_v23  ;;  %12365 = vmatprep.subr.bf16.mxu1 %v21692_v24  ;;  %v21775_v23 = vld [vmem:[%s23323_s9 + $0x2e08] ss:$16 sps:$4 sm:$0xff]   ;;  %v21780_v24 = vld [vmem:[%s23323_s9 + $0x2e24] ss:$16 sps:$4 sm:$0xff]   ;;  %v21778_v12 = vld [vmem:[%s23323_s9 + $0x2e20] ss:$16 sps:$4 sm:$0xff]  }
 0x65b   : > { %11341 = vmatpush1.bf16.msra.mxu0 %v21687_v60  ;;  %12366 = vmatpush1.bf16.msra.mxu1 %v21690_v27  ;;  %v21783_v60 = vld [vmem:[%s23323_s9 + $0x2e2c] ss:$16 sps:$4 sm:$0xff]   ;;  %v2361_v27 = vcombine.high %v25024_v19, %v25024_v19  ;;  %v21784_v19 = vld [vmem:[%s23323_s9 + $0x2e40] ss:$16 sps:$4 sm:$0xff]  }
 0x65c   : > { %11342 = vmatprep.subr.bf16.mxu0 %v21695_v28  ;;  %12367 = vmatprep.subr.bf16.mxu1 %v21698_v10  ;;  %v21781_v28 = vld [vmem:[%s23323_s9 + $0x2e28] ss:$16 sps:$4 sm:$0xff]   ;;  %v21786_v10 = vld [vmem:[%s23323_s9 + $0x2e44] ss:$16 sps:$4 sm:$0xff]  }
 0x65f   : > { %11343 = vmatpush1.bf16.msra.mxu0 %v21693_v29  ;;  %12368 = vmatpush1.bf16.msra.mxu1 %v21696_v30  ;;  %v21789_v29 = vld [vmem:[%s23323_s9 + $0x2e4c] ss:$16 sps:$4 sm:$0xff]   ;;  %v21787_v30 = vld [vmem:[%s23323_s9 + $0x2e48] ss:$16 sps:$4 sm:$0xff]  }
 0x660   : > { %11344 = vmatprep.subr.bf16.mxu0 %v21701_v20  ;;  %12369 = vmatprep.subr.bf16.mxu1 %v21704_v31  ;;  %v21792_v20 = vld [vmem:[%s23323_s9 + $0x2e64] ss:$16 sps:$4 sm:$0xff]   ;;  %v21795_v31 = vld [vmem:[%s23323_s9 + $0x2e6c] ss:$16 sps:$4 sm:$0xff]  }
 0x663   : > { %11345 = vmatpush1.bf16.msra.mxu0 %v21699_v32  ;;  %12370 = vmatpush1.bf16.msra.mxu1 %v21702_v25  ;;  %v21790_v32 = vld [vmem:[%s23323_s9 + $0x2e60] ss:$16 sps:$4 sm:$0xff]   ;;  %v21793_v25 = vld [vmem:[%s23323_s9 + $0x2e68] ss:$16 sps:$4 sm:$0xff]  }
 0x664   : > { %11346 = vmatprep.subr.bf16.mxu0 %v21707_v36  ;;  %12371 = vmatprep.subr.bf16.mxu1 %v21710_v37  ;;  %v21798_v36 = vld [vmem:[%s23323_s9 + $0x2e84] ss:$16 sps:$4 sm:$0xff]   ;;  %v21801_v37 = vld [vmem:[%s23323_s9 + $0x2e8c] ss:$16 sps:$4 sm:$0xff]  }
 0x667   : > { %11347 = vmatpush1.bf16.msra.mxu0 %v21705_v39  ;;  %12372 = vmatpush1.bf16.msra.mxu1 %v21708_v26  ;;  %v21796_v39 = vld [vmem:[%s23323_s9 + $0x2e80] ss:$16 sps:$4 sm:$0xff]   ;;  %v21799_v26 = vld [vmem:[%s23323_s9 + $0x2e88] ss:$16 sps:$4 sm:$0xff]  }
 0x668   : > { %11348 = vmatprep.subr.bf16.mxu0 %v21713_v40  ;;  %12373 = vmatprep.subr.bf16.mxu1 %v21716_v21  ;;  %v21804_v40 = vld [vmem:[%s23323_s9 + $0x2ea4] ss:$16 sps:$4 sm:$0xff]   ;;  %v21807_v21 = vld [vmem:[%s23323_s9 + $0x2eac] ss:$16 sps:$4 sm:$0xff]  }
 0x66b   : > { %11349 = vmatpush1.bf16.msra.mxu0 %v21711_v41  ;;  %12374 = vmatpush1.bf16.msra.mxu1 %v21714_v33  ;;  %v21802_v41 = vld [vmem:[%s23323_s9 + $0x2ea0] ss:$16 sps:$4 sm:$0xff]   ;;  %v21805_v33 = vld [vmem:[%s23323_s9 + $0x2ea8] ss:$16 sps:$4 sm:$0xff]  }
 0x66c   : > { %11350 = vmatprep.subr.bf16.mxu0 %v21719_v43  ;;  %12375 = vmatprep.subr.bf16.mxu1 %v21722_v44  ;;  %v21810_v43 = vld [vmem:[%s23323_s9 + $0x2ec4] ss:$16 sps:$4 sm:$0xff]   ;;  %v21813_v44 = vld [vmem:[%s23323_s9 + $0x2ecc] ss:$16 sps:$4 sm:$0xff]  }
 0x66f   : > { %11351 = vmatpush1.bf16.msra.mxu0 %v21717_v22  ;;  %12376 = vmatpush1.bf16.msra.mxu1 %v21720_v47  ;;  %v21808_v22 = vld [vmem:[%s23323_s9 + $0x2ec0] ss:$16 sps:$4 sm:$0xff]   ;;  %v21811_v47 = vld [vmem:[%s23323_s9 + $0x2ec8] ss:$16 sps:$4 sm:$0xff]  }
 0x670   : > { %11352 = vmatprep.subr.bf16.mxu0 %v21725_v50  ;;  %12377 = vmatprep.subr.bf16.mxu1 %v21728_v15  ;;  %v21816_v50 = vld [vmem:[%s23323_s9 + $0x2ee4] ss:$16 sps:$4 sm:$0xff]   ;;  %v21819_v15 = vld [vmem:[%s23323_s9 + $0x2eec] ss:$16 sps:$4 sm:$0xff]  }
 0x673   : > { %11353 = vmatpush1.bf16.msra.mxu0 %v21723_v53  ;;  %12378 = vmatpush1.bf16.msra.mxu1 %v21726_v54  ;;  %v21814_v53 = vld [vmem:[%s23323_s9 + $0x2ee0] ss:$16 sps:$4 sm:$0xff]   ;;  %v21817_v54 = vld [vmem:[%s23323_s9 + $0x2ee8] ss:$16 sps:$4 sm:$0xff]  }
 0x674   : > { %11354 = vmatprep.subr.bf16.mxu0 %v21731_v34  ;;  %12379 = vmatprep.subr.bf16.mxu1 %v21734_v55  ;;  %v21822_v34 = vld [vmem:[%s23323_s9 + $0x2f04] ss:$16 sps:$4 sm:$0xff]   ;;  %v21825_v55 = vld [vmem:[%s23323_s9 + $0x2f0c] ss:$16 sps:$4 sm:$0xff]  }
 0x677   : > { %11355 = vmatpush1.bf16.msra.mxu0 %v21729_v38  ;;  %12380 = vmatpush1.bf16.msra.mxu1 %v21732_v45  ;;  %v21820_v38 = vld [vmem:[%s23323_s9 + $0x2f00] ss:$16 sps:$4 sm:$0xff]   ;;  %v21823_v45 = vld [vmem:[%s23323_s9 + $0x2f08] ss:$16 sps:$4 sm:$0xff]  }
 0x678   : > { %11356 = vmatprep.subr.bf16.mxu0 %v21737_v57  ;;  %12381 = vmatprep.subr.bf16.mxu1 %v21740_v58  ;;  %v21828_v57 = vld [vmem:[%s23323_s9 + $0x2f24] ss:$16 sps:$4 sm:$0xff]   ;;  %v21831_v58 = vld [vmem:[%s23323_s9 + $0x2f2c] ss:$16 sps:$4 sm:$0xff]  }
 0x67b   : > { %11357 = vmatpush1.bf16.msra.mxu0 %v21735_v59  ;;  %12382 = vmatpush1.bf16.msra.mxu1 %v21738_v62  ;;  %v21826_v59 = vld [vmem:[%s23323_s9 + $0x2f20] ss:$16 sps:$4 sm:$0xff]   ;;  %v21829_v62 = vld [vmem:[%s23323_s9 + $0x2f28] ss:$16 sps:$4 sm:$0xff]  }
 0x67c   : > { %11358 = vmatprep.subr.bf16.mxu0 %v21743_v0  ;;  %12383 = vmatprep.subr.bf16.mxu1 %v21746_v1  ;;  %v21834_v0 = vld [vmem:[%s23323_s9 + $0x2f44] ss:$16 sps:$4 sm:$0xff]   ;;  %v21837_v1 = vld [vmem:[%s23323_s9 + $0x2f4c] ss:$16 sps:$4 sm:$0xff]  }
 0x67f   : > { %11359 = vmatpush1.bf16.msra.mxu0 %v21741_v51  ;;  %12384 = vmatpush1.bf16.msra.mxu1 %v21744_v35  ;;  %v21832_v51 = vld [vmem:[%s23323_s9 + $0x2f40] ss:$16 sps:$4 sm:$0xff]   ;;  %v21835_v35 = vld [vmem:[%s23323_s9 + $0x2f48] ss:$16 sps:$4 sm:$0xff]  }
 0x680   : > { %11360 = vmatprep.subr.bf16.mxu0 %v21749_v2  ;;  %12385 = vmatprep.subr.bf16.mxu1 %v21752_v3  ;;  %v21840_v2 = vld [vmem:[%s23323_s9 + $0x2f64] ss:$16 sps:$4 sm:$0xff]   ;;  %v21843_v3 = vld [vmem:[%s23323_s9 + $0x2f6c] ss:$16 sps:$4 sm:$0xff]  }
 0x683   : > { %11361 = vmatpush1.bf16.msra.mxu0 %v21747_v48  ;;  %12386 = vmatpush1.bf16.msra.mxu1 %v21750_v4  ;;  %v21838_v48 = vld [vmem:[%s23323_s9 + $0x2f60] ss:$16 sps:$4 sm:$0xff]   ;;  %v21841_v4 = vld [vmem:[%s23323_s9 + $0x2f68] ss:$16 sps:$4 sm:$0xff]  }
 0x684   : > { %11362 = vmatprep.subr.bf16.mxu0 %v21755_v5  ;;  %12387 = vmatprep.subr.bf16.mxu1 %v21758_v46  ;;  %v21846_v5 = vld [vmem:[%s23323_s9 + $0x2f84] ss:$16 sps:$4 sm:$0xff]   ;;  %v21849_v46 = vld [vmem:[%s23323_s9 + $0x2f8c] ss:$16 sps:$4 sm:$0xff]  }
 0x687   : > { %11363 = vmatpush1.bf16.msra.mxu0 %v21753_v9  ;;  %12388 = vmatpush1.bf16.msra.mxu1 %v21756_v11  ;;  %v21844_v9 = vld [vmem:[%s23323_s9 + $0x2f80] ss:$16 sps:$4 sm:$0xff]   ;;  %v21847_v11 = vld [vmem:[%s23323_s9 + $0x2f88] ss:$16 sps:$4 sm:$0xff]  }
 0x688   : > { %11364 = vmatprep.subr.bf16.mxu0 %v21761_v56  ;;  %12389 = vmatprep.subr.bf16.mxu1 %v21764_v14  ;;  %v21852_v56 = vld [vmem:[%s23323_s9 + $0x2fa4] ss:$16 sps:$4 sm:$0xff]   ;;  %v21855_v14 = vld [vmem:[%s23323_s9 + $0x2fac] ss:$16 sps:$4 sm:$0xff]  }
 0x68b   : > { %11365 = vmatpush1.bf16.msra.mxu0 %v21759_v63  ;;  %12390 = vmatpush1.bf16.msra.mxu1 %v21762_v61  ;;  %v21850_v63 = vld [vmem:[%s23323_s9 + $0x2fa0] ss:$16 sps:$4 sm:$0xff]   ;;  %v21853_v61 = vld [vmem:[%s23323_s9 + $0x2fa8] ss:$16 sps:$4 sm:$0xff]  }
 0x68c   : > { %11366 = vmatprep.subr.bf16.mxu0 %v21767_v16  ;;  %12391 = vmatprep.subr.bf16.mxu1 %v21770_v52  ;;  %v21858_v16 = vld [vmem:[%s23323_s9 + $0x2fc4] ss:$16 sps:$4 sm:$0xff]   ;;  %v21861_v52 = vld [vmem:[%s23323_s9 + $0x2fcc] ss:$16 sps:$4 sm:$0xff]  }
 0x68f   : > { %11367 = vmatpush1.bf16.msra.mxu0 %v21765_v17  ;;  %12392 = vmatpush1.bf16.msra.mxu1 %v21768_v6  ;;  %v21856_v17 = vld [vmem:[%s23323_s9 + $0x2fc0] ss:$16 sps:$4 sm:$0xff]   ;;  %v21859_v6 = vld [vmem:[%s23323_s9 + $0x2fc8] ss:$16 sps:$4 sm:$0xff]  }
 0x690   : > { %11377 = vmatprep.subr.bf16.mxu0 %v21774_v8  ;;  %12402 = vmatprep.subr.bf16.mxu1 %v21777_v18  ;;  %v21864_v8 = vld [vmem:[%s23323_s9 + $0x2fe4] ss:$16 sps:$4 sm:$0xff]   ;;  %v21867_v18 = vld [vmem:[%s23323_s9 + $0x2fec] ss:$16 sps:$4 sm:$0xff]  }
 0x692   : > { %11369 = vmatmul.mubr.bf16.vlgmr.msra.gmra.mrb[0].mxu0 %v25090_v7  ;;  %12394 = vmatmul.mubr.bf16.vlgmr.msra.gmra.mrb[0].mxu1 %v25090_v7 }
 0x693   : > { %11378 = vmatpush1.bf16.msra.mxu0 %v21772_v13  ;;  %12403 = vmatpush1.bf16.msra.mxu1 %v21775_v23  ;;  %v25159_v13 = vld.sshfl [vmem:[%s25483_s0 + $0x30] sm:$0x11 pattern:$0x75316420] }
 0x694   : > { %11379 = vmatprep.subr.bf16.mxu0 %v21780_v24  ;;  %12404 = vmatprep.subr.bf16.mxu1 %v21783_v60  ;;  %v21862_v23 = vld [vmem:[%s23323_s9 + $0x2fe0] ss:$16 sps:$4 sm:$0xff]   ;;  %v21865_v24 = vld [vmem:[%s23323_s9 + $0x2fe8] ss:$16 sps:$4 sm:$0xff]   ;;  %v21870_v60 = vld [vmem:[%s23323_s9 + $0x3004] ss:$16 sps:$4 sm:$0xff]  }
 0x695   : > { %11409 = vmatprep.mubr.bf16.mxu0 %v2361_v27  ;;  %12434 = vmatprep.mubr.bf16.mxu1 %v2361_v27  ;;  %v21873_v27 = vld [vmem:[%s23323_s9 + $0x300c] ss:$16 sps:$4 sm:$0xff]  }
 0x697   : > { %11380 = vmatpush1.bf16.msra.mxu0 %v21778_v12  ;;  %12405 = vmatpush1.bf16.msra.mxu1 %v21781_v28  ;;  %v2369_v12 = vcombine.high %v25159_v13, %v25159_v13  ;;  %v2359_v28 = vcombine.high %v25090_v7, %v25090_v7  ;;  %v21874_v7 = vld [vmem:[%s23323_s9 + $0x3020] ss:$16 sps:$4 sm:$0xff]  }
 0x698   : > { %11381 = vmatprep.subr.bf16.mxu0 %v21786_v10  ;;  %12406 = vmatprep.subr.bf16.mxu1 %v21789_v29  ;;  %v21868_v10 = vld [vmem:[%s23323_s9 + $0x3000] ss:$16 sps:$4 sm:$0xff]   ;;  %v21871_v29 = vld [vmem:[%s23323_s9 + $0x3008] ss:$16 sps:$4 sm:$0xff]  }
 0x69b   : > { %11382 = vmatpush1.bf16.msra.mxu0 %v21784_v19  ;;  %12407 = vmatpush1.bf16.msra.mxu1 %v21787_v30  ;;  %v21876_v19 = vld [vmem:[%s23323_s9 + $0x3024] ss:$16 sps:$4 sm:$0xff]   ;;  %v21879_v30 = vld [vmem:[%s23323_s9 + $0x302c] ss:$16 sps:$4 sm:$0xff]  }
 0x69c   : > { %11383 = vmatprep.subr.bf16.mxu0 %v21792_v20  ;;  %12408 = vmatprep.subr.bf16.mxu1 %v21795_v31  ;;  %v2383_v20 = vrot.slane %v2369_v12, %v23395_v49  ;;  %v21877_v31 = vld [vmem:[%s23323_s9 + $0x3028] ss:$16 sps:$4 sm:$0xff]   ;;  %v21960_v12 = vld [vmem:[%s23323_s9 + $0x31e4] ss:$16 sps:$4 sm:$0xff]  }
 0x69f   : > { %11384 = vmatpush1.bf16.msra.mxu0 %v21790_v32  ;;  %12409 = vmatpush1.bf16.msra.mxu1 %v21793_v25  ;;  %v21882_v32 = vld [vmem:[%s23323_s9 + $0x3044] ss:$16 sps:$4 sm:$0xff]   ;;  %v21885_v25 = vld [vmem:[%s23323_s9 + $0x304c] ss:$16 sps:$4 sm:$0xff]  }
 0x6a0   : > { %11385 = vmatprep.subr.bf16.mxu0 %v21798_v36  ;;  %12410 = vmatprep.subr.bf16.mxu1 %v21801_v37  ;;  %v21880_v36 = vld [vmem:[%s23323_s9 + $0x3040] ss:$16 sps:$4 sm:$0xff]   ;;  %v21883_v37 = vld [vmem:[%s23323_s9 + $0x3048] ss:$16 sps:$4 sm:$0xff]  }
 0x6a3   : > { %11386 = vmatpush1.bf16.msra.mxu0 %v21796_v39  ;;  %12411 = vmatpush1.bf16.msra.mxu1 %v21799_v26  ;;  %v21888_v39 = vld [vmem:[%s23323_s9 + $0x3064] ss:$16 sps:$4 sm:$0xff]   ;;  %v21891_v26 = vld [vmem:[%s23323_s9 + $0x306c] ss:$16 sps:$4 sm:$0xff]  }
 0x6a4   : > { %11387 = vmatprep.subr.bf16.mxu0 %v21804_v40  ;;  %12412 = vmatprep.subr.bf16.mxu1 %v21807_v21  ;;  %v21886_v40 = vld [vmem:[%s23323_s9 + $0x3060] ss:$16 sps:$4 sm:$0xff]   ;;  %v21889_v21 = vld [vmem:[%s23323_s9 + $0x3068] ss:$16 sps:$4 sm:$0xff]  }
 0x6a7   : > { %11388 = vmatpush1.bf16.msra.mxu0 %v21802_v41  ;;  %12413 = vmatpush1.bf16.msra.mxu1 %v21805_v33  ;;  %v21894_v41 = vld [vmem:[%s23323_s9 + $0x3084] ss:$16 sps:$4 sm:$0xff]   ;;  %v21897_v33 = vld [vmem:[%s23323_s9 + $0x308c] ss:$16 sps:$4 sm:$0xff]  }
 0x6a8   : > { %11389 = vmatprep.subr.bf16.mxu0 %v21810_v43  ;;  %12414 = vmatprep.subr.bf16.mxu1 %v21813_v44  ;;  %v21892_v43 = vld [vmem:[%s23323_s9 + $0x3080] ss:$16 sps:$4 sm:$0xff]   ;;  %v21895_v44 = vld [vmem:[%s23323_s9 + $0x3088] ss:$16 sps:$4 sm:$0xff]  }
 0x6ab   : > { %11390 = vmatpush1.bf16.msra.mxu0 %v21808_v22  ;;  %12415 = vmatpush1.bf16.msra.mxu1 %v21811_v47  ;;  %v21900_v22 = vld [vmem:[%s23323_s9 + $0x30a4] ss:$16 sps:$4 sm:$0xff]   ;;  %v21903_v47 = vld [vmem:[%s23323_s9 + $0x30ac] ss:$16 sps:$4 sm:$0xff]  }
 0x6ac   : > { %11391 = vmatprep.subr.bf16.mxu0 %v21816_v50  ;;  %12416 = vmatprep.subr.bf16.mxu1 %v21819_v15  ;;  %v21898_v50 = vld [vmem:[%s23323_s9 + $0x30a0] ss:$16 sps:$4 sm:$0xff]   ;;  %v21901_v15 = vld [vmem:[%s23323_s9 + $0x30a8] ss:$16 sps:$4 sm:$0xff]  }
 0x6af   : > { %11392 = vmatpush1.bf16.msra.mxu0 %v21814_v53  ;;  %12417 = vmatpush1.bf16.msra.mxu1 %v21817_v54  ;;  %v21906_v53 = vld [vmem:[%s23323_s9 + $0x30c4] ss:$16 sps:$4 sm:$0xff]   ;;  %v21909_v54 = vld [vmem:[%s23323_s9 + $0x30cc] ss:$16 sps:$4 sm:$0xff]  }
 0x6b0   : > { %11393 = vmatprep.subr.bf16.mxu0 %v21822_v34  ;;  %12418 = vmatprep.subr.bf16.mxu1 %v21825_v55  ;;  %v21904_v34 = vld [vmem:[%s23323_s9 + $0x30c0] ss:$16 sps:$4 sm:$0xff]   ;;  %v21907_v55 = vld [vmem:[%s23323_s9 + $0x30c8] ss:$16 sps:$4 sm:$0xff]  }
 0x6b3   : > { %11394 = vmatpush1.bf16.msra.mxu0 %v21820_v38  ;;  %12419 = vmatpush1.bf16.msra.mxu1 %v21823_v45  ;;  %v21912_v38 = vld [vmem:[%s23323_s9 + $0x30e4] ss:$16 sps:$4 sm:$0xff]   ;;  %v21915_v45 = vld [vmem:[%s23323_s9 + $0x30ec] ss:$16 sps:$4 sm:$0xff]  }
 0x6b4   : > { %11395 = vmatprep.subr.bf16.mxu0 %v21828_v57  ;;  %12420 = vmatprep.subr.bf16.mxu1 %v21831_v58  ;;  %v21910_v57 = vld [vmem:[%s23323_s9 + $0x30e0] ss:$16 sps:$4 sm:$0xff]   ;;  %v21913_v58 = vld [vmem:[%s23323_s9 + $0x30e8] ss:$16 sps:$4 sm:$0xff]  }
 0x6b7   : > { %11396 = vmatpush1.bf16.msra.mxu0 %v21826_v59  ;;  %12421 = vmatpush1.bf16.msra.mxu1 %v21829_v62  ;;  %v21918_v59 = vld [vmem:[%s23323_s9 + $0x3104] ss:$16 sps:$4 sm:$0xff]   ;;  %v21921_v62 = vld [vmem:[%s23323_s9 + $0x310c] ss:$16 sps:$4 sm:$0xff]  }
 0x6b8   : > { %11397 = vmatprep.subr.bf16.mxu0 %v21834_v0  ;;  %12422 = vmatprep.subr.bf16.mxu1 %v21837_v1  ;;  %v21916_v0 = vld [vmem:[%s23323_s9 + $0x3100] ss:$16 sps:$4 sm:$0xff]   ;;  %v21919_v1 = vld [vmem:[%s23323_s9 + $0x3108] ss:$16 sps:$4 sm:$0xff]  }
 0x6bb   : > { %11398 = vmatpush1.bf16.msra.mxu0 %v21832_v51  ;;  %12423 = vmatpush1.bf16.msra.mxu1 %v21835_v35  ;;  %v21924_v51 = vld [vmem:[%s23323_s9 + $0x3124] ss:$16 sps:$4 sm:$0xff]   ;;  %v21927_v35 = vld [vmem:[%s23323_s9 + $0x312c] ss:$16 sps:$4 sm:$0xff]  }
 0x6bc   : > { %11399 = vmatprep.subr.bf16.mxu0 %v21840_v2  ;;  %12424 = vmatprep.subr.bf16.mxu1 %v21843_v3  ;;  %v21922_v2 = vld [vmem:[%s23323_s9 + $0x3120] ss:$16 sps:$4 sm:$0xff]   ;;  %v21925_v3 = vld [vmem:[%s23323_s9 + $0x3128] ss:$16 sps:$4 sm:$0xff]  }
 0x6bf   : > { %11400 = vmatpush1.bf16.msra.mxu0 %v21838_v48  ;;  %12425 = vmatpush1.bf16.msra.mxu1 %v21841_v4  ;;  %v21930_v48 = vld [vmem:[%s23323_s9 + $0x3144] ss:$16 sps:$4 sm:$0xff]   ;;  %v21933_v4 = vld [vmem:[%s23323_s9 + $0x314c] ss:$16 sps:$4 sm:$0xff]  }
 0x6c0   : > { %11401 = vmatprep.subr.bf16.mxu0 %v21846_v5  ;;  %12426 = vmatprep.subr.bf16.mxu1 %v21849_v46  ;;  %v21928_v5 = vld [vmem:[%s23323_s9 + $0x3140] ss:$16 sps:$4 sm:$0xff]   ;;  %v21931_v46 = vld [vmem:[%s23323_s9 + $0x3148] ss:$16 sps:$4 sm:$0xff]  }
 0x6c3   : > { %11402 = vmatpush1.bf16.msra.mxu0 %v21844_v9  ;;  %12427 = vmatpush1.bf16.msra.mxu1 %v21847_v11  ;;  %v21936_v9 = vld [vmem:[%s23323_s9 + $0x3164] ss:$16 sps:$4 sm:$0xff]   ;;  %v21939_v11 = vld [vmem:[%s23323_s9 + $0x316c] ss:$16 sps:$4 sm:$0xff]  }
 0x6c4   : > { %11403 = vmatprep.subr.bf16.mxu0 %v21852_v56  ;;  %12428 = vmatprep.subr.bf16.mxu1 %v21855_v14  ;;  %v21934_v56 = vld [vmem:[%s23323_s9 + $0x3160] ss:$16 sps:$4 sm:$0xff]   ;;  %v21937_v14 = vld [vmem:[%s23323_s9 + $0x3168] ss:$16 sps:$4 sm:$0xff]  }
 0x6c7   : > { %11404 = vmatpush1.bf16.msra.mxu0 %v21850_v63  ;;  %12429 = vmatpush1.bf16.msra.mxu1 %v21853_v61  ;;  %v21942_v63 = vld [vmem:[%s23323_s9 + $0x3184] ss:$16 sps:$4 sm:$0xff]   ;;  %v21945_v61 = vld [vmem:[%s23323_s9 + $0x318c] ss:$16 sps:$4 sm:$0xff]  }
 0x6c8   : > { %11405 = vmatprep.subr.bf16.mxu0 %v21858_v16  ;;  %12430 = vmatprep.subr.bf16.mxu1 %v21861_v52  ;;  %v21940_v16 = vld [vmem:[%s23323_s9 + $0x3180] ss:$16 sps:$4 sm:$0xff]   ;;  %v21943_v52 = vld [vmem:[%s23323_s9 + $0x3188] ss:$16 sps:$4 sm:$0xff]  }
 0x6cb   : > { %11406 = vmatpush1.bf16.msra.mxu0 %v21856_v17  ;;  %12431 = vmatpush1.bf16.msra.mxu1 %v21859_v6  ;;  %v21948_v17 = vld [vmem:[%s23323_s9 + $0x31a4] ss:$16 sps:$4 sm:$0xff]   ;;  %v21951_v6 = vld [vmem:[%s23323_s9 + $0x31ac] ss:$16 sps:$4 sm:$0xff]  }
 0x6cc   : > { %11407 = vmatprep.subr.bf16.mxu0 %v21864_v8  ;;  %12432 = vmatprep.subr.bf16.mxu1 %v21867_v18  ;;  %v21946_v8 = vld [vmem:[%s23323_s9 + $0x31a0] ss:$16 sps:$4 sm:$0xff]   ;;  %v21949_v18 = vld [vmem:[%s23323_s9 + $0x31a8] ss:$16 sps:$4 sm:$0xff]  }
 0x6cf   : > { %11408 = vmatpush1.bf16.msra.mxu0 %v21862_v23  ;;  %12433 = vmatpush1.bf16.msra.mxu1 %v21865_v24  ;;  %v21954_v23 = vld [vmem:[%s23323_s9 + $0x31c4] ss:$16 sps:$4 sm:$0xff]   ;;  %v21957_v24 = vld [vmem:[%s23323_s9 + $0x31cc] ss:$16 sps:$4 sm:$0xff]  }
 0x6d0   : > { %11418 = vmatprep.subr.bf16.mxu0 %v21870_v60  ;;  %12443 = vmatprep.subr.bf16.mxu1 %v21873_v27  ;;  %v21952_v60 = vld [vmem:[%s23323_s9 + $0x31c0] ss:$16 sps:$4 sm:$0xff]   ;;  %v21955_v27 = vld [vmem:[%s23323_s9 + $0x31c8] ss:$16 sps:$4 sm:$0xff]  }
 0x6d2   : > { %11410 = vmatmul.mubr.bf16.vlgmr.msra.gmra.mrb[0].mxu0 %v2359_v28  ;;  %12435 = vmatmul.mubr.bf16.vlgmr.msra.gmra.mrb[0].mxu1 %v2359_v28  ;;  %v21963_v28 = vld [vmem:[%s23323_s9 + $0x31ec] ss:$16 sps:$4 sm:$0xff]  }
 0x6d3   : > { %11419 = vmatpush1.bf16.msra.mxu0 %v21868_v10  ;;  %12444 = vmatpush1.bf16.msra.mxu1 %v21871_v29  ;;  %v21958_v10 = vld [vmem:[%s23323_s9 + $0x31e0] ss:$16 sps:$4 sm:$0xff]   ;;  %v21961_v29 = vld [vmem:[%s23323_s9 + $0x31e8] ss:$16 sps:$4 sm:$0xff]   ;;  %s18560_s9 = sshll.u32 %s23110_s13, 9 }
 0x6d4   : > { %11420 = vmatprep.subr.bf16.mxu0 %v21876_v19  ;;  %12445 = vmatprep.subr.bf16.mxu1 %v21879_v30  ;;  %v2376_v19 = vrot.slane %v25159_v13, %v23395_v49  ;;  %v2043_v30 = vsub.s32 0, %v23387_v42  ;;  %s12511_s1 = sshra.s32 %s18560_s9, 7 }
 0x6d5   : > { %11450 = vmatprep.mubr.bf16.mxu0 %v2383_v20  ;;  %12475 = vmatprep.mubr.bf16.mxu1 %v2383_v20  ;;  %v2051_v20 = vsub.s32 2, %v23387_v42 }
 0x6d7   : > { %11421 = vmatpush1.bf16.msra.mxu0 %v21874_v7  ;;  %12446 = vmatpush1.bf16.msra.mxu1 %v21877_v31  ;;  %v2039_v7 = vld [vmem:[%s23330_s4] sm:$0xf]  ;;  %v2047_v31 = vsub.s32 1, %v23387_v42  ;;  %s18561_s4 = sshll.u32 %s12511_s1, 1 }
 0x6d8   : > { %11422 = vmatprep.subr.bf16.mxu0 %v21882_v32  ;;  %12447 = vmatprep.subr.bf16.mxu1 %v21885_v25  ;;  %v2055_v32 = vsub.s32 3, %v23387_v42  ;;  %v23036_v25 = vmov 1983009808   ;;  %v2052_v49 = vrot.slane %v2039_v7, %v2051_v20  ;;  %s12514_s14 = scalar_lea.vmem [#allocation2], %s18561_s4 }
 0x6d9   : > { %v2048_v13 = vrot.slane %v2039_v7, %v2047_v31 }
 0x6db   : > { %11423 = vmatpush1.bf16.msra.mxu0 %v21880_v36  ;;  %12448 = vmatpush1.bf16.msra.mxu1 %v21883_v37  ;;  %v12496_v36 = vunpack.c.l.s4 %v23036_v25  ;;  %v2044_v37 = vrot.slane %v2039_v7, %v2043_v30  ;;  %v22012_v25 = vld [vmem:[#allocation8 + $0xe0] ss:$16 sps:$4 sm:$0xff] (!%p18562_p8)  }
 0x6dc   : > { %11424 = vmatprep.subr.bf16.mxu0 %v21888_v39  ;;  %12449 = vmatprep.subr.bf16.mxu1 %v21891_v26  ;;  %v2056_v39 = vrot.slane %v2039_v7, %v2055_v32  ;;  %v22010_v7 = vld [vmem:[#allocation8 + $0xec] ss:$16 sps:$4 sm:$0xff] (!%p18562_p8)  }
 0x6df   : > { %11425 = vmatpush1.bf16.msra.mxu0 %v21886_v40  ;;  %12450 = vmatpush1.bf16.msra.mxu1 %v21889_v21  ;;  %v12497_v21 = vunpack.c.0.s8 %v12496_v36  ;;  %v22013_v36 = vld [vmem:[#allocation8 + $0xe8] ss:$16 sps:$4 sm:$0xff] (!%p18562_p8)  }
 0x6e0   : > { %11426 = vmatprep.subr.bf16.mxu0 %v21894_v41  ;;  %12451 = vmatprep.subr.bf16.mxu1 %v21897_v33 }
 0x6e3   : > { %11427 = vmatpush1.bf16.msra.mxu0 %v21892_v43  ;;  %12452 = vmatpush1.bf16.msra.mxu1 %v21895_v44 }
 0x6e4   : > { %11428 = vmatprep.subr.bf16.mxu0 %v21900_v22  ;;  %12453 = vmatprep.subr.bf16.mxu1 %v21903_v47 }
 0x6e7   : > { %11429 = vmatpush1.bf16.msra.mxu0 %v21898_v50  ;;  %12454 = vmatpush1.bf16.msra.mxu1 %v21901_v15 }
 0x6e8   : > { %11430 = vmatprep.subr.bf16.mxu0 %v21906_v53  ;;  %12455 = vmatprep.subr.bf16.mxu1 %v21909_v54 }
 0x6eb   : > { %11431 = vmatpush1.bf16.msra.mxu0 %v21904_v34  ;;  %12456 = vmatpush1.bf16.msra.mxu1 %v21907_v55 }
 0x6ec   : > { %11432 = vmatprep.subr.bf16.mxu0 %v21912_v38  ;;  %12457 = vmatprep.subr.bf16.mxu1 %v21915_v45  ;;  %v25249_v45 = vsub.s32 %v12497_v21, %v23387_v42  ;;  %v22024_v21 = vld [vmem:[#allocation8 + $0x120] ss:$16 sps:$4 sm:$0xff] (!%p18562_p8)  }
 0x6ed   : > { %v16731_v42 = vld [vmem:[%s25490_s7 + $0x8] sm:$0xff] (!%p18562_p8) }
 0x6ef   : > { %11433 = vmatpush1.bf16.msra.mxu0 %v21910_v57  ;;  %12458 = vmatpush1.bf16.msra.mxu1 %v21913_v58 }
 0x6f0   : > { %11434 = vmatprep.subr.bf16.mxu0 %v21918_v59  ;;  %12459 = vmatprep.subr.bf16.mxu1 %v21921_v62 }
 0x6f3   : > { %11435 = vmatpush1.bf16.msra.mxu0 %v21916_v0  ;;  %12460 = vmatpush1.bf16.msra.mxu1 %v21919_v1 }
 0x6f4   : > { %11436 = vmatprep.subr.bf16.mxu0 %v21924_v51  ;;  %12461 = vmatprep.subr.bf16.mxu1 %v21927_v35  ;;  %v21966_v51 = vld [vmem:[#allocation8 + $0x4] ss:$16 sps:$4 sm:$0xff] (!%p18562_p8)   ;;  %v21968_v35 = vld [vmem:[#allocation8 + $0xc] ss:$16 sps:$4 sm:$0xff] (!%p18562_p8)  }
 0x6f7   : > { %11437 = vmatpush1.bf16.msra.mxu0 %v21922_v2  ;;  %12462 = vmatpush1.bf16.msra.mxu1 %v21925_v3  ;;  %v21970_v2 = vld [vmem:[#allocation8] ss:$16 sps:$4 sm:$0xff] (!%p18562_p8)   ;;  %v21971_v3 = vld [vmem:[#allocation8 + $0x8] ss:$16 sps:$4 sm:$0xff] (!%p18562_p8)  }
 0x6f8   : > { %11438 = vmatprep.subr.bf16.mxu0 %v21930_v48  ;;  %12463 = vmatprep.subr.bf16.mxu1 %v21933_v4  ;;  %v21972_v48 = vld [vmem:[#allocation8 + $0x24] ss:$16 sps:$4 sm:$0xff] (!%p18562_p8)   ;;  %v21974_v4 = vld [vmem:[#allocation8 + $0x2c] ss:$16 sps:$4 sm:$0xff] (!%p18562_p8)  }
 0x6fb   : > { %11439 = vmatpush1.bf16.msra.mxu0 %v21928_v5  ;;  %12464 = vmatpush1.bf16.msra.mxu1 %v21931_v46  ;;  %v21976_v5 = vld [vmem:[#allocation8 + $0x20] ss:$16 sps:$4 sm:$0xff] (!%p18562_p8)   ;;  %v21977_v46 = vld [vmem:[#allocation8 + $0x28] ss:$16 sps:$4 sm:$0xff] (!%p18562_p8)  }
 0x6fc   : > { %11440 = vmatprep.subr.bf16.mxu0 %v21936_v9  ;;  %12465 = vmatprep.subr.bf16.mxu1 %v21939_v11  ;;  %v21978_v9 = vld [vmem:[#allocation8 + $0x44] ss:$16 sps:$4 sm:$0xff] (!%p18562_p8)   ;;  %v21980_v11 = vld [vmem:[#allocation8 + $0x4c] ss:$16 sps:$4 sm:$0xff] (!%p18562_p8)  }
 0x6ff   : > { %11441 = vmatpush1.bf16.msra.mxu0 %v21934_v56  ;;  %12466 = vmatpush1.bf16.msra.mxu1 %v21937_v14  ;;  %v21982_v56 = vld [vmem:[#allocation8 + $0x40] ss:$16 sps:$4 sm:$0xff] (!%p18562_p8)   ;;  %v21983_v14 = vld [vmem:[#allocation8 + $0x48] ss:$16 sps:$4 sm:$0xff] (!%p18562_p8)  }
 0x700   : > { %11442 = vmatprep.subr.bf16.mxu0 %v21942_v63  ;;  %12467 = vmatprep.subr.bf16.mxu1 %v21945_v61  ;;  %v21984_v63 = vld [vmem:[#allocation8 + $0x64] ss:$16 sps:$4 sm:$0xff] (!%p18562_p8)   ;;  %v21986_v61 = vld [vmem:[#allocation8 + $0x6c] ss:$16 sps:$4 sm:$0xff] (!%p18562_p8)  }
 0x703   : > { %11443 = vmatpush1.bf16.msra.mxu0 %v21940_v16  ;;  %12468 = vmatpush1.bf16.msra.mxu1 %v21943_v52  ;;  %v21988_v16 = vld [vmem:[#allocation8 + $0x60] ss:$16 sps:$4 sm:$0xff] (!%p18562_p8)   ;;  %v21989_v52 = vld [vmem:[#allocation8 + $0x68] ss:$16 sps:$4 sm:$0xff] (!%p18562_p8)  }
 0x704   : > { %11444 = vmatprep.subr.bf16.mxu0 %v21948_v17  ;;  %12469 = vmatprep.subr.bf16.mxu1 %v21951_v6  ;;  %v21990_v17 = vld [vmem:[#allocation8 + $0x84] ss:$16 sps:$4 sm:$0xff] (!%p18562_p8)   ;;  %v21992_v6 = vld [vmem:[#allocation8 + $0x8c] ss:$16 sps:$4 sm:$0xff] (!%p18562_p8)  }
 0x707   : > { %11445 = vmatpush1.bf16.msra.mxu0 %v21946_v8  ;;  %12470 = vmatpush1.bf16.msra.mxu1 %v21949_v18  ;;  %v21994_v8 = vld [vmem:[#allocation8 + $0x80] ss:$16 sps:$4 sm:$0xff] (!%p18562_p8)   ;;  %v21995_v18 = vld [vmem:[#allocation8 + $0x88] ss:$16 sps:$4 sm:$0xff] (!%p18562_p8)  }
 0x708   : > { %11446 = vmatprep.subr.bf16.mxu0 %v21954_v23  ;;  %12471 = vmatprep.subr.bf16.mxu1 %v21957_v24  ;;  %v21996_v23 = vld [vmem:[#allocation8 + $0xa4] ss:$16 sps:$4 sm:$0xff] (!%p18562_p8)   ;;  %v21998_v24 = vld [vmem:[#allocation8 + $0xac] ss:$16 sps:$4 sm:$0xff] (!%p18562_p8)  }
 0x70b   : > { %11447 = vmatpush1.bf16.msra.mxu0 %v21952_v60  ;;  %12472 = vmatpush1.bf16.msra.mxu1 %v21955_v27  ;;  %v22000_v60 = vld [vmem:[#allocation8 + $0xa0] ss:$16 sps:$4 sm:$0xff] (!%p18562_p8)   ;;  %v22001_v27 = vld [vmem:[#allocation8 + $0xa8] ss:$16 sps:$4 sm:$0xff] (!%p18562_p8)  }
 0x70c   : > { %11448 = vmatprep.subr.bf16.mxu0 %v21960_v12  ;;  %12473 = vmatprep.subr.bf16.mxu1 %v21963_v28  ;;  %v22002_v12 = vld [vmem:[#allocation8 + $0xc4] ss:$16 sps:$4 sm:$0xff] (!%p18562_p8)   ;;  %v22004_v28 = vld [vmem:[#allocation8 + $0xcc] ss:$16 sps:$4 sm:$0xff] (!%p18562_p8)  }
 0x70f   : > { %11449 = vmatpush1.bf16.msra.mxu0 %v21958_v10  ;;  %12474 = vmatpush1.bf16.msra.mxu1 %v21961_v29  ;;  %v22006_v10 = vld [vmem:[#allocation8 + $0xc0] ss:$16 sps:$4 sm:$0xff] (!%p18562_p8)   ;;  %v22007_v29 = vld [vmem:[#allocation8 + $0xc8] ss:$16 sps:$4 sm:$0xff] (!%p18562_p8)  }
 0x710   : > { %15722 = vmatprep.subr.bf16.mxu0 (!%p18562_p8), %v21966_v51  ;;  %16050 = vmatprep.subr.bf16.mxu1 (!%p18562_p8), %v21968_v35  ;;  %v22048_v51 = vld [vmem:[#allocation8 + $0x1a0] ss:$16 sps:$4 sm:$0xff] (!%p18562_p8)   ;;  %v22049_v35 = vld [vmem:[#allocation8 + $0x1a8] ss:$16 sps:$4 sm:$0xff] (!%p18562_p8)  }
 0x712   : > { %11451 = vmatmul.mubr.bf16.vlgmr.msra.gmra.mrb[0].mxu0 %v2376_v19  ;;  %12476 = vmatmul.mubr.bf16.vlgmr.msra.gmra.mrb[0].mxu1 %v2376_v19  ;;  %v22008_v19 = vld [vmem:[#allocation8 + $0xe4] ss:$16 sps:$4 sm:$0xff] (!%p18562_p8)  }
 0x713   : > { %15723 = vmatpush1.bf16.msra.mxu0 (!%p18562_p8), %v21970_v2  ;;  %16051 = vmatpush1.bf16.msra.mxu1 (!%p18562_p8), %v21971_v3  ;;  %v22050_v2 = vld [vmem:[#allocation8 + $0x1c4] ss:$16 sps:$4 sm:$0xff] (!%p18562_p8)   ;;  %v22052_v3 = vld [vmem:[#allocation8 + $0x1cc] ss:$16 sps:$4 sm:$0xff] (!%p18562_p8)  }
 0x714   : > { %15724 = vmatprep.subr.bf16.mxu0 (!%p18562_p8), %v21972_v48  ;;  %16052 = vmatprep.subr.bf16.mxu1 (!%p18562_p8), %v21974_v4  ;;  %v22054_v4 = vld [vmem:[#allocation8 + $0x1c0] ss:$16 sps:$4 sm:$0xff] (!%p18562_p8)  }
 0x717   : > { %15725 = vmatpush1.bf16.msra.mxu0 (!%p18562_p8), %v21976_v5  ;;  %16053 = vmatpush1.bf16.msra.mxu1 (!%p18562_p8), %v21977_v46  ;;  %v22055_v5 = vld [vmem:[#allocation8 + $0x1c8] ss:$16 sps:$4 sm:$0xff] (!%p18562_p8)   ;;  %v22056_v46 = vld [vmem:[#allocation8 + $0x1e4] ss:$16 sps:$4 sm:$0xff] (!%p18562_p8)  }
 0x718   : > { %15726 = vmatprep.subr.bf16.mxu0 (!%p18562_p8), %v21978_v9  ;;  %16054 = vmatprep.subr.bf16.mxu1 (!%p18562_p8), %v21980_v11  ;;  %v22058_v9 = vld [vmem:[#allocation8 + $0x1ec] ss:$16 sps:$4 sm:$0xff] (!%p18562_p8)  }
 0x71b   : > { %15727 = vmatpush1.bf16.msra.mxu0 (!%p18562_p8), %v21982_v56  ;;  %16055 = vmatpush1.bf16.msra.mxu1 (!%p18562_p8), %v21983_v14  ;;  %v22060_v56 = vld [vmem:[#allocation8 + $0x1e0] ss:$16 sps:$4 sm:$0xff] (!%p18562_p8)   ;;  %v22061_v14 = vld [vmem:[#allocation8 + $0x1e8] ss:$16 sps:$4 sm:$0xff] (!%p18562_p8)  }
 0x71c   : > { %15728 = vmatprep.subr.bf16.mxu0 (!%p18562_p8), %v21984_v63  ;;  %16056 = vmatprep.subr.bf16.mxu1 (!%p18562_p8), %v21986_v61  ;;  %v22065_v63 = vld [vmem:[#allocation8 + $0x204] ss:$16 sps:$4 sm:$0xff] (!%p18562_p8)   ;;  %v22068_v61 = vld [vmem:[#allocation8 + $0x20c] ss:$16 sps:$4 sm:$0xff] (!%p18562_p8)  }
 0x71f   : > { %15729 = vmatpush1.bf16.msra.mxu0 (!%p18562_p8), %v21988_v16  ;;  %16057 = vmatpush1.bf16.msra.mxu1 (!%p18562_p8), %v21989_v52  ;;  %v22063_v52 = vld [vmem:[#allocation8 + $0x200] ss:$16 sps:$4 sm:$0xff] (!%p18562_p8)  }
 0x720   : > { %15730 = vmatprep.subr.bf16.mxu0 (!%p18562_p8), %v21990_v17  ;;  %16058 = vmatprep.subr.bf16.mxu1 (!%p18562_p8), %v21992_v6  ;;  %v22066_v6 = vld [vmem:[#allocation8 + $0x208] ss:$16 sps:$4 sm:$0xff] (!%p18562_p8)  }
 0x723   : > { %15731 = vmatpush1.bf16.msra.mxu0 (!%p18562_p8), %v21994_v8  ;;  %16059 = vmatpush1.bf16.msra.mxu1 (!%p18562_p8), %v21995_v18  ;;  %v22071_v8 = vld [vmem:[#allocation8 + $0x224] ss:$16 sps:$4 sm:$0xff] (!%p18562_p8)   ;;  %v22074_v18 = vld [vmem:[#allocation8 + $0x22c] ss:$16 sps:$4 sm:$0xff] (!%p18562_p8)  }
 0x724   : > { %15732 = vmatprep.subr.bf16.mxu0 (!%p18562_p8), %v21996_v23  ;;  %16060 = vmatprep.subr.bf16.mxu1 (!%p18562_p8), %v21998_v24  ;;  %v22069_v24 = vld [vmem:[#allocation8 + $0x220] ss:$16 sps:$4 sm:$0xff] (!%p18562_p8)  }
 0x727   : > { %15733 = vmatpush1.bf16.msra.mxu0 (!%p18562_p8), %v22000_v60  ;;  %16061 = vmatpush1.bf16.msra.mxu1 (!%p18562_p8), %v22001_v27  ;;  %v22072_v60 = vld [vmem:[#allocation8 + $0x228] ss:$16 sps:$4 sm:$0xff] (!%p18562_p8)   ;;  %v22077_v27 = vld [vmem:[#allocation8 + $0x244] ss:$16 sps:$4 sm:$0xff] (!%p18562_p8)  }
 0x728   : > { %15734 = vmatprep.subr.bf16.mxu0 (!%p18562_p8), %v22002_v12  ;;  %16062 = vmatprep.subr.bf16.mxu1 (!%p18562_p8), %v22004_v28  ;;  %v22080_v12 = vld [vmem:[#allocation8 + $0x24c] ss:$16 sps:$4 sm:$0xff] (!%p18562_p8)   ;;  %v22075_v28 = vld [vmem:[#allocation8 + $0x240] ss:$16 sps:$4 sm:$0xff] (!%p18562_p8)  }
 0x72b   : > { %15735 = vmatpush1.bf16.msra.mxu0 (!%p18562_p8), %v22006_v10  ;;  %16063 = vmatpush1.bf16.msra.mxu1 (!%p18562_p8), %v22007_v29  ;;  %v22078_v10 = vld [vmem:[#allocation8 + $0x248] ss:$16 sps:$4 sm:$0xff] (!%p18562_p8)   ;;  %v22083_v29 = vld [vmem:[#allocation8 + $0x264] ss:$16 sps:$4 sm:$0xff] (!%p18562_p8)  }
 0x72c   : > { %15736 = vmatprep.subr.bf16.mxu0 (!%p18562_p8), %v22008_v19  ;;  %16064 = vmatprep.subr.bf16.mxu1 (!%p18562_p8), %v22010_v7  ;;  %v22086_v19 = vld [vmem:[#allocation8 + $0x26c] ss:$16 sps:$4 sm:$0xff] (!%p18562_p8)   ;;  %v22081_v7 = vld [vmem:[#allocation8 + $0x260] ss:$16 sps:$4 sm:$0xff] (!%p18562_p8)  }
 0x72f   : > { %15737 = vmatpush1.bf16.msra.mxu0 (!%p18562_p8), %v22012_v25  ;;  %16065 = vmatpush1.bf16.msra.mxu1 (!%p18562_p8), %v22013_v36  ;;  %v22084_v25 = vld [vmem:[#allocation8 + $0x268] ss:$16 sps:$4 sm:$0xff] (!%p18562_p8)   ;;  %v22089_v36 = vld [vmem:[#allocation8 + $0x284] ss:$16 sps:$4 sm:$0xff] (!%p18562_p8)  }
 0x7e5   : > { %v11452_v26 = vpop.f32.mrb[0].mxu0  ;;  %v12477_v40 = vpop.f32.mrb[0].mxu1 }
 0x7e6   : > { %v19200_v41 = vadd.f32 %v11452_v26, %v2044_v37  ;;  %v19202_v33 = vadd.f32 %v12477_v40, %v2052_v49  ;;  %v11454_v43 = vpop.f32.mrb[1].mxu0  ;;  %v12479_v44 = vpop.f32.mrb[1].mxu1  ;;  %v22014_v37 = vld [vmem:[#allocation8 + $0x104] ss:$16 sps:$4 sm:$0xff] (!%p18562_p8)   ;;  %v22016_v49 = vld [vmem:[#allocation8 + $0x10c] ss:$16 sps:$4 sm:$0xff] (!%p18562_p8)  }
 0x7e7   : > { %v19201_v22 = vadd.f32 %v11454_v43, %v2048_v13  ;;  %v19203_v47 = vadd.f32 %v12479_v44, %v2056_v39  ;;  %v11456_v50 = vpop.f32.mrb[2].mxu0  ;;  %v12481_v15 = vpop.f32.mrb[2].mxu1  ;;  %v22018_v13 = vld [vmem:[#allocation8 + $0x100] ss:$16 sps:$4 sm:$0xff] (!%p18562_p8)   ;;  %v22019_v39 = vld [vmem:[#allocation8 + $0x108] ss:$16 sps:$4 sm:$0xff] (!%p18562_p8)   ;;  %15738 = vmatprep.subr.bf16.mxu0 (!%p18562_p8), %v22014_v37  ;;  %16066 = vmatprep.subr.bf16.mxu1 (!%p18562_p8), %v22016_v49 }
 0x7e8   : > { %v12484_v53 = vmax.f32 %v19200_v41, 0.0  ;;  %v12486_v54 = vmax.f32 %v19202_v33, 0.0  ;;  %v11457_v34 = vpop.f32.mrb[3].mxu0  ;;  %v12482_v55 = vpop.f32.mrb[3].mxu1  ;;  %v22020_v26 = vld [vmem:[#allocation8 + $0x124] ss:$16 sps:$4 sm:$0xff] (!%p18562_p8)   ;;  %15739 = vmatpush1.bf16.msra.mxu0 (!%p18562_p8), %v22018_v13  ;;  %16067 = vmatpush1.bf16.msra.mxu1 (!%p18562_p8), %v22019_v39 }
 0x7e9   : > { %v12485_v38 = vmax.f32 %v19201_v22, 0.0  ;;  %v12487_v57 = vmax.f32 %v19203_v47, 0.0  ;;  %v22022_v40 = vld [vmem:[#allocation8 + $0x12c] ss:$16 sps:$4 sm:$0xff] (!%p18562_p8)   ;;  %v22025_v41 = vld [vmem:[#allocation8 + $0x128] ss:$16 sps:$4 sm:$0xff] (!%p18562_p8)   ;;  %15740 = vmatprep.subr.bf16.mxu0 (!%p18562_p8), %v22020_v26 }
 0x7ea   : > { %v22026_v33 = vld [vmem:[#allocation8 + $0x144] ss:$16 sps:$4 sm:$0xff] (!%p18562_p8)   ;;  %16068 = vmatprep.subr.bf16.mxu1 (!%p18562_p8), %v22022_v40  ;;  %v22028_v43 = vld [vmem:[#allocation8 + $0x14c] ss:$16 sps:$4 sm:$0xff] (!%p18562_p8)   ;;  %v22030_v44 = vld [vmem:[#allocation8 + $0x140] ss:$16 sps:$4 sm:$0xff] (!%p18562_p8)  }
 0x7eb   : > { %v12493_v58 = vcombine.low %v12484_v53, %v12485_v38  ;;  %v12494_v59 = vcombine.low %v12486_v54, %v12487_v57  ;;  %12519 = sbr.rel (%p18562_p8) target bundleno = 3159 (0xc57), region = 84  ;;  %v22031_v22 = vld [vmem:[#allocation8 + $0x148] ss:$16 sps:$4 sm:$0xff] (!%p18562_p8)   ;;  %v22032_v47 = vld [vmem:[#allocation8 + $0x164] ss:$16 sps:$4 sm:$0xff] (!%p18562_p8)  }
 0x7ec   : > { %15741 = vmatpush1.bf16.msra.mxu0 (!%p18562_p8), %v22024_v21  ;;  %16069 = vmatpush1.bf16.msra.mxu1 (!%p18562_p8), %v22025_v41  ;;  %v22034_v50 = vld [vmem:[#allocation8 + $0x16c] ss:$16 sps:$4 sm:$0xff] (!%p18562_p8)   ;;  %v22036_v53 = vld [vmem:[#allocation8 + $0x160] ss:$16 sps:$4 sm:$0xff] (!%p18562_p8)   ;;  %v22037_v34 = vld [vmem:[#allocation8 + $0x168] ss:$16 sps:$4 sm:$0xff] (!%p18562_p8)  }
 0x7ed   : > { %v12501_v62 = vrot.slane %v12493_v58, %v25249_v45  ;;  %v12508_v0 = vrot.slane %v12494_v59, %v25249_v45  ;;  %15742 = vmatprep.subr.bf16.mxu0 (!%p18562_p8), %v22026_v33  ;;  %16070 = vmatprep.subr.bf16.mxu1 (!%p18562_p8), %v22028_v43  ;;  %v22038_v55 = vld [vmem:[#allocation8 + $0x184] ss:$16 sps:$4 sm:$0xff] (!%p18562_p8)   ;;  %v22040_v38 = vld [vmem:[#allocation8 + $0x18c] ss:$16 sps:$4 sm:$0xff] (!%p18562_p8)   ;;  %v22042_v58 = vld [vmem:[#allocation8 + $0x180] ss:$16 sps:$4 sm:$0xff] (!%p18562_p8)  }
 0x7ee   : > { %v22092_v37 = vld [vmem:[#allocation8 + $0x28c] ss:$16 sps:$4 sm:$0xff] (!%p18562_p8)   ;;  %v22087_v49 = vld [vmem:[#allocation8 + $0x280] ss:$16 sps:$4 sm:$0xff] (!%p18562_p8)   ;;  %v22090_v13 = vld [vmem:[#allocation8 + $0x288] ss:$16 sps:$4 sm:$0xff] (!%p18562_p8)  }
 0x7ef   : > { %v12509_v1 = vcombine.low %v12501_v62, %v12508_v0  ;;  %v22043_v62 = vld [vmem:[#allocation8 + $0x188] ss:$16 sps:$4 sm:$0xff] (!%p18562_p8)   ;;  %v22044_v0 = vld [vmem:[#allocation8 + $0x1a4] ss:$16 sps:$4 sm:$0xff] (!%p18562_p8)   ;;  %v22098_v26 = vld [vmem:[#allocation8 + $0x2ac] ss:$16 sps:$4 sm:$0xff] (!%p18562_p8)  }
 0x7f0   : > { %15743 = vmatpush1.bf16.msra.mxu0 (!%p18562_p8), %v22030_v44  ;;  %16071 = vmatpush1.bf16.msra.mxu1 (!%p18562_p8), %v22031_v22  ;;  %v22095_v39 = vld [vmem:[#allocation8 + $0x2a4] ss:$16 sps:$4 sm:$0xff] (!%p18562_p8)   ;;  %v22093_v40 = vld [vmem:[#allocation8 + $0x2a0] ss:$16 sps:$4 sm:$0xff] (!%p18562_p8)   ;;  %v22096_v21 = vld [vmem:[#allocation8 + $0x2a8] ss:$16 sps:$4 sm:$0xff] (!%p18562_p8)  }
 0x7f1   : > { %12515 = vst [vmem:[%s12514_s14] sm:$0xff] %v12509_v1  ;;  %15744 = vmatprep.subr.bf16.mxu0 (!%p18562_p8), %v22032_v47  ;;  %16072 = vmatprep.subr.bf16.mxu1 (!%p18562_p8), %v22034_v50  ;;  %v22046_v1 = vld [vmem:[#allocation8 + $0x1ac] ss:$16 sps:$4 sm:$0xff] (!%p18562_p8)   ;;  %v22101_v41 = vld [vmem:[#allocation8 + $0x2c4] ss:$16 sps:$4 sm:$0xff] (!%p18562_p8)   ;;  %v22099_v43 = vld [vmem:[#allocation8 + $0x2c0] ss:$16 sps:$4 sm:$0xff] (!%p18562_p8)  }
 0x7f2   : > { %v22104_v33 = vld [vmem:[#allocation8 + $0x2cc] ss:$16 sps:$4 sm:$0xff]   ;;  %v22102_v44 = vld [vmem:[#allocation8 + $0x2c8] ss:$16 sps:$4 sm:$0xff]   ;;  %v22107_v22 = vld [vmem:[#allocation8 + $0x2e4] ss:$16 sps:$4 sm:$0xff]  }
 0x7f3   : > { %v22110_v47 = vld [vmem:[#allocation8 + $0x2ec] ss:$16 sps:$4 sm:$0xff]   ;;  %v22105_v50 = vld [vmem:[#allocation8 + $0x2e0] ss:$16 sps:$4 sm:$0xff]  }
 0x7f4   : > { %15745 = vmatpush1.bf16.msra.mxu0 %v22036_v53  ;;  %16073 = vmatpush1.bf16.msra.mxu1 %v22037_v34  ;;  %v22113_v53 = vld [vmem:[#allocation8 + $0x304] ss:$16 sps:$4 sm:$0xff]   ;;  %v22111_v34 = vld [vmem:[#allocation8 + $0x300] ss:$16 sps:$4 sm:$0xff]  }
 0x7f5   : > { %15746 = vmatprep.subr.bf16.mxu0 %v22038_v55  ;;  %16074 = vmatprep.subr.bf16.mxu1 %v22040_v38  ;;  %v22114_v55 = vld [vmem:[#allocation8 + $0x308] ss:$16 sps:$4 sm:$0xff]   ;;  %v22119_v38 = vld [vmem:[#allocation8 + $0x324] ss:$16 sps:$4 sm:$0xff]  }
 0x7f8   : > { %v12520_v15 = vld [vmem:[#allocation2] sm:$0xff]  ;;  %15747 = vmatpush1.bf16.msra.mxu0 %v22042_v58  ;;  %16075 = vmatpush1.bf16.msra.mxu1 %v22043_v62  ;;  %v22117_v58 = vld [vmem:[#allocation8 + $0x320] ss:$16 sps:$4 sm:$0xff]   ;;  %v22125_v62 = vld [vmem:[#allocation8 + $0x344] ss:$16 sps:$4 sm:$0xff]  }
 0x7f9   : > { %v12535_v54 = vrot.slane %v12520_v15, %v25249_v45  ;;  %15748 = vmatprep.subr.bf16.mxu0 %v22044_v0  ;;  %16076 = vmatprep.subr.bf16.mxu1 %v22046_v1  ;;  %v12528_v48 = vcombine.high %v12520_v15, %v12520_v15  ;;  %v22108_v15 = vld [vmem:[#allocation8 + $0x2e8] ss:$16 sps:$4 sm:$0xff]   ;;  %v22128_v0 = vld [vmem:[#allocation8 + $0x34c] ss:$16 sps:$4 sm:$0xff]   ;;  %v22123_v1 = vld [vmem:[#allocation8 + $0x340] ss:$16 sps:$4 sm:$0xff]  }
 0x7fb   : > { %v12543_v57 = vcombine.high %v12535_v54, %v12535_v54  ;;  %v25256_v11 = vrot.slane %v12528_v48, %v25249_v45  ;;  %v12612_v17 = vpack.c.bf16 %v12535_v54, %v12535_v54  ;;  %v22116_v54 = vld [vmem:[#allocation8 + $0x30c] ss:$16 sps:$4 sm:$0xff]   ;;  %v22132_v48 = vld [vmem:[#allocation8 + $0x368] ss:$16 sps:$4 sm:$0xff]  }
 0x7fc   : > { %15749 = vmatpush1.bf16.msra.mxu0 %v22048_v51  ;;  %16077 = vmatpush1.bf16.msra.mxu1 %v22049_v35  ;;  %v22126_v51 = vld [vmem:[#allocation8 + $0x348] ss:$16 sps:$4 sm:$0xff]   ;;  %v22131_v35 = vld [vmem:[#allocation8 + $0x364] ss:$16 sps:$4 sm:$0xff]  }
 0x7fd   : > { %v12613_v59 = vpack.c.bf16 %v12543_v57, %v12543_v57  ;;  %15750 = vmatprep.subr.bf16.mxu0 %v22050_v2  ;;  %16078 = vmatprep.subr.bf16.mxu1 %v22052_v3  ;;  %v12544_v16 = vcombine.high %v25256_v11, %v25256_v11  ;;  %v22122_v57 = vld [vmem:[#allocation8 + $0x32c] ss:$16 sps:$4 sm:$0xff]   ;;  %v22129_v3 = vld [vmem:[#allocation8 + $0x360] ss:$16 sps:$4 sm:$0xff]  }
 0x7fe   : > { %v22134_v2 = vld [vmem:[#allocation8 + $0x36c] ss:$16 sps:$4 sm:$0xff]  }
 0x7ff   : > { %15754 = vmatprep.mubr.bf16.mxu0 %v12613_v59  ;;  %16082 = vmatprep.mubr.bf16.mxu1 %v12613_v59  ;;  %v12615_v23 = vpack.c.bf16 %v12544_v16, %v12544_v16  ;;  %v22120_v59 = vld [vmem:[#allocation8 + $0x328] ss:$16 sps:$4 sm:$0xff]   ;;  %v22149_v16 = vld [vmem:[#allocation8 + $0x3c4] ss:$16 sps:$4 sm:$0xff]  }
 0x800   : > { %15751 = vmatpush1.bf16.msra.mxu0 %v22054_v4  ;;  %16079 = vmatpush1.bf16.msra.mxu1 %v22055_v5  ;;  %v22137_v4 = vld [vmem:[#allocation8 + $0x384] ss:$16 sps:$4 sm:$0xff]   ;;  %v22140_v5 = vld [vmem:[#allocation8 + $0x38c] ss:$16 sps:$4 sm:$0xff]  }
 0x801   : > { %15752 = vmatprep.subr.bf16.mxu0 %v22056_v46  ;;  %16080 = vmatprep.subr.bf16.mxu1 %v22058_v9  ;;  %v22135_v46 = vld [vmem:[#allocation8 + $0x380] ss:$16 sps:$4 sm:$0xff]   ;;  %v22138_v9 = vld [vmem:[#allocation8 + $0x388] ss:$16 sps:$4 sm:$0xff]  }
 0x804   : > { %15753 = vmatpush1.bf16.msra.mxu0 %v22060_v56  ;;  %16081 = vmatpush1.bf16.msra.mxu1 %v22061_v14  ;;  %v22143_v56 = vld [vmem:[#allocation8 + $0x3a4] ss:$16 sps:$4 sm:$0xff]   ;;  %v22146_v14 = vld [vmem:[#allocation8 + $0x3ac] ss:$16 sps:$4 sm:$0xff]  }
 0x805   : > { %15763 = vmatprep.subr.bf16.mxu0 %v22065_v63  ;;  %16091 = vmatprep.subr.bf16.mxu1 %v22068_v61  ;;  %v22141_v63 = vld [vmem:[#allocation8 + $0x3a0] ss:$16 sps:$4 sm:$0xff]   ;;  %v22144_v61 = vld [vmem:[#allocation8 + $0x3a8] ss:$16 sps:$4 sm:$0xff]  }
 0x807   : > { %15755 = vmatmul.mubr.bf16.vlgmr.msra.gmra.mrb[0].mxu0 %v12612_v17  ;;  %16083 = vmatmul.mubr.bf16.vlgmr.msra.gmra.mrb[0].mxu1 %v12612_v17  ;;  %v22147_v17 = vld [vmem:[#allocation8 + $0x3c0] ss:$16 sps:$4 sm:$0xff]  }
 0x808   : > { %15764 = vmatpush1.bf16.msra.mxu0 %v22063_v52  ;;  %16092 = vmatpush1.bf16.msra.mxu1 %v22066_v6  ;;  %v22152_v52 = vld [vmem:[#allocation8 + $0x3cc] ss:$16 sps:$4 sm:$0xff]   ;;  %v22150_v6 = vld [vmem:[#allocation8 + $0x3c8] ss:$16 sps:$4 sm:$0xff]  }
 0x809   : > { %15765 = vmatprep.subr.bf16.mxu0 %v22071_v8  ;;  %16093 = vmatprep.subr.bf16.mxu1 %v22074_v18  ;;  %v22155_v8 = vld [vmem:[#allocation8 + $0x3e4] ss:$16 sps:$4 sm:$0xff]   ;;  %v22158_v18 = vld [vmem:[#allocation8 + $0x3ec] ss:$16 sps:$4 sm:$0xff]  }
 0x80a   : > { %15795 = vmatprep.mubr.bf16.mxu0 %v12615_v23  ;;  %16123 = vmatprep.mubr.bf16.mxu1 %v12615_v23  ;;  %v22153_v23 = vld [vmem:[#allocation8 + $0x3e0] ss:$16 sps:$4 sm:$0xff]  }
 0x80c   : > { %15766 = vmatpush1.bf16.msra.mxu0 %v22069_v24  ;;  %16094 = vmatpush1.bf16.msra.mxu1 %v22072_v60  ;;  %v22156_v24 = vld [vmem:[#allocation8 + $0x3e8] ss:$16 sps:$4 sm:$0xff]   ;;  %v22161_v60 = vld [vmem:[#allocation8 + $0x404] ss:$16 sps:$4 sm:$0xff]  }
 0x80d   : > { %15767 = vmatprep.subr.bf16.mxu0 %v22077_v27  ;;  %16095 = vmatprep.subr.bf16.mxu1 %v22080_v12  ;;  %v22164_v27 = vld [vmem:[#allocation8 + $0x40c] ss:$16 sps:$4 sm:$0xff]   ;;  %v22159_v12 = vld [vmem:[#allocation8 + $0x400] ss:$16 sps:$4 sm:$0xff]  }
 0x810   : > { %15768 = vmatpush1.bf16.msra.mxu0 %v22075_v28  ;;  %16096 = vmatpush1.bf16.msra.mxu1 %v22078_v10  ;;  %v12614_v28 = vpack.c.bf16 %v25256_v11, %v25256_v11  ;;  %v22162_v10 = vld [vmem:[#allocation8 + $0x408] ss:$16 sps:$4 sm:$0xff]   ;;  %v22165_v11 = vld [vmem:[#allocation8 + $0x420] ss:$16 sps:$4 sm:$0xff]  }
 0x811   : > { %15769 = vmatprep.subr.bf16.mxu0 %v22083_v29  ;;  %16097 = vmatprep.subr.bf16.mxu1 %v22086_v19  ;;  %v25262_v29 = vld [vmem:[#allocation2 + $0x8] sm:$0xff] }
 0x812   : > { %v22167_v19 = vld [vmem:[#allocation8 + $0x424] ss:$16 sps:$4 sm:$0xff]  }
 0x814   : > { %15770 = vmatpush1.bf16.msra.mxu0 %v22081_v7  ;;  %16098 = vmatpush1.bf16.msra.mxu1 %v22084_v25  ;;  %v22170_v7 = vld [vmem:[#allocation8 + $0x42c] ss:$16 sps:$4 sm:$0xff]   ;;  %v25266_v25 = vrot.slane %v25262_v29, %v25249_v45 }
 0x815   : > { %15771 = vmatprep.subr.bf16.mxu0 %v22089_v36  ;;  %16099 = vmatprep.subr.bf16.mxu1 %v22092_v37  ;;  %v22168_v37 = vld [vmem:[#allocation8 + $0x428] ss:$16 sps:$4 sm:$0xff]  }
 0x816   : > { %v12560_v36 = vcombine.high %v25266_v25, %v25266_v25 }
 0x818   : > { %15772 = vmatpush1.bf16.msra.mxu0 %v22087_v49  ;;  %16100 = vmatpush1.bf16.msra.mxu1 %v22090_v13  ;;  %v22173_v49 = vld [vmem:[#allocation8 + $0x444] ss:$16 sps:$4 sm:$0xff]   ;;  %v22176_v13 = vld [vmem:[#allocation8 + $0x44c] ss:$16 sps:$4 sm:$0xff]  }
 0x819   : > { %15773 = vmatprep.subr.bf16.mxu0 %v22095_v39  ;;  %16101 = vmatprep.subr.bf16.mxu1 %v22098_v26  ;;  %v12617_v39 = vpack.c.bf16 %v12560_v36, %v12560_v36  ;;  %v22171_v26 = vld [vmem:[#allocation8 + $0x440] ss:$16 sps:$4 sm:$0xff]   ;;  %v22246_v36 = vld [vmem:[#allocation8 + $0x5c8] ss:$16 sps:$4 sm:$0xff]  }
 0x81c   : > { %15774 = vmatpush1.bf16.msra.mxu0 %v22093_v40  ;;  %16102 = vmatpush1.bf16.msra.mxu1 %v22096_v21  ;;  %v22174_v40 = vld [vmem:[#allocation8 + $0x448] ss:$16 sps:$4 sm:$0xff]   ;;  %v22179_v21 = vld [vmem:[#allocation8 + $0x464] ss:$16 sps:$4 sm:$0xff]  }
 0x81d   : > { %15775 = vmatprep.subr.bf16.mxu0 %v22101_v41  ;;  %16103 = vmatprep.subr.bf16.mxu1 %v22104_v33  ;;  %v22182_v41 = vld [vmem:[#allocation8 + $0x46c] ss:$16 sps:$4 sm:$0xff]   ;;  %v22177_v33 = vld [vmem:[#allocation8 + $0x460] ss:$16 sps:$4 sm:$0xff]  }
 0x820   : > { %15776 = vmatpush1.bf16.msra.mxu0 %v22099_v43  ;;  %16104 = vmatpush1.bf16.msra.mxu1 %v22102_v44  ;;  %v22180_v43 = vld [vmem:[#allocation8 + $0x468] ss:$16 sps:$4 sm:$0xff]   ;;  %v22185_v44 = vld [vmem:[#allocation8 + $0x484] ss:$16 sps:$4 sm:$0xff]  }
 0x821   : > { %15777 = vmatprep.subr.bf16.mxu0 %v22107_v22  ;;  %16105 = vmatprep.subr.bf16.mxu1 %v22110_v47  ;;  %v22188_v22 = vld [vmem:[#allocation8 + $0x48c] ss:$16 sps:$4 sm:$0xff]   ;;  %v22183_v47 = vld [vmem:[#allocation8 + $0x480] ss:$16 sps:$4 sm:$0xff]  }
 0x824   : > { %15778 = vmatpush1.bf16.msra.mxu0 %v22105_v50  ;;  %16106 = vmatpush1.bf16.msra.mxu1 %v22108_v15  ;;  %v22186_v50 = vld [vmem:[#allocation8 + $0x488] ss:$16 sps:$4 sm:$0xff]   ;;  %v22191_v15 = vld [vmem:[#allocation8 + $0x4a4] ss:$16 sps:$4 sm:$0xff]  }
 0x825   : > { %15779 = vmatprep.subr.bf16.mxu0 %v22113_v53  ;;  %16107 = vmatprep.subr.bf16.mxu1 %v22116_v54  ;;  %v22194_v53 = vld [vmem:[#allocation8 + $0x4ac] ss:$16 sps:$4 sm:$0xff]   ;;  %v22189_v54 = vld [vmem:[#allocation8 + $0x4a0] ss:$16 sps:$4 sm:$0xff]  }
 0x828   : > { %15780 = vmatpush1.bf16.msra.mxu0 %v22111_v34  ;;  %16108 = vmatpush1.bf16.msra.mxu1 %v22114_v55  ;;  %v22192_v34 = vld [vmem:[#allocation8 + $0x4a8] ss:$16 sps:$4 sm:$0xff]   ;;  %v22197_v55 = vld [vmem:[#allocation8 + $0x4c4] ss:$16 sps:$4 sm:$0xff]  }
 0x829   : > { %15781 = vmatprep.subr.bf16.mxu0 %v22119_v38  ;;  %16109 = vmatprep.subr.bf16.mxu1 %v22122_v57  ;;  %v22200_v38 = vld [vmem:[#allocation8 + $0x4cc] ss:$16 sps:$4 sm:$0xff]   ;;  %v22195_v57 = vld [vmem:[#allocation8 + $0x4c0] ss:$16 sps:$4 sm:$0xff]  }
 0x82c   : > { %15782 = vmatpush1.bf16.msra.mxu0 %v22117_v58  ;;  %16110 = vmatpush1.bf16.msra.mxu1 %v22120_v59  ;;  %v22198_v58 = vld [vmem:[#allocation8 + $0x4c8] ss:$16 sps:$4 sm:$0xff]   ;;  %v22203_v59 = vld [vmem:[#allocation8 + $0x4e4] ss:$16 sps:$4 sm:$0xff]  }
 0x82d   : > { %15783 = vmatprep.subr.bf16.mxu0 %v22125_v62  ;;  %16111 = vmatprep.subr.bf16.mxu1 %v22128_v0  ;;  %v22206_v62 = vld [vmem:[#allocation8 + $0x4ec] ss:$16 sps:$4 sm:$0xff]   ;;  %v22201_v0 = vld [vmem:[#allocation8 + $0x4e0] ss:$16 sps:$4 sm:$0xff]  }
 0x830   : > { %15784 = vmatpush1.bf16.msra.mxu0 %v22123_v1  ;;  %16112 = vmatpush1.bf16.msra.mxu1 %v22126_v51  ;;  %v22204_v1 = vld [vmem:[#allocation8 + $0x4e8] ss:$16 sps:$4 sm:$0xff]   ;;  %v22209_v51 = vld [vmem:[#allocation8 + $0x504] ss:$16 sps:$4 sm:$0xff]  }
 0x831   : > { %15785 = vmatprep.subr.bf16.mxu0 %v22131_v35  ;;  %16113 = vmatprep.subr.bf16.mxu1 %v22134_v2  ;;  %v22212_v35 = vld [vmem:[#allocation8 + $0x50c] ss:$16 sps:$4 sm:$0xff]   ;;  %v22207_v2 = vld [vmem:[#allocation8 + $0x500] ss:$16 sps:$4 sm:$0xff]  }
 0x834   : > { %15786 = vmatpush1.bf16.msra.mxu0 %v22129_v3  ;;  %16114 = vmatpush1.bf16.msra.mxu1 %v22132_v48  ;;  %v22210_v3 = vld [vmem:[#allocation8 + $0x508] ss:$16 sps:$4 sm:$0xff]   ;;  %v22215_v48 = vld [vmem:[#allocation8 + $0x524] ss:$16 sps:$4 sm:$0xff]  }
 0x835   : > { %15787 = vmatprep.subr.bf16.mxu0 %v22137_v4  ;;  %16115 = vmatprep.subr.bf16.mxu1 %v22140_v5  ;;  %v22218_v4 = vld [vmem:[#allocation8 + $0x52c] ss:$16 sps:$4 sm:$0xff]   ;;  %v22213_v5 = vld [vmem:[#allocation8 + $0x520] ss:$16 sps:$4 sm:$0xff]  }
 0x838   : > { %15788 = vmatpush1.bf16.msra.mxu0 %v22135_v46  ;;  %16116 = vmatpush1.bf16.msra.mxu1 %v22138_v9  ;;  %v22216_v46 = vld [vmem:[#allocation8 + $0x528] ss:$16 sps:$4 sm:$0xff]   ;;  %v22221_v9 = vld [vmem:[#allocation8 + $0x544] ss:$16 sps:$4 sm:$0xff]  }
 0x839   : > { %15789 = vmatprep.subr.bf16.mxu0 %v22143_v56  ;;  %16117 = vmatprep.subr.bf16.mxu1 %v22146_v14  ;;  %v22224_v56 = vld [vmem:[#allocation8 + $0x54c] ss:$16 sps:$4 sm:$0xff]   ;;  %v22219_v14 = vld [vmem:[#allocation8 + $0x540] ss:$16 sps:$4 sm:$0xff]  }
 0x83c   : > { %15790 = vmatpush1.bf16.msra.mxu0 %v22141_v63  ;;  %16118 = vmatpush1.bf16.msra.mxu1 %v22144_v61  ;;  %v22222_v63 = vld [vmem:[#allocation8 + $0x548] ss:$16 sps:$4 sm:$0xff]   ;;  %v22227_v61 = vld [vmem:[#allocation8 + $0x564] ss:$16 sps:$4 sm:$0xff]  }
 0x83d   : > { %15791 = vmatprep.subr.bf16.mxu0 %v22149_v16  ;;  %16119 = vmatprep.subr.bf16.mxu1 %v22152_v52  ;;  %v22230_v16 = vld [vmem:[#allocation8 + $0x56c] ss:$16 sps:$4 sm:$0xff]   ;;  %v22225_v52 = vld [vmem:[#allocation8 + $0x560] ss:$16 sps:$4 sm:$0xff]  }
 0x840   : > { %15792 = vmatpush1.bf16.msra.mxu0 %v22147_v17  ;;  %16120 = vmatpush1.bf16.msra.mxu1 %v22150_v6  ;;  %v22228_v17 = vld [vmem:[#allocation8 + $0x568] ss:$16 sps:$4 sm:$0xff]   ;;  %v22233_v6 = vld [vmem:[#allocation8 + $0x584] ss:$16 sps:$4 sm:$0xff]  }
 0x841   : > { %15793 = vmatprep.subr.bf16.mxu0 %v22155_v8  ;;  %16121 = vmatprep.subr.bf16.mxu1 %v22158_v18  ;;  %v22236_v8 = vld [vmem:[#allocation8 + $0x58c] ss:$16 sps:$4 sm:$0xff]   ;;  %v22231_v18 = vld [vmem:[#allocation8 + $0x580] ss:$16 sps:$4 sm:$0xff]  }
 0x844   : > { %15794 = vmatpush1.bf16.msra.mxu0 %v22153_v23  ;;  %16122 = vmatpush1.bf16.msra.mxu1 %v22156_v24  ;;  %v22234_v23 = vld [vmem:[#allocation8 + $0x588] ss:$16 sps:$4 sm:$0xff]   ;;  %v22239_v24 = vld [vmem:[#allocation8 + $0x5a4] ss:$16 sps:$4 sm:$0xff]  }
 0x845   : > { %15804 = vmatprep.subr.bf16.mxu0 %v22161_v60  ;;  %16132 = vmatprep.subr.bf16.mxu1 %v22164_v27  ;;  %v22242_v60 = vld [vmem:[#allocation8 + $0x5ac] ss:$16 sps:$4 sm:$0xff]   ;;  %v22237_v27 = vld [vmem:[#allocation8 + $0x5a0] ss:$16 sps:$4 sm:$0xff]  }
 0x847   : > { %15796 = vmatmul.mubr.bf16.vlgmr.msra.gmra.mrb[0].mxu0 %v12614_v28  ;;  %16124 = vmatmul.mubr.bf16.vlgmr.msra.gmra.mrb[0].mxu1 %v12614_v28  ;;  %v22245_v28 = vld [vmem:[#allocation8 + $0x5c4] ss:$16 sps:$4 sm:$0xff]  }
 0x848   : > { %15805 = vmatpush1.bf16.msra.mxu0 %v22159_v12  ;;  %16133 = vmatpush1.bf16.msra.mxu1 %v22162_v10  ;;  %v22240_v12 = vld [vmem:[#allocation8 + $0x5a8] ss:$16 sps:$4 sm:$0xff]   ;;  %v22248_v10 = vld [vmem:[#allocation8 + $0x5cc] ss:$16 sps:$4 sm:$0xff]  }
 0x849   : > { %15806 = vmatprep.subr.bf16.mxu0 %v22167_v19  ;;  %16134 = vmatprep.subr.bf16.mxu1 %v22170_v7  ;;  %v12545_v19 = vcombine.high %v25262_v29, %v25262_v29  ;;  %v22243_v7 = vld [vmem:[#allocation8 + $0x5c0] ss:$16 sps:$4 sm:$0xff]  }
 0x84a   : > { %15836 = vmatprep.mubr.bf16.mxu0 %v12617_v39  ;;  %16164 = vmatprep.mubr.bf16.mxu1 %v12617_v39  ;;  %v22252_v39 = vld [vmem:[#allocation8 + $0x5e8] ss:$16 sps:$4 sm:$0xff]  }
 0x84c   : > { %15807 = vmatpush1.bf16.msra.mxu0 %v22165_v11  ;;  %16135 = vmatpush1.bf16.msra.mxu1 %v22168_v37  ;;  %v22251_v11 = vld [vmem:[#allocation8 + $0x5e4] ss:$16 sps:$4 sm:$0xff]   ;;  %v22254_v37 = vld [vmem:[#allocation8 + $0x5ec] ss:$16 sps:$4 sm:$0xff]  }
 0x84d   : > { %15808 = vmatprep.subr.bf16.mxu0 %v22173_v49  ;;  %16136 = vmatprep.subr.bf16.mxu1 %v22176_v13  ;;  %v25273_v49 = vrot.slane %v12545_v19, %v25249_v45  ;;  %v22249_v13 = vld [vmem:[#allocation8 + $0x5e0] ss:$16 sps:$4 sm:$0xff]   ;;  %v22324_v19 = vld [vmem:[#allocation8 + $0x768] ss:$16 sps:$4 sm:$0xff]  }
 0x84f   : > { %v12561_v29 = vcombine.high %v25273_v49, %v25273_v49 }
 0x850   : > { %15809 = vmatpush1.bf16.msra.mxu0 %v22171_v26  ;;  %16137 = vmatpush1.bf16.msra.mxu1 %v22174_v40  ;;  %v22257_v26 = vld [vmem:[#allocation8 + $0x604] ss:$16 sps:$4 sm:$0xff]   ;;  %v22260_v40 = vld [vmem:[#allocation8 + $0x60c] ss:$16 sps:$4 sm:$0xff]  }
 0x851   : > { %15810 = vmatprep.subr.bf16.mxu0 %v22179_v21  ;;  %16138 = vmatprep.subr.bf16.mxu1 %v22182_v41  ;;  %v12616_v21 = vpack.c.bf16 %v25266_v25, %v25266_v25  ;;  %v22255_v41 = vld [vmem:[#allocation8 + $0x600] ss:$16 sps:$4 sm:$0xff]  }
 0x852   : > { %v22267_v25 = vld [vmem:[#allocation8 + $0x640] ss:$16 sps:$4 sm:$0xff]  }
 0x854   : > { %15811 = vmatpush1.bf16.msra.mxu0 %v22177_v33  ;;  %16139 = vmatpush1.bf16.msra.mxu1 %v22180_v43  ;;  %v22258_v33 = vld [vmem:[#allocation8 + $0x608] ss:$16 sps:$4 sm:$0xff]   ;;  %v22263_v43 = vld [vmem:[#allocation8 + $0x624] ss:$16 sps:$4 sm:$0xff]  }
 0x855   : > { %15812 = vmatprep.subr.bf16.mxu0 %v22185_v44  ;;  %16140 = vmatprep.subr.bf16.mxu1 %v22188_v22  ;;  %v22266_v44 = vld [vmem:[#allocation8 + $0x62c] ss:$16 sps:$4 sm:$0xff]   ;;  %v12619_v22 = vpack.c.bf16 %v12561_v29, %v12561_v29  ;;  %v22341_v29 = vld [vmem:[#allocation8 + $0x7c4] ss:$16 sps:$4 sm:$0xff]  }
 0x858   : > { %15813 = vmatpush1.bf16.msra.mxu0 %v22183_v47  ;;  %16141 = vmatpush1.bf16.msra.mxu1 %v22186_v50  ;;  %v22261_v47 = vld [vmem:[#allocation8 + $0x620] ss:$16 sps:$4 sm:$0xff]   ;;  %v22264_v50 = vld [vmem:[#allocation8 + $0x628] ss:$16 sps:$4 sm:$0xff]  }
 0x859   : > { %15814 = vmatprep.subr.bf16.mxu0 %v22191_v15  ;;  %16142 = vmatprep.subr.bf16.mxu1 %v22194_v53  ;;  %v22269_v15 = vld [vmem:[#allocation8 + $0x644] ss:$16 sps:$4 sm:$0xff]   ;;  %v22272_v53 = vld [vmem:[#allocation8 + $0x64c] ss:$16 sps:$4 sm:$0xff]  }
 0x85c   : > { %15815 = vmatpush1.bf16.msra.mxu0 %v22189_v54  ;;  %16143 = vmatpush1.bf16.msra.mxu1 %v22192_v34  ;;  %v22270_v54 = vld [vmem:[#allocation8 + $0x648] ss:$16 sps:$4 sm:$0xff]   ;;  %v22275_v34 = vld [vmem:[#allocation8 + $0x664] ss:$16 sps:$4 sm:$0xff]  }
 0x85d   : > { %15816 = vmatprep.subr.bf16.mxu0 %v22197_v55  ;;  %16144 = vmatprep.subr.bf16.mxu1 %v22200_v38  ;;  %v22278_v55 = vld [vmem:[#allocation8 + $0x66c] ss:$16 sps:$4 sm:$0xff]   ;;  %v22273_v38 = vld [vmem:[#allocation8 + $0x660] ss:$16 sps:$4 sm:$0xff]  }
 0x860   : > { %15817 = vmatpush1.bf16.msra.mxu0 %v22195_v57  ;;  %16145 = vmatpush1.bf16.msra.mxu1 %v22198_v58  ;;  %v22276_v57 = vld [vmem:[#allocation8 + $0x668] ss:$16 sps:$4 sm:$0xff]   ;;  %v22281_v58 = vld [vmem:[#allocation8 + $0x684] ss:$16 sps:$4 sm:$0xff]  }
 0x861   : > { %15818 = vmatprep.subr.bf16.mxu0 %v22203_v59  ;;  %16146 = vmatprep.subr.bf16.mxu1 %v22206_v62  ;;  %v22284_v59 = vld [vmem:[#allocation8 + $0x68c] ss:$16 sps:$4 sm:$0xff]   ;;  %v22279_v62 = vld [vmem:[#allocation8 + $0x680] ss:$16 sps:$4 sm:$0xff]  }
 0x864   : > { %15819 = vmatpush1.bf16.msra.mxu0 %v22201_v0  ;;  %16147 = vmatpush1.bf16.msra.mxu1 %v22204_v1  ;;  %v22282_v0 = vld [vmem:[#allocation8 + $0x688] ss:$16 sps:$4 sm:$0xff]   ;;  %v22287_v1 = vld [vmem:[#allocation8 + $0x6a4] ss:$16 sps:$4 sm:$0xff]  }
 0x865   : > { %15820 = vmatprep.subr.bf16.mxu0 %v22209_v51  ;;  %16148 = vmatprep.subr.bf16.mxu1 %v22212_v35  ;;  %v22290_v51 = vld [vmem:[#allocation8 + $0x6ac] ss:$16 sps:$4 sm:$0xff]   ;;  %v22285_v35 = vld [vmem:[#allocation8 + $0x6a0] ss:$16 sps:$4 sm:$0xff]  }
 0x868   : > { %15821 = vmatpush1.bf16.msra.mxu0 %v22207_v2  ;;  %16149 = vmatpush1.bf16.msra.mxu1 %v22210_v3  ;;  %v22288_v2 = vld [vmem:[#allocation8 + $0x6a8] ss:$16 sps:$4 sm:$0xff]   ;;  %v22293_v3 = vld [vmem:[#allocation8 + $0x6c4] ss:$16 sps:$4 sm:$0xff]  }
 0x869   : > { %15822 = vmatprep.subr.bf16.mxu0 %v22215_v48  ;;  %16150 = vmatprep.subr.bf16.mxu1 %v22218_v4  ;;  %v22296_v48 = vld [vmem:[#allocation8 + $0x6cc] ss:$16 sps:$4 sm:$0xff]   ;;  %v22291_v4 = vld [vmem:[#allocation8 + $0x6c0] ss:$16 sps:$4 sm:$0xff]  }
 0x86c   : > { %15823 = vmatpush1.bf16.msra.mxu0 %v22213_v5  ;;  %16151 = vmatpush1.bf16.msra.mxu1 %v22216_v46  ;;  %v22294_v5 = vld [vmem:[#allocation8 + $0x6c8] ss:$16 sps:$4 sm:$0xff]   ;;  %v22299_v46 = vld [vmem:[#allocation8 + $0x6e4] ss:$16 sps:$4 sm:$0xff]  }
 0x86d   : > { %15824 = vmatprep.subr.bf16.mxu0 %v22221_v9  ;;  %16152 = vmatprep.subr.bf16.mxu1 %v22224_v56  ;;  %v22302_v9 = vld [vmem:[#allocation8 + $0x6ec] ss:$16 sps:$4 sm:$0xff]   ;;  %v22297_v56 = vld [vmem:[#allocation8 + $0x6e0] ss:$16 sps:$4 sm:$0xff]  }
 0x870   : > { %15825 = vmatpush1.bf16.msra.mxu0 %v22219_v14  ;;  %16153 = vmatpush1.bf16.msra.mxu1 %v22222_v63  ;;  %v22300_v14 = vld [vmem:[#allocation8 + $0x6e8] ss:$16 sps:$4 sm:$0xff]   ;;  %v22305_v63 = vld [vmem:[#allocation8 + $0x704] ss:$16 sps:$4 sm:$0xff]  }
 0x871   : > { %15826 = vmatprep.subr.bf16.mxu0 %v22227_v61  ;;  %16154 = vmatprep.subr.bf16.mxu1 %v22230_v16  ;;  %v22308_v61 = vld [vmem:[#allocation8 + $0x70c] ss:$16 sps:$4 sm:$0xff]   ;;  %v22303_v16 = vld [vmem:[#allocation8 + $0x700] ss:$16 sps:$4 sm:$0xff]  }
 0x874   : > { %15827 = vmatpush1.bf16.msra.mxu0 %v22225_v52  ;;  %16155 = vmatpush1.bf16.msra.mxu1 %v22228_v17  ;;  %v22306_v52 = vld [vmem:[#allocation8 + $0x708] ss:$16 sps:$4 sm:$0xff]   ;;  %v22311_v17 = vld [vmem:[#allocation8 + $0x724] ss:$16 sps:$4 sm:$0xff]  }
 0x875   : > { %15828 = vmatprep.subr.bf16.mxu0 %v22233_v6  ;;  %16156 = vmatprep.subr.bf16.mxu1 %v22236_v8  ;;  %v22314_v6 = vld [vmem:[#allocation8 + $0x72c] ss:$16 sps:$4 sm:$0xff]   ;;  %v22309_v8 = vld [vmem:[#allocation8 + $0x720] ss:$16 sps:$4 sm:$0xff]  }
 0x878   : > { %15829 = vmatpush1.bf16.msra.mxu0 %v22231_v18  ;;  %16157 = vmatpush1.bf16.msra.mxu1 %v22234_v23  ;;  %v22312_v18 = vld [vmem:[#allocation8 + $0x728] ss:$16 sps:$4 sm:$0xff]   ;;  %v22317_v23 = vld [vmem:[#allocation8 + $0x744] ss:$16 sps:$4 sm:$0xff]  }
 0x879   : > { %15830 = vmatprep.subr.bf16.mxu0 %v22239_v24  ;;  %16158 = vmatprep.subr.bf16.mxu1 %v22242_v60  ;;  %v22320_v24 = vld [vmem:[#allocation8 + $0x74c] ss:$16 sps:$4 sm:$0xff]   ;;  %v22315_v60 = vld [vmem:[#allocation8 + $0x740] ss:$16 sps:$4 sm:$0xff]  }
 0x87c   : > { %15831 = vmatpush1.bf16.msra.mxu0 %v22237_v27  ;;  %16159 = vmatpush1.bf16.msra.mxu1 %v22240_v12  ;;  %v22318_v27 = vld [vmem:[#allocation8 + $0x748] ss:$16 sps:$4 sm:$0xff]   ;;  %v22323_v12 = vld [vmem:[#allocation8 + $0x764] ss:$16 sps:$4 sm:$0xff]  }
 0x87d   : > { %15832 = vmatprep.subr.bf16.mxu0 %v22245_v28  ;;  %16160 = vmatprep.subr.bf16.mxu1 %v22248_v10  ;;  %v22326_v28 = vld [vmem:[#allocation8 + $0x76c] ss:$16 sps:$4 sm:$0xff]   ;;  %v22321_v10 = vld [vmem:[#allocation8 + $0x760] ss:$16 sps:$4 sm:$0xff]  }
 0x880   : > { %15833 = vmatpush1.bf16.msra.mxu0 %v22243_v7  ;;  %16161 = vmatpush1.bf16.msra.mxu1 %v22246_v36  ;;  %v22329_v7 = vld [vmem:[#allocation8 + $0x784] ss:$16 sps:$4 sm:$0xff]   ;;  %v22332_v36 = vld [vmem:[#allocation8 + $0x78c] ss:$16 sps:$4 sm:$0xff]  }
 0x881   : > { %15834 = vmatprep.subr.bf16.mxu0 %v22251_v11  ;;  %16162 = vmatprep.subr.bf16.mxu1 %v22254_v37  ;;  %v22327_v11 = vld [vmem:[#allocation8 + $0x780] ss:$16 sps:$4 sm:$0xff]   ;;  %v22330_v37 = vld [vmem:[#allocation8 + $0x788] ss:$16 sps:$4 sm:$0xff]  }
 0x884   : > { %15835 = vmatpush1.bf16.msra.mxu0 %v22249_v13  ;;  %16163 = vmatpush1.bf16.msra.mxu1 %v22252_v39  ;;  %v22335_v13 = vld [vmem:[#allocation8 + $0x7a4] ss:$16 sps:$4 sm:$0xff]   ;;  %v22338_v39 = vld [vmem:[#allocation8 + $0x7ac] ss:$16 sps:$4 sm:$0xff]  }
 0x885   : > { %15845 = vmatprep.subr.bf16.mxu0 %v22257_v26  ;;  %16173 = vmatprep.subr.bf16.mxu1 %v22260_v40  ;;  %v22333_v26 = vld [vmem:[#allocation8 + $0x7a0] ss:$16 sps:$4 sm:$0xff]   ;;  %v22336_v40 = vld [vmem:[#allocation8 + $0x7a8] ss:$16 sps:$4 sm:$0xff]  }
 0x887   : > { %15837 = vmatmul.mubr.bf16.vlgmr.msra.gmra.mrb[0].mxu0 %v12616_v21  ;;  %16165 = vmatmul.mubr.bf16.vlgmr.msra.gmra.mrb[0].mxu1 %v12616_v21  ;;  %v22344_v21 = vld [vmem:[#allocation8 + $0x7cc] ss:$16 sps:$4 sm:$0xff]  }
 0x888   : > { %15846 = vmatpush1.bf16.msra.mxu0 %v22255_v41  ;;  %16174 = vmatpush1.bf16.msra.mxu1 %v22258_v33  ;;  %v22339_v41 = vld [vmem:[#allocation8 + $0x7c0] ss:$16 sps:$4 sm:$0xff]   ;;  %v25279_v33 = vld [vmem:[#allocation2 + $0x10] sm:$0xff] }
 0x889   : > { %15847 = vmatprep.subr.bf16.mxu0 %v22263_v43  ;;  %16175 = vmatprep.subr.bf16.mxu1 %v22266_v44  ;;  %v22342_v43 = vld [vmem:[#allocation8 + $0x7c8] ss:$16 sps:$4 sm:$0xff]   ;;  %v22347_v44 = vld [vmem:[#allocation8 + $0x7e4] ss:$16 sps:$4 sm:$0xff]  }
 0x88a   : > { %15877 = vmatprep.mubr.bf16.mxu0 %v12619_v22  ;;  %16205 = vmatprep.mubr.bf16.mxu1 %v12619_v22  ;;  %v22350_v22 = vld [vmem:[#allocation8 + $0x7ec] ss:$16 sps:$4 sm:$0xff]  }
 0x88c   : > { %15848 = vmatpush1.bf16.msra.mxu0 %v22261_v47  ;;  %16176 = vmatpush1.bf16.msra.mxu1 %v22264_v50  ;;  %v25283_v47 = vrot.slane %v25279_v33, %v25249_v45  ;;  %v22345_v50 = vld [vmem:[#allocation8 + $0x7e0] ss:$16 sps:$4 sm:$0xff]  }
 0x88d   : > { %15849 = vmatprep.subr.bf16.mxu0 %v22269_v15  ;;  %16177 = vmatprep.subr.bf16.mxu1 %v22272_v53  ;;  %v22348_v15 = vld [vmem:[#allocation8 + $0x7e8] ss:$16 sps:$4 sm:$0xff]   ;;  %v22354_v53 = vld [vmem:[#allocation8 + $0x804] ss:$16 sps:$4 sm:$0xff]  }
 0x890   : > { %15850 = vmatpush1.bf16.msra.mxu0 %v22267_v25  ;;  %16178 = vmatpush1.bf16.msra.mxu1 %v22270_v54  ;;  %v22357_v25 = vld [vmem:[#allocation8 + $0x80c] ss:$16 sps:$4 sm:$0xff]   ;;  %v12577_v54 = vcombine.high %v25283_v47, %v25283_v47 }
 0x891   : > { %15851 = vmatprep.subr.bf16.mxu0 %v22275_v34  ;;  %16179 = vmatprep.subr.bf16.mxu1 %v22278_v55  ;;  %v22352_v34 = vld [vmem:[#allocation8 + $0x800] ss:$16 sps:$4 sm:$0xff]   ;;  %v12618_v55 = vpack.c.bf16 %v25273_v49, %v25273_v49 }
 0x892   : > { %v22364_v49 = vld [vmem:[#allocation8 + $0x840] ss:$16 sps:$4 sm:$0xff]  }
 0x894   : > { %15852 = vmatpush1.bf16.msra.mxu0 %v22273_v38  ;;  %16180 = vmatpush1.bf16.msra.mxu1 %v22276_v57  ;;  %v22355_v38 = vld [vmem:[#allocation8 + $0x808] ss:$16 sps:$4 sm:$0xff]   ;;  %v22360_v57 = vld [vmem:[#allocation8 + $0x824] ss:$16 sps:$4 sm:$0xff]  }
 0x895   : > { %15853 = vmatprep.subr.bf16.mxu0 %v22281_v58  ;;  %16181 = vmatprep.subr.bf16.mxu1 %v22284_v59  ;;  %v22363_v58 = vld [vmem:[#allocation8 + $0x82c] ss:$16 sps:$4 sm:$0xff]   ;;  %v12621_v59 = vpack.c.bf16 %v12577_v54, %v12577_v54  ;;  %v22433_v54 = vld [vmem:[#allocation8 + $0x9a8] ss:$16 sps:$4 sm:$0xff]  }
 0x898   : > { %15854 = vmatpush1.bf16.msra.mxu0 %v22279_v62  ;;  %16182 = vmatpush1.bf16.msra.mxu1 %v22282_v0  ;;  %v22358_v62 = vld [vmem:[#allocation8 + $0x820] ss:$16 sps:$4 sm:$0xff]   ;;  %v22361_v0 = vld [vmem:[#allocation8 + $0x828] ss:$16 sps:$4 sm:$0xff]  }
 0x899   : > { %15855 = vmatprep.subr.bf16.mxu0 %v22287_v1  ;;  %16183 = vmatprep.subr.bf16.mxu1 %v22290_v51  ;;  %v22366_v1 = vld [vmem:[#allocation8 + $0x844] ss:$16 sps:$4 sm:$0xff]   ;;  %v22369_v51 = vld [vmem:[#allocation8 + $0x84c] ss:$16 sps:$4 sm:$0xff]  }
 0x89c   : > { %15856 = vmatpush1.bf16.msra.mxu0 %v22285_v35  ;;  %16184 = vmatpush1.bf16.msra.mxu1 %v22288_v2  ;;  %v22367_v35 = vld [vmem:[#allocation8 + $0x848] ss:$16 sps:$4 sm:$0xff]   ;;  %v22372_v2 = vld [vmem:[#allocation8 + $0x864] ss:$16 sps:$4 sm:$0xff]  }
 0x89d   : > { %15857 = vmatprep.subr.bf16.mxu0 %v22293_v3  ;;  %16185 = vmatprep.subr.bf16.mxu1 %v22296_v48  ;;  %v22375_v3 = vld [vmem:[#allocation8 + $0x86c] ss:$16 sps:$4 sm:$0xff]   ;;  %v22370_v48 = vld [vmem:[#allocation8 + $0x860] ss:$16 sps:$4 sm:$0xff]  }
 0x8a0   : > { %15858 = vmatpush1.bf16.msra.mxu0 %v22291_v4  ;;  %16186 = vmatpush1.bf16.msra.mxu1 %v22294_v5  ;;  %v22373_v4 = vld [vmem:[#allocation8 + $0x868] ss:$16 sps:$4 sm:$0xff]   ;;  %v22378_v5 = vld [vmem:[#allocation8 + $0x884] ss:$16 sps:$4 sm:$0xff]  }
 0x8a1   : > { %15859 = vmatprep.subr.bf16.mxu0 %v22299_v46  ;;  %16187 = vmatprep.subr.bf16.mxu1 %v22302_v9  ;;  %v22381_v46 = vld [vmem:[#allocation8 + $0x88c] ss:$16 sps:$4 sm:$0xff]   ;;  %v22376_v9 = vld [vmem:[#allocation8 + $0x880] ss:$16 sps:$4 sm:$0xff]  }
 0x8a4   : > { %15860 = vmatpush1.bf16.msra.mxu0 %v22297_v56  ;;  %16188 = vmatpush1.bf16.msra.mxu1 %v22300_v14  ;;  %v22379_v56 = vld [vmem:[#allocation8 + $0x888] ss:$16 sps:$4 sm:$0xff]   ;;  %v22384_v14 = vld [vmem:[#allocation8 + $0x8a4] ss:$16 sps:$4 sm:$0xff]  }
 0x8a5   : > { %15861 = vmatprep.subr.bf16.mxu0 %v22305_v63  ;;  %16189 = vmatprep.subr.bf16.mxu1 %v22308_v61  ;;  %v22387_v63 = vld [vmem:[#allocation8 + $0x8ac] ss:$16 sps:$4 sm:$0xff]   ;;  %v22382_v61 = vld [vmem:[#allocation8 + $0x8a0] ss:$16 sps:$4 sm:$0xff]  }
 0x8a8   : > { %15862 = vmatpush1.bf16.msra.mxu0 %v22303_v16  ;;  %16190 = vmatpush1.bf16.msra.mxu1 %v22306_v52  ;;  %v22385_v16 = vld [vmem:[#allocation8 + $0x8a8] ss:$16 sps:$4 sm:$0xff]   ;;  %v22390_v52 = vld [vmem:[#allocation8 + $0x8c4] ss:$16 sps:$4 sm:$0xff]  }
 0x8a9   : > { %15863 = vmatprep.subr.bf16.mxu0 %v22311_v17  ;;  %16191 = vmatprep.subr.bf16.mxu1 %v22314_v6  ;;  %v22393_v17 = vld [vmem:[#allocation8 + $0x8cc] ss:$16 sps:$4 sm:$0xff]   ;;  %v22388_v6 = vld [vmem:[#allocation8 + $0x8c0] ss:$16 sps:$4 sm:$0xff]  }
 0x8ac   : > { %15864 = vmatpush1.bf16.msra.mxu0 %v22309_v8  ;;  %16192 = vmatpush1.bf16.msra.mxu1 %v22312_v18  ;;  %v22391_v8 = vld [vmem:[#allocation8 + $0x8c8] ss:$16 sps:$4 sm:$0xff]   ;;  %v22396_v18 = vld [vmem:[#allocation8 + $0x8e4] ss:$16 sps:$4 sm:$0xff]  }
 0x8ad   : > { %15865 = vmatprep.subr.bf16.mxu0 %v22317_v23  ;;  %16193 = vmatprep.subr.bf16.mxu1 %v22320_v24  ;;  %v22399_v23 = vld [vmem:[#allocation8 + $0x8ec] ss:$16 sps:$4 sm:$0xff]   ;;  %v22394_v24 = vld [vmem:[#allocation8 + $0x8e0] ss:$16 sps:$4 sm:$0xff]  }
 0x8b0   : > { %15866 = vmatpush1.bf16.msra.mxu0 %v22315_v60  ;;  %16194 = vmatpush1.bf16.msra.mxu1 %v22318_v27  ;;  %v22397_v60 = vld [vmem:[#allocation8 + $0x8e8] ss:$16 sps:$4 sm:$0xff]   ;;  %v22402_v27 = vld [vmem:[#allocation8 + $0x904] ss:$16 sps:$4 sm:$0xff]  }
 0x8b1   : > { %15867 = vmatprep.subr.bf16.mxu0 %v22323_v12  ;;  %16195 = vmatprep.subr.bf16.mxu1 %v22326_v28  ;;  %v22405_v12 = vld [vmem:[#allocation8 + $0x90c] ss:$16 sps:$4 sm:$0xff]   ;;  %v22400_v28 = vld [vmem:[#allocation8 + $0x900] ss:$16 sps:$4 sm:$0xff]  }
 0x8b4   : > { %15868 = vmatpush1.bf16.msra.mxu0 %v22321_v10  ;;  %16196 = vmatpush1.bf16.msra.mxu1 %v22324_v19  ;;  %v22403_v10 = vld [vmem:[#allocation8 + $0x908] ss:$16 sps:$4 sm:$0xff]   ;;  %v22408_v19 = vld [vmem:[#allocation8 + $0x924] ss:$16 sps:$4 sm:$0xff]  }
 0x8b5   : > { %15869 = vmatprep.subr.bf16.mxu0 %v22329_v7  ;;  %16197 = vmatprep.subr.bf16.mxu1 %v22332_v36  ;;  %v22411_v7 = vld [vmem:[#allocation8 + $0x92c] ss:$16 sps:$4 sm:$0xff]   ;;  %v22406_v36 = vld [vmem:[#allocation8 + $0x920] ss:$16 sps:$4 sm:$0xff]  }
 0x8b8   : > { %15870 = vmatpush1.bf16.msra.mxu0 %v22327_v11  ;;  %16198 = vmatpush1.bf16.msra.mxu1 %v22330_v37  ;;  %v22409_v11 = vld [vmem:[#allocation8 + $0x928] ss:$16 sps:$4 sm:$0xff]   ;;  %v22414_v37 = vld [vmem:[#allocation8 + $0x944] ss:$16 sps:$4 sm:$0xff]  }
 0x8b9   : > { %15871 = vmatprep.subr.bf16.mxu0 %v22335_v13  ;;  %16199 = vmatprep.subr.bf16.mxu1 %v22338_v39  ;;  %v22417_v13 = vld [vmem:[#allocation8 + $0x94c] ss:$16 sps:$4 sm:$0xff]   ;;  %v22412_v39 = vld [vmem:[#allocation8 + $0x940] ss:$16 sps:$4 sm:$0xff]  }
 0x8bc   : > { %15872 = vmatpush1.bf16.msra.mxu0 %v22333_v26  ;;  %16200 = vmatpush1.bf16.msra.mxu1 %v22336_v40  ;;  %v22415_v26 = vld [vmem:[#allocation8 + $0x948] ss:$16 sps:$4 sm:$0xff]   ;;  %v22420_v40 = vld [vmem:[#allocation8 + $0x964] ss:$16 sps:$4 sm:$0xff]  }
 0x8bd   : > { %15873 = vmatprep.subr.bf16.mxu0 %v22341_v29  ;;  %16201 = vmatprep.subr.bf16.mxu1 %v22344_v21  ;;  %v22423_v29 = vld [vmem:[#allocation8 + $0x96c] ss:$16 sps:$4 sm:$0xff]   ;;  %v22418_v21 = vld [vmem:[#allocation8 + $0x960] ss:$16 sps:$4 sm:$0xff]  }
 0x8c0   : > { %15874 = vmatpush1.bf16.msra.mxu0 %v22339_v41  ;;  %16202 = vmatpush1.bf16.msra.mxu1 %v22342_v43  ;;  %v22421_v41 = vld [vmem:[#allocation8 + $0x968] ss:$16 sps:$4 sm:$0xff]   ;;  %v22426_v43 = vld [vmem:[#allocation8 + $0x984] ss:$16 sps:$4 sm:$0xff]  }
 0x8c1   : > { %15875 = vmatprep.subr.bf16.mxu0 %v22347_v44  ;;  %16203 = vmatprep.subr.bf16.mxu1 %v22350_v22  ;;  %v22429_v44 = vld [vmem:[#allocation8 + $0x98c] ss:$16 sps:$4 sm:$0xff]   ;;  %v22424_v22 = vld [vmem:[#allocation8 + $0x980] ss:$16 sps:$4 sm:$0xff]  }
 0x8c4   : > { %15876 = vmatpush1.bf16.msra.mxu0 %v22345_v50  ;;  %16204 = vmatpush1.bf16.msra.mxu1 %v22348_v15  ;;  %v22427_v50 = vld [vmem:[#allocation8 + $0x988] ss:$16 sps:$4 sm:$0xff]   ;;  %v22432_v15 = vld [vmem:[#allocation8 + $0x9a4] ss:$16 sps:$4 sm:$0xff]  }
 0x8c5   : > { %15886 = vmatprep.subr.bf16.mxu0 %v22354_v53  ;;  %16214 = vmatprep.subr.bf16.mxu1 %v22357_v25  ;;  %v22435_v53 = vld [vmem:[#allocation8 + $0x9ac] ss:$16 sps:$4 sm:$0xff]   ;;  %v22430_v25 = vld [vmem:[#allocation8 + $0x9a0] ss:$16 sps:$4 sm:$0xff]  }
 0x8c7   : > { %15878 = vmatmul.mubr.bf16.vlgmr.msra.gmra.mrb[0].mxu0 %v12618_v55  ;;  %16206 = vmatmul.mubr.bf16.vlgmr.msra.gmra.mrb[0].mxu1 %v12618_v55  ;;  %v22441_v55 = vld [vmem:[#allocation8 + $0x9cc] ss:$16 sps:$4 sm:$0xff]  }
 0x8c8   : > { %15887 = vmatpush1.bf16.msra.mxu0 %v22352_v34  ;;  %16215 = vmatpush1.bf16.msra.mxu1 %v22355_v38  ;;  %v22438_v34 = vld [vmem:[#allocation8 + $0x9c4] ss:$16 sps:$4 sm:$0xff]   ;;  %v12562_v38 = vcombine.high %v25279_v33, %v25279_v33 }
 0x8c9   : > { %15888 = vmatprep.subr.bf16.mxu0 %v22360_v57  ;;  %16216 = vmatprep.subr.bf16.mxu1 %v22363_v58  ;;  %v22436_v57 = vld [vmem:[#allocation8 + $0x9c0] ss:$16 sps:$4 sm:$0xff]   ;;  %v22439_v58 = vld [vmem:[#allocation8 + $0x9c8] ss:$16 sps:$4 sm:$0xff]  }
 0x8ca   : > { %15918 = vmatprep.mubr.bf16.mxu0 %v12621_v59  ;;  %16246 = vmatprep.mubr.bf16.mxu1 %v12621_v59  ;;  %v22444_v59 = vld [vmem:[#allocation8 + $0x9e4] ss:$16 sps:$4 sm:$0xff]  }
 0x8cc   : > { %15889 = vmatpush1.bf16.msra.mxu0 %v22358_v62  ;;  %16217 = vmatpush1.bf16.msra.mxu1 %v22361_v0  ;;  %v22447_v62 = vld [vmem:[#allocation8 + $0x9ec] ss:$16 sps:$4 sm:$0xff]   ;;  %v25292_v0 = vrot.slane %v12562_v38, %v25249_v45  ;;  %v22517_v38 = vld [vmem:[#allocation8 + $0xb68] ss:$16 sps:$4 sm:$0xff]  }
 0x8cd   : > { %15890 = vmatprep.subr.bf16.mxu0 %v22366_v1  ;;  %16218 = vmatprep.subr.bf16.mxu1 %v22369_v51  ;;  %v22442_v1 = vld [vmem:[#allocation8 + $0x9e0] ss:$16 sps:$4 sm:$0xff]   ;;  %v22445_v51 = vld [vmem:[#allocation8 + $0x9e8] ss:$16 sps:$4 sm:$0xff]  }
 0x8ce   : > { %v12578_v33 = vcombine.high %v25292_v0, %v25292_v0 }
 0x8d0   : > { %15891 = vmatpush1.bf16.msra.mxu0 %v22364_v49  ;;  %16219 = vmatpush1.bf16.msra.mxu1 %v22367_v35  ;;  %v22450_v49 = vld [vmem:[#allocation8 + $0xa04] ss:$16 sps:$4 sm:$0xff]   ;;  %v22453_v35 = vld [vmem:[#allocation8 + $0xa0c] ss:$16 sps:$4 sm:$0xff]  }
 0x8d1   : > { %15892 = vmatprep.subr.bf16.mxu0 %v22372_v2  ;;  %16220 = vmatprep.subr.bf16.mxu1 %v22375_v3  ;;  %v12620_v2 = vpack.c.bf16 %v25283_v47, %v25283_v47  ;;  %v22448_v3 = vld [vmem:[#allocation8 + $0xa00] ss:$16 sps:$4 sm:$0xff]  }
 0x8d2   : > { %v22460_v47 = vld [vmem:[#allocation8 + $0xa40] ss:$16 sps:$4 sm:$0xff]  }
 0x8d4   : > { %15893 = vmatpush1.bf16.msra.mxu0 %v22370_v48  ;;  %16221 = vmatpush1.bf16.msra.mxu1 %v22373_v4  ;;  %v22451_v48 = vld [vmem:[#allocation8 + $0xa08] ss:$16 sps:$4 sm:$0xff]   ;;  %v22456_v4 = vld [vmem:[#allocation8 + $0xa24] ss:$16 sps:$4 sm:$0xff]  }
 0x8d5   : > { %15894 = vmatprep.subr.bf16.mxu0 %v22378_v5  ;;  %16222 = vmatprep.subr.bf16.mxu1 %v22381_v46  ;;  %v22459_v5 = vld [vmem:[#allocation8 + $0xa2c] ss:$16 sps:$4 sm:$0xff]   ;;  %v12623_v46 = vpack.c.bf16 %v12578_v33, %v12578_v33  ;;  %v22534_v33 = vld [vmem:[#allocation8 + $0xbc4] ss:$16 sps:$4 sm:$0xff]  }
 0x8d8   : > { %15895 = vmatpush1.bf16.msra.mxu0 %v22376_v9  ;;  %16223 = vmatpush1.bf16.msra.mxu1 %v22379_v56  ;;  %v22454_v9 = vld [vmem:[#allocation8 + $0xa20] ss:$16 sps:$4 sm:$0xff]   ;;  %v22457_v56 = vld [vmem:[#allocation8 + $0xa28] ss:$16 sps:$4 sm:$0xff]  }
 0x8d9   : > { %15896 = vmatprep.subr.bf16.mxu0 %v22384_v14  ;;  %16224 = vmatprep.subr.bf16.mxu1 %v22387_v63  ;;  %v22462_v14 = vld [vmem:[#allocation8 + $0xa44] ss:$16 sps:$4 sm:$0xff]   ;;  %v22465_v63 = vld [vmem:[#allocation8 + $0xa4c] ss:$16 sps:$4 sm:$0xff]  }
 0x8dc   : > { %15897 = vmatpush1.bf16.msra.mxu0 %v22382_v61  ;;  %16225 = vmatpush1.bf16.msra.mxu1 %v22385_v16  ;;  %v22463_v61 = vld [vmem:[#allocation8 + $0xa48] ss:$16 sps:$4 sm:$0xff]   ;;  %v22468_v16 = vld [vmem:[#allocation8 + $0xa64] ss:$16 sps:$4 sm:$0xff]  }
 0x8dd   : > { %15898 = vmatprep.subr.bf16.mxu0 %v22390_v52  ;;  %16226 = vmatprep.subr.bf16.mxu1 %v22393_v17  ;;  %v22471_v52 = vld [vmem:[#allocation8 + $0xa6c] ss:$16 sps:$4 sm:$0xff]   ;;  %v22466_v17 = vld [vmem:[#allocation8 + $0xa60] ss:$16 sps:$4 sm:$0xff]  }
 0x8e0   : > { %15899 = vmatpush1.bf16.msra.mxu0 %v22388_v6  ;;  %16227 = vmatpush1.bf16.msra.mxu1 %v22391_v8  ;;  %v22469_v6 = vld [vmem:[#allocation8 + $0xa68] ss:$16 sps:$4 sm:$0xff]   ;;  %v22474_v8 = vld [vmem:[#allocation8 + $0xa84] ss:$16 sps:$4 sm:$0xff]  }
 0x8e1   : > { %15900 = vmatprep.subr.bf16.mxu0 %v22396_v18  ;;  %16228 = vmatprep.subr.bf16.mxu1 %v22399_v23  ;;  %v22477_v18 = vld [vmem:[#allocation8 + $0xa8c] ss:$16 sps:$4 sm:$0xff]   ;;  %v22472_v23 = vld [vmem:[#allocation8 + $0xa80] ss:$16 sps:$4 sm:$0xff]  }
 0x8e4   : > { %15901 = vmatpush1.bf16.msra.mxu0 %v22394_v24  ;;  %16229 = vmatpush1.bf16.msra.mxu1 %v22397_v60  ;;  %v22475_v24 = vld [vmem:[#allocation8 + $0xa88] ss:$16 sps:$4 sm:$0xff]   ;;  %v22480_v60 = vld [vmem:[#allocation8 + $0xaa4] ss:$16 sps:$4 sm:$0xff]  }
 0x8e5   : > { %15902 = vmatprep.subr.bf16.mxu0 %v22402_v27  ;;  %16230 = vmatprep.subr.bf16.mxu1 %v22405_v12  ;;  %v22483_v27 = vld [vmem:[#allocation8 + $0xaac] ss:$16 sps:$4 sm:$0xff]   ;;  %v22478_v12 = vld [vmem:[#allocation8 + $0xaa0] ss:$16 sps:$4 sm:$0xff]  }
 0x8e8   : > { %15903 = vmatpush1.bf16.msra.mxu0 %v22400_v28  ;;  %16231 = vmatpush1.bf16.msra.mxu1 %v22403_v10  ;;  %v22481_v28 = vld [vmem:[#allocation8 + $0xaa8] ss:$16 sps:$4 sm:$0xff]   ;;  %v22486_v10 = vld [vmem:[#allocation8 + $0xac4] ss:$16 sps:$4 sm:$0xff]  }
 0x8e9   : > { %15904 = vmatprep.subr.bf16.mxu0 %v22408_v19  ;;  %16232 = vmatprep.subr.bf16.mxu1 %v22411_v7  ;;  %v22489_v19 = vld [vmem:[#allocation8 + $0xacc] ss:$16 sps:$4 sm:$0xff]   ;;  %v22484_v7 = vld [vmem:[#allocation8 + $0xac0] ss:$16 sps:$4 sm:$0xff]  }
 0x8ec   : > { %15905 = vmatpush1.bf16.msra.mxu0 %v22406_v36  ;;  %16233 = vmatpush1.bf16.msra.mxu1 %v22409_v11  ;;  %v22487_v36 = vld [vmem:[#allocation8 + $0xac8] ss:$16 sps:$4 sm:$0xff]   ;;  %v22492_v11 = vld [vmem:[#allocation8 + $0xae4] ss:$16 sps:$4 sm:$0xff]  }
 0x8ed   : > { %15906 = vmatprep.subr.bf16.mxu0 %v22414_v37  ;;  %16234 = vmatprep.subr.bf16.mxu1 %v22417_v13  ;;  %v22495_v37 = vld [vmem:[#allocation8 + $0xaec] ss:$16 sps:$4 sm:$0xff]   ;;  %v22490_v13 = vld [vmem:[#allocation8 + $0xae0] ss:$16 sps:$4 sm:$0xff]  }
 0x8f0   : > { %15907 = vmatpush1.bf16.msra.mxu0 %v22412_v39  ;;  %16235 = vmatpush1.bf16.msra.mxu1 %v22415_v26  ;;  %v22493_v39 = vld [vmem:[#allocation8 + $0xae8] ss:$16 sps:$4 sm:$0xff]   ;;  %v22498_v26 = vld [vmem:[#allocation8 + $0xb04] ss:$16 sps:$4 sm:$0xff]  }
 0x8f1   : > { %15908 = vmatprep.subr.bf16.mxu0 %v22420_v40  ;;  %16236 = vmatprep.subr.bf16.mxu1 %v22423_v29  ;;  %v22501_v40 = vld [vmem:[#allocation8 + $0xb0c] ss:$16 sps:$4 sm:$0xff]   ;;  %v22496_v29 = vld [vmem:[#allocation8 + $0xb00] ss:$16 sps:$4 sm:$0xff]  }
 0x8f4   : > { %15909 = vmatpush1.bf16.msra.mxu0 %v22418_v21  ;;  %16237 = vmatpush1.bf16.msra.mxu1 %v22421_v41  ;;  %v22499_v21 = vld [vmem:[#allocation8 + $0xb08] ss:$16 sps:$4 sm:$0xff]   ;;  %v22504_v41 = vld [vmem:[#allocation8 + $0xb24] ss:$16 sps:$4 sm:$0xff]  }
 0x8f5   : > { %15910 = vmatprep.subr.bf16.mxu0 %v22426_v43  ;;  %16238 = vmatprep.subr.bf16.mxu1 %v22429_v44  ;;  %v22507_v43 = vld [vmem:[#allocation8 + $0xb2c] ss:$16 sps:$4 sm:$0xff]   ;;  %v22502_v44 = vld [vmem:[#allocation8 + $0xb20] ss:$16 sps:$4 sm:$0xff]  }
 0x8f8   : > { %15911 = vmatpush1.bf16.msra.mxu0 %v22424_v22  ;;  %16239 = vmatpush1.bf16.msra.mxu1 %v22427_v50  ;;  %v22505_v22 = vld [vmem:[#allocation8 + $0xb28] ss:$16 sps:$4 sm:$0xff]   ;;  %v22510_v50 = vld [vmem:[#allocation8 + $0xb44] ss:$16 sps:$4 sm:$0xff]  }
 0x8f9   : > { %15912 = vmatprep.subr.bf16.mxu0 %v22432_v15  ;;  %16240 = vmatprep.subr.bf16.mxu1 %v22435_v53  ;;  %v22513_v15 = vld [vmem:[#allocation8 + $0xb4c] ss:$16 sps:$4 sm:$0xff]   ;;  %v22508_v53 = vld [vmem:[#allocation8 + $0xb40] ss:$16 sps:$4 sm:$0xff]  }
 0x8fc   : > { %15913 = vmatpush1.bf16.msra.mxu0 %v22430_v25  ;;  %16241 = vmatpush1.bf16.msra.mxu1 %v22433_v54  ;;  %v22511_v25 = vld [vmem:[#allocation8 + $0xb48] ss:$16 sps:$4 sm:$0xff]   ;;  %v22516_v54 = vld [vmem:[#allocation8 + $0xb64] ss:$16 sps:$4 sm:$0xff]  }
 0x8fd   : > { %15914 = vmatprep.subr.bf16.mxu0 %v22438_v34  ;;  %16242 = vmatprep.subr.bf16.mxu1 %v22441_v55  ;;  %v22519_v34 = vld [vmem:[#allocation8 + $0xb6c] ss:$16 sps:$4 sm:$0xff]   ;;  %v22514_v55 = vld [vmem:[#allocation8 + $0xb60] ss:$16 sps:$4 sm:$0xff]  }
 0x900   : > { %15915 = vmatpush1.bf16.msra.mxu0 %v22436_v57  ;;  %16243 = vmatpush1.bf16.msra.mxu1 %v22439_v58  ;;  %v22522_v57 = vld [vmem:[#allocation8 + $0xb84] ss:$16 sps:$4 sm:$0xff]   ;;  %v22525_v58 = vld [vmem:[#allocation8 + $0xb8c] ss:$16 sps:$4 sm:$0xff]  }
 0x901   : > { %15916 = vmatprep.subr.bf16.mxu0 %v22444_v59  ;;  %16244 = vmatprep.subr.bf16.mxu1 %v22447_v62  ;;  %v22520_v59 = vld [vmem:[#allocation8 + $0xb80] ss:$16 sps:$4 sm:$0xff]   ;;  %v22523_v62 = vld [vmem:[#allocation8 + $0xb88] ss:$16 sps:$4 sm:$0xff]  }
 0x904   : > { %15917 = vmatpush1.bf16.msra.mxu0 %v22442_v1  ;;  %16245 = vmatpush1.bf16.msra.mxu1 %v22445_v51  ;;  %v22528_v1 = vld [vmem:[#allocation8 + $0xba4] ss:$16 sps:$4 sm:$0xff]   ;;  %v22531_v51 = vld [vmem:[#allocation8 + $0xbac] ss:$16 sps:$4 sm:$0xff]  }
 0x905   : > { %15927 = vmatprep.subr.bf16.mxu0 %v22450_v49  ;;  %16255 = vmatprep.subr.bf16.mxu1 %v22453_v35  ;;  %v22526_v49 = vld [vmem:[#allocation8 + $0xba0] ss:$16 sps:$4 sm:$0xff]   ;;  %v22529_v35 = vld [vmem:[#allocation8 + $0xba8] ss:$16 sps:$4 sm:$0xff]  }
 0x907   : > { %15919 = vmatmul.mubr.bf16.vlgmr.msra.gmra.mrb[0].mxu0 %v12620_v2  ;;  %16247 = vmatmul.mubr.bf16.vlgmr.msra.gmra.mrb[0].mxu1 %v12620_v2  ;;  %v22537_v2 = vld [vmem:[#allocation8 + $0xbcc] ss:$16 sps:$4 sm:$0xff]  }
 0x908   : > { %15928 = vmatpush1.bf16.msra.mxu0 %v22448_v3  ;;  %16256 = vmatpush1.bf16.msra.mxu1 %v22451_v48  ;;  %v25298_v3 = vld [vmem:[#allocation2 + $0x18] sm:$0xff] }
 0x909   : > { %15929 = vmatprep.subr.bf16.mxu0 %v22456_v4  ;;  %16257 = vmatprep.subr.bf16.mxu1 %v22459_v5  ;;  %v22532_v48 = vld [vmem:[#allocation8 + $0xbc0] ss:$16 sps:$4 sm:$0xff]   ;;  %v22535_v4 = vld [vmem:[#allocation8 + $0xbc8] ss:$16 sps:$4 sm:$0xff]   ;;  %v22540_v5 = vld [vmem:[#allocation8 + $0xbe4] ss:$16 sps:$4 sm:$0xff]  }
 0x90a   : > { %15959 = vmatprep.mubr.bf16.mxu0 %v12623_v46  ;;  %16287 = vmatprep.mubr.bf16.mxu1 %v12623_v46  ;;  %v22543_v46 = vld [vmem:[#allocation8 + $0xbec] ss:$16 sps:$4 sm:$0xff]  }
 0x90c   : > { %15930 = vmatpush1.bf16.msra.mxu0 %v22454_v9  ;;  %16258 = vmatpush1.bf16.msra.mxu1 %v22457_v56  ;;  %v25302_v9 = vrot.slane %v25298_v3, %v25249_v45  ;;  %v22538_v56 = vld [vmem:[#allocation8 + $0xbe0] ss:$16 sps:$4 sm:$0xff]  }
 0x90d   : > { %15931 = vmatprep.subr.bf16.mxu0 %v22462_v14  ;;  %16259 = vmatprep.subr.bf16.mxu1 %v22465_v63  ;;  %v22541_v14 = vld [vmem:[#allocation8 + $0xbe8] ss:$16 sps:$4 sm:$0xff]   ;;  %v22547_v63 = vld [vmem:[#allocation8 + $0xc04] ss:$16 sps:$4 sm:$0xff]  }
 0x910   : > { %15932 = vmatpush1.bf16.msra.mxu0 %v22460_v47  ;;  %16260 = vmatpush1.bf16.msra.mxu1 %v22463_v61  ;;  %v22550_v47 = vld [vmem:[#allocation8 + $0xc0c] ss:$16 sps:$4 sm:$0xff]   ;;  %v12594_v61 = vcombine.high %v25302_v9, %v25302_v9 }
 0x911   : > { %15933 = vmatprep.subr.bf16.mxu0 %v22468_v16  ;;  %16261 = vmatprep.subr.bf16.mxu1 %v22471_v52  ;;  %v12622_v16 = vpack.c.bf16 %v25292_v0, %v25292_v0  ;;  %v22545_v52 = vld [vmem:[#allocation8 + $0xc00] ss:$16 sps:$4 sm:$0xff]  }
 0x912   : > { %v22557_v0 = vld [vmem:[#allocation8 + $0xc40] ss:$16 sps:$4 sm:$0xff]  }
 0x914   : > { %15934 = vmatpush1.bf16.msra.mxu0 %v22466_v17  ;;  %16262 = vmatpush1.bf16.msra.mxu1 %v22469_v6  ;;  %v22548_v17 = vld [vmem:[#allocation8 + $0xc08] ss:$16 sps:$4 sm:$0xff]   ;;  %v22553_v6 = vld [vmem:[#allocation8 + $0xc24] ss:$16 sps:$4 sm:$0xff]  }
 0x915   : > { %15935 = vmatprep.subr.bf16.mxu0 %v22474_v8  ;;  %16263 = vmatprep.subr.bf16.mxu1 %v22477_v18  ;;  %v22556_v8 = vld [vmem:[#allocation8 + $0xc2c] ss:$16 sps:$4 sm:$0xff]   ;;  %v12625_v18 = vpack.c.bf16 %v12594_v61, %v12594_v61  ;;  %v22626_v61 = vld [vmem:[#allocation8 + $0xda8] ss:$16 sps:$4 sm:$0xff]  }
 0x918   : > { %15936 = vmatpush1.bf16.msra.mxu0 %v22472_v23  ;;  %16264 = vmatpush1.bf16.msra.mxu1 %v22475_v24  ;;  %v22551_v23 = vld [vmem:[#allocation8 + $0xc20] ss:$16 sps:$4 sm:$0xff]   ;;  %v22554_v24 = vld [vmem:[#allocation8 + $0xc28] ss:$16 sps:$4 sm:$0xff]  }
 0x919   : > { %15937 = vmatprep.subr.bf16.mxu0 %v22480_v60  ;;  %16265 = vmatprep.subr.bf16.mxu1 %v22483_v27  ;;  %v22559_v60 = vld [vmem:[#allocation8 + $0xc44] ss:$16 sps:$4 sm:$0xff]   ;;  %v22562_v27 = vld [vmem:[#allocation8 + $0xc4c] ss:$16 sps:$4 sm:$0xff]  }
 0x91c   : > { %15938 = vmatpush1.bf16.msra.mxu0 %v22478_v12  ;;  %16266 = vmatpush1.bf16.msra.mxu1 %v22481_v28  ;;  %v22560_v12 = vld [vmem:[#allocation8 + $0xc48] ss:$16 sps:$4 sm:$0xff]   ;;  %v22565_v28 = vld [vmem:[#allocation8 + $0xc64] ss:$16 sps:$4 sm:$0xff]  }
 0x91d   : > { %15939 = vmatprep.subr.bf16.mxu0 %v22486_v10  ;;  %16267 = vmatprep.subr.bf16.mxu1 %v22489_v19  ;;  %v22568_v10 = vld [vmem:[#allocation8 + $0xc6c] ss:$16 sps:$4 sm:$0xff]   ;;  %v22563_v19 = vld [vmem:[#allocation8 + $0xc60] ss:$16 sps:$4 sm:$0xff]  }
 0x920   : > { %15940 = vmatpush1.bf16.msra.mxu0 %v22484_v7  ;;  %16268 = vmatpush1.bf16.msra.mxu1 %v22487_v36  ;;  %v22566_v7 = vld [vmem:[#allocation8 + $0xc68] ss:$16 sps:$4 sm:$0xff]   ;;  %v22571_v36 = vld [vmem:[#allocation8 + $0xc84] ss:$16 sps:$4 sm:$0xff]  }
 0x921   : > { %15941 = vmatprep.subr.bf16.mxu0 %v22492_v11  ;;  %16269 = vmatprep.subr.bf16.mxu1 %v22495_v37  ;;  %v22574_v11 = vld [vmem:[#allocation8 + $0xc8c] ss:$16 sps:$4 sm:$0xff]   ;;  %v22569_v37 = vld [vmem:[#allocation8 + $0xc80] ss:$16 sps:$4 sm:$0xff]  }
 0x924   : > { %15942 = vmatpush1.bf16.msra.mxu0 %v22490_v13  ;;  %16270 = vmatpush1.bf16.msra.mxu1 %v22493_v39  ;;  %v22572_v13 = vld [vmem:[#allocation8 + $0xc88] ss:$16 sps:$4 sm:$0xff]   ;;  %v22577_v39 = vld [vmem:[#allocation8 + $0xca4] ss:$16 sps:$4 sm:$0xff]  }
 0x925   : > { %15943 = vmatprep.subr.bf16.mxu0 %v22498_v26  ;;  %16271 = vmatprep.subr.bf16.mxu1 %v22501_v40  ;;  %v22580_v26 = vld [vmem:[#allocation8 + $0xcac] ss:$16 sps:$4 sm:$0xff]   ;;  %v22575_v40 = vld [vmem:[#allocation8 + $0xca0] ss:$16 sps:$4 sm:$0xff]  }
 0x928   : > { %15944 = vmatpush1.bf16.msra.mxu0 %v22496_v29  ;;  %16272 = vmatpush1.bf16.msra.mxu1 %v22499_v21  ;;  %v22578_v29 = vld [vmem:[#allocation8 + $0xca8] ss:$16 sps:$4 sm:$0xff]   ;;  %v22583_v21 = vld [vmem:[#allocation8 + $0xcc4] ss:$16 sps:$4 sm:$0xff]  }
 0x929   : > { %15945 = vmatprep.subr.bf16.mxu0 %v22504_v41  ;;  %16273 = vmatprep.subr.bf16.mxu1 %v22507_v43  ;;  %v22586_v41 = vld [vmem:[#allocation8 + $0xccc] ss:$16 sps:$4 sm:$0xff]   ;;  %v22581_v43 = vld [vmem:[#allocation8 + $0xcc0] ss:$16 sps:$4 sm:$0xff]  }
 0x92c   : > { %15946 = vmatpush1.bf16.msra.mxu0 %v22502_v44  ;;  %16274 = vmatpush1.bf16.msra.mxu1 %v22505_v22  ;;  %v22584_v44 = vld [vmem:[#allocation8 + $0xcc8] ss:$16 sps:$4 sm:$0xff]   ;;  %v22589_v22 = vld [vmem:[#allocation8 + $0xce4] ss:$16 sps:$4 sm:$0xff]  }
 0x92d   : > { %15947 = vmatprep.subr.bf16.mxu0 %v22510_v50  ;;  %16275 = vmatprep.subr.bf16.mxu1 %v22513_v15  ;;  %v22592_v50 = vld [vmem:[#allocation8 + $0xcec] ss:$16 sps:$4 sm:$0xff]   ;;  %v22587_v15 = vld [vmem:[#allocation8 + $0xce0] ss:$16 sps:$4 sm:$0xff]  }
 0x930   : > { %15948 = vmatpush1.bf16.msra.mxu0 %v22508_v53  ;;  %16276 = vmatpush1.bf16.msra.mxu1 %v22511_v25  ;;  %v22590_v53 = vld [vmem:[#allocation8 + $0xce8] ss:$16 sps:$4 sm:$0xff]   ;;  %v22595_v25 = vld [vmem:[#allocation8 + $0xd04] ss:$16 sps:$4 sm:$0xff]  }
 0x931   : > { %15949 = vmatprep.subr.bf16.mxu0 %v22516_v54  ;;  %16277 = vmatprep.subr.bf16.mxu1 %v22519_v34  ;;  %v22598_v54 = vld [vmem:[#allocation8 + $0xd0c] ss:$16 sps:$4 sm:$0xff]   ;;  %v22593_v34 = vld [vmem:[#allocation8 + $0xd00] ss:$16 sps:$4 sm:$0xff]  }
 0x934   : > { %15950 = vmatpush1.bf16.msra.mxu0 %v22514_v55  ;;  %16278 = vmatpush1.bf16.msra.mxu1 %v22517_v38  ;;  %v22596_v55 = vld [vmem:[#allocation8 + $0xd08] ss:$16 sps:$4 sm:$0xff]   ;;  %v22601_v38 = vld [vmem:[#allocation8 + $0xd24] ss:$16 sps:$4 sm:$0xff]  }
 0x935   : > { %15951 = vmatprep.subr.bf16.mxu0 %v22522_v57  ;;  %16279 = vmatprep.subr.bf16.mxu1 %v22525_v58  ;;  %v22604_v57 = vld [vmem:[#allocation8 + $0xd2c] ss:$16 sps:$4 sm:$0xff]   ;;  %v22599_v58 = vld [vmem:[#allocation8 + $0xd20] ss:$16 sps:$4 sm:$0xff]  }
 0x938   : > { %15952 = vmatpush1.bf16.msra.mxu0 %v22520_v59  ;;  %16280 = vmatpush1.bf16.msra.mxu1 %v22523_v62  ;;  %v22602_v59 = vld [vmem:[#allocation8 + $0xd28] ss:$16 sps:$4 sm:$0xff]   ;;  %v22607_v62 = vld [vmem:[#allocation8 + $0xd44] ss:$16 sps:$4 sm:$0xff]  }
 0x939   : > { %15953 = vmatprep.subr.bf16.mxu0 %v22528_v1  ;;  %16281 = vmatprep.subr.bf16.mxu1 %v22531_v51  ;;  %v22610_v1 = vld [vmem:[#allocation8 + $0xd4c] ss:$16 sps:$4 sm:$0xff]   ;;  %v22605_v51 = vld [vmem:[#allocation8 + $0xd40] ss:$16 sps:$4 sm:$0xff]  }
 0x93c   : > { %15954 = vmatpush1.bf16.msra.mxu0 %v22526_v49  ;;  %16282 = vmatpush1.bf16.msra.mxu1 %v22529_v35  ;;  %v22608_v49 = vld [vmem:[#allocation8 + $0xd48] ss:$16 sps:$4 sm:$0xff]   ;;  %v22613_v35 = vld [vmem:[#allocation8 + $0xd64] ss:$16 sps:$4 sm:$0xff]  }
 0x93d   : > { %15955 = vmatprep.subr.bf16.mxu0 %v22534_v33  ;;  %16283 = vmatprep.subr.bf16.mxu1 %v22537_v2  ;;  %v22616_v33 = vld [vmem:[#allocation8 + $0xd6c] ss:$16 sps:$4 sm:$0xff]   ;;  %v22611_v2 = vld [vmem:[#allocation8 + $0xd60] ss:$16 sps:$4 sm:$0xff]  }
 0x940   : > { %15956 = vmatpush1.bf16.msra.mxu0 %v22532_v48  ;;  %16284 = vmatpush1.bf16.msra.mxu1 %v22535_v4  ;;  %v22614_v48 = vld [vmem:[#allocation8 + $0xd68] ss:$16 sps:$4 sm:$0xff]   ;;  %v22619_v4 = vld [vmem:[#allocation8 + $0xd84] ss:$16 sps:$4 sm:$0xff]  }
 0x941   : > { %15957 = vmatprep.subr.bf16.mxu0 %v22540_v5  ;;  %16285 = vmatprep.subr.bf16.mxu1 %v22543_v46  ;;  %v22622_v5 = vld [vmem:[#allocation8 + $0xd8c] ss:$16 sps:$4 sm:$0xff]   ;;  %v22617_v46 = vld [vmem:[#allocation8 + $0xd80] ss:$16 sps:$4 sm:$0xff]  }
 0x944   : > { %15958 = vmatpush1.bf16.msra.mxu0 %v22538_v56  ;;  %16286 = vmatpush1.bf16.msra.mxu1 %v22541_v14  ;;  %v22620_v56 = vld [vmem:[#allocation8 + $0xd88] ss:$16 sps:$4 sm:$0xff]   ;;  %v22625_v14 = vld [vmem:[#allocation8 + $0xda4] ss:$16 sps:$4 sm:$0xff]  }
 0x945   : > { %15968 = vmatprep.subr.bf16.mxu0 %v22547_v63  ;;  %16296 = vmatprep.subr.bf16.mxu1 %v22550_v47  ;;  %v22628_v63 = vld [vmem:[#allocation8 + $0xdac] ss:$16 sps:$4 sm:$0xff]   ;;  %v22623_v47 = vld [vmem:[#allocation8 + $0xda0] ss:$16 sps:$4 sm:$0xff]  }
 0x947   : > { %15960 = vmatmul.mubr.bf16.vlgmr.msra.gmra.mrb[0].mxu0 %v12622_v16  ;;  %16288 = vmatmul.mubr.bf16.vlgmr.msra.gmra.mrb[0].mxu1 %v12622_v16  ;;  %v22631_v16 = vld [vmem:[#allocation8 + $0xdc4] ss:$16 sps:$4 sm:$0xff]  }
 0x948   : > { %15969 = vmatpush1.bf16.msra.mxu0 %v22545_v52  ;;  %16297 = vmatpush1.bf16.msra.mxu1 %v22548_v17  ;;  %v22634_v52 = vld [vmem:[#allocation8 + $0xdcc] ss:$16 sps:$4 sm:$0xff]   ;;  %v12579_v17 = vcombine.high %v25298_v3, %v25298_v3 }
 0x949   : > { %15970 = vmatprep.subr.bf16.mxu0 %v22553_v6  ;;  %16298 = vmatprep.subr.bf16.mxu1 %v22556_v8  ;;  %v22629_v6 = vld [vmem:[#allocation8 + $0xdc0] ss:$16 sps:$4 sm:$0xff]   ;;  %v22632_v8 = vld [vmem:[#allocation8 + $0xdc8] ss:$16 sps:$4 sm:$0xff]  }
 0x94a   : > { %16000 = vmatprep.mubr.bf16.mxu0 %v12625_v18  ;;  %16328 = vmatprep.mubr.bf16.mxu1 %v12625_v18  ;;  %v22637_v18 = vld [vmem:[#allocation8 + $0xde4] ss:$16 sps:$4 sm:$0xff]  }
 0x94c   : > { %15971 = vmatpush1.bf16.msra.mxu0 %v22551_v23  ;;  %16299 = vmatpush1.bf16.msra.mxu1 %v22554_v24  ;;  %v22640_v23 = vld [vmem:[#allocation8 + $0xdec] ss:$16 sps:$4 sm:$0xff]   ;;  %v25311_v24 = vrot.slane %v12579_v17, %v25249_v45  ;;  %v22649_v45 = vld [vmem:[#allocation8 + $0xe24] ss:$16 sps:$4 sm:$0xff]  }
 0x94d   : > { %15972 = vmatprep.subr.bf16.mxu0 %v22559_v60  ;;  %16300 = vmatprep.subr.bf16.mxu1 %v22562_v27  ;;  %v22635_v60 = vld [vmem:[#allocation8 + $0xde0] ss:$16 sps:$4 sm:$0xff]   ;;  %v22638_v27 = vld [vmem:[#allocation8 + $0xde8] ss:$16 sps:$4 sm:$0xff]   ;;  %v22715_v17 = vld [vmem:[#allocation8 + $0xf84] ss:$16 sps:$4 sm:$0xff]  }
 0x94e   : > { %v12595_v3 = vcombine.high %v25311_v24, %v25311_v24 }
 0x950   : > { %15973 = vmatpush1.bf16.msra.mxu0 %v22557_v0  ;;  %16301 = vmatpush1.bf16.msra.mxu1 %v22560_v12  ;;  %v22643_v0 = vld [vmem:[#allocation8 + $0xe04] ss:$16 sps:$4 sm:$0xff]   ;;  %v22646_v12 = vld [vmem:[#allocation8 + $0xe0c] ss:$16 sps:$4 sm:$0xff]  }
 0x951   : > { %15974 = vmatprep.subr.bf16.mxu0 %v22565_v28  ;;  %16302 = vmatprep.subr.bf16.mxu1 %v22568_v10  ;;  %v12624_v28 = vpack.c.bf16 %v25302_v9, %v25302_v9  ;;  %v22641_v10 = vld [vmem:[#allocation8 + $0xe00] ss:$16 sps:$4 sm:$0xff]  }
 0x952   : > { %v22653_v9 = vld [vmem:[#allocation8 + $0xe40] ss:$16 sps:$4 sm:$0xff]  }
 0x954   : > { %15975 = vmatpush1.bf16.msra.mxu0 %v22563_v19  ;;  %16303 = vmatpush1.bf16.msra.mxu1 %v22566_v7  ;;  %v22644_v19 = vld [vmem:[#allocation8 + $0xe08] ss:$16 sps:$4 sm:$0xff]   ;;  %v22652_v7 = vld [vmem:[#allocation8 + $0xe2c] ss:$16 sps:$4 sm:$0xff]  }
 0x955   : > { %15976 = vmatprep.subr.bf16.mxu0 %v22571_v36  ;;  %16304 = vmatprep.subr.bf16.mxu1 %v22574_v11  ;;  %v12627_v36 = vpack.c.bf16 %v12595_v3, %v12595_v3  ;;  %v22647_v11 = vld [vmem:[#allocation8 + $0xe20] ss:$16 sps:$4 sm:$0xff]   ;;  %v22730_v3 = vld [vmem:[#allocation8 + $0xfcc] ss:$16 sps:$4 sm:$0xff]  }
 0x958   : > { %15977 = vmatpush1.bf16.msra.mxu0 %v22569_v37  ;;  %16305 = vmatpush1.bf16.msra.mxu1 %v22572_v13  ;;  %v22650_v37 = vld [vmem:[#allocation8 + $0xe28] ss:$16 sps:$4 sm:$0xff]   ;;  %v22655_v13 = vld [vmem:[#allocation8 + $0xe44] ss:$16 sps:$4 sm:$0xff]  }
 0x959   : > { %15978 = vmatprep.subr.bf16.mxu0 %v22577_v39  ;;  %16306 = vmatprep.subr.bf16.mxu1 %v22580_v26  ;;  %v22658_v39 = vld [vmem:[#allocation8 + $0xe4c] ss:$16 sps:$4 sm:$0xff]   ;;  %v22656_v26 = vld [vmem:[#allocation8 + $0xe48] ss:$16 sps:$4 sm:$0xff]  }
 0x95c   : > { %15979 = vmatpush1.bf16.msra.mxu0 %v22575_v40  ;;  %16307 = vmatpush1.bf16.msra.mxu1 %v22578_v29  ;;  %v22661_v40 = vld [vmem:[#allocation8 + $0xe64] ss:$16 sps:$4 sm:$0xff]   ;;  %v22664_v29 = vld [vmem:[#allocation8 + $0xe6c] ss:$16 sps:$4 sm:$0xff]  }
 0x95d   : > { %15980 = vmatprep.subr.bf16.mxu0 %v22583_v21  ;;  %16308 = vmatprep.subr.bf16.mxu1 %v22586_v41  ;;  %v22659_v21 = vld [vmem:[#allocation8 + $0xe60] ss:$16 sps:$4 sm:$0xff]   ;;  %v22662_v41 = vld [vmem:[#allocation8 + $0xe68] ss:$16 sps:$4 sm:$0xff]  }
 0x960   : > { %15981 = vmatpush1.bf16.msra.mxu0 %v22581_v43  ;;  %16309 = vmatpush1.bf16.msra.mxu1 %v22584_v44  ;;  %v22667_v43 = vld [vmem:[#allocation8 + $0xe84] ss:$16 sps:$4 sm:$0xff]   ;;  %v22670_v44 = vld [vmem:[#allocation8 + $0xe8c] ss:$16 sps:$4 sm:$0xff]  }
 0x961   : > { %15982 = vmatprep.subr.bf16.mxu0 %v22589_v22  ;;  %16310 = vmatprep.subr.bf16.mxu1 %v22592_v50  ;;  %v22665_v22 = vld [vmem:[#allocation8 + $0xe80] ss:$16 sps:$4 sm:$0xff]   ;;  %v22668_v50 = vld [vmem:[#allocation8 + $0xe88] ss:$16 sps:$4 sm:$0xff]  }
 0x964   : > { %15983 = vmatpush1.bf16.msra.mxu0 %v22587_v15  ;;  %16311 = vmatpush1.bf16.msra.mxu1 %v22590_v53  ;;  %v22673_v15 = vld [vmem:[#allocation8 + $0xea4] ss:$16 sps:$4 sm:$0xff]   ;;  %v22676_v53 = vld [vmem:[#allocation8 + $0xeac] ss:$16 sps:$4 sm:$0xff]  }
 0x965   : > { %15984 = vmatprep.subr.bf16.mxu0 %v22595_v25  ;;  %16312 = vmatprep.subr.bf16.mxu1 %v22598_v54  ;;  %v22671_v25 = vld [vmem:[#allocation8 + $0xea0] ss:$16 sps:$4 sm:$0xff]   ;;  %v22674_v54 = vld [vmem:[#allocation8 + $0xea8] ss:$16 sps:$4 sm:$0xff]  }
 0x968   : > { %15985 = vmatpush1.bf16.msra.mxu0 %v22593_v34  ;;  %16313 = vmatpush1.bf16.msra.mxu1 %v22596_v55  ;;  %v22679_v34 = vld [vmem:[#allocation8 + $0xec4] ss:$16 sps:$4 sm:$0xff]   ;;  %v22682_v55 = vld [vmem:[#allocation8 + $0xecc] ss:$16 sps:$4 sm:$0xff]  }
 0x969   : > { %15986 = vmatprep.subr.bf16.mxu0 %v22601_v38  ;;  %16314 = vmatprep.subr.bf16.mxu1 %v22604_v57  ;;  %v22677_v38 = vld [vmem:[#allocation8 + $0xec0] ss:$16 sps:$4 sm:$0xff]   ;;  %v22680_v57 = vld [vmem:[#allocation8 + $0xec8] ss:$16 sps:$4 sm:$0xff]  }
 0x96c   : > { %15987 = vmatpush1.bf16.msra.mxu0 %v22599_v58  ;;  %16315 = vmatpush1.bf16.msra.mxu1 %v22602_v59  ;;  %v22685_v58 = vld [vmem:[#allocation8 + $0xee4] ss:$16 sps:$4 sm:$0xff]   ;;  %v22688_v59 = vld [vmem:[#allocation8 + $0xeec] ss:$16 sps:$4 sm:$0xff]  }
 0x96d   : > { %15988 = vmatprep.subr.bf16.mxu0 %v22607_v62  ;;  %16316 = vmatprep.subr.bf16.mxu1 %v22610_v1  ;;  %v22683_v62 = vld [vmem:[#allocation8 + $0xee0] ss:$16 sps:$4 sm:$0xff]   ;;  %v22686_v1 = vld [vmem:[#allocation8 + $0xee8] ss:$16 sps:$4 sm:$0xff]  }
 0x970   : > { %15989 = vmatpush1.bf16.msra.mxu0 %v22605_v51  ;;  %16317 = vmatpush1.bf16.msra.mxu1 %v22608_v49  ;;  %v22691_v51 = vld [vmem:[#allocation8 + $0xf04] ss:$16 sps:$4 sm:$0xff]   ;;  %v22694_v49 = vld [vmem:[#allocation8 + $0xf0c] ss:$16 sps:$4 sm:$0xff]  }
 0x971   : > { %15990 = vmatprep.subr.bf16.mxu0 %v22613_v35  ;;  %16318 = vmatprep.subr.bf16.mxu1 %v22616_v33  ;;  %v22689_v35 = vld [vmem:[#allocation8 + $0xf00] ss:$16 sps:$4 sm:$0xff]   ;;  %v22692_v33 = vld [vmem:[#allocation8 + $0xf08] ss:$16 sps:$4 sm:$0xff]  }
 0x974   : > { %15991 = vmatpush1.bf16.msra.mxu0 %v22611_v2  ;;  %16319 = vmatpush1.bf16.msra.mxu1 %v22614_v48  ;;  %v22697_v2 = vld [vmem:[#allocation8 + $0xf24] ss:$16 sps:$4 sm:$0xff]   ;;  %v22700_v48 = vld [vmem:[#allocation8 + $0xf2c] ss:$16 sps:$4 sm:$0xff]  }
 0x975   : > { %15992 = vmatprep.subr.bf16.mxu0 %v22619_v4  ;;  %16320 = vmatprep.subr.bf16.mxu1 %v22622_v5  ;;  %v22695_v4 = vld [vmem:[#allocation8 + $0xf20] ss:$16 sps:$4 sm:$0xff]   ;;  %v22698_v5 = vld [vmem:[#allocation8 + $0xf28] ss:$16 sps:$4 sm:$0xff]  }
 0x978   : > { %15993 = vmatpush1.bf16.msra.mxu0 %v22617_v46  ;;  %16321 = vmatpush1.bf16.msra.mxu1 %v22620_v56  ;;  %v22703_v46 = vld [vmem:[#allocation8 + $0xf44] ss:$16 sps:$4 sm:$0xff]   ;;  %v22706_v56 = vld [vmem:[#allocation8 + $0xf4c] ss:$16 sps:$4 sm:$0xff]  }
 0x979   : > { %15994 = vmatprep.subr.bf16.mxu0 %v22625_v14  ;;  %16322 = vmatprep.subr.bf16.mxu1 %v22628_v63  ;;  %v22701_v14 = vld [vmem:[#allocation8 + $0xf40] ss:$16 sps:$4 sm:$0xff]   ;;  %v22704_v63 = vld [vmem:[#allocation8 + $0xf48] ss:$16 sps:$4 sm:$0xff]  }
 0x97c   : > { %15995 = vmatpush1.bf16.msra.mxu0 %v22623_v47  ;;  %16323 = vmatpush1.bf16.msra.mxu1 %v22626_v61  ;;  %v22709_v47 = vld [vmem:[#allocation8 + $0xf64] ss:$16 sps:$4 sm:$0xff]   ;;  %v22712_v61 = vld [vmem:[#allocation8 + $0xf6c] ss:$16 sps:$4 sm:$0xff]  }
 0x97d   : > { %15996 = vmatprep.subr.bf16.mxu0 %v22631_v16  ;;  %16324 = vmatprep.subr.bf16.mxu1 %v22634_v52  ;;  %v22707_v16 = vld [vmem:[#allocation8 + $0xf60] ss:$16 sps:$4 sm:$0xff]   ;;  %v22710_v52 = vld [vmem:[#allocation8 + $0xf68] ss:$16 sps:$4 sm:$0xff]  }
 0x980   : > { %15997 = vmatpush1.bf16.msra.mxu0 %v22629_v6  ;;  %16325 = vmatpush1.bf16.msra.mxu1 %v22632_v8  ;;  %v22718_v6 = vld [vmem:[#allocation8 + $0xf8c] ss:$16 sps:$4 sm:$0xff]   ;;  %v22713_v8 = vld [vmem:[#allocation8 + $0xf80] ss:$16 sps:$4 sm:$0xff]  }
 0x981   : > { %15998 = vmatprep.subr.bf16.mxu0 %v22637_v18  ;;  %16326 = vmatprep.subr.bf16.mxu1 %v22640_v23  ;;  %v22716_v18 = vld [vmem:[#allocation8 + $0xf88] ss:$16 sps:$4 sm:$0xff]   ;;  %v22721_v23 = vld [vmem:[#allocation8 + $0xfa4] ss:$16 sps:$4 sm:$0xff]  }
 0x984   : > { %15999 = vmatpush1.bf16.msra.mxu0 %v22635_v60  ;;  %16327 = vmatpush1.bf16.msra.mxu1 %v22638_v27  ;;  %v22724_v60 = vld [vmem:[#allocation8 + $0xfac] ss:$16 sps:$4 sm:$0xff]   ;;  %v22719_v27 = vld [vmem:[#allocation8 + $0xfa0] ss:$16 sps:$4 sm:$0xff]  }
 0x985   : > { %16009 = vmatprep.subr.bf16.mxu0 %v22643_v0  ;;  %16337 = vmatprep.subr.bf16.mxu1 %v22646_v12  ;;  %v22722_v0 = vld [vmem:[#allocation8 + $0xfa8] ss:$16 sps:$4 sm:$0xff]   ;;  %v22727_v12 = vld [vmem:[#allocation8 + $0xfc4] ss:$16 sps:$4 sm:$0xff]  }
 0x987   : > { %16001 = vmatmul.mubr.bf16.vlgmr.msra.gmra.mrb[0].mxu0 %v12624_v28  ;;  %16329 = vmatmul.mubr.bf16.vlgmr.msra.gmra.mrb[0].mxu1 %v12624_v28  ;;  %v22725_v28 = vld [vmem:[#allocation8 + $0xfc0] ss:$16 sps:$4 sm:$0xff]  }
 0x988   : > { %16010 = vmatpush1.bf16.msra.mxu0 %v22641_v10  ;;  %16338 = vmatpush1.bf16.msra.mxu1 %v22644_v19  ;;  %v22728_v10 = vld [vmem:[#allocation8 + $0xfc8] ss:$16 sps:$4 sm:$0xff]   ;;  %v22733_v19 = vld [vmem:[#allocation8 + $0xfe4] ss:$16 sps:$4 sm:$0xff]  }
 0x989   : > { %16011 = vmatprep.subr.bf16.mxu0 %v22649_v45  ;;  %16339 = vmatprep.subr.bf16.mxu1 %v22652_v7  ;;  %v22736_v45 = vld [vmem:[#allocation8 + $0xfec] ss:$16 sps:$4 sm:$0xff]   ;;  %v22731_v7 = vld [vmem:[#allocation8 + $0xfe0] ss:$16 sps:$4 sm:$0xff]  }
 0x98a   : > { %16041 = vmatprep.mubr.bf16.mxu0 %v12627_v36  ;;  %16369 = vmatprep.mubr.bf16.mxu1 %v12627_v36  ;;  %v22734_v36 = vld [vmem:[#allocation8 + $0xfe8] ss:$16 sps:$4 sm:$0xff]  }
 0x98c   : > { %16012 = vmatpush1.bf16.msra.mxu0 %v22647_v11  ;;  %16340 = vmatpush1.bf16.msra.mxu1 %v22650_v37  ;;  %v22738_v11 = vld [vmem:[%s25488_s5 + $0x40] sm:$0xff]  }
 0x98d   : > { %16013 = vmatprep.subr.bf16.mxu0 %v22655_v13  ;;  %16341 = vmatprep.subr.bf16.mxu1 %v22658_v39  ;;  %v22739_v37 = vld [vmem:[%s25488_s5 + $0xc0] sm:$0xff]   ;;  %v12626_v13 = vpack.c.bf16 %v25311_v24, %v25311_v24  ;;  %v22743_v24 = vld [vmem:[%s25488_s5 + $0xc8] sm:$0xff]  }
 0x98e   : > { %v22740_v39 = vld [vmem:[%s25488_s5] sm:$0xff]  }
 0x990   : > { %16014 = vmatpush1.bf16.msra.mxu0 %v22653_v9  ;;  %16342 = vmatpush1.bf16.msra.mxu1 %v22656_v26  ;;  %v22741_v9 = vld [vmem:[%s25488_s5 + $0x80] sm:$0xff]   ;;  %v22742_v26 = vld [vmem:[%s25488_s5 + $0x48] sm:$0xff]  }
 0x991   : > { %16015 = vmatprep.subr.bf16.mxu0 %v22661_v40  ;;  %16343 = vmatprep.subr.bf16.mxu1 %v22664_v29  ;;  %v22744_v40 = vld [vmem:[%s25488_s5 + $0x8] sm:$0xff]  }
 0x992   : > { %v22745_v29 = vld [vmem:[%s25488_s5 + $0x88] sm:$0xff]  }
 0x994   : > { %16016 = vmatpush1.bf16.msra.mxu0 %v22659_v21  ;;  %16344 = vmatpush1.bf16.msra.mxu1 %v22662_v41  ;;  %v22746_v21 = vld [vmem:[%s25488_s5 + $0x50] sm:$0xff]  }
 0x995   : > { %16017 = vmatprep.subr.bf16.mxu0 %v22667_v43  ;;  %16345 = vmatprep.subr.bf16.mxu1 %v22670_v44  ;;  %v22747_v41 = vld [vmem:[%s25488_s5 + $0xd0] sm:$0xff]  }
 0x996   : > { %v22748_v43 = vld [vmem:[%s25488_s5 + $0x10] sm:$0xff]  }
 0x997   : > { %v22749_v44 = vld [vmem:[%s25488_s5 + $0x90] sm:$0xff]  }
 0x998   : > { %16018 = vmatpush1.bf16.msra.mxu0 %v22665_v22  ;;  %16346 = vmatpush1.bf16.msra.mxu1 %v22668_v50  ;;  %v22750_v22 = vld [vmem:[%s25488_s5 + $0x58] sm:$0xff]  }
 0x999   : > { %16019 = vmatprep.subr.bf16.mxu0 %v22673_v15  ;;  %16347 = vmatprep.subr.bf16.mxu1 %v22676_v53  ;;  %v22751_v50 = vld [vmem:[%s25488_s5 + $0xd8] sm:$0xff]  }
 0x99a   : > { %v22752_v15 = vld [vmem:[%s25488_s5 + $0x18] sm:$0xff]  }
 0x99b   : > { %v22753_v53 = vld [vmem:[%s25488_s5 + $0x98] sm:$0xff]  }
 0x99c   : > { %16020 = vmatpush1.bf16.msra.mxu0 %v22671_v25  ;;  %16348 = vmatpush1.bf16.msra.mxu1 %v22674_v54  ;;  %v22754_v25 = vld [vmem:[%s25488_s5 + $0x60] sm:$0xff]  }
 0x99d   : > { %16021 = vmatprep.subr.bf16.mxu0 %v22679_v34  ;;  %16349 = vmatprep.subr.bf16.mxu1 %v22682_v55  ;;  %v22755_v54 = vld [vmem:[%s25488_s5 + $0xe0] sm:$0xff]  }
 0x99e   : > { %v22756_v34 = vld [vmem:[%s25488_s5 + $0x20] sm:$0xff]  }
 0x99f   : > { %v22757_v55 = vld [vmem:[%s25488_s5 + $0xa0] sm:$0xff]  }
 0x9a0   : > { %16022 = vmatpush1.bf16.msra.mxu0 %v22677_v38  ;;  %16350 = vmatpush1.bf16.msra.mxu1 %v22680_v57  ;;  %v22758_v38 = vld [vmem:[%s25488_s5 + $0x68] sm:$0xff]  }
 0x9a1   : > { %16023 = vmatprep.subr.bf16.mxu0 %v22685_v58  ;;  %16351 = vmatprep.subr.bf16.mxu1 %v22688_v59  ;;  %v22759_v57 = vld [vmem:[%s25488_s5 + $0xe8] sm:$0xff]  }
 0x9a2   : > { %v22760_v58 = vld [vmem:[%s25488_s5 + $0x28] sm:$0xff]  }
 0x9a3   : > { %v22761_v59 = vld [vmem:[%s25488_s5 + $0xa8] sm:$0xff]  }
 0x9a4   : > { %16024 = vmatpush1.bf16.msra.mxu0 %v22683_v62  ;;  %16352 = vmatpush1.bf16.msra.mxu1 %v22686_v1  ;;  %v22762_v62 = vld [vmem:[%s25488_s5 + $0x70] sm:$0xff]  }
 0x9a5   : > { %16025 = vmatprep.subr.bf16.mxu0 %v22691_v51  ;;  %16353 = vmatprep.subr.bf16.mxu1 %v22694_v49  ;;  %v22763_v1 = vld [vmem:[%s25488_s5 + $0xf0] sm:$0xff]  }
 0x9a6   : > { %v22764_v51 = vld [vmem:[%s25488_s5 + $0x30] sm:$0xff]  }
 0x9a7   : > { %v22765_v49 = vld [vmem:[%s25488_s5 + $0xb0] sm:$0xff]  }
 0x9a8   : > { %16026 = vmatpush1.bf16.msra.mxu0 %v22689_v35  ;;  %16354 = vmatpush1.bf16.msra.mxu1 %v22692_v33  ;;  %v22766_v35 = vld [vmem:[%s25488_s5 + $0x78] sm:$0xff]  }
 0x9a9   : > { %16027 = vmatprep.subr.bf16.mxu0 %v22697_v2  ;;  %16355 = vmatprep.subr.bf16.mxu1 %v22700_v48  ;;  %v22767_v33 = vld [vmem:[%s25488_s5 + $0xf8] sm:$0xff]  }
 0x9aa   : > { %v22768_v2 = vld [vmem:[%s25488_s5 + $0x38] sm:$0xff]  }
 0x9ab   : > { %v22769_v48 = vld [vmem:[%s25488_s5 + $0xb8] sm:$0xff]  }
 0x9ac   : > { %16028 = vmatpush1.bf16.msra.mxu0 %v22695_v4  ;;  %16356 = vmatpush1.bf16.msra.mxu1 %v22698_v5  ;;  %v23037_v4 = vmov 0.0|0.0   ;;  %v13140_v5 = vld [vmem:[#allocation9] sm:$0xf] }
 0x9ad   : > { %16029 = vmatprep.subr.bf16.mxu0 %v22703_v46  ;;  %16357 = vmatprep.subr.bf16.mxu1 %v22706_v56  ;;  %v13145_v46 = vrot.slane %v13140_v5, %v2043_v30  ;;  %v13153_v56 = vrot.slane %v13140_v5, %v2051_v20 }
 0x9b0   : > { %16030 = vmatpush1.bf16.msra.mxu0 %v22701_v14  ;;  %16358 = vmatpush1.bf16.msra.mxu1 %v22704_v63  ;;  %v13149_v14 = vrot.slane %v13140_v5, %v2047_v31  ;;  %v13157_v63 = vrot.slane %v13140_v5, %v2055_v32  ;;  %v16730_v31 = vld [vmem:[%s25490_s7] sm:$0xff] }
 0x9b1   : > { %16031 = vmatprep.subr.bf16.mxu0 %v22709_v47  ;;  %16359 = vmatprep.subr.bf16.mxu1 %v22712_v61 }
 0x9b4   : > { %16032 = vmatpush1.bf16.msra.mxu0 %v22707_v16  ;;  %16360 = vmatpush1.bf16.msra.mxu1 %v22710_v52 }
 0x9b5   : > { %16033 = vmatprep.subr.bf16.mxu0 %v22715_v17  ;;  %16361 = vmatprep.subr.bf16.mxu1 %v22718_v6 }
 0x9b8   : > { %16034 = vmatpush1.bf16.msra.mxu0 %v22713_v8  ;;  %16362 = vmatpush1.bf16.msra.mxu1 %v22716_v18 }
 0x9b9   : > { %16035 = vmatprep.subr.bf16.mxu0 %v22721_v23  ;;  %16363 = vmatprep.subr.bf16.mxu1 %v22724_v60 }
 0x9bc   : > { %16036 = vmatpush1.bf16.msra.mxu0 %v22719_v27  ;;  %16364 = vmatpush1.bf16.msra.mxu1 %v22722_v0 }
 0x9bd   : > { %16037 = vmatprep.subr.bf16.mxu0 %v22727_v12  ;;  %16365 = vmatprep.subr.bf16.mxu1 %v22730_v3 }
 0x9c0   : > { %16038 = vmatpush1.bf16.msra.mxu0 %v22725_v28  ;;  %16366 = vmatpush1.bf16.msra.mxu1 %v22728_v10  ;;  %v19189_v10 = vpack.c.bf16 %v16731_v42, %v16730_v31 }
 0x9c1   : > { %16039 = vmatprep.subr.bf16.mxu0 %v22733_v19  ;;  %16367 = vmatprep.subr.bf16.mxu1 %v22736_v45 }
 0x9c4   : > { %16040 = vmatpush1.bf16.msra.mxu0 %v22731_v7  ;;  %16368 = vmatpush1.bf16.msra.mxu1 %v22734_v36  ;;  %v16732_v7 = vld [vmem:[%s25490_s7 + $0x10] sm:$0xff]  ;;  %v16733_v36 = vld [vmem:[%s25490_s7 + $0x18] sm:$0xff] }
 0x9c5   : > { %19116 = vmatprep.subr.bf16.mxu0 %v22738_v11  ;;  %19138 = vmatprep.subr.bf16.mxu1 %v22739_v37  ;;  %v19192_v11 = vpack.c.bf16 %v16733_v36, %v16732_v7  ;;  %v16734_v37 = vld [vmem:[%s25490_s7 + $0x20] sm:$0xff] }
 0x9c7   : > { %16042 = vmatmul.mubr.bf16.vlgmr.msra.gmra.mrb[0].mxu0 %v12626_v13  ;;  %16370 = vmatmul.mubr.bf16.vlgmr.msra.gmra.mrb[0].mxu1 %v12626_v13  ;;  %v16735_v13 = vld [vmem:[%s25490_s7 + $0x28] sm:$0xff] }
 0x9c8   : > { %19117 = vmatpush3.bf16.msra.mxu0 %v22740_v39  ;;  %19139 = vmatpush3.bf16.msra.mxu1 %v22741_v9  ;;  %v19195_v39 = vpack.c.bf16 %v16735_v13, %v16734_v37  ;;  %v16736_v9 = vld [vmem:[%s25490_s7 + $0x30] sm:$0xff] }
 0x9c9   : > { %19118 = vmatprep.subr.bf16.mxu0 %v22742_v26  ;;  %19140 = vmatprep.subr.bf16.mxu1 %v22743_v24  ;;  %v16737_v26 = vld [vmem:[%s25490_s7 + $0x38] sm:$0xff] }
 0x9ca   : > { %v19198_v24 = vpack.c.bf16 %v16737_v26, %v16736_v9 }
 0x9cc   : > { %19119 = vmatpush3.bf16.msra.mxu0 %v22744_v40  ;;  %19141 = vmatpush3.bf16.msra.mxu1 %v22745_v29  ;;  %v23039_v40 = vmov 0.0  }
 0x9cd   : > { %19120 = vmatprep.subr.bf16.mxu0 %v22746_v21  ;;  %19142 = vmatprep.subr.bf16.mxu1 %v22747_v41  ;;  %v19075_v41 = vld [vmem:[#allocation11] ss:$0 sm:$0xff] }
 0x9d0   : > { %19121 = vmatpush3.bf16.msra.mxu0 %v22748_v43  ;;  %19143 = vmatpush3.bf16.msra.mxu1 %v22749_v44 }
 0x9d1   : > { %19122 = vmatprep.subr.bf16.mxu0 %v22750_v22  ;;  %19144 = vmatprep.subr.bf16.mxu1 %v22751_v50 }
 0x9d4   : > { %19123 = vmatpush3.bf16.msra.mxu0 %v22752_v15  ;;  %19145 = vmatpush3.bf16.msra.mxu1 %v22753_v53 }
 0x9d5   : > { %19124 = vmatprep.subr.bf16.mxu0 %v22754_v25  ;;  %19146 = vmatprep.subr.bf16.mxu1 %v22755_v54 }
 0x9d8   : > { %19125 = vmatpush3.bf16.msra.mxu0 %v22756_v34  ;;  %19147 = vmatpush3.bf16.msra.mxu1 %v22757_v55 }
 0x9d9   : > { %19126 = vmatprep.subr.bf16.mxu0 %v22758_v38  ;;  %19148 = vmatprep.subr.bf16.mxu1 %v22759_v57  ;;  %v19108_v57 = vld [vmem:[#allocation12] ss:$0 sm:$0xff] }
 0x9dc   : > { %19127 = vmatpush3.bf16.msra.mxu0 %v22760_v58  ;;  %19149 = vmatpush3.bf16.msra.mxu1 %v22761_v59 }
 0x9dd   : > { %19128 = vmatprep.subr.bf16.mxu0 %v22762_v62  ;;  %19150 = vmatprep.subr.bf16.mxu1 %v22763_v1 }
 0x9e0   : > { %19129 = vmatpush3.bf16.msra.mxu0 %v22764_v51  ;;  %19151 = vmatpush3.bf16.msra.mxu1 %v22765_v49 }
 0x9e1   : > { %19130 = vmatprep.subr.bf16.mxu0 %v22766_v35  ;;  %19152 = vmatprep.subr.bf16.mxu1 %v22767_v33 }
 0x9e4   : > { %19131 = vmatpush3.bf16.msra.mxu0 %v22768_v2  ;;  %19153 = vmatpush3.bf16.msra.mxu1 %v22769_v48 }
 0x9e5   : > { %19188 = vmatprep.subr.bf16.mxu0 %v23037_v4 }
 0xa9a   : > { %v16043_v47 = vpop.f32.mrb[0].mxu0  ;;  %v16371_v61 = vpop.f32.mrb[0].mxu1 }
 0xa9b   : > { %v19396_v16 = vadd.f32 %v16043_v47, %v13145_v46  ;;  %v19398_v52 = vadd.f32 %v16371_v61, %v13153_v56  ;;  %v16045_v17 = vpop.f32.mrb[1].mxu0  ;;  %v16373_v6 = vpop.f32.mrb[1].mxu1 }
 0xa9c   : > { %v19397_v8 = vadd.f32 %v16045_v17, %v13149_v14  ;;  %v19399_v18 = vadd.f32 %v16373_v6, %v13157_v63  ;;  %v16047_v23 = vpop.f32.mrb[2].mxu0  ;;  %v16375_v60 = vpop.f32.mrb[2].mxu1 }
 0xa9d   : > { %v16378_v30 = vmax.f32 %v19396_v16, 0.0  ;;  %v16380_v27 = vmax.f32 %v19398_v52, 0.0  ;;  %v16048_v0 = vpop.f32.mrb[3].mxu0  ;;  %v16376_v20 = vpop.f32.mrb[3].mxu1 }
 0xa9e   : > { %v16379_v32 = vmax.f32 %v19397_v8, 0.0  ;;  %v16381_v12 = vmax.f32 %v19399_v18, 0.0 }
 0xa9f   : > { %v16382_v19 = vpack.c.bf16 %v16378_v30, %v16378_v30  ;;  %v16384_v45 = vpack.c.bf16 %v16380_v27, %v16380_v27 }
 0xaa0   : > { %v16383_v3 = vpack.c.bf16 %v16379_v32, %v16379_v32  ;;  %v16385_v28 = vpack.c.bf16 %v16381_v12, %v16381_v12 }
 0xaa2   : > { %16681 = vmatprep.mubr.bf16.mxu0 %v16383_v3  ;;  %16721 = vmatprep.mubr.bf16.mxu1 %v16385_v28 }
 0xaa3   : > { %16682 = vmatmul.mubr.bf16.vlgmr.msra.gmra.mrb[4].mxu0 %v16382_v19  ;;  %16722 = vmatmul.mubr.bf16.vlgmr.msra.gmra.mrb[4].mxu1 %v16384_v45 }
 0xaa4   : > { %19190 = vmatpush3.bf16.msra.mxu0 %v19189_v10  ;;  %19185 = vmatprep.mubr.msk.f32.mxu0 %vm23038_vm0, %v23039_v40 }
 0xaa5   : > { %19191 = vmatprep.subr.bf16.mxu0 %v23037_v4 }
 0xaa8   : > { %19193 = vmatpush3.bf16.msra.mxu0 %v19192_v11 }
 0xaa9   : > { %19194 = vmatprep.subr.bf16.mxu0 %v23037_v4 }
 0xaac   : > { %19196 = vmatpush3.bf16.msra.mxu0 %v19195_v39 }
 0xaad   : > { %19197 = vmatprep.subr.bf16.mxu0 %v23037_v4 }
 0xab0   : > { %19199 = vmatpush3.bf16.msra.mxu0 %v19198_v24 }
 0xb76   : > { %v19132_v29 = vpop.f32.mrb[4].mxu0  ;;  %v19154_v21 = vpop.f32.mrb[4].mxu1 }
 0xb77   : > { %v19133_v43 = vpop.f32.mrb[5].mxu0  ;;  %v19155_v44 = vpop.f32.mrb[5].mxu1 }
 0xb78   : > { %v19134_v22 = vadd.f32 %v19133_v43, %v19132_v29  ;;  %v19156_v50 = vadd.f32 %v19155_v44, %v19154_v21  ;;  %v19135_v15 = vpop.f32.mrb[6].mxu0  ;;  %v19157_v53 = vpop.f32.mrb[6].mxu1 }
 0xb79   : > { %v19136_v25 = vpop.f32.mrb[7].mxu0  ;;  %v19158_v54 = vpop.f32.mrb[7].mxu1 }
 0xb7a   : > { %v16684_v34 = vadd.f32 %v19134_v22, %v19075_v41 }
 0xb7c   : > { %v16724_v55 = vadd.f32 %v19156_v50, %v16684_v34 }
 0xb7e   : > { %v16729_v38 = vmax.f32 %v16724_v55, 0.0 }
 0xb80   : > { %19186 = vmatmul.mubr.msk.f32.vlgmr.msra.gmra.mrb[8].mxu0 %vm16745_vm1, %v16729_v38 }
 0xc53   : > { %v16815_v58 = vpop.f32.mrb[8].mxu0 }
 0xc54   : > { %v16816_v59 = vadd.f32 %v19108_v57, %v16815_v58  ;;  %v19187_v62 = vpop.f32.mrb[9].mxu0 }
 0xc56   : > { %16820 = vst.msk [vmem:[#allocation14] sm:$0x3] %vm16819_vm2, %v16816_v59 }
 0xc57 PF: > { %p19511_p10 = scmp.eq.s32.totalorder %s23110_s13, 3  ;;  %s23040_s9 = smov [#allocation14]  }
 0xc58   : > { %s16828_s1 = sshll.u32 %s23040_s9, 4  ;;  %s16829_s1 = int_to_ptr.vmem [resolvable:$true] %s16828_s1 }
 0xc59   : > { %s22944_s4 = scalar_lea.vmem %s16829_s1, 32  ;;  %p22951_p12 = scmp.lt.s32.totalorder %s16829_s1, %s16829_s1 }
 0xc5a   : > { %p22945_p6 = scmp.ne.s32.totalorder %s16829_s1, %s22944_s4  ;;  %p22952_p11 = scmp.lt.s32.totalorder %s22944_s4, %s22944_s4 }
 0xc5c   : > { %p22946_p1 = pnand %p22945_p6, %p19511_p10  ;;  %p22953_p2 = por %p22952_p11, %p22951_p12 }
 0xc5e   : > { %p22947_p9 = pneg %p22946_p1 }
 0xc60   : > { %p22954_p7 = pnand %p22953_p2, %p22947_p9 }
 0xc62   : > { %22957 = shalt.err (!%p22954_p7)
}
 0xc63   : > { %s25524_s16 = sld [smem:[#allocation25_spill]] }
 0xc69   : > { %s22958_s19 = scalar_lea.hbm %s25524_s16, 32 }
 0xc6a   : > { %p22959_p4 = scmp.ne.s32.totalorder %s25524_s16, %s22958_s19  ;;  %p22964_p0 = scmp.lt.u32.totalorder %s22958_s19, %s25524_s16 }
 0xc6c   : > { %p22960_p5 = pnand %p22959_p4, %p19511_p10 }
 0xc6e   : > { %p22961_p13 = pneg %p22960_p5 }
 0xc70   : > { %p22966_p3 = pnand %p22964_p0, %p22961_p13 }
 0xc72   : > { %22969 = shalt.err (!%p22966_p3)
}
 0xc73   : > { %19479 = dma.vmem_to_hbm [thread:$0]  (%p19511_p10), %s16829_s1, 32, %s25524_s16, [#allocation5]  }
 0xc74   : > { %23007 = dma.done.wait (%p19511_p10), [#allocation5], 32  }
 0xc75   : > { %23009 = vsyncadd (%p19511_p10), [#allocation5], 4294967264 }
 0xc76 PF: > { %p25_p8 = scmp.ge.s32.totalorder %s23233_s28, 6   ;;  %s25525_s30 = smov %s23016_s10 }
 0xc77   : > { %s25526_s10 = smov %s23020_s11  ;;  %s25527_s11 = smov %s23246_s29 }
 0xc78   : > { %s25528_s12 = smov %s23233_s28  ;;  %27 = sbr.rel (!%p25_p8) target bundleno = 14 (0xe), region = 127 }
 0xc7f   :  { %16841 = vsyncpa [#allocation4], 1 }
 0xc80   :  { %16843 = vsyncpa [#allocation4 + $0x1], 1 }
 0xc81   :  { %16844 = vsyncpa [#allocation7], 1 }
 0xc82   :  { %16846 = vsyncpa [#allocation7 + $0x1], 1 }
 0xc83   :  { %16847 = vsyncpa [#allocation10], 1 }
 0xc84   :  { %16848 = vsyncpa [#allocation13], 1 }
 0xc85   :  { %16849 = vsyncpa [#allocation5], 1 }
 0xc86   :  { %16851 = vsyncpa [#allocation5 + $0x1], 1 }

</bundles_post_ra>
